<compile_context>
chip_gen: v6e
topology: v6e:2x2x1
jax: 0.10.0
libtpu: 0.0.40
codegen_flags: <defaults>
</compile_context>

<pallas_src>
import jax
import jax.numpy as jnp
from jax.experimental import pallas as pl
from jax.experimental.pallas import tpu as pltpu

GAMMA = 1e-10
LANE = 128
DEFAULT_TILE_BUDGET = 4 * 1024 * 1024   # bytes per input tile (double-buffered)
_CHUNK_ELEMS = 128 * 1024               # ~512 KiB f32 live per accumulation chunk


def _sublane_rows(dtype):
    # (8,128) tiling for 32-bit dtypes, (16,128) for 16-bit, (32,128) for 8-bit.
    return 8 * (4 // jnp.dtype(dtype).itemsize)


def _vmem_capacity_bytes():
    try:
        info = pltpu.get_tpu_info()
        cap = getattr(info, "vmem_capacity_bytes", None)
        if cap:
            return int(cap)
    except Exception:
        pass
    return 64 * 1024 * 1024   # conservative fallback (v7x per-TC VMEM)


def _pick_tiles(m_rows, n_cols, dtype, tile_budget):
    """Pick (block_rows, col_block, chunk_rows): sublane/lane aligned, budgeted."""
    sub = _sublane_rows(dtype)
    itemsize = jnp.dtype(dtype).itemsize
    max_elems = max(sub * LANE, tile_budget // itemsize)

    # Widest lane block that still allows at least `sub` rows in the budget.
    col_block = min(n_cols, max(LANE, ((max_elems // sub) // LANE) * LANE))

    # Tallest row block within budget; never taller than the sublane-rounded M
    # (avoids a block larger than the array in the row dimension).
    rows_cap = max(sub, (m_rows // sub) * sub)
    block_rows = min(rows_cap, max(sub, ((max_elems // col_block) // sub) * sub))

    # Chunk rows: keep the f32 upcast intermediate small; chunk divides block.
    chunk_rows = min(block_rows,
                     max(sub, ((_CHUNK_ELEMS // col_block) // sub) * sub))
    block_rows = max(chunk_rows, (block_rows // chunk_rows) * chunk_rows)
    return block_rows, col_block, chunk_rows


def _make_bpr_kernel(block_rows, col_block, chunk_rows,
                     m_total, n_total, ragged_rows, ragged_cols):
    n_chunks = block_rows // chunk_rows
    n_lane = col_block // LANE

    def kernel(pos_ref, neg_ref, partial_ref):
        row_block_start = pl.program_id(0) * block_rows
        col_block_start = pl.program_id(1) * col_block

        def chunk_body(c, acc):
            r0 = c * chunk_rows
            if not isinstance(r0, int):
                r0 = pl.multiple_of(r0, chunk_rows)
            pos = pos_ref[pl.ds(r0, chunk_rows), :].astype(jnp.float32)
            neg = neg_ref[pl.ds(r0, chunk_rows), :].astype(jnp.float32)
            diff = pos - neg
            # sigmoid(x) == 0.5 * tanh(0.5 * x) + 0.5 : one EUP op, branch-free.
            sig = 0.5 * jnp.tanh(0.5 * diff) + 0.5
            val = jnp.log(GAMMA + sig)          # sign hoisted to the wrapper
            if ragged_rows:                      # static gate: only traced if ragged
                rows = row_block_start + r0 + jax.lax.broadcasted_iota(
                    jnp.int32, (chunk_rows, col_block), 0)
                val = jnp.where(rows < m_total, val, 0.0)
            if ragged_cols:
                cols = col_block_start + jax.lax.broadcasted_iota(
                    jnp.int32, (chunk_rows, col_block), 1)
                val = jnp.where(cols < n_total, val, 0.0)
            # Sublane-aligned fold (chunk_rows, col_block) -> (8, col_block):
            folded = val.reshape(chunk_rows // 8, 8, col_block).sum(axis=0)
            # Lane-aligned fold (8, col_block) -> (8, 128): static 128-slices,
            # pure vreg adds on the VPU.
            upd = folded[:, :LANE]
            for lb in range(1, n_lane):
                upd = upd + folded[:, lb * LANE:(lb + 1) * LANE]
            return acc + upd

        acc0 = jnp.zeros((8, LANE), jnp.float32)
        if n_chunks == 1:
            acc = chunk_body(0, acc0)
        else:
            acc = jax.lax.fori_loop(0, n_chunks, chunk_body, acc0,
                                    unroll=(n_chunks <= 8))
        partial_ref[...] = acc

    return kernel


def bpr_loss(pos_score, neg_score, *, tile_budget_bytes=DEFAULT_TILE_BUDGET):
    """Pallas BPR loss. pos_score/neg_score: (M, N) score slabs, same shape/dtype."""
    assert pos_score.shape == neg_score.shape
    assert pos_score.dtype == neg_score.dtype
    assert pos_score.ndim == 2, "expects (M, N) score slabs"
    M, N = pos_score.shape
    dtype = pos_score.dtype
    itemsize = jnp.dtype(dtype).itemsize
    sub = _sublane_rows(dtype)
    assert N % LANE == 0, "N must be a multiple of 128 (lane dimension)"
    # TODO(synk): pad + mask ragged N (non-multiple-of-128) instead of asserting.

    # Rows are handled ragged (cdiv grid + masking); only pad if M < one sublane group.
    m_arr = M
    if m_arr < sub:
        pad_rows = sub - m_arr
        pos_score = jnp.pad(pos_score, ((0, pad_rows), (0, 0)))
        neg_score = jnp.pad(neg_score, ((0, pad_rows), (0, 0)))
        m_arr = sub

    # Generation-aware VMEM budgeting.
    vmem_cap = _vmem_capacity_bytes()                  # 128 MiB v5e/v6e, 64 MiB v7x
    vmem_limit = max(32 * 1024 * 1024, (vmem_cap * 3) // 4)
    tile_budget = max(sub * LANE * itemsize,
                      min(tile_budget_bytes, vmem_limit // 8))

    block_rows, col_block, chunk_rows = _pick_tiles(m_arr, N, dtype, tile_budget)
    num_row_blocks = pl.cdiv(m_arr, block_rows)
    num_col_blocks = pl.cdiv(N, col_block)
    ragged_rows = num_row_blocks * block_rows > M      # includes tiny-M pad rows
    ragged_cols = num_col_blocks * col_block > N

    kernel = _make_bpr_kernel(block_rows, col_block, chunk_rows,
                              M, N, ragged_rows, ragged_cols)

    out_rows = num_row_blocks * 8
    out_cols = num_col_blocks * LANE
    cost = pl.CostEstimate(
        flops=6 * M * N,
        transcendentals=2 * M * N,
        bytes_accessed=2 * M * N * itemsize + out_rows * out_cols * 4,
    )

    partials = pl.pallas_call(
        kernel,
        out_shape=jax.ShapeDtypeStruct((out_rows, out_cols), jnp.float32),
        grid_spec=pltpu.PrefetchScalarGridSpec(
            num_scalar_prefetch=0,
            grid=(num_row_blocks, num_col_blocks),
            in_specs=[
                pl.BlockSpec((block_rows, col_block), lambda i, j: (i, j)),
                pl.BlockSpec((block_rows, col_block), lambda i, j: (i, j)),
            ],
            out_specs=pl.BlockSpec((8, LANE), lambda i, j: (i, j)),
        ),
        compiler_params=pltpu.CompilerParams(
            dimension_semantics=("parallel", "parallel"),
            vmem_limit_bytes=vmem_limit,
        ),
        cost_estimate=cost,
    )(pos_score, neg_score)

    # Tiny cross-block finish in the wrapper; negation + mean folded into one scale.
    return jnp.sum(partials) * jnp.float32(-1.0 / (M * N))


if __name__ == "__main__":
    key = jax.random.PRNGKey(0)
    k1, k2, k3, k4 = jax.random.split(key, 4)

    def reference(p, n):
        d = p.astype(jnp.float32) - n.astype(jnp.float32)
        return -jnp.log(GAMMA + jax.nn.sigmoid(d)).mean()

    # Case 1: f32, single-block grid with chunked (fori_loop) in-block accumulation.
    M, N = 512, 512
    pos = jax.random.normal(k1, (M, N), dtype=jnp.float32)
    neg = jax.random.normal(k2, (M, N), dtype=jnp.float32)
    loss = jax.block_until_ready(bpr_loss(pos, neg))
    ref = reference(pos, neg)
    assert jnp.allclose(loss, ref, rtol=1e-5, atol=1e-5), (loss, ref)

    # Case 2: same data, tiny tile budget -> multi-block parallel grid of
    # independent (8,128) partials.
    loss2 = jax.block_until_ready(bpr_loss(pos, neg, tile_budget_bytes=64 * 1024))
    assert jnp.allclose(loss2, ref, rtol=1e-5, atol=1e-5), (loss2, ref)

    # Case 3: ragged M (not a multiple of the block) -> cdiv grid + row masking.
    posr, negr = pos[:200, :256], neg[:200, :256]
    loss3 = jax.block_until_ready(bpr_loss(posr, negr, tile_budget_bytes=64 * 1024))
    ref3 = reference(posr, negr)
    assert jnp.allclose(loss3, ref3, rtol=1e-5, atol=1e-5), (loss3, ref3)

    # Case 4: bf16 scores (16-row sublane multiple), cast to f32 in-register.
    pos16 = jax.random.normal(k3, (64, 128), dtype=jnp.bfloat16)
    neg16 = jax.random.normal(k4, (64, 128), dtype=jnp.bfloat16)
    loss4 = jax.block_until_ready(bpr_loss(pos16, neg16))
    ref4 = reference(pos16, neg16)
    assert jnp.allclose(loss4, ref4, rtol=1e-5, atol=1e-5), (loss4, ref4)

    print("KERNEL_OK")
</pallas_src>

<mosaic_0001>
module attributes {stable_mosaic.version = 11 : i64} {
  func.func @kernel(%arg0: i32, %arg1: i32, %arg2: memref<512x512xf32, #tpu.memory_space<vmem>>, %arg3: memref<512x512xf32, #tpu.memory_space<vmem>>, %arg4: memref<8x128xf32, #tpu.memory_space<vmem>>) attributes {dimension_semantics = [#tpu.dimension_semantics<parallel>, #tpu.dimension_semantics<parallel>], iteration_bounds = array<i64: 1, 1>, scalar_prefetch = 0 : i64, scratch_operands = 0 : i64, tpu.core_type = #tpu.core_type<tc>, window_params = [{transform_indices = @transform_0, window_bounds = array<i64: 512, 512>}, {transform_indices = @transform_1, window_bounds = array<i64: 512, 512>}, {transform_indices = @transform_2, window_bounds = array<i64: 8, 128>}]} {
    %cst = arith.constant 0.000000e+00 : f32
    %0 = vector.broadcast %cst : f32 to vector<8x128xf32>
    %c0_i32 = arith.constant 0 : i32
    %c256_i32 = arith.constant 256 : i32
    %1 = arith.muli %c0_i32, %c256_i32 : i32
    %2 = tpu.assume_multiple %1, 256 : i32
    %3 = arith.index_cast %2 : i32 to index
    %c0 = arith.constant 0 : index
    %4 = vector.load %arg2[%3, %c0] : memref<512x512xf32, #tpu.memory_space<vmem>>, vector<256x512xf32>
    %5 = arith.index_cast %2 : i32 to index
    %c0_0 = arith.constant 0 : index
    %6 = vector.load %arg3[%5, %c0_0] : memref<512x512xf32, #tpu.memory_space<vmem>>, vector<256x512xf32>
    %7 = arith.subf %4, %6 : vector<256x512xf32>
    %cst_1 = arith.constant 5.000000e-01 : f32
    %8 = vector.broadcast %cst_1 : f32 to vector<256x512xf32>
    %9 = arith.mulf %8, %7 : vector<256x512xf32>
    %10 = math.tanh %9 : vector<256x512xf32>
    %cst_2 = arith.constant 5.000000e-01 : f32
    %11 = vector.broadcast %cst_2 : f32 to vector<256x512xf32>
    %12 = arith.mulf %11, %10 : vector<256x512xf32>
    %cst_3 = arith.constant 5.000000e-01 : f32
    %13 = vector.broadcast %cst_3 : f32 to vector<256x512xf32>
    %14 = arith.addf %12, %13 : vector<256x512xf32>
    %cst_4 = arith.constant 1.000000e-10 : f32
    %15 = vector.broadcast %cst_4 : f32 to vector<256x512xf32>
    %16 = arith.addf %15, %14 : vector<256x512xf32>
    %17 = math.log %16 : vector<256x512xf32>
    %18 = vector.shape_cast %17 : vector<256x512xf32> to vector<32x8x512xf32>
    %cst_5 = arith.constant dense<0.000000e+00> : vector<8x512xf32>
    %19 = vector.multi_reduction <add>, %18, %cst_5 [0] : vector<32x8x512xf32> to vector<8x512xf32>
    %20 = vector.extract_strided_slice %19 {offsets = [0, 0], sizes = [8, 128], strides = [1, 1]} : vector<8x512xf32> to vector<8x128xf32>
    %21 = vector.extract_strided_slice %19 {offsets = [0, 128], sizes = [8, 128], strides = [1, 1]} : vector<8x512xf32> to vector<8x128xf32>
    %22 = arith.addf %20, %21 : vector<8x128xf32>
    %23 = vector.extract_strided_slice %19 {offsets = [0, 256], sizes = [8, 128], strides = [1, 1]} : vector<8x512xf32> to vector<8x128xf32>
    %24 = arith.addf %22, %23 : vector<8x128xf32>
    %25 = vector.extract_strided_slice %19 {offsets = [0, 384], sizes = [8, 128], strides = [1, 1]} : vector<8x512xf32> to vector<8x128xf32>
    %26 = arith.addf %24, %25 : vector<8x128xf32>
    %27 = arith.addf %0, %26 : vector<8x128xf32>
    %c1_i32 = arith.constant 1 : i32
    %c256_i32_6 = arith.constant 256 : i32
    %28 = arith.muli %c1_i32, %c256_i32_6 : i32
    %29 = tpu.assume_multiple %28, 256 : i32
    %30 = arith.index_cast %29 : i32 to index
    %c0_7 = arith.constant 0 : index
    %31 = vector.load %arg2[%30, %c0_7] : memref<512x512xf32, #tpu.memory_space<vmem>>, vector<256x512xf32>
    %32 = arith.index_cast %29 : i32 to index
    %c0_8 = arith.constant 0 : index
    %33 = vector.load %arg3[%32, %c0_8] : memref<512x512xf32, #tpu.memory_space<vmem>>, vector<256x512xf32>
    %34 = arith.subf %31, %33 : vector<256x512xf32>
    %cst_9 = arith.constant 5.000000e-01 : f32
    %35 = vector.broadcast %cst_9 : f32 to vector<256x512xf32>
    %36 = arith.mulf %35, %34 : vector<256x512xf32>
    %37 = math.tanh %36 : vector<256x512xf32>
    %cst_10 = arith.constant 5.000000e-01 : f32
    %38 = vector.broadcast %cst_10 : f32 to vector<256x512xf32>
    %39 = arith.mulf %38, %37 : vector<256x512xf32>
    %cst_11 = arith.constant 5.000000e-01 : f32
    %40 = vector.broadcast %cst_11 : f32 to vector<256x512xf32>
    %41 = arith.addf %39, %40 : vector<256x512xf32>
    %cst_12 = arith.constant 1.000000e-10 : f32
    %42 = vector.broadcast %cst_12 : f32 to vector<256x512xf32>
    %43 = arith.addf %42, %41 : vector<256x512xf32>
    %44 = math.log %43 : vector<256x512xf32>
    %45 = vector.shape_cast %44 : vector<256x512xf32> to vector<32x8x512xf32>
    %cst_13 = arith.constant dense<0.000000e+00> : vector<8x512xf32>
    %46 = vector.multi_reduction <add>, %45, %cst_13 [0] : vector<32x8x512xf32> to vector<8x512xf32>
    %47 = vector.extract_strided_slice %46 {offsets = [0, 0], sizes = [8, 128], strides = [1, 1]} : vector<8x512xf32> to vector<8x128xf32>
    %48 = vector.extract_strided_slice %46 {offsets = [0, 128], sizes = [8, 128], strides = [1, 1]} : vector<8x512xf32> to vector<8x128xf32>
    %49 = arith.addf %47, %48 : vector<8x128xf32>
    %50 = vector.extract_strided_slice %46 {offsets = [0, 256], sizes = [8, 128], strides = [1, 1]} : vector<8x512xf32> to vector<8x128xf32>
    %51 = arith.addf %49, %50 : vector<8x128xf32>
    %52 = vector.extract_strided_slice %46 {offsets = [0, 384], sizes = [8, 128], strides = [1, 1]} : vector<8x512xf32> to vector<8x128xf32>
    %53 = arith.addf %51, %52 : vector<8x128xf32>
    %54 = arith.addf %27, %53 : vector<8x128xf32>
    %c2_i32 = arith.constant 2 : i32
    %c0_14 = arith.constant 0 : index
    %c0_15 = arith.constant 0 : index
    %55 = vector.load %arg4[%c0_14, %c0_15] : memref<8x128xf32, #tpu.memory_space<vmem>>, vector<8x128xf32>
    tpu.vector_store %arg4[%c0_14, %c0_15], %54 {strides = array<i32>} : memref<8x128xf32, #tpu.memory_space<vmem>>, vector<8x128xf32>,
    return
  }
  func.func @transform_0(%arg0: i32, %arg1: i32) -> (i32, i32) {
    %c0_i32 = arith.constant 0 : i32
    return %arg0, %arg1 : i32, i32
  }
  func.func @transform_1(%arg0: i32, %arg1: i32) -> (i32, i32) {
    %c0_i32 = arith.constant 0 : i32
    return %arg0, %arg1 : i32, i32
  }
  func.func @transform_2(%arg0: i32, %arg1: i32) -> (i32, i32) {
    %c0_i32 = arith.constant 0 : i32
    return %arg0, %arg1 : i32, i32
  }
}

</mosaic_0001>

<bundles_post_ra>
// kernel: tpu_custom_call.1
= control target key start
LH: loop header
LB: loop body
LE: loop exit
PB: predicated region body
PF: predicated region fallthrough
CT: control target
= control target key end

     0   :  { %7 = vsyncpa [#allocation3], 0  ;;  %s8113_s0 = inlined_call_operand.hbm [shape: f32[512,512], index: 0, kind: input, shape index: {}]   ;;  %s8114_s1 = inlined_call_operand.hbm [shape: f32[512,512], index: 1, kind: input, shape index: {}]   ;;  %s8115_s2 = inlined_call_operand.hbm [shape: f32[8,128], index: 2, kind: output, shape index: {}]  }
   0x1   :  { %8 = vsyncpa [#allocation6], 0 }
   0x2   :  { %9 = vsyncpa [#allocation4], 0  ;;  %s3980_s9 = smov [#allocation2]  }
   0x3   :  { %s15_s10 = sshll.u32 %s3980_s9, 4  ;;  %s16_s10 = int_to_ptr.vmem [resolvable:$true] %s15_s10 }
   0x4   :  { %s3922_s11 = scalar_lea.vmem %s16_s10, 32768  ;;  %p3927_p1 = scmp.lt.s32.totalorder %s16_s10, %s16_s10 }
   0x5   :  { %p3923_p0 = scmp.ne.s32.totalorder %s16_s10, %s3922_s11  ;;  %p3928_p2 = scmp.lt.s32.totalorder %s3922_s11, %s3922_s11 }
   0x7   :  { %p3929_p3 = por %p3928_p2, %p3927_p1 }
   0x9   :  { %p3930_p4 = pnand %p3929_p3, %p3923_p0 }
   0xb   :  { %3933 = shalt.err (!%p3930_p4)
}
   0xc   :  { %s3981_s12 = smov 512   ;;  %s3982_s13 = smov 32  }
   0xd   :  { %21 = dma.hbm_to_vmem [thread:$0]  %s8113_s0, 32768, %s16_s10, [#allocation3], %s3981_s12, %s3981_s12, %s3982_s13  }
   0xe   :  { %s3983_s16 = smov [#allocation5]  }
   0xf   :  { %s27_s17 = sshll.u32 %s3983_s16, 4  ;;  %s28_s17 = int_to_ptr.vmem [resolvable:$true] %s27_s17 }
  0x10   :  { %s3942_s18 = scalar_lea.vmem %s28_s17, 32768  ;;  %p3947_p6 = scmp.lt.s32.totalorder %s28_s17, %s28_s17 }
  0x11   :  { %p3943_p5 = scmp.ne.s32.totalorder %s28_s17, %s3942_s18  ;;  %p3948_p7 = scmp.lt.s32.totalorder %s3942_s18, %s3942_s18 }
  0x13   :  { %p3949_p8 = por %p3948_p7, %p3947_p6 }
  0x15   :  { %p3950_p9 = pnand %p3949_p8, %p3943_p5 }
  0x17   :  { %3953 = shalt.err (!%p3950_p9)
}
  0x18   :  { %33 = dma.hbm_to_vmem [thread:$0]  %s8114_s1, 32768, %s28_s17, [#allocation6], %s3981_s12, %s3981_s12, %s3982_s13  }
  0x19   :  { %3974 = dma.done.wait [#allocation3], 32768  }
  0x1a   :  { %3975 = vsyncadd [#allocation3], 4294934528 }
  0x1b   :  { %3976 = dma.done.wait [#allocation6], 32768  }
  0x1c   :  { %3977 = vsyncadd [#allocation6], 4294934528  ;;  %v43_v0 = vld [vmem:[#allocation2] sm:$0xff]  ;;  %v44_v1 = vld [vmem:[#allocation2 + $0x8] sm:$0xff]  ;;  %s3984_s0 = smov [#allocation7]  }
  0x1d   :  { %v173_v2 = vld [vmem:[#allocation5] sm:$0xff]  ;;  %v45_v3 = vld [vmem:[#allocation2 + $0x10] sm:$0xff]  ;;  %v4006_v4 = vld [vmem:[#allocation2 + $0x18] sm:$0xff]  ;;  %s2873_s1 = sshll.u32 %s3984_s0, 4  ;;  %s2874_s1 = int_to_ptr.vmem [resolvable:$true] %s2873_s1 }
  0x1e   :  { %v174_v5 = vld [vmem:[#allocation5 + $0x8] sm:$0xff]  ;;  %v4008_v6 = vld [vmem:[#allocation2 + $0x20] sm:$0xff]  ;;  %v4012_v8 = vld [vmem:[#allocation2 + $0x30] sm:$0xff]  ;;  %v301_v14 = vsub.f32 %v43_v0, %v173_v2  ;;  %s3954_s21 = scalar_lea.vmem %s2874_s1, 128  ;;  %p3959_p11 = scmp.lt.s32.totalorder %s2874_s1, %s2874_s1 }
  0x1f   :  { %v4010_v7 = vld [vmem:[#allocation2 + $0x28] sm:$0xff]  ;;  %v175_v9 = vld [vmem:[#allocation5 + $0x10] sm:$0xff]  ;;  %v4014_v10 = vld [vmem:[#allocation2 + $0x38] sm:$0xff]  ;;  %v302_v21 = vsub.f32 %v44_v1, %v174_v5  ;;  %p3955_p10 = scmp.ne.s32.totalorder %s2874_s1, %s3954_s21  ;;  %p3960_p12 = scmp.lt.s32.totalorder %s3954_s21, %s3954_s21 }
  0x20   :  { %v4016_v11 = vld [vmem:[#allocation2 + $0x40] sm:$0xff]  ;;  %v4018_v12 = vld [vmem:[#allocation2 + $0x48] sm:$0xff]  ;;  %v176_v13 = vld [vmem:[#allocation5 + $0x18] sm:$0xff]  ;;  %v303_v28 = vsub.f32 %v45_v3, %v175_v9  ;;  %v4075_v45 = vmul.f32 0.5, %v301_v14 }
  0x21   :  { %v4020_v15 = vld [vmem:[#allocation2 + $0x50] sm:$0xff]  ;;  %v4022_v16 = vld [vmem:[#allocation2 + $0x58] sm:$0xff]  ;;  %v4024_v17 = vld [vmem:[#allocation2 + $0x60] sm:$0xff]  ;;  %v304_v35 = vsub.f32 %v4006_v4, %v176_v13  ;;  %v4095_v55 = vmul.f32 0.5, %v302_v21  ;;  %p3961_p13 = por %p3960_p12, %p3959_p11 }
  0x22   :  { %v4026_v18 = vld [vmem:[#allocation5 + $0x20] sm:$0xff]  ;;  %v4028_v19 = vld [vmem:[#allocation5 + $0x28] sm:$0xff]  ;;  %v4030_v20 = vld [vmem:[#allocation5 + $0x30] sm:$0xff]  ;;  %8498 = vst [vmem:[#allocation14_spill] sm:$0xff] %v4075_v45  ;;  %v4115_v1 = vmul.f32 0.5, %v303_v28 }
  0x23   :  { %v4032_v22 = vld [vmem:[#allocation2 + $0x68] sm:$0xff]  ;;  %v4034_v23 = vld [vmem:[#allocation2 + $0x70] sm:$0xff]  ;;  %v4036_v24 = vld [vmem:[#allocation2 + $0x78] sm:$0xff]  ;;  %v305_v42 = vsub.f32 %v4008_v6, %v4026_v18  ;;  %v306_v43 = vsub.f32 %v4010_v7, %v4028_v19  ;;  %v307_v44 = vsub.f32 %v4012_v8, %v4030_v20  ;;  %8502 = vst [vmem:[#allocation18_spill] sm:$0xff] %v4095_v55  ;;  %v4135_v14 = vmul.f32 0.5, %v304_v35  ;;  %p3962_p0 = pnand %p3961_p13, %p3955_p10 }
  0x24   :  { %v4038_v25 = vld [vmem:[#allocation5 + $0x38] sm:$0xff]  ;;  %v4040_v26 = vld [vmem:[#allocation5 + $0x40] sm:$0xff]  ;;  %v4042_v27 = vld [vmem:[#allocation5 + $0x48] sm:$0xff]  ;;  %8507 = vst [vmem:[#allocation23_spill] sm:$0xff] %v4115_v1 }
  0x25   :  { %v4044_v29 = vld [vmem:[#allocation2 + $0x80] sm:$0xff]  ;;  %v4046_v30 = vld [vmem:[#allocation2 + $0x88] sm:$0xff]  ;;  %v4048_v31 = vld [vmem:[#allocation2 + $0x90] sm:$0xff]  ;;  %8511 = vst [vmem:[#allocation27_spill] sm:$0xff] %v4135_v14  ;;  %v4155_v8 = vmul.f32 0.5, %v305_v42  ;;  %v4175_v9 = vmul.f32 0.5, %v306_v43  ;;  %v8531_v35 = vsub.f32 %v4014_v10, %v4038_v25 }
  0x26   :  { %8495 = vst [vmem:[#allocation11_spill] sm:$0xff] %v4048_v31  ;;  %v4050_v32 = vld [vmem:[#allocation5 + $0x50] sm:$0xff]  ;;  %v4052_v33 = vld [vmem:[#allocation5 + $0x58] sm:$0xff]  ;;  %v4054_v34 = vld [vmem:[#allocation5 + $0x60] sm:$0xff]  ;;  %v4195_v13 = vmul.f32 0.5, %v307_v44 }
  0x27   :  { %v4057_v36 = vld [vmem:[#allocation2 + $0x98] sm:$0xff]  ;;  %v4059_v37 = vld [vmem:[#allocation2 + $0xa0] sm:$0xff]  ;;  %v4061_v38 = vld [vmem:[#allocation2 + $0xa8] sm:$0xff]  ;;  %8516 = vst [vmem:[#allocation32_spill] sm:$0xff] %v4155_v8 }
  0x28   :  { %8496 = vst [vmem:[#allocation12_spill] sm:$0xff] %v4059_v37  ;;  %8497 = vst [vmem:[#allocation13_spill] sm:$0xff] %v4061_v38  ;;  %v4063_v39 = vld [vmem:[#allocation5 + $0x68] sm:$0xff]  ;;  %v4065_v40 = vld [vmem:[#allocation5 + $0x70] sm:$0xff] }
  0x29   :  { %v4067_v41 = vld [vmem:[#allocation5 + $0x78] sm:$0xff]  ;;  %v4077_v46 = vld [vmem:[#allocation2 + $0xb0] sm:$0xff]  ;;  %v4081_v48 = vld [vmem:[#allocation2 + $0xc0] sm:$0xff]  ;;  %8521 = vst [vmem:[#allocation37_spill] sm:$0xff] %v4175_v9 }
  0x2a   :  { %v4079_v47 = vld [vmem:[#allocation2 + $0xb8] sm:$0xff]  ;;  %8500 = vst [vmem:[#allocation16_spill] sm:$0xff] %v4081_v48  ;;  %v4083_v49 = vld [vmem:[#allocation5 + $0x80] sm:$0xff]  ;;  %v4085_v50 = vld [vmem:[#allocation5 + $0x88] sm:$0xff] }
  0x2b   :  { %8499 = vst [vmem:[#allocation15_spill] sm:$0xff] %v4079_v47  ;;  %v4087_v51 = vld [vmem:[#allocation5 + $0x90] sm:$0xff]  ;;  %v4097_v56 = vld [vmem:[#allocation2 + $0xc8] sm:$0xff]  ;;  %v4101_v58 = vld [vmem:[#allocation2 + $0xd8] sm:$0xff] }
  0x2c   :  { %8501 = vst [vmem:[#allocation17_spill] sm:$0xff] %v4087_v51  ;;  %v4099_v57 = vld [vmem:[#allocation2 + $0xd0] sm:$0xff]  ;;  %8503 = vst [vmem:[#allocation19_spill] sm:$0xff] %v4101_v58  ;;  %v4103_v59 = vld [vmem:[#allocation5 + $0x98] sm:$0xff] }
  0x2d   :  { %8504 = vst [vmem:[#allocation20_spill] sm:$0xff] %v4103_v59  ;;  %v4105_v60 = vld [vmem:[#allocation5 + $0xa0] sm:$0xff]  ;;  %v4107_v61 = vld [vmem:[#allocation5 + $0xa8] sm:$0xff]  ;;  %v4121_v4 = vld [vmem:[#allocation2 + $0xf0] sm:$0xff] }
  0x2e   :  { %8505 = vst [vmem:[#allocation21_spill] sm:$0xff] %v4105_v60  ;;  %8506 = vst [vmem:[#allocation22_spill] sm:$0xff] %v4107_v61  ;;  %v4117_v2 = vld [vmem:[#allocation2 + $0xe0] sm:$0xff]  ;;  %v4119_v3 = vld [vmem:[#allocation2 + $0xe8] sm:$0xff] }
  0x2f   :  { %8508 = vst [vmem:[#allocation24_spill] sm:$0xff] %v4121_v4  ;;  %v4123_v5 = vld [vmem:[#allocation5 + $0xb0] sm:$0xff]  ;;  %v4125_v6 = vld [vmem:[#allocation5 + $0xb8] sm:$0xff]  ;;  %v4127_v7 = vld [vmem:[#allocation5 + $0xc0] sm:$0xff] }
  0x30   :  { %8509 = vst [vmem:[#allocation25_spill] sm:$0xff] %v4125_v6  ;;  %8510 = vst [vmem:[#allocation26_spill] sm:$0xff] %v4127_v7  ;;  %v4137_v18 = vld [vmem:[#allocation2 + $0xf8] sm:$0xff]  ;;  %v4139_v19 = vld [vmem:[#allocation2 + $0x100] sm:$0xff] }
  0x31   :  { %v4141_v20 = vld [vmem:[#allocation2 + $0x108] sm:$0xff]  ;;  %v4145_v28 = vld [vmem:[#allocation5 + $0xd0] sm:$0xff]  ;;  %v4147_v0 = vld [vmem:[#allocation5 + $0xd8] sm:$0xff]  ;;  %8526 = vst [vmem:[#allocation42_spill] sm:$0xff] %v4195_v13  ;;  %v4218_v13 = vmul.f32 0.5, %v8531_v35  ;;  %v8537_v35 = vsub.f32 %v4016_v11, %v4040_v26 }
  0x32   :  { %8512 = vst [vmem:[#allocation28_spill] sm:$0xff] %v4141_v20  ;;  %v4143_v21 = vld [vmem:[#allocation5 + $0xc8] sm:$0xff]  ;;  %8514 = vst [vmem:[#allocation30_spill] sm:$0xff] %v4145_v28  ;;  %v4157_v63 = vld [vmem:[#allocation2 + $0x110] sm:$0xff] }
  0x33   :  { %8513 = vst [vmem:[#allocation29_spill] sm:$0xff] %v4143_v21  ;;  %8515 = vst [vmem:[#allocation31_spill] sm:$0xff] %v4147_v0  ;;  %v4159_v62 = vld [vmem:[#allocation2 + $0x118] sm:$0xff]  ;;  %v4161_v54 = vld [vmem:[#allocation2 + $0x120] sm:$0xff]  ;;  %v4241_v43 = vmul.f32 0.5, %v8537_v35  ;;  %v8543_v35 = vsub.f32 %v4018_v12, %v4042_v27 }
  0x34   :  { %8517 = vst [vmem:[#allocation33_spill] sm:$0xff] %v4161_v54  ;;  %v4163_v53 = vld [vmem:[#allocation5 + $0xe0] sm:$0xff]  ;;  %v4165_v52 = vld [vmem:[#allocation5 + $0xe8] sm:$0xff]  ;;  %v4167_v14 = vld [vmem:[#allocation5 + $0xf0] sm:$0xff] }
  0x35   :  { %8518 = vst [vmem:[#allocation34_spill] sm:$0xff] %v4163_v53  ;;  %8519 = vst [vmem:[#allocation35_spill] sm:$0xff] %v4165_v52  ;;  %v4177_v8 = vld [vmem:[#allocation2 + $0x128] sm:$0xff]  ;;  %v4179_v1 = vld [vmem:[#allocation2 + $0x130] sm:$0xff]  ;;  %v4264_v10 = vmul.f32 0.5, %v8543_v35  ;;  %v8549_v35 = vsub.f32 %v4020_v15, %v4050_v32 }
  0x36   :  { %8520 = vst [vmem:[#allocation36_spill] sm:$0xff] %v4167_v14  ;;  %v4181_v55 = vld [vmem:[#allocation2 + $0x138] sm:$0xff]  ;;  %v4185_v51 = vld [vmem:[#allocation5 + $0x100] sm:$0xff]  ;;  %v4187_v31 = vld [vmem:[#allocation5 + $0x108] sm:$0xff] }
  0x37   :  { %8522 = vst [vmem:[#allocation38_spill] sm:$0xff] %v4181_v55  ;;  %v4183_v45 = vld [vmem:[#allocation5 + $0xf8] sm:$0xff]  ;;  %8524 = vst [vmem:[#allocation40_spill] sm:$0xff] %v4185_v51  ;;  %v4197_v9 = vld [vmem:[#allocation2 + $0x140] sm:$0xff]  ;;  %v4287_v11 = vmul.f32 0.5, %v8549_v35  ;;  %v8555_v35 = vsub.f32 %v4022_v16, %v4052_v33 }
  0x38   :  { %8523 = vst [vmem:[#allocation39_spill] sm:$0xff] %v4183_v45  ;;  %8525 = vst [vmem:[#allocation41_spill] sm:$0xff] %v4187_v31  ;;  %v4199_v61 = vld [vmem:[#allocation2 + $0x148] sm:$0xff]  ;;  %v4201_v38 = vld [vmem:[#allocation2 + $0x150] sm:$0xff] }
  0x39   :  { %8527 = vst [vmem:[#allocation43_spill] sm:$0xff] %v4201_v38  ;;  %v4203_v60 = vld [vmem:[#allocation5 + $0x110] sm:$0xff]  ;;  %v4205_v37 = vld [vmem:[#allocation5 + $0x118] sm:$0xff]  ;;  %v4207_v59 = vld [vmem:[#allocation5 + $0x120] sm:$0xff]  ;;  %v4310_v12 = vmul.f32 0.5, %v8555_v35  ;;  %v8563_v35 = vsub.f32 %v4024_v17, %v4054_v34 }
  0x3a   :  { %8528 = vst [vmem:[#allocation44_spill] sm:$0xff] %v4203_v60  ;;  %8529 = vst [vmem:[#allocation45_spill] sm:$0xff] %v4205_v37  ;;  %v4220_v7 = vld [vmem:[#allocation2 + $0x158] sm:$0xff]  ;;  %v4222_v48 = vld [vmem:[#allocation2 + $0x160] sm:$0xff] }
  0x3b   :  { %8530 = vst [vmem:[#allocation46_spill] sm:$0xff] %v4207_v59  ;;  %8532 = vst [vmem:[#allocation47_spill] sm:$0xff] %v4218_v13  ;;  %v4224_v6 = vld [vmem:[#allocation2 + $0x168] sm:$0xff]  ;;  %v4228_v42 = vld [vmem:[#allocation5 + $0x130] sm:$0xff]  ;;  %v4333_v15 = vmul.f32 0.5, %v8563_v35  ;;  %v8570_v35 = vsub.f32 %v4032_v22, %v4063_v39 }
  0x3c   :  { %8533 = vst [vmem:[#allocation48_spill] sm:$0xff] %v4224_v6  ;;  %v4226_v47 = vld [vmem:[#allocation5 + $0x128] sm:$0xff]  ;;  %8535 = vst [vmem:[#allocation50_spill] sm:$0xff] %v4228_v42  ;;  %v4230_v21 = vld [vmem:[#allocation5 + $0x138] sm:$0xff] }
  0x3d   :  { %8534 = vst [vmem:[#allocation49_spill] sm:$0xff] %v4226_v47  ;;  %8536 = vst [vmem:[#allocation51_spill] sm:$0xff] %v4230_v21  ;;  %v4243_v13 = vld [vmem:[#allocation2 + $0x170] sm:$0xff]  ;;  %v4245_v0 = vld [vmem:[#allocation2 + $0x178] sm:$0xff]  ;;  %v4356_v16 = vmul.f32 0.5, %v8570_v35  ;;  %v8578_v35 = vsub.f32 %v4034_v23, %v4065_v40 }
  0x3e   :  { %8538 = vst [vmem:[#allocation52_spill] sm:$0xff] %v4241_v43  ;;  %v4247_v58 = vld [vmem:[#allocation2 + $0x180] sm:$0xff]  ;;  %v4251_v44 = vld [vmem:[#allocation5 + $0x148] sm:$0xff]  ;;  %v4253_v53 = vld [vmem:[#allocation5 + $0x150] sm:$0xff] }
  0x3f   :  { %8539 = vst [vmem:[#allocation53_spill] sm:$0xff] %v4247_v58  ;;  %v4249_v28 = vld [vmem:[#allocation5 + $0x140] sm:$0xff]  ;;  %8541 = vst [vmem:[#allocation55_spill] sm:$0xff] %v4251_v44  ;;  %v4266_v43 = vld [vmem:[#allocation2 + $0x188] sm:$0xff]  ;;  %v4379_v17 = vmul.f32 0.5, %v8578_v35  ;;  %v8586_v35 = vsub.f32 %v4036_v24, %v4067_v41 }
  0x40   :  { %8540 = vst [vmem:[#allocation54_spill] sm:$0xff] %v4249_v28  ;;  %8542 = vst [vmem:[#allocation56_spill] sm:$0xff] %v4253_v53  ;;  %v4268_v14 = vld [vmem:[#allocation2 + $0x190] sm:$0xff]  ;;  %v4270_v4 = vld [vmem:[#allocation2 + $0x198] sm:$0xff] }
  0x41   :  { %8544 = vst [vmem:[#allocation57_spill] sm:$0xff] %v4264_v10  ;;  %8545 = vst [vmem:[#allocation58_spill] sm:$0xff] %v4270_v4  ;;  %v4272_v52 = vld [vmem:[#allocation5 + $0x158] sm:$0xff]  ;;  %v4274_v25 = vld [vmem:[#allocation5 + $0x160] sm:$0xff]  ;;  %v4402_v22 = vmul.f32 0.5, %v8586_v35  ;;  %v8592_v35 = vsub.f32 %v4044_v29, %v4083_v49 }
  0x42   :  { %8546 = vst [vmem:[#allocation59_spill] sm:$0xff] %v4272_v52  ;;  %8547 = vst [vmem:[#allocation60_spill] sm:$0xff] %v4274_v25  ;;  %v4276_v45 = vld [vmem:[#allocation5 + $0x168] sm:$0xff]  ;;  %v4289_v10 = vld [vmem:[#allocation2 + $0x1a0] sm:$0xff] }
  0x43   :  { %8548 = vst [vmem:[#allocation61_spill] sm:$0xff] %v4276_v45  ;;  %8550 = vst [vmem:[#allocation62_spill] sm:$0xff] %v4287_v11  ;;  %v4291_v31 = vld [vmem:[#allocation2 + $0x1a8] sm:$0xff]  ;;  %v4293_v20 = vld [vmem:[#allocation2 + $0x1b0] sm:$0xff]  ;;  %v4425_v23 = vmul.f32 0.5, %v8592_v35  ;;  %v8600_v35 = vsub.f32 %v4046_v30, %v4085_v50 }
  0x44   :  { %8551 = vst [vmem:[#allocation63_spill] sm:$0xff] %v4293_v20  ;;  %v4295_v51 = vld [vmem:[#allocation5 + $0x170] sm:$0xff]  ;;  %v4297_v26 = vld [vmem:[#allocation5 + $0x178] sm:$0xff]  ;;  %v4299_v60 = vld [vmem:[#allocation5 + $0x180] sm:$0xff] }
  0x45   :  { %8552 = vst [vmem:[#allocation64_spill] sm:$0xff] %v4295_v51  ;;  %8553 = vst [vmem:[#allocation65_spill] sm:$0xff] %v4297_v26  ;;  %v4312_v11 = vld [vmem:[#allocation2 + $0x1b8] sm:$0xff]  ;;  %v4314_v59 = vld [vmem:[#allocation2 + $0x1c0] sm:$0xff]  ;;  %v4448_v24 = vmul.f32 0.5, %v8600_v35 }
  0x46   :  { %8554 = vst [vmem:[#allocation66_spill] sm:$0xff] %v4299_v60  ;;  %8556 = vst [vmem:[#allocation67_spill] sm:$0xff] %v4310_v12  ;;  %v4316_v54 = vld [vmem:[#allocation2 + $0x1c8] sm:$0xff]  ;;  %v4320_v27 = vld [vmem:[#allocation5 + $0x190] sm:$0xff] }
  0x47   :  { %8557 = vst [vmem:[#allocation68_spill] sm:$0xff] %v4312_v11  ;;  %8558 = vst [vmem:[#allocation69_spill] sm:$0xff] %v4314_v59  ;;  %v4318_v37 = vld [vmem:[#allocation5 + $0x188] sm:$0xff]  ;;  %v4322_v47 = vld [vmem:[#allocation5 + $0x198] sm:$0xff] }
  0x48   :  { %8559 = vst [vmem:[#allocation70_spill] sm:$0xff] %v4316_v54  ;;  %8560 = vst [vmem:[#allocation71_spill] sm:$0xff] %v4318_v37  ;;  %v4335_v12 = vld [vmem:[#allocation2 + $0x1d0] sm:$0xff]  ;;  %v4337_v21 = vld [vmem:[#allocation2 + $0x1d8] sm:$0xff] }
  0x49   :  { %8561 = vst [vmem:[#allocation72_spill] sm:$0xff] %v4320_v27  ;;  %8562 = vst [vmem:[#allocation73_spill] sm:$0xff] %v4322_v47  ;;  %v4339_v55 = vld [vmem:[#allocation2 + $0x1e0] sm:$0xff]  ;;  %v4343_v32 = vld [vmem:[#allocation5 + $0x1a8] sm:$0xff] }
  0x4a   :  { %8564 = vst [vmem:[#allocation74_spill] sm:$0xff] %v4333_v15  ;;  %8565 = vst [vmem:[#allocation75_spill] sm:$0xff] %v4337_v21  ;;  %v4341_v42 = vld [vmem:[#allocation5 + $0x1a0] sm:$0xff]  ;;  %v4345_v28 = vld [vmem:[#allocation5 + $0x1b0] sm:$0xff] }
  0x4b   :  { %8566 = vst [vmem:[#allocation76_spill] sm:$0xff] %v4339_v55  ;;  %8567 = vst [vmem:[#allocation77_spill] sm:$0xff] %v4341_v42  ;;  %v4358_v15 = vld [vmem:[#allocation2 + $0x1e8] sm:$0xff]  ;;  %v4360_v53 = vld [vmem:[#allocation2 + $0x1f0] sm:$0xff] }
  0x4c   :  { %8568 = vst [vmem:[#allocation78_spill] sm:$0xff] %v4343_v32  ;;  %8569 = vst [vmem:[#allocation79_spill] sm:$0xff] %v4345_v28  ;;  %v4362_v38 = vld [vmem:[#allocation2 + $0x1f8] sm:$0xff]  ;;  %v4366_v33 = vld [vmem:[#allocation5 + $0x1c0] sm:$0xff] }
  0x4d   :  { %8571 = vst [vmem:[#allocation80_spill] sm:$0xff] %v4356_v16  ;;  %8572 = vst [vmem:[#allocation81_spill] sm:$0xff] %v4358_v15  ;;  %v4364_v44 = vld [vmem:[#allocation5 + $0x1b8] sm:$0xff]  ;;  %v4368_v52 = vld [vmem:[#allocation5 + $0x1c8] sm:$0xff] }
  0x4e   :  { %8573 = vst [vmem:[#allocation82_spill] sm:$0xff] %v4360_v53  ;;  %8574 = vst [vmem:[#allocation83_spill] sm:$0xff] %v4362_v38  ;;  %v4381_v16 = vld [vmem:[#allocation2 + $0x200] sm:$0xff]  ;;  %v4383_v45 = vld [vmem:[#allocation2 + $0x208] sm:$0xff] }
  0x4f   :  { %8575 = vst [vmem:[#allocation84_spill] sm:$0xff] %v4364_v44  ;;  %8576 = vst [vmem:[#allocation85_spill] sm:$0xff] %v4366_v33  ;;  %v4385_v6 = vld [vmem:[#allocation2 + $0x210] sm:$0xff]  ;;  %v4389_v34 = vld [vmem:[#allocation5 + $0x1d8] sm:$0xff] }
  0x50   :  { %8577 = vst [vmem:[#allocation86_spill] sm:$0xff] %v4368_v52  ;;  %8579 = vst [vmem:[#allocation87_spill] sm:$0xff] %v4379_v17  ;;  %v4387_v25 = vld [vmem:[#allocation5 + $0x1d0] sm:$0xff]  ;;  %v4391_v51 = vld [vmem:[#allocation5 + $0x1e0] sm:$0xff] }
  0x51   :  { %8580 = vst [vmem:[#allocation88_spill] sm:$0xff] %v4381_v16  ;;  %8581 = vst [vmem:[#allocation89_spill] sm:$0xff] %v4383_v45  ;;  %v4404_v17 = vld [vmem:[#allocation2 + $0x218] sm:$0xff]  ;;  %v4406_v60 = vld [vmem:[#allocation2 + $0x220] sm:$0xff] }
  0x52   :  { %8582 = vst [vmem:[#allocation90_spill] sm:$0xff] %v4385_v6  ;;  %8583 = vst [vmem:[#allocation91_spill] sm:$0xff] %v4387_v25  ;;  %v4408_v58 = vld [vmem:[#allocation2 + $0x228] sm:$0xff]  ;;  %v4412_v39 = vld [vmem:[#allocation5 + $0x1f0] sm:$0xff] }
  0x53   :  { %8584 = vst [vmem:[#allocation92_spill] sm:$0xff] %v4389_v34  ;;  %8585 = vst [vmem:[#allocation93_spill] sm:$0xff] %v4391_v51  ;;  %v4410_v26 = vld [vmem:[#allocation5 + $0x1e8] sm:$0xff]  ;;  %v4414_v37 = vld [vmem:[#allocation5 + $0x1f8] sm:$0xff] }
  0x54   :  { %8587 = vst [vmem:[#allocation94_spill] sm:$0xff] %v4402_v22  ;;  %8588 = vst [vmem:[#allocation95_spill] sm:$0xff] %v4408_v58  ;;  %v4427_v22 = vld [vmem:[#allocation2 + $0x230] sm:$0xff]  ;;  %v4429_v47 = vld [vmem:[#allocation2 + $0x238] sm:$0xff] }
  0x55   :  { %8589 = vst [vmem:[#allocation96_spill] sm:$0xff] %v4410_v26  ;;  %8590 = vst [vmem:[#allocation97_spill] sm:$0xff] %v4412_v39  ;;  %v4431_v4 = vld [vmem:[#allocation2 + $0x240] sm:$0xff]  ;;  %v4435_v40 = vld [vmem:[#allocation5 + $0x208] sm:$0xff] }
  0x56   :  { %8591 = vst [vmem:[#allocation98_spill] sm:$0xff] %v4414_v37  ;;  %8593 = vst [vmem:[#allocation99_spill] sm:$0xff] %v4425_v23  ;;  %v4433_v27 = vld [vmem:[#allocation5 + $0x200] sm:$0xff]  ;;  %v4437_v42 = vld [vmem:[#allocation5 + $0x210] sm:$0xff] }
  0x57   :  { %8594 = vst [vmem:[#allocation100_spill] sm:$0xff] %v4427_v22  ;;  %8595 = vst [vmem:[#allocation101_spill] sm:$0xff] %v4429_v47  ;;  %v4450_v23 = vld [vmem:[#allocation2 + $0x248] sm:$0xff]  ;;  %v4452_v28 = vld [vmem:[#allocation2 + $0x250] sm:$0xff] }
  0x58   :  { %8596 = vst [vmem:[#allocation102_spill] sm:$0xff] %v4431_v4  ;;  %8597 = vst [vmem:[#allocation103_spill] sm:$0xff] %v4433_v27  ;;  %v4454_v20 = vld [vmem:[#allocation2 + $0x258] sm:$0xff]  ;;  %v4458_v41 = vld [vmem:[#allocation5 + $0x220] sm:$0xff] }
  0x59   :  { %8598 = vst [vmem:[#allocation104_spill] sm:$0xff] %v4435_v40  ;;  %8599 = vst [vmem:[#allocation105_spill] sm:$0xff] %v4437_v42  ;;  %v4456_v32 = vld [vmem:[#allocation5 + $0x218] sm:$0xff]  ;;  %v4460_v44 = vld [vmem:[#allocation5 + $0x228] sm:$0xff] }
  0x5a   :  { %8601 = vst [vmem:[#allocation106_spill] sm:$0xff] %v4448_v24  ;;  %8602 = vst [vmem:[#allocation107_spill] sm:$0xff] %v4450_v23  ;;  %v8608_v35 = vld [vmem:[#allocation11_spill] sm:$0xff]  ;;  %v8609_v29 = vld [vmem:[#allocation17_spill] sm:$0xff] }
  0x5b   :  { %8603 = vst [vmem:[#allocation108_spill] sm:$0xff] %v4452_v28  ;;  %8604 = vst [vmem:[#allocation109_spill] sm:$0xff] %v4454_v20  ;;  %v8610_v24 = vsub.f32 %v8608_v35, %v8609_v29  ;;  %v4473_v54 = vld [vmem:[#allocation2 + $0x260] sm:$0xff]  ;;  %v4475_v33 = vld [vmem:[#allocation2 + $0x268] sm:$0xff] }
  0x5c   :  { %8605 = vst [vmem:[#allocation110_spill] sm:$0xff] %v4456_v32  ;;  %8606 = vst [vmem:[#allocation111_spill] sm:$0xff] %v4458_v41  ;;  %v4477_v59 = vld [vmem:[#allocation2 + $0x270] sm:$0xff]  ;;  %v4481_v49 = vld [vmem:[#allocation5 + $0x238] sm:$0xff] }
  0x5d   :  { %8607 = vst [vmem:[#allocation112_spill] sm:$0xff] %v4460_v44  ;;  %v4471_v52 = vmul.f32 0.5, %v8610_v24  ;;  %8612 = vst [vmem:[#allocation17_spill] sm:$0xff] %v4475_v33  ;;  %v4479_v11 = vld [vmem:[#allocation5 + $0x230] sm:$0xff]  ;;  %v4483_v25 = vld [vmem:[#allocation5 + $0x240] sm:$0xff] }
  0x5e   :  { %8613 = vst [vmem:[#allocation113_spill] sm:$0xff] %v4477_v59  ;;  %8614 = vst [vmem:[#allocation114_spill] sm:$0xff] %v4479_v11  ;;  %v8617_v35 = vld [vmem:[#allocation20_spill] sm:$0xff]  ;;  %v4496_v51 = vld [vmem:[#allocation2 + $0x278] sm:$0xff] }
  0x5f   :  { %8611 = vst [vmem:[#allocation11_spill] sm:$0xff] %v4471_v52  ;;  %8615 = vst [vmem:[#allocation115_spill] sm:$0xff] %v4481_v49  ;;  %v8618_v30 = vsub.f32 %v4057_v36, %v8617_v35  ;;  %v4498_v55 = vld [vmem:[#allocation2 + $0x280] sm:$0xff]  ;;  %v4500_v34 = vld [vmem:[#allocation2 + $0x288] sm:$0xff] }
  0x60   :  { %8616 = vst [vmem:[#allocation116_spill] sm:$0xff] %v4483_v25  ;;  %8620 = vst [vmem:[#allocation117_spill] sm:$0xff] %v4498_v55  ;;  %v4502_v21 = vld [vmem:[#allocation5 + $0x248] sm:$0xff]  ;;  %v4504_v50 = vld [vmem:[#allocation5 + $0x250] sm:$0xff] }
  0x61   :  { %v4494_v52 = vmul.f32 0.5, %v8618_v30  ;;  %8621 = vst [vmem:[#allocation118_spill] sm:$0xff] %v4500_v34  ;;  %8622 = vst [vmem:[#allocation119_spill] sm:$0xff] %v4502_v21  ;;  %v4506_v26 = vld [vmem:[#allocation5 + $0x258] sm:$0xff]  ;;  %v8625_v35 = vld [vmem:[#allocation12_spill] sm:$0xff] }
  0x62   :  { %8623 = vst [vmem:[#allocation120_spill] sm:$0xff] %v4504_v50  ;;  %8624 = vst [vmem:[#allocation121_spill] sm:$0xff] %v4506_v26  ;;  %v8626_v29 = vld [vmem:[#allocation21_spill] sm:$0xff]  ;;  %v4519_v38 = vld [vmem:[#allocation2 + $0x290] sm:$0xff] }
  0x63   :  { %8619 = vst [vmem:[#allocation20_spill] sm:$0xff] %v4494_v52  ;;  %v8627_v52 = vsub.f32 %v8625_v35, %v8626_v29  ;;  %8629 = vst [vmem:[#allocation21_spill] sm:$0xff] %v4519_v38  ;;  %v4521_v39 = vld [vmem:[#allocation2 + $0x298] sm:$0xff]  ;;  %v4523_v53 = vld [vmem:[#allocation2 + $0x2a0] sm:$0xff] }
  0x64   :  { %8630 = vst [vmem:[#allocation122_spill] sm:$0xff] %v4521_v39  ;;  %8631 = vst [vmem:[#allocation123_spill] sm:$0xff] %v4523_v53  ;;  %v4525_v15 = vld [vmem:[#allocation5 + $0x260] sm:$0xff]  ;;  %v4527_v24 = vld [vmem:[#allocation5 + $0x268] sm:$0xff] }
  0x65   :  { %v4517_v37 = vmul.f32 0.5, %v8627_v52  ;;  %8632 = vst [vmem:[#allocation124_spill] sm:$0xff] %v4525_v15  ;;  %8633 = vst [vmem:[#allocation125_spill] sm:$0xff] %v4527_v24  ;;  %v4529_v27 = vld [vmem:[#allocation5 + $0x270] sm:$0xff]  ;;  %v8635_v35 = vld [vmem:[#allocation13_spill] sm:$0xff] }
  0x66   :  { %8634 = vst [vmem:[#allocation126_spill] sm:$0xff] %v4529_v27  ;;  %v8636_v36 = vld [vmem:[#allocation22_spill] sm:$0xff]  ;;  %v4542_v6 = vld [vmem:[#allocation2 + $0x2a8] sm:$0xff]  ;;  %v4544_v40 = vld [vmem:[#allocation2 + $0x2b0] sm:$0xff] }
  0x67   :  { %8628 = vst [vmem:[#allocation12_spill] sm:$0xff] %v4517_v37  ;;  %v8637_v37 = vsub.f32 %v8635_v35, %v8636_v36  ;;  %8639 = vst [vmem:[#allocation22_spill] sm:$0xff] %v4544_v40  ;;  %v4546_v45 = vld [vmem:[#allocation2 + $0x2b8] sm:$0xff]  ;;  %v4550_v30 = vld [vmem:[#allocation5 + $0x280] sm:$0xff]  ;;  %v8644_v35 = vsub.f32 %v4077_v46, %v4123_v5 }
  0x68   :  { %8640 = vst [vmem:[#allocation127_spill] sm:$0xff] %v4546_v45  ;;  %v4548_v16 = vld [vmem:[#allocation5 + $0x278] sm:$0xff]  ;;  %8642 = vst [vmem:[#allocation129_spill] sm:$0xff] %v4550_v30  ;;  %v4552_v32 = vld [vmem:[#allocation5 + $0x288] sm:$0xff] }
  0x69   :  { %v4540_v42 = vmul.f32 0.5, %v8637_v37  ;;  %8641 = vst [vmem:[#allocation128_spill] sm:$0xff] %v4548_v16  ;;  %8643 = vst [vmem:[#allocation130_spill] sm:$0xff] %v4552_v32  ;;  %v4563_v29 = vmul.f32 0.5, %v8644_v35  ;;  %v4567_v44 = vld [vmem:[#allocation2 + $0x2c8] sm:$0xff]  ;;  %v4569_v58 = vld [vmem:[#allocation2 + $0x2d0] sm:$0xff] }
  0x6a   :  { %8646 = vst [vmem:[#allocation132_spill] sm:$0xff] %v4567_v44  ;;  %8647 = vst [vmem:[#allocation133_spill] sm:$0xff] %v4569_v58  ;;  %v4571_v41 = vld [vmem:[#allocation5 + $0x290] sm:$0xff]  ;;  %v4573_v52 = vld [vmem:[#allocation5 + $0x298] sm:$0xff] }
  0x6b   :  { %8638 = vst [vmem:[#allocation13_spill] sm:$0xff] %v4540_v42  ;;  %8645 = vst [vmem:[#allocation131_spill] sm:$0xff] %v4563_v29  ;;  %v4565_v42 = vld [vmem:[#allocation2 + $0x2c0] sm:$0xff]  ;;  %v8651_v35 = vld [vmem:[#allocation15_spill] sm:$0xff] }
  0x6c   :  { %8648 = vst [vmem:[#allocation134_spill] sm:$0xff] %v4571_v41  ;;  %8649 = vst [vmem:[#allocation135_spill] sm:$0xff] %v4573_v52  ;;  %v4575_v11 = vld [vmem:[#allocation5 + $0x2a0] sm:$0xff]  ;;  %v8652_v36 = vld [vmem:[#allocation25_spill] sm:$0xff] }
  0x6d   :  { %8650 = vst [vmem:[#allocation136_spill] sm:$0xff] %v4575_v11  ;;  %v8653_v29 = vsub.f32 %v8651_v35, %v8652_v36  ;;  %v4588_v4 = vld [vmem:[#allocation2 + $0x2d8] sm:$0xff]  ;;  %v4590_v49 = vld [vmem:[#allocation2 + $0x2e0] sm:$0xff]  ;;  %v4592_v47 = vld [vmem:[#allocation2 + $0x2e8] sm:$0xff] }
  0x6e   :  { %8655 = vst [vmem:[#allocation25_spill] sm:$0xff] %v4588_v4  ;;  %8656 = vst [vmem:[#allocation137_spill] sm:$0xff] %v4590_v49  ;;  %v4594_v22 = vld [vmem:[#allocation5 + $0x2a8] sm:$0xff]  ;;  %v4596_v37 = vld [vmem:[#allocation5 + $0x2b0] sm:$0xff] }
  0x6f   :  { %v4586_v25 = vmul.f32 0.5, %v8653_v29  ;;  %8657 = vst [vmem:[#allocation138_spill] sm:$0xff] %v4592_v47  ;;  %8658 = vst [vmem:[#allocation139_spill] sm:$0xff] %v4594_v22  ;;  %v4598_v21 = vld [vmem:[#allocation5 + $0x2b8] sm:$0xff]  ;;  %v8661_v35 = vld [vmem:[#allocation16_spill] sm:$0xff] }
  0x70   :  { %8659 = vst [vmem:[#allocation140_spill] sm:$0xff] %v4596_v37  ;;  %8660 = vst [vmem:[#allocation141_spill] sm:$0xff] %v4598_v21  ;;  %v8662_v46 = vld [vmem:[#allocation26_spill] sm:$0xff]  ;;  %v4611_v20 = vld [vmem:[#allocation2 + $0x2f0] sm:$0xff] }
  0x71   :  { %8654 = vst [vmem:[#allocation15_spill] sm:$0xff] %v4586_v25  ;;  %v8663_v25 = vsub.f32 %v8661_v35, %v8662_v46  ;;  %v4613_v50 = vld [vmem:[#allocation2 + $0x2f8] sm:$0xff]  ;;  %v4615_v28 = vld [vmem:[#allocation2 + $0x300] sm:$0xff]  ;;  %v4619_v5 = vld [vmem:[#allocation5 + $0x2c8] sm:$0xff] }
  0x72   :  { %8665 = vst [vmem:[#allocation26_spill] sm:$0xff] %v4613_v50  ;;  %8666 = vst [vmem:[#allocation142_spill] sm:$0xff] %v4615_v28  ;;  %v4617_v23 = vld [vmem:[#allocation5 + $0x2c0] sm:$0xff]  ;;  %v4621_v15 = vld [vmem:[#allocation5 + $0x2d0] sm:$0xff] }
  0x73   :  { %v4609_v26 = vmul.f32 0.5, %v8663_v25  ;;  %8667 = vst [vmem:[#allocation143_spill] sm:$0xff] %v4617_v23  ;;  %8668 = vst [vmem:[#allocation144_spill] sm:$0xff] %v4619_v5  ;;  %v8670_v35 = vld [vmem:[#allocation29_spill] sm:$0xff]  ;;  %v4634_v27 = vld [vmem:[#allocation2 + $0x308] sm:$0xff] }
  0x74   :  { %8669 = vst [vmem:[#allocation145_spill] sm:$0xff] %v4621_v15  ;;  %v8671_v36 = vsub.f32 %v4097_v56, %v8670_v35  ;;  %v4636_v59 = vld [vmem:[#allocation2 + $0x310] sm:$0xff]  ;;  %v4638_v24 = vld [vmem:[#allocation2 + $0x318] sm:$0xff]  ;;  %v4642_v29 = vld [vmem:[#allocation5 + $0x2e0] sm:$0xff] }
  0x75   :  { %8664 = vst [vmem:[#allocation16_spill] sm:$0xff] %v4609_v26  ;;  %8673 = vst [vmem:[#allocation146_spill] sm:$0xff] %v4636_v59  ;;  %v4640_v33 = vld [vmem:[#allocation5 + $0x2d8] sm:$0xff]  ;;  %v4644_v16 = vld [vmem:[#allocation5 + $0x2e8] sm:$0xff] }
  0x76   :  { %v4632_v26 = vmul.f32 0.5, %v8671_v36  ;;  %8674 = vst [vmem:[#allocation147_spill] sm:$0xff] %v4638_v24  ;;  %8675 = vst [vmem:[#allocation148_spill] sm:$0xff] %v4640_v33  ;;  %v8678_v35 = vld [vmem:[#allocation30_spill] sm:$0xff]  ;;  %v4659_v34 = vld [vmem:[#allocation2 + $0x328] sm:$0xff] }
  0x77   :  { %8676 = vst [vmem:[#allocation149_spill] sm:$0xff] %v4642_v29  ;;  %8677 = vst [vmem:[#allocation150_spill] sm:$0xff] %v4644_v16  ;;  %v8679_v46 = vsub.f32 %v4099_v57, %v8678_v35  ;;  %v4657_v32 = vld [vmem:[#allocation2 + $0x320] sm:$0xff]  ;;  %v4661_v30 = vld [vmem:[#allocation2 + $0x330] sm:$0xff] }
  0x78   :  { %8672 = vst [vmem:[#allocation29_spill] sm:$0xff] %v4632_v26  ;;  %8681 = vst [vmem:[#allocation151_spill] sm:$0xff] %v4657_v32  ;;  %v4663_v55 = vld [vmem:[#allocation5 + $0x2f0] sm:$0xff]  ;;  %v4665_v25 = vld [vmem:[#allocation5 + $0x2f8] sm:$0xff] }
  0x79   :  { %v4655_v26 = vmul.f32 0.5, %v8679_v46  ;;  %8682 = vst [vmem:[#allocation152_spill] sm:$0xff] %v4659_v34  ;;  %8683 = vst [vmem:[#allocation153_spill] sm:$0xff] %v4661_v30  ;;  %v4667_v41 = vld [vmem:[#allocation5 + $0x300] sm:$0xff]  ;;  %v8687_v35 = vld [vmem:[#allocation19_spill] sm:$0xff] }
  0x7a   :  { %8684 = vst [vmem:[#allocation154_spill] sm:$0xff] %v4663_v55  ;;  %8685 = vst [vmem:[#allocation155_spill] sm:$0xff] %v4665_v25  ;;  %v8688_v56 = vld [vmem:[#allocation31_spill] sm:$0xff]  ;;  %v4680_v53 = vld [vmem:[#allocation2 + $0x338] sm:$0xff] }
  0x7b   :  { %8680 = vst [vmem:[#allocation30_spill] sm:$0xff] %v4655_v26  ;;  %8686 = vst [vmem:[#allocation156_spill] sm:$0xff] %v4667_v41  ;;  %v8689_v26 = vsub.f32 %v8687_v35, %v8688_v56  ;;  %v4682_v52 = vld [vmem:[#allocation2 + $0x340] sm:$0xff]  ;;  %v4684_v39 = vld [vmem:[#allocation2 + $0x348] sm:$0xff] }
  0x7c   :  { %8691 = vst [vmem:[#allocation31_spill] sm:$0xff] %v4682_v52  ;;  %8692 = vst [vmem:[#allocation157_spill] sm:$0xff] %v4684_v39  ;;  %v4686_v38 = vld [vmem:[#allocation5 + $0x308] sm:$0xff]  ;;  %v4688_v36 = vld [vmem:[#allocation5 + $0x310] sm:$0xff] }
  0x7d   :  { %v4678_v11 = vmul.f32 0.5, %v8689_v26  ;;  %8693 = vst [vmem:[#allocation158_spill] sm:$0xff] %v4686_v38  ;;  %8694 = vst [vmem:[#allocation159_spill] sm:$0xff] %v4688_v36  ;;  %v4690_v22 = vld [vmem:[#allocation5 + $0x318] sm:$0xff]  ;;  %v8696_v35 = vld [vmem:[#allocation34_spill] sm:$0xff] }
  0x7e   :  { %8695 = vst [vmem:[#allocation160_spill] sm:$0xff] %v4690_v22  ;;  %v8697_v57 = vsub.f32 %v4117_v2, %v8696_v35  ;;  %v4703_v21 = vld [vmem:[#allocation2 + $0x350] sm:$0xff]  ;;  %v4705_v45 = vld [vmem:[#allocation2 + $0x358] sm:$0xff]  ;;  %v4707_v37 = vld [vmem:[#allocation2 + $0x360] sm:$0xff] }
  0x7f   :  { %8690 = vst [vmem:[#allocation19_spill] sm:$0xff] %v4678_v11  ;;  %8699 = vst [vmem:[#allocation161_spill] sm:$0xff] %v4707_v37  ;;  %v4709_v40 = vld [vmem:[#allocation5 + $0x320] sm:$0xff]  ;;  %v4711_v46 = vld [vmem:[#allocation5 + $0x328] sm:$0xff] }
  0x80   :  { %v4701_v11 = vmul.f32 0.5, %v8697_v57  ;;  %8700 = vst [vmem:[#allocation162_spill] sm:$0xff] %v4709_v40  ;;  %8701 = vst [vmem:[#allocation163_spill] sm:$0xff] %v4711_v46  ;;  %v4713_v23 = vld [vmem:[#allocation5 + $0x330] sm:$0xff]  ;;  %v8703_v35 = vld [vmem:[#allocation35_spill] sm:$0xff] }
  0x81   :  { %8702 = vst [vmem:[#allocation164_spill] sm:$0xff] %v4713_v23  ;;  %v8704_v56 = vsub.f32 %v4119_v3, %v8703_v35  ;;  %v4726_v15 = vld [vmem:[#allocation2 + $0x368] sm:$0xff]  ;;  %v4728_v58 = vld [vmem:[#allocation2 + $0x370] sm:$0xff]  ;;  %v4730_v5 = vld [vmem:[#allocation2 + $0x378] sm:$0xff] }
  0x82   :  { %8698 = vst [vmem:[#allocation34_spill] sm:$0xff] %v4701_v11  ;;  %8706 = vst [vmem:[#allocation165_spill] sm:$0xff] %v4730_v5  ;;  %v4732_v44 = vld [vmem:[#allocation5 + $0x338] sm:$0xff]  ;;  %v4734_v26 = vld [vmem:[#allocation5 + $0x340] sm:$0xff] }
  0x83   :  { %v4724_v11 = vmul.f32 0.5, %v8704_v56  ;;  %8707 = vst [vmem:[#allocation166_spill] sm:$0xff] %v4732_v44  ;;  %8708 = vst [vmem:[#allocation167_spill] sm:$0xff] %v4734_v26  ;;  %v4736_v33 = vld [vmem:[#allocation5 + $0x348] sm:$0xff]  ;;  %v8710_v35 = vld [vmem:[#allocation24_spill] sm:$0xff] }
  0x84   :  { %8709 = vst [vmem:[#allocation168_spill] sm:$0xff] %v4736_v33  ;;  %v8711_v2 = vld [vmem:[#allocation36_spill] sm:$0xff]  ;;  %v4749_v47 = vld [vmem:[#allocation2 + $0x380] sm:$0xff]  ;;  %v4751_v29 = vld [vmem:[#allocation2 + $0x388] sm:$0xff] }
  0x85   :  { %8705 = vst [vmem:[#allocation35_spill] sm:$0xff] %v4724_v11  ;;  %v8712_v11 = vsub.f32 %v8710_v35, %v8711_v2  ;;  %v4753_v49 = vld [vmem:[#allocation2 + $0x390] sm:$0xff]  ;;  %v4757_v57 = vld [vmem:[#allocation5 + $0x358] sm:$0xff]  ;;  %v4759_v55 = vld [vmem:[#allocation5 + $0x360] sm:$0xff] }
  0x86   :  { %8714 = vst [vmem:[#allocation36_spill] sm:$0xff] %v4753_v49  ;;  %v4755_v4 = vld [vmem:[#allocation5 + $0x350] sm:$0xff]  ;;  %8716 = vst [vmem:[#allocation170_spill] sm:$0xff] %v4757_v57  ;;  %v8718_v35 = vld [vmem:[#allocation39_spill] sm:$0xff] }
  0x87   :  { %v4747_v16 = vmul.f32 0.5, %v8712_v11  ;;  %8715 = vst [vmem:[#allocation169_spill] sm:$0xff] %v4755_v4  ;;  %8717 = vst [vmem:[#allocation171_spill] sm:$0xff] %v4759_v55  ;;  %v8719_v3 = vsub.f32 %v4137_v18, %v8718_v35  ;;  %v4772_v41 = vld [vmem:[#allocation2 + $0x398] sm:$0xff]  ;;  %v4774_v28 = vld [vmem:[#allocation2 + $0x3a0] sm:$0xff] }
  0x88   :  { %v4776_v25 = vld [vmem:[#allocation2 + $0x3a8] sm:$0xff]  ;;  %v4780_v56 = vld [vmem:[#allocation5 + $0x370] sm:$0xff]  ;;  %v4782_v38 = vld [vmem:[#allocation5 + $0x378] sm:$0xff] }
  0x89   :  { %8713 = vst [vmem:[#allocation24_spill] sm:$0xff] %v4747_v16  ;;  %v4770_v16 = vmul.f32 0.5, %v8719_v3  ;;  %8721 = vst [vmem:[#allocation172_spill] sm:$0xff] %v4776_v25  ;;  %v4778_v50 = vld [vmem:[#allocation5 + $0x368] sm:$0xff]  ;;  %v8724_v35 = vld [vmem:[#allocation40_spill] sm:$0xff] }
  0x8a   :  { %8722 = vst [vmem:[#allocation173_spill] sm:$0xff] %v4780_v56  ;;  %8723 = vst [vmem:[#allocation174_spill] sm:$0xff] %v4782_v38  ;;  %v8725_v2 = vsub.f32 %v4139_v19, %v8724_v35  ;;  %v4795_v22 = vld [vmem:[#allocation2 + $0x3b0] sm:$0xff]  ;;  %v4797_v24 = vld [vmem:[#allocation2 + $0x3b8] sm:$0xff] }
  0x8b   :  { %8720 = vst [vmem:[#allocation39_spill] sm:$0xff] %v4770_v16  ;;  %v4799_v36 = vld [vmem:[#allocation2 + $0x3c0] sm:$0xff]  ;;  %v4803_v11 = vld [vmem:[#allocation5 + $0x388] sm:$0xff]  ;;  %v4805_v40 = vld [vmem:[#allocation5 + $0x390] sm:$0xff] }
  0x8c   :  { %v4793_v16 = vmul.f32 0.5, %v8725_v2  ;;  %v4801_v59 = vld [vmem:[#allocation5 + $0x380] sm:$0xff]  ;;  %8727 = vst [vmem:[#allocation175_spill] sm:$0xff] %v4805_v40  ;;  %v8728_v35 = vld [vmem:[#allocation28_spill] sm:$0xff]  ;;  %v8729_v18 = vld [vmem:[#allocation41_spill] sm:$0xff] }
  0x8d   :  { %v4818_v30 = vld [vmem:[#allocation2 + $0x3c8] sm:$0xff]  ;;  %v4820_v46 = vld [vmem:[#allocation2 + $0x3d0] sm:$0xff]  ;;  %v4822_v34 = vld [vmem:[#allocation2 + $0x3d8] sm:$0xff] }
  0x8e   :  { %8726 = vst [vmem:[#allocation40_spill] sm:$0xff] %v4793_v16  ;;  %v8730_v16 = vsub.f32 %v8728_v35, %v8729_v18  ;;  %v4824_v32 = vld [vmem:[#allocation5 + $0x398] sm:$0xff]  ;;  %v4826_v3 = vld [vmem:[#allocation5 + $0x3a0] sm:$0xff]  ;;  %v4828_v44 = vld [vmem:[#allocation5 + $0x3a8] sm:$0xff] }
  0x8f   :  { %8732 = vst [vmem:[#allocation41_spill] sm:$0xff] %v4828_v44  ;;  %v8733_v35 = vld [vmem:[#allocation44_spill] sm:$0xff]  ;;  %v4841_v33 = vld [vmem:[#allocation2 + $0x3e0] sm:$0xff]  ;;  %v4843_v39 = vld [vmem:[#allocation2 + $0x3e8] sm:$0xff] }
  0x90   :  { %v4816_v23 = vmul.f32 0.5, %v8730_v16  ;;  %v8734_v19 = vsub.f32 %v4157_v63, %v8733_v35  ;;  %v4845_v26 = vld [vmem:[#allocation2 + $0x3f0] sm:$0xff]  ;;  %v4849_v2 = vld [vmem:[#allocation5 + $0x3b8] sm:$0xff]  ;;  %v4851_v4 = vld [vmem:[#allocation5 + $0x3c0] sm:$0xff] }
  0x91   :  { %8736 = vst [vmem:[#allocation176_spill] sm:$0xff] %v4845_v26  ;;  %v4847_v52 = vld [vmem:[#allocation5 + $0x3b0] sm:$0xff]  ;;  %8737 = vst [vmem:[#allocation177_spill] sm:$0xff] %v4849_v2  ;;  %v8738_v35 = vld [vmem:[#allocation45_spill] sm:$0xff] }
  0x92   :  { %8731 = vst [vmem:[#allocation28_spill] sm:$0xff] %v4816_v23  ;;  %v4839_v23 = vmul.f32 0.5, %v8734_v19  ;;  %v8739_v18 = vsub.f32 %v4159_v62, %v8738_v35  ;;  %v4864_v55 = vld [vmem:[#allocation5 + $0x3c8] sm:$0xff]  ;;  %v4866_v37 = vld [vmem:[#allocation5 + $0x3d0] sm:$0xff]  ;;  %v4868_v57 = vld [vmem:[#allocation5 + $0x3d8] sm:$0xff] }
  0x93   :  { %v8741_v38 = vld [vmem:[#allocation33_spill] sm:$0xff]  ;;  %v8742_v5 = vld [vmem:[#allocation46_spill] sm:$0xff]  ;;  %v4885_v56 = vld [vmem:[#allocation5 + $0x3f0] sm:$0xff] }
  0x94   :  { %8735 = vst [vmem:[#allocation44_spill] sm:$0xff] %v4839_v23  ;;  %v4862_v23 = vmul.f32 0.5, %v8739_v18  ;;  %v8743_v62 = vsub.f32 %v8741_v38, %v8742_v5  ;;  %v4881_v35 = vld [vmem:[#allocation5 + $0x3e0] sm:$0xff]  ;;  %8745 = vst [vmem:[#allocation46_spill] sm:$0xff] %v4885_v56  ;;  %v8746_v40 = vld [vmem:[#allocation49_spill] sm:$0xff] }
  0x95   :  { %v8747_v38 = vsub.f32 %v4177_v8, %v8746_v40  ;;  %v8749_v19 = vld [vmem:[#allocation50_spill] sm:$0xff]  ;;  %v8761_v63 = vld [vmem:[#allocation43_spill] sm:$0xff] }
  0x96   :  { %8740 = vst [vmem:[#allocation45_spill] sm:$0xff] %v4862_v23  ;;  %v4879_v18 = vmul.f32 0.5, %v8743_v62  ;;  %v4883_v23 = vld [vmem:[#allocation5 + $0x3e8] sm:$0xff]  ;;  %v4898_v62 = vld [vmem:[#allocation2 + $0x3f8] sm:$0xff]  ;;  %v8750_v44 = vsub.f32 %v4179_v1, %v8749_v19  ;;  %v8752_v49 = vld [vmem:[#allocation38_spill] sm:$0xff] }
  0x97   :  { %v4896_v5 = vmul.f32 0.5, %v8747_v38  ;;  %v8756_v19 = vld [vmem:[#allocation54_spill] sm:$0xff]  ;;  %v8769_v38 = vld [vmem:[#allocation48_spill] sm:$0xff] }
  0x98   :  { %8744 = vst [vmem:[#allocation33_spill] sm:$0xff] %v4879_v18  ;;  %v4900_v18 = vld [vmem:[#allocation5 + $0x3f8] sm:$0xff]  ;;  %v4911_v25 = vmul.f32 0.5, %v8750_v44  ;;  %v8757_v40 = vsub.f32 %v4197_v9, %v8756_v19  ;;  %v8764_v44 = vld [vmem:[#allocation59_spill] sm:$0xff]  ;;  %v8767_v9 = vld [vmem:[#allocation60_spill] sm:$0xff] }
  0x99   :  { %8748 = vst [vmem:[#allocation49_spill] sm:$0xff] %v4896_v5  ;;  %v8753_v5 = vld [vmem:[#allocation51_spill] sm:$0xff]  ;;  %v8765_v56 = vsub.f32 %v4220_v7, %v8764_v44  ;;  %v8777_v44 = vld [vmem:[#allocation53_spill] sm:$0xff] }
  0x9a   :  { %8751 = vst [vmem:[#allocation50_spill] sm:$0xff] %v4911_v25  ;;  %v8754_v16 = vsub.f32 %v8752_v49, %v8753_v5  ;;  %v4933_v8 = vmul.f32 0.5, %v8757_v40  ;;  %v8759_v49 = vld [vmem:[#allocation55_spill] sm:$0xff]  ;;  %v8768_v40 = vsub.f32 %v4222_v48, %v8767_v9 }
  0x9b   :  { %v4950_v26 = vmul.f32 0.5, %v8765_v56 }
  0x9c   :  { %v4922_v2 = vmul.f32 0.5, %v8754_v16  ;;  %8758 = vst [vmem:[#allocation51_spill] sm:$0xff] %v4933_v8  ;;  %v8760_v16 = vsub.f32 %v4199_v61, %v8759_v49  ;;  %v4955_v19 = vmul.f32 0.5, %v8768_v40  ;;  %v8770_v8 = vld [vmem:[#allocation61_spill] sm:$0xff]  ;;  %v8780_v40 = vld [vmem:[#allocation71_spill] sm:$0xff] }
  0x9d   :  { %8766 = vst [vmem:[#allocation54_spill] sm:$0xff] %v4950_v26  ;;  %v8771_v61 = vsub.f32 %v8769_v38, %v8770_v8  ;;  %v8778_v26 = vld [vmem:[#allocation66_spill] sm:$0xff]  ;;  %v8781_v8 = vsub.f32 %v4266_v43, %v8780_v40 }
  0x9e   :  { %8755 = vst [vmem:[#allocation38_spill] sm:$0xff] %v4922_v2  ;;  %v4940_v5 = vmul.f32 0.5, %v8760_v16  ;;  %v8762_v2 = vld [vmem:[#allocation56_spill] sm:$0xff]  ;;  %v8779_v48 = vsub.f32 %v8777_v44, %v8778_v26 }
  0x9f   :  { %v8763_v25 = vsub.f32 %v8761_v63, %v8762_v2  ;;  %v4960_v49 = vmul.f32 0.5, %v8771_v61  ;;  %v8772_v16 = vld [vmem:[#allocation64_spill] sm:$0xff]  ;;  %v8775_v63 = vld [vmem:[#allocation65_spill] sm:$0xff]  ;;  %v4980_v38 = vmul.f32 0.5, %v8781_v8  ;;  %v8795_v8 = vld [vmem:[#allocation63_spill] sm:$0xff] }
  0xa0   :  { %v8773_v2 = vsub.f32 %v4243_v13, %v8772_v16  ;;  %v8776_v7 = vsub.f32 %v4245_v0, %v8775_v63  ;;  %v4975_v9 = vmul.f32 0.5, %v8779_v48  ;;  %v8783_v61 = vld [vmem:[#allocation72_spill] sm:$0xff]  ;;  %v8793_v48 = vld [vmem:[#allocation78_spill] sm:$0xff] }
  0xa1   :  { %v4945_v1 = vmul.f32 0.5, %v8763_v25  ;;  %8782 = vst [vmem:[#allocation43_spill] sm:$0xff] %v4980_v38  ;;  %v8784_v13 = vsub.f32 %v4268_v14, %v8783_v61  ;;  %v8794_v43 = vsub.f32 %v4291_v31, %v8793_v48  ;;  %v8796_v38 = vld [vmem:[#allocation79_spill] sm:$0xff] }
  0xa2   :  { %v4965_v25 = vmul.f32 0.5, %v8773_v2  ;;  %v4970_v56 = vmul.f32 0.5, %v8776_v7  ;;  %v8786_v2 = vld [vmem:[#allocation58_spill] sm:$0xff]  ;;  %v8790_v7 = vld [vmem:[#allocation77_spill] sm:$0xff]  ;;  %v8797_v14 = vsub.f32 %v8795_v8, %v8796_v38 }
  0xa3   :  { %v4985_v16 = vmul.f32 0.5, %v8784_v13  ;;  %v8791_v26 = vsub.f32 %v4289_v10, %v8790_v7  ;;  %v5000_v40 = vmul.f32 0.5, %v8794_v43  ;;  %v8799_v13 = vld [vmem:[#allocation68_spill] sm:$0xff]  ;;  %v8811_v43 = vld [vmem:[#allocation91_spill] sm:$0xff] }
  0xa4   :  { %8774 = vst [vmem:[#allocation55_spill] sm:$0xff] %v4965_v25  ;;  %v8787_v25 = vld [vmem:[#allocation73_spill] sm:$0xff]  ;;  %v5005_v61 = vmul.f32 0.5, %v8797_v14  ;;  %v8812_v38 = vsub.f32 %v4335_v12, %v8811_v43  ;;  %v8813_v14 = vld [vmem:[#allocation75_spill] sm:$0xff] }
  0xa5   :  { %8785 = vst [vmem:[#allocation56_spill] sm:$0xff] %v4985_v16  ;;  %v8788_v0 = vsub.f32 %v8786_v2, %v8787_v25  ;;  %v4995_v44 = vmul.f32 0.5, %v8791_v26  ;;  %v8800_v16 = vld [vmem:[#allocation84_spill] sm:$0xff]  ;;  %v8807_v26 = vld [vmem:[#allocation70_spill] sm:$0xff] }
  0xa6   :  { %8798 = vst [vmem:[#allocation48_spill] sm:$0xff] %v5005_v61  ;;  %v8801_v25 = vsub.f32 %v8799_v13, %v8800_v16  ;;  %v5025_v8 = vmul.f32 0.5, %v8812_v38  ;;  %v8814_v61 = vld [vmem:[#allocation92_spill] sm:$0xff]  ;;  %v8829_v38 = vld [vmem:[#allocation14_spill] sm:$0xff] }
  0xa7   :  { %v4990_v63 = vmul.f32 0.5, %v8788_v0  ;;  %8792 = vst [vmem:[#allocation60_spill] sm:$0xff] %v4995_v44  ;;  %v8803_v0 = vld [vmem:[#allocation69_spill] sm:$0xff]  ;;  %v8808_v44 = vld [vmem:[#allocation86_spill] sm:$0xff]  ;;  %v8815_v16 = vsub.f32 %v8813_v14, %v8814_v61  ;;  %2890 = vtanh.f32 %v8829_v38  ;;  %v8830_v61 = vld [vmem:[#allocation83_spill] sm:$0xff] }
  0xa8   :  { %v5010_v2 = vmul.f32 0.5, %v8801_v25  ;;  %v8809_v31 = vsub.f32 %v8807_v26, %v8808_v44  ;;  %v8817_v25 = vld [vmem:[#allocation76_spill] sm:$0xff]  ;;  %v8831_v14 = vld [vmem:[#allocation98_spill] sm:$0xff] }
  0xa9   :  { %8789 = vst [vmem:[#allocation59_spill] sm:$0xff] %v4990_v63  ;;  %v8804_v63 = vld [vmem:[#allocation85_spill] sm:$0xff]  ;;  %v5030_v13 = vmul.f32 0.5, %v8815_v16  ;;  %v8832_v16 = vsub.f32 %v8830_v61, %v8831_v14  ;;  %v8845_v61 = vld [vmem:[#allocation110_spill] sm:$0xff] }
  0xaa   :  { %8802 = vst [vmem:[#allocation61_spill] sm:$0xff] %v5010_v2  ;;  %v8805_v10 = vsub.f32 %v8803_v0, %v8804_v63  ;;  %v5020_v48 = vmul.f32 0.5, %v8809_v31  ;;  %v8818_v2 = vld [vmem:[#allocation93_spill] sm:$0xff]  ;;  %v8825_v31 = vld [vmem:[#allocation82_spill] sm:$0xff]  ;;  %v8846_v14 = vsub.f32 %v4404_v17, %v8845_v61  ;;  %v8861_v61 = vld [vmem:[#allocation115_spill] sm:$0xff] }
  0xab   :  { %8816 = vst [vmem:[#allocation53_spill] sm:$0xff] %v5030_v13  ;;  %v8819_v63 = vsub.f32 %v8817_v25, %v8818_v2  ;;  %v5051_v13 = vmul.f32 0.5, %v8832_v16  ;;  %v8833_v2 = vld [vmem:[#allocation88_spill] sm:$0xff]  ;;  %v8834_v25 = vld [vmem:[#allocation103_spill] sm:$0xff]  ;;  %v8860_v17 = vld [vmem:[#allocation101_spill] sm:$0xff] }
  0xac   :  { %v5015_v7 = vmul.f32 0.5, %v8805_v10  ;;  %8810 = vst [vmem:[#allocation65_spill] sm:$0xff] %v5020_v48  ;;  %v8821_v10 = vld [vmem:[#allocation81_spill] sm:$0xff]  ;;  %v5072_v16 = vmul.f32 0.5, %v8846_v14  ;;  %v8862_v14 = vsub.f32 %v8860_v17, %v8861_v61  ;;  %v8876_v17 = vld [vmem:[#allocation32_spill] sm:$0xff] }
  0xad   :  { %v5035_v0 = vmul.f32 0.5, %v8819_v63  ;;  %v8826_v48 = vld [vmem:[#allocation97_spill] sm:$0xff]  ;;  %v8835_v63 = vsub.f32 %v8833_v2, %v8834_v25  ;;  %v8848_v2 = vld [vmem:[#allocation111_spill] sm:$0xff] }
  0xae   :  { %8806 = vst [vmem:[#allocation64_spill] sm:$0xff] %v5015_v7  ;;  %v8822_v7 = vld [vmem:[#allocation96_spill] sm:$0xff]  ;;  %v8827_v12 = vsub.f32 %v8825_v31, %v8826_v48  ;;  %v8840_v48 = vld [vmem:[#allocation18_spill] sm:$0xff]  ;;  %8847 = vst [vmem:[#allocation77_spill] sm:$0xff] %v5072_v16  ;;  %v8849_v25 = vsub.f32 %v4406_v60, %v8848_v2  ;;  %v5093_v16 = vmul.f32 0.5, %v8862_v14 }
  0xaf   :  { %8820 = vst [vmem:[#allocation66_spill] sm:$0xff] %v5035_v0  ;;  %v8823_v44 = vsub.f32 %v8821_v10, %v8822_v7  ;;  %v5056_v0 = vmul.f32 0.5, %v8835_v63  ;;  %v8836_v7 = vld [vmem:[#allocation89_spill] sm:$0xff]  ;;  %v8837_v10 = vld [vmem:[#allocation104_spill] sm:$0xff]  ;;  %2892 = vtanh.f32 %v8840_v48  ;;  %v8841_v31 = vld [vmem:[#allocation90_spill] sm:$0xff] }
  0xb0   :  { %v5045_v43 = vmul.f32 0.5, %v8827_v12  ;;  %v8842_v12 = vld [vmem:[#allocation105_spill] sm:$0xff]  ;;  %v5077_v63 = vmul.f32 0.5, %v8849_v25  ;;  %8863 = vst [vmem:[#allocation68_spill] sm:$0xff] %v5093_v16  ;;  %v8864_v60 = vld [vmem:[#allocation27_spill] sm:$0xff]  ;;  %v8865_v2 = vld [vmem:[#allocation102_spill] sm:$0xff] }
  0xb1   :  { %v5040_v26 = vmul.f32 0.5, %v8823_v44  ;;  %v8838_v44 = vsub.f32 %v8836_v7, %v8837_v10  ;;  %v8843_v38 = vsub.f32 %v8841_v31, %v8842_v12  ;;  %v8851_v7 = vld [vmem:[#allocation23_spill] sm:$0xff]  ;;  %v8856_v31 = vld [vmem:[#allocation100_spill] sm:$0xff]  ;;  %v8857_v12 = vld [vmem:[#allocation114_spill] sm:$0xff] }
  0xb2   :  { %8828 = vst [vmem:[#allocation72_spill] sm:$0xff] %v5045_v43  ;;  %8850 = vst [vmem:[#allocation78_spill] sm:$0xff] %v5077_v63  ;;  %2894 = vtanh.f32 %v8851_v7  ;;  %v8852_v10 = vld [vmem:[#allocation95_spill] sm:$0xff]  ;;  %v8866_v25 = vld [vmem:[#allocation116_spill] sm:$0xff] }
  0xb3   :  { %8824 = vst [vmem:[#allocation71_spill] sm:$0xff] %v5040_v26  ;;  %v5061_v26 = vmul.f32 0.5, %v8838_v44  ;;  %v5067_v43 = vmul.f32 0.5, %v8843_v38  ;;  %v8853_v44 = vld [vmem:[#allocation112_spill] sm:$0xff]  ;;  %v8858_v38 = vsub.f32 %v8856_v31, %v8857_v12  ;;  %2896 = vtanh.f32 %v8864_v60  ;;  %v8877_v61 = vld [vmem:[#allocation109_spill] sm:$0xff] }
  0xb4   :  { %v8854_v48 = vsub.f32 %v8852_v10, %v8853_v44  ;;  %v8867_v7 = vsub.f32 %v8865_v2, %v8866_v25  ;;  %v8868_v10 = vld [vmem:[#allocation107_spill] sm:$0xff]  ;;  %v8872_v31 = vld [vmem:[#allocation108_spill] sm:$0xff]  ;;  %2898 = vtanh.f32 %v8876_v17  ;;  %v8878_v14 = vld [vmem:[#allocation121_spill] sm:$0xff] }
  0xb5   :  { %8839 = vst [vmem:[#allocation58_spill] sm:$0xff] %v5061_v26  ;;  %8844 = vst [vmem:[#allocation73_spill] sm:$0xff] %v5067_v43  ;;  %v5088_v43 = vmul.f32 0.5, %v8858_v38  ;;  %v8869_v44 = vld [vmem:[#allocation119_spill] sm:$0xff]  ;;  %v8873_v12 = vld [vmem:[#allocation120_spill] sm:$0xff]  ;;  %v8879_v60 = vsub.f32 %v8877_v61, %v8878_v14 }
  0xb6   :  { %v5083_v26 = vmul.f32 0.5, %v8854_v48  ;;  %v5099_v63 = vmul.f32 0.5, %v8867_v7  ;;  %v8870_v48 = vsub.f32 %v8868_v10, %v8869_v44  ;;  %v8874_v38 = vsub.f32 %v8872_v31, %v8873_v12  ;;  %v8880_v2 = vld [vmem:[#allocation124_spill] sm:$0xff]  ;;  %v8883_v10 = vld [vmem:[#allocation17_spill] sm:$0xff] }
  0xb7   :  { %8859 = vst [vmem:[#allocation79_spill] sm:$0xff] %v5088_v43  ;;  %v5115_v16 = vmul.f32 0.5, %v8879_v60  ;;  %v8881_v25 = vsub.f32 %v4473_v54, %v8880_v2  ;;  %v8884_v44 = vld [vmem:[#allocation125_spill] sm:$0xff]  ;;  %v8892_v61 = vld [vmem:[#allocation128_spill] sm:$0xff] }
  0xb8   :  { %8855 = vst [vmem:[#allocation63_spill] sm:$0xff] %v5083_v26  ;;  %v5104_v26 = vmul.f32 0.5, %v8870_v48  ;;  %v5109_v43 = vmul.f32 0.5, %v8874_v38  ;;  %v8885_v48 = vsub.f32 %v8883_v10, %v8884_v44  ;;  %v8887_v31 = vld [vmem:[#allocation37_spill] sm:$0xff]  ;;  %v8889_v38 = vld [vmem:[#allocation126_spill] sm:$0xff]  ;;  %v8893_v14 = vsub.f32 %v4496_v51, %v8892_v61  ;;  %v8908_v61 = vld [vmem:[#allocation135_spill] sm:$0xff] }
  0xb9   :  { %v5120_v7 = vmul.f32 0.5, %v8881_v25  ;;  %2900 = vtanh.f32 %v8887_v31  ;;  %v8888_v12 = vld [vmem:[#allocation113_spill] sm:$0xff]  ;;  %v8899_v10 = vld [vmem:[#allocation42_spill] sm:$0xff] }
  0xba   :  { %8871 = vst [vmem:[#allocation84_spill] sm:$0xff] %v5104_v26  ;;  %8875 = vst [vmem:[#allocation69_spill] sm:$0xff] %v5109_v43  ;;  %v5125_v26 = vmul.f32 0.5, %v8885_v48  ;;  %v8890_v17 = vsub.f32 %v8888_v12, %v8889_v38  ;;  %v5136_v60 = vmul.f32 0.5, %v8893_v14  ;;  %v8895_v54 = vld [vmem:[#allocation117_spill] sm:$0xff]  ;;  %2902 = vtanh.f32 %v8899_v10  ;;  %v8900_v44 = vld [vmem:[#allocation118_spill] sm:$0xff] }
  0xbb   :  { %8882 = vst [vmem:[#allocation85_spill] sm:$0xff] %v5120_v7  ;;  %v8896_v2 = vld [vmem:[#allocation129_spill] sm:$0xff]  ;;  %v8901_v48 = vld [vmem:[#allocation130_spill] sm:$0xff] }
  0xbc   :  { %8886 = vst [vmem:[#allocation70_spill] sm:$0xff] %v5125_v26  ;;  %v5131_v43 = vmul.f32 0.5, %v8890_v17  ;;  %8894 = vst [vmem:[#allocation91_spill] sm:$0xff] %v5136_v60  ;;  %v8897_v25 = vsub.f32 %v8895_v54, %v8896_v2  ;;  %v8902_v31 = vsub.f32 %v8900_v44, %v8901_v48  ;;  %v8903_v12 = vld [vmem:[#allocation21_spill] sm:$0xff]  ;;  %v8904_v38 = vld [vmem:[#allocation134_spill] sm:$0xff] }
  0xbd   :  { %v8905_v17 = vsub.f32 %v8903_v12, %v8904_v38  ;;  %v8907_v51 = vld [vmem:[#allocation122_spill] sm:$0xff]  ;;  %v8911_v54 = vld [vmem:[#allocation47_spill] sm:$0xff]  ;;  %v8919_v38 = vld [vmem:[#allocation140_spill] sm:$0xff] }
  0xbe   :  { %8891 = vst [vmem:[#allocation86_spill] sm:$0xff] %v5131_v43  ;;  %v5141_v7 = vmul.f32 0.5, %v8897_v25  ;;  %v5147_v26 = vmul.f32 0.5, %v8902_v31  ;;  %v8909_v14 = vsub.f32 %v8907_v51, %v8908_v61  ;;  %2904 = vtanh.f32 %v8911_v54  ;;  %v8912_v2 = vld [vmem:[#allocation123_spill] sm:$0xff]  ;;  %v8913_v25 = vld [vmem:[#allocation136_spill] sm:$0xff]  ;;  %v8918_v12 = vld [vmem:[#allocation22_spill] sm:$0xff] }
  0xbf   :  { %v5152_v43 = vmul.f32 0.5, %v8905_v17  ;;  %v8914_v10 = vsub.f32 %v8912_v2, %v8913_v25  ;;  %v8915_v44 = vld [vmem:[#allocation139_spill] sm:$0xff]  ;;  %v8920_v17 = vsub.f32 %v8918_v12, %v8919_v38  ;;  %v8922_v51 = vld [vmem:[#allocation52_spill] sm:$0xff]  ;;  %v8934_v12 = vld [vmem:[#allocation57_spill] sm:$0xff] }
  0xc0   :  { %8898 = vst [vmem:[#allocation75_spill] sm:$0xff] %v5141_v7  ;;  %v5157_v60 = vmul.f32 0.5, %v8909_v14  ;;  %v8916_v48 = vsub.f32 %v4542_v6, %v8915_v44  ;;  %2906 = vtanh.f32 %v8922_v51  ;;  %v8923_v61 = vld [vmem:[#allocation127_spill] sm:$0xff]  ;;  %v8924_v14 = vld [vmem:[#allocation141_spill] sm:$0xff]  ;;  %v8930_v6 = vld [vmem:[#allocation132_spill] sm:$0xff] }
  0xc1   :  { %8906 = vst [vmem:[#allocation92_spill] sm:$0xff] %v5152_v43  ;;  %v5163_v7 = vmul.f32 0.5, %v8914_v10  ;;  %v5173_v43 = vmul.f32 0.5, %v8920_v17  ;;  %v8925_v54 = vsub.f32 %v8923_v61, %v8924_v14  ;;  %v8927_v2 = vld [vmem:[#allocation143_spill] sm:$0xff]  ;;  %v8931_v44 = vld [vmem:[#allocation144_spill] sm:$0xff]  ;;  %2908 = vtanh.f32 %v8934_v12  ;;  %v8935_v38 = vld [vmem:[#allocation133_spill] sm:$0xff] }
  0xc2   :  { %8910 = vst [vmem:[#allocation76_spill] sm:$0xff] %v5157_v60  ;;  %v5168_v31 = vmul.f32 0.5, %v8916_v48  ;;  %v8928_v25 = vsub.f32 %v4565_v42, %v8927_v2  ;;  %v8932_v48 = vsub.f32 %v8930_v6, %v8931_v44  ;;  %v8936_v17 = vld [vmem:[#allocation145_spill] sm:$0xff]  ;;  %v8940_v14 = vld [vmem:[#allocation148_spill] sm:$0xff]  ;;  %v8947_v6 = vld [vmem:[#allocation62_spill] sm:$0xff] }
  0xc3   :  { %8921 = vst [vmem:[#allocation81_spill] sm:$0xff] %v5173_v43  ;;  %v5179_v60 = vmul.f32 0.5, %v8925_v54  ;;  %v8937_v51 = vsub.f32 %v8935_v38, %v8936_v17  ;;  %v8939_v61 = vld [vmem:[#allocation25_spill] sm:$0xff]  ;;  %2910 = vtanh.f32 %v8947_v6  ;;  %v8948_v44 = vld [vmem:[#allocation138_spill] sm:$0xff] }
  0xc4   :  { %8917 = vst [vmem:[#allocation93_spill] sm:$0xff] %v5168_v31  ;;  %v5184_v10 = vmul.f32 0.5, %v8928_v25  ;;  %v5189_v31 = vmul.f32 0.5, %v8932_v48  ;;  %v8941_v54 = vsub.f32 %v8939_v61, %v8940_v14  ;;  %v8943_v42 = vld [vmem:[#allocation137_spill] sm:$0xff]  ;;  %v8949_v48 = vld [vmem:[#allocation150_spill] sm:$0xff]  ;;  %v8956_v14 = vld [vmem:[#allocation155_spill] sm:$0xff] }
  0xc5   :  { %8926 = vst [vmem:[#allocation96_spill] sm:$0xff] %v5179_v60  ;;  %v5195_v43 = vmul.f32 0.5, %v8937_v51  ;;  %v8944_v2 = vld [vmem:[#allocation149_spill] sm:$0xff]  ;;  %v8950_v12 = vsub.f32 %v8948_v44, %v8949_v48  ;;  %v8952_v38 = vld [vmem:[#allocation154_spill] sm:$0xff] }
  0xc6   :  { %8929 = vst [vmem:[#allocation82_spill] sm:$0xff] %v5184_v10  ;;  %8933 = vst [vmem:[#allocation97_spill] sm:$0xff] %v5189_v31  ;;  %v5200_v60 = vmul.f32 0.5, %v8941_v54  ;;  %v8945_v25 = vsub.f32 %v8943_v42, %v8944_v2  ;;  %v8953_v17 = vsub.f32 %v4611_v20, %v8952_v38  ;;  %v8955_v61 = vld [vmem:[#allocation26_spill] sm:$0xff]  ;;  %v8959_v42 = vld [vmem:[#allocation67_spill] sm:$0xff] }
  0xc7   :  { %8938 = vst [vmem:[#allocation14_spill] sm:$0xff] %v5195_v43  ;;  %v5211_v31 = vmul.f32 0.5, %v8950_v12  ;;  %v8957_v54 = vsub.f32 %v8955_v61, %v8956_v14  ;;  %2912 = vtanh.f32 %v8959_v42  ;;  %v8960_v2 = vld [vmem:[#allocation142_spill] sm:$0xff]  ;;  %v8968_v38 = vld [vmem:[#allocation159_spill] sm:$0xff]  ;;  %v2891_v14 = vpop.eup %2890  ;;  %v8973_v42 = vld [vmem:[#allocation160_spill] sm:$0xff] }
  0xc8   :  { %8942 = vst [vmem:[#allocation83_spill] sm:$0xff] %v5200_v60  ;;  %v5205_v10 = vmul.f32 0.5, %v8945_v25  ;;  %v5216_v51 = vmul.f32 0.5, %v8953_v17  ;;  %v8961_v25 = vld [vmem:[#allocation156_spill] sm:$0xff]  ;;  %v8964_v44 = vld [vmem:[#allocation158_spill] sm:$0xff] }
  0xc9   :  { %8951 = vst [vmem:[#allocation88_spill] sm:$0xff] %v5211_v31  ;;  %v5221_v60 = vmul.f32 0.5, %v8957_v54  ;;  %v8962_v6 = vsub.f32 %v8960_v2, %v8961_v25  ;;  %v8965_v48 = vsub.f32 %v4634_v27, %v8964_v44  ;;  %v8967_v20 = vld [vmem:[#allocation146_spill] sm:$0xff]  ;;  %v8972_v54 = vld [vmem:[#allocation147_spill] sm:$0xff]  ;;  %v8980_v27 = vld [vmem:[#allocation152_spill] sm:$0xff] }
  0xca   :  { %8946 = vst [vmem:[#allocation98_spill] sm:$0xff] %v5205_v10  ;;  %8954 = vst [vmem:[#allocation103_spill] sm:$0xff] %v5216_v51  ;;  %v8969_v17 = vsub.f32 %v8967_v20, %v8968_v38  ;;  %v8971_v61 = vld [vmem:[#allocation74_spill] sm:$0xff]  ;;  %v8976_v2 = vld [vmem:[#allocation151_spill] sm:$0xff]  ;;  %v2893_v38 = vpop.eup %2892 }
  0xcb   :  { %8958 = vst [vmem:[#allocation89_spill] sm:$0xff] %v5221_v60  ;;  %v5227_v10 = vmul.f32 0.5, %v8962_v6  ;;  %v5232_v12 = vmul.f32 0.5, %v8965_v48  ;;  %2914 = vtanh.f32 %v8971_v61  ;;  %v8974_v60 = vsub.f32 %v8972_v54, %v8973_v42  ;;  %v8977_v25 = vld [vmem:[#allocation162_spill] sm:$0xff]  ;;  %v8981_v44 = vld [vmem:[#allocation163_spill] sm:$0xff]  ;;  %v8984_v20 = vld [vmem:[#allocation80_spill] sm:$0xff] }
  0xcc   :  { %v5237_v51 = vmul.f32 0.5, %v8969_v17  ;;  %v8978_v6 = vsub.f32 %v8976_v2, %v8977_v25  ;;  %v8982_v48 = vsub.f32 %v8980_v27, %v8981_v44  ;;  %2916 = vtanh.f32 %v8984_v20  ;;  %v8985_v17 = vld [vmem:[#allocation153_spill] sm:$0xff]  ;;  %v8986_v61 = vld [vmem:[#allocation164_spill] sm:$0xff]  ;;  %v8991_v2 = vld [vmem:[#allocation31_spill] sm:$0xff]  ;;  %v2895_v44 = vpop.eup %2894 }
  0xcd   :  { %8963 = vst [vmem:[#allocation104_spill] sm:$0xff] %v5227_v10  ;;  %8966 = vst [vmem:[#allocation18_spill] sm:$0xff] %v5232_v12  ;;  %v5243_v31 = vmul.f32 0.5, %v8974_v60  ;;  %v8988_v60 = vld [vmem:[#allocation166_spill] sm:$0xff]  ;;  %v8992_v25 = vld [vmem:[#allocation167_spill] sm:$0xff] }
  0xce   :  { %8970 = vst [vmem:[#allocation90_spill] sm:$0xff] %v5237_v51  ;;  %v5248_v10 = vmul.f32 0.5, %v8978_v6  ;;  %v5253_v12 = vmul.f32 0.5, %v8982_v48  ;;  %v8987_v51 = vsub.f32 %v8985_v17, %v8986_v61  ;;  %v8989_v54 = vsub.f32 %v4680_v53, %v8988_v60  ;;  %v8995_v27 = vld [vmem:[#allocation87_spill] sm:$0xff]  ;;  %v8996_v48 = vld [vmem:[#allocation157_spill] sm:$0xff]  ;;  %v8997_v20 = vld [vmem:[#allocation168_spill] sm:$0xff] }
  0xcf   :  { %8975 = vst [vmem:[#allocation105_spill] sm:$0xff] %v5243_v31  ;;  %v8993_v6 = vsub.f32 %v8991_v2, %v8992_v25  ;;  %2918 = vtanh.f32 %v8995_v27  ;;  %v9001_v53 = vld [vmem:[#allocation170_spill] sm:$0xff]  ;;  %v2897_v25 = vpop.eup %2896  ;;  %v9006_v27 = vld [vmem:[#allocation171_spill] sm:$0xff] }
  0xd0   :  { %8979 = vst [vmem:[#allocation110_spill] sm:$0xff] %v5248_v10  ;;  %8983 = vst [vmem:[#allocation111_spill] sm:$0xff] %v5253_v12  ;;  %v5259_v43 = vmul.f32 0.5, %v8987_v51  ;;  %v5264_v42 = vmul.f32 0.5, %v8989_v54  ;;  %v8998_v12 = vsub.f32 %v8996_v48, %v8997_v20  ;;  %v8999_v51 = vld [vmem:[#allocation169_spill] sm:$0xff]  ;;  %v9002_v60 = vsub.f32 %v4705_v45, %v9001_v53  ;;  %v9004_v2 = vld [vmem:[#allocation94_spill] sm:$0xff] }
  0xd1   :  { %v5269_v10 = vmul.f32 0.5, %v8993_v6  ;;  %v9000_v17 = vsub.f32 %v4703_v21, %v8999_v51  ;;  %2920 = vtanh.f32 %v9004_v2  ;;  %v9005_v6 = vld [vmem:[#allocation161_spill] sm:$0xff]  ;;  %v9011_v45 = vld [vmem:[#allocation99_spill] sm:$0xff] }
  0xd2   :  { %8990 = vst [vmem:[#allocation23_spill] sm:$0xff] %v5264_v42  ;;  %v5275_v31 = vmul.f32 0.5, %v8998_v12  ;;  %v5285_v54 = vmul.f32 0.5, %v9002_v60  ;;  %v9008_v12 = vsub.f32 %v4726_v15, %v4778_v50  ;;  %v9009_v21 = vld [vmem:[#allocation173_spill] sm:$0xff]  ;;  %2922 = vtanh.f32 %v9011_v45  ;;  %v9013_v60 = vld [vmem:[#allocation174_spill] sm:$0xff] }
  0xd3   :  { %8994 = vst [vmem:[#allocation95_spill] sm:$0xff] %v5269_v10  ;;  %v5280_v61 = vmul.f32 0.5, %v9000_v17  ;;  %v9007_v10 = vsub.f32 %v9005_v6, %v9006_v27  ;;  %v9010_v20 = vsub.f32 %v4728_v58, %v9009_v21  ;;  %v2899_v17 = vpop.eup %2898  ;;  %v9012_v53 = vld [vmem:[#allocation165_spill] sm:$0xff]  ;;  %v9016_v15 = vsub.f32 %v4751_v29, %v4803_v11  ;;  %v9017_v58 = vld [vmem:[#allocation106_spill] sm:$0xff]  ;;  %v9019_v21 = vld [vmem:[#allocation175_spill] sm:$0xff] }
  0xd4   :  { %9003 = vst [vmem:[#allocation112_spill] sm:$0xff] %v5285_v54  ;;  %v5296_v48 = vmul.f32 0.5, %v9008_v12  ;;  %v9014_v2 = vsub.f32 %v9012_v53, %v9013_v60  ;;  %2924 = vtanh.f32 %v9017_v58  ;;  %v2901_v27 = vpop.eup %2900  ;;  %v9018_v12 = vld [vmem:[#allocation36_spill] sm:$0xff]  ;;  %v9021_v53 = vsub.f32 %v4772_v41, %v4824_v32  ;;  %v9023_v29 = vld [vmem:[#allocation11_spill] sm:$0xff] }
  0xd5   :  { %v5291_v42 = vmul.f32 0.5, %v9007_v10  ;;  %v5301_v51 = vmul.f32 0.5, %v9010_v20  ;;  %v9015_v10 = vsub.f32 %v4749_v47, %v4801_v59  ;;  %v5317_v50 = vmul.f32 0.5, %v9016_v15  ;;  %v2903_v11 = vpop.eup %2902  ;;  %v9028_v32 = vld [vmem:[#allocation20_spill] sm:$0xff] }
  0xd6   :  { %v5307_v54 = vmul.f32 0.5, %v9014_v2  ;;  %v9020_v20 = vsub.f32 %v9018_v12, %v9019_v21  ;;  %v5328_v60 = vmul.f32 0.5, %v9021_v53  ;;  %v9022_v47 = vsub.f32 %v4774_v28, %v4826_v3  ;;  %v9024_v2 = vld [vmem:[#allocation172_spill] sm:$0xff]  ;;  %v9029_v28 = vld [vmem:[#allocation177_spill] sm:$0xff] }
  0xd7   :  { %v5312_v6 = vmul.f32 0.5, %v9015_v10  ;;  %2926 = vtanh.f32 %v9023_v29  ;;  %v9025_v10 = vld [vmem:[#allocation41_spill] sm:$0xff]  ;;  %v9027_v12 = vsub.f32 %v4795_v22, %v4847_v52  ;;  %v685_v41 = vmul.f32 0.5, %v2891_v14 }
  0xd8   :  { %v5323_v45 = vmul.f32 0.5, %v9020_v20  ;;  %v5333_v59 = vmul.f32 0.5, %v9022_v47  ;;  %v9026_v15 = vsub.f32 %v9024_v2, %v9025_v10  ;;  %2928 = vtanh.f32 %v9028_v32  ;;  %v2905_v20 = vpop.eup %2904  ;;  %v9031_v47 = vld [vmem:[#allocation12_spill] sm:$0xff]  ;;  %v9033_v52 = vld [vmem:[#allocation13_spill] sm:$0xff] }
  0xd9   :  { %v5344_v21 = vmul.f32 0.5, %v9027_v12  ;;  %v9030_v3 = vsub.f32 %v4797_v24, %v9029_v28  ;;  %2930 = vtanh.f32 %v9031_v47  ;;  %v686_v29 = vmul.f32 0.5, %v2893_v38  ;;  %v2907_v10 = vpop.eup %2906 }
  0xda   :  { %v5339_v58 = vmul.f32 0.5, %v9026_v15  ;;  %v687_v2 = vmul.f32 0.5, %v2895_v44  ;;  %v9032_v15 = vsub.f32 %v4799_v36, %v4851_v4  ;;  %2932 = vtanh.f32 %v9033_v52  ;;  %v2909_v32 = vpop.eup %2908 }
  0xdb   :  { %v5350_v53 = vmul.f32 0.5, %v9030_v3  ;;  %v688_v12 = vmul.f32 0.5, %v2897_v25  ;;  %v689_v14 = vmul.f32 0.5, %v2899_v17  ;;  %v9034_v24 = vsub.f32 %v4818_v30, %v4864_v55  ;;  %v9036_v3 = vld [vmem:[#allocation131_spill] sm:$0xff]  ;;  %v2911_v36 = vpop.eup %2910 }
  0xdc   :  { %v5356_v22 = vmul.f32 0.5, %v9032_v15  ;;  %v9035_v38 = vsub.f32 %v4820_v46, %v4866_v37  ;;  %2934 = vtanh.f32 %v9036_v3  ;;  %v690_v4 = vmul.f32 0.5, %v2901_v27  ;;  %v9040_v30 = vld [vmem:[#allocation15_spill] sm:$0xff]  ;;  %v2913_v37 = vpop.eup %2912  ;;  %v9041_v46 = vld [vmem:[#allocation16_spill] sm:$0xff]  ;;  %v9044_v3 = vld [vmem:[#allocation29_spill] sm:$0xff] }
  0xdd   :  { %v5362_v28 = vmul.f32 0.5, %v9034_v24  ;;  %v9037_v47 = vsub.f32 %v4822_v34, %v4868_v57  ;;  %v9038_v17 = vsub.f32 %v4841_v33, %v4881_v35  ;;  %2936 = vtanh.f32 %v9040_v30  ;;  %v9046_v30 = vld [vmem:[#allocation46_spill] sm:$0xff] }
  0xde   :  { %v5367_v44 = vmul.f32 0.5, %v9035_v38  ;;  %v813_v15 = vadd.f32 0.5, %v685_v41  ;;  %2938 = vtanh.f32 %v9041_v46  ;;  %v691_v52 = vmul.f32 0.5, %v2903_v11  ;;  %v2915_v38 = vpop.eup %2914  ;;  %v9049_v46 = vld [vmem:[#allocation30_spill] sm:$0xff] }
  0xdf   :  { %v5373_v25 = vmul.f32 0.5, %v9037_v47  ;;  %v5378_v55 = vmul.f32 0.5, %v9038_v17  ;;  %v814_v24 = vadd.f32 0.5, %v686_v29  ;;  %v815_v27 = vadd.f32 0.5, %v687_v2  ;;  %v2917_v47 = vpop.eup %2916  ;;  %v9045_v17 = vld [vmem:[#allocation176_spill] sm:$0xff] }
  0xe0   :  { %v9042_v34 = vsub.f32 %v4843_v39, %v4883_v23  ;;  %2940 = vtanh.f32 %v9044_v3  ;;  %v816_v33 = vadd.f32 0.5, %v688_v12  ;;  %v817_v35 = vadd.f32 0.5, %v689_v14  ;;  %v2919_v2 = vpop.eup %2918 }
  0xe1   :  { %9039 = vst [vmem:[#allocation100_spill] sm:$0xff] %v5378_v55  ;;  %v9047_v41 = vsub.f32 %v9045_v17, %v9046_v30  ;;  %2942 = vtanh.f32 %v9049_v46  ;;  %v692_v11 = vmul.f32 0.5, %v2905_v20  ;;  %v818_v29 = vadd.f32 0.5, %v690_v4  ;;  %v2921_v3 = vpop.eup %2920  ;;  %v9057_v4 = vld [vmem:[#allocation35_spill] sm:$0xff] }
  0xe2   :  { %v5385_v57 = vmul.f32 0.5, %v9042_v34  ;;  %v9050_v39 = vsub.f32 %v4898_v62, %v4900_v18  ;;  %v9052_v34 = vld [vmem:[#allocation19_spill] sm:$0xff]  ;;  %v693_v12 = vmul.f32 0.5, %v2907_v10  ;;  %v5400_v14 = vadd.f32 1e-10, %v813_v15  ;;  %v2923_v20 = vpop.eup %2922  ;;  %v9060_v10 = vld [vmem:[#allocation24_spill] sm:$0xff] }
  0xe3   :  { %v5391_v55 = vmul.f32 0.5, %v9047_v41  ;;  %2944 = vtanh.f32 %v9052_v34  ;;  %v819_v17 = vadd.f32 0.5, %v691_v52  ;;  %v5403_v30 = vadd.f32 1e-10, %v814_v24  ;;  %v9062_v24 = vld [vmem:[#allocation39_spill] sm:$0xff] }
  0xe4   :  { %9043 = vst [vmem:[#allocation114_spill] sm:$0xff] %v5385_v57  ;;  %v5397_v23 = vmul.f32 0.5, %v9050_v39  ;;  %9053 = vst [vmem:[#allocation27_spill] sm:$0xff] %v5400_v14  ;;  %v9054_v57 = vld [vmem:[#allocation34_spill] sm:$0xff]  ;;  %v5405_v41 = vadd.f32 1e-10, %v815_v27  ;;  %v2925_v39 = vpop.eup %2924 }
  0xe5   :  { %9048 = vst [vmem:[#allocation101_spill] sm:$0xff] %v5391_v55  ;;  %2946 = vtanh.f32 %v9054_v57  ;;  %9055 = vst [vmem:[#allocation102_spill] sm:$0xff] %v5403_v30  ;;  %v694_v46 = vmul.f32 0.5, %v2909_v32  ;;  %v5408_v18 = vadd.f32 1e-10, %v816_v33  ;;  %v695_v15 = vmul.f32 0.5, %v2911_v36  ;;  %v2927_v52 = vpop.eup %2926 }
  0xe6   :  { %9051 = vst [vmem:[#allocation115_spill] sm:$0xff] %v5397_v23  ;;  %9056 = vst [vmem:[#allocation116_spill] sm:$0xff] %v5405_v41  ;;  %2948 = vtanh.f32 %v9057_v4  ;;  %v5410_v62 = vadd.f32 1e-10, %v817_v35  ;;  %v820_v34 = vadd.f32 0.5, %v692_v11  ;;  %v696_v27 = vmul.f32 0.5, %v2913_v37  ;;  %v2929_v30 = vpop.eup %2928 }
  0xe7   :  { %9058 = vst [vmem:[#allocation107_spill] sm:$0xff] %v5408_v18  ;;  %2950 = vtanh.f32 %v9060_v10  ;;  %v5413_v14 = vadd.f32 1e-10, %v818_v29  ;;  %v697_v57 = vmul.f32 0.5, %v2915_v38  ;;  %v821_v41 = vadd.f32 0.5, %v693_v12  ;;  %v9063_v4 = vld [vmem:[#allocation40_spill] sm:$0xff] }
  0xe8   :  { %9059 = vst [vmem:[#allocation119_spill] sm:$0xff] %v5410_v62  ;;  %2952 = vtanh.f32 %v9062_v24  ;;  %v698_v32 = vmul.f32 0.5, %v2917_v47  ;;  %v699_v33 = vmul.f32 0.5, %v2919_v2  ;;  %v5417_v35 = vadd.f32 1e-10, %v819_v17  ;;  %v2931_v62 = vpop.eup %2930  ;;  %v9065_v18 = vld [vmem:[#allocation28_spill] sm:$0xff] }
  0xe9   :  { %9061 = vst [vmem:[#allocation108_spill] sm:$0xff] %v5413_v14  ;;  %2954 = vtanh.f32 %v9063_v4  ;;  %v700_v36 = vmul.f32 0.5, %v2921_v3  ;;  %v701_v11 = vmul.f32 0.5, %v2923_v20  ;;  %v822_v29 = vadd.f32 0.5, %v694_v46  ;;  %v2933_v10 = vpop.eup %2932  ;;  %v9066_v14 = vld [vmem:[#allocation44_spill] sm:$0xff]  ;;  %v9068_v23 = vld [vmem:[#allocation45_spill] sm:$0xff] }
  0xea   :  { %9064 = vst [vmem:[#allocation120_spill] sm:$0xff] %v5417_v35  ;;  %2956 = vtanh.f32 %v9065_v18  ;;  %v702_v24 = vmul.f32 0.5, %v2925_v39  ;;  %v823_v37 = vadd.f32 0.5, %v695_v15  ;;  %v5421_v38 = vadd.f32 1e-10, %v820_v34  ;;  %v2935_v12 = vpop.eup %2934  ;;  %v9070_v35 = vld [vmem:[#allocation33_spill] sm:$0xff] }
  0xeb   :  { %2958 = vtanh.f32 %v9066_v14  ;;  %v824_v47 = vadd.f32 0.5, %v696_v27  ;;  %v825_v2 = vadd.f32 0.5, %v697_v57  ;;  %v5424_v17 = vadd.f32 1e-10, %v821_v41  ;;  %v2937_v4 = vpop.eup %2936  ;;  %v9071_v55 = vld [vmem:[#allocation49_spill] sm:$0xff] }
  0xec   :  { %9067 = vst [vmem:[#allocation32_spill] sm:$0xff] %v5421_v38  ;;  %2960 = vtanh.f32 %v9068_v23  ;;  %v703_v3 = vmul.f32 0.5, %v2927_v52  ;;  %v826_v20 = vadd.f32 0.5, %v698_v32  ;;  %v827_v46 = vadd.f32 0.5, %v699_v33  ;;  %v2939_v18 = vpop.eup %2938  ;;  %v9072_v38 = vld [vmem:[#allocation50_spill] sm:$0xff] }
  0xed   :  { %9069 = vst [vmem:[#allocation109_spill] sm:$0xff] %v5424_v17  ;;  %2962 = vtanh.f32 %v9070_v35  ;;  %v828_v14 = vadd.f32 0.5, %v700_v36  ;;  %v829_v39 = vadd.f32 0.5, %v701_v11  ;;  %v5428_v15 = vadd.f32 1e-10, %v822_v29  ;;  %v2941_v34 = vpop.eup %2940  ;;  %v9073_v17 = vld [vmem:[#allocation38_spill] sm:$0xff] }
  0xee   :  { %2964 = vtanh.f32 %v9071_v55  ;;  %v704_v23 = vmul.f32 0.5, %v2929_v30  ;;  %v830_v27 = vadd.f32 0.5, %v702_v24  ;;  %v5431_v41 = vadd.f32 1e-10, %v823_v37  ;;  %v2943_v57 = vpop.eup %2942  ;;  %v9074_v35 = vld [vmem:[#allocation51_spill] sm:$0xff] }
  0xef   :  { %2966 = vtanh.f32 %v9072_v38  ;;  %v705_v52 = vmul.f32 0.5, %v2931_v62  ;;  %v5434_v32 = vadd.f32 1e-10, %v824_v47  ;;  %v5436_v33 = vadd.f32 1e-10, %v825_v2 }
  0xf0   :  { %2968 = vtanh.f32 %v9073_v17  ;;  %v2945_v55 = vpop.eup %2944  ;;  %v831_v36 = vadd.f32 0.5, %v703_v3  ;;  %v5439_v11 = vadd.f32 1e-10, %v826_v20  ;;  %v5441_v29 = vadd.f32 1e-10, %v827_v46  ;;  %v9078_v20 = vld [vmem:[#allocation54_spill] sm:$0xff] }
  0xf1   :  { %2970 = vtanh.f32 %v9074_v35  ;;  %v706_v24 = vmul.f32 0.5, %v2933_v10  ;;  %v5444_v37 = vadd.f32 1e-10, %v828_v14  ;;  %v5446_v38 = vadd.f32 1e-10, %v829_v39 }
  0xf2   :  { %9075 = vst [vmem:[#allocation121_spill] sm:$0xff] %v5439_v11  ;;  %9076 = vst [vmem:[#allocation124_spill] sm:$0xff] %v5441_v29  ;;  %v2947_v30 = vpop.eup %2946  ;;  %2972 = vtanh.f32 %v4940_v5  ;;  %v707_v47 = vmul.f32 0.5, %v2935_v12  ;;  %v832_v2 = vadd.f32 0.5, %v704_v23  ;;  %v5449_v17 = vadd.f32 1e-10, %v830_v27 }
  0xf3   :  { %v2949_v62 = vpop.eup %2948  ;;  %2974 = vtanh.f32 %v4945_v1  ;;  %v708_v46 = vmul.f32 0.5, %v2937_v4  ;;  %v709_v35 = vmul.f32 0.5, %v2939_v18  ;;  %v833_v29 = vadd.f32 0.5, %v705_v52 }
  0xf4   :  { %9077 = vst [vmem:[#allocation17_spill] sm:$0xff] %v5449_v17  ;;  %v2951_v3 = vpop.eup %2950  ;;  %2976 = vtanh.f32 %v9078_v20  ;;  %v710_v5 = vmul.f32 0.5, %v2941_v34  ;;  %v711_v10 = vmul.f32 0.5, %v2943_v57  ;;  %v5453_v14 = vadd.f32 1e-10, %v831_v36  ;;  %v9080_v17 = vld [vmem:[#allocation55_spill] sm:$0xff] }
  0xf5   :  { %v2953_v11 = vpop.eup %2952  ;;  %2978 = vtanh.f32 %v4955_v19  ;;  %v712_v1 = vmul.f32 0.5, %v2945_v55  ;;  %v713_v12 = vmul.f32 0.5, %v2947_v30  ;;  %v834_v23 = vadd.f32 0.5, %v706_v24 }
  0xf6   :  { %9079 = vst [vmem:[#allocation125_spill] sm:$0xff] %v5453_v14  ;;  %v2955_v39 = vpop.eup %2954  ;;  %2980 = vtanh.f32 %v4960_v49  ;;  %v714_v20 = vmul.f32 0.5, %v2949_v62  ;;  %v835_v4 = vadd.f32 0.5, %v707_v47  ;;  %v5457_v18 = vadd.f32 1e-10, %v832_v2  ;;  %v9083_v14 = vld [vmem:[#allocation43_spill] sm:$0xff] }
  0xf7   :  { %v2957_v27 = vpop.eup %2956  ;;  %2982 = vtanh.f32 %v9080_v17  ;;  %v836_v19 = vadd.f32 0.5, %v708_v46  ;;  %v837_v34 = vadd.f32 0.5, %v709_v35  ;;  %v5460_v57 = vadd.f32 1e-10, %v833_v29 }
  0xf8   :  { %9081 = vst [vmem:[#allocation37_spill] sm:$0xff] %v5457_v18  ;;  %v2959_v52 = vpop.eup %2958  ;;  %2984 = vtanh.f32 %v4970_v56  ;;  %v715_v49 = vmul.f32 0.5, %v2951_v3  ;;  %v838_v55 = vadd.f32 0.5, %v710_v5  ;;  %v839_v30 = vadd.f32 0.5, %v711_v10  ;;  %v9084_v18 = vld [vmem:[#allocation56_spill] sm:$0xff] }
  0xf9   :  { %9082 = vst [vmem:[#allocation113_spill] sm:$0xff] %v5460_v57  ;;  %v2961_v36 = vpop.eup %2960  ;;  %2986 = vtanh.f32 %v4975_v9  ;;  %v840_v62 = vadd.f32 0.5, %v712_v1  ;;  %v841_v47 = vadd.f32 0.5, %v713_v12  ;;  %v5464_v2 = vadd.f32 1e-10, %v834_v23  ;;  %v9085_v57 = vld [vmem:[#allocation59_spill] sm:$0xff] }
  0xfa   :  { %v2963_v24 = vpop.eup %2962  ;;  %2988 = vtanh.f32 %v9083_v14  ;;  %v716_v56 = vmul.f32 0.5, %v2953_v11  ;;  %v842_v46 = vadd.f32 0.5, %v714_v20  ;;  %v5467_v29 = vadd.f32 1e-10, %v835_v4  ;;  %v9088_v14 = vld [vmem:[#allocation60_spill] sm:$0xff] }
  0xfb   :  { %v2965_v17 = vpop.eup %2964  ;;  %2990 = vtanh.f32 %v9084_v18  ;;  %v717_v9 = vmul.f32 0.5, %v2955_v39  ;;  %v5470_v3 = vadd.f32 1e-10, %v836_v19  ;;  %v5472_v5 = vadd.f32 1e-10, %v837_v34  ;;  %v9093_v19 = vld [vmem:[#allocation48_spill] sm:$0xff] }
  0xfc   :  { %v2967_v35 = vpop.eup %2966  ;;  %2992 = vtanh.f32 %v9085_v57  ;;  %v843_v1 = vadd.f32 0.5, %v715_v49  ;;  %v5475_v12 = vadd.f32 1e-10, %v838_v55  ;;  %v5477_v23 = vadd.f32 1e-10, %v839_v30  ;;  %v9095_v55 = vld [vmem:[#allocation61_spill] sm:$0xff] }
  0xfd   :  { %9086 = vst [vmem:[#allocation126_spill] sm:$0xff] %v5470_v3  ;;  %9087 = vst [vmem:[#allocation128_spill] sm:$0xff] %v5472_v5  ;;  %v2969_v10 = vpop.eup %2968  ;;  %2994 = vtanh.f32 %v9088_v14  ;;  %v718_v20 = vmul.f32 0.5, %v2957_v27  ;;  %v5480_v4 = vadd.f32 1e-10, %v840_v62  ;;  %v719_v34 = vmul.f32 0.5, %v2959_v52 }
  0xfe   :  { %9089 = vst [vmem:[#allocation117_spill] sm:$0xff] %v5475_v12  ;;  %9090 = vst [vmem:[#allocation129_spill] sm:$0xff] %v5477_v23  ;;  %v2971_v11 = vpop.eup %2970  ;;  %2996 = vtanh.f32 %v5000_v40  ;;  %v5482_v18 = vadd.f32 1e-10, %v841_v47  ;;  %v844_v57 = vadd.f32 0.5, %v716_v56  ;;  %v720_v30 = vmul.f32 0.5, %v2961_v36 }
  0xff   :  { %9091 = vst [vmem:[#allocation42_spill] sm:$0xff] %v5480_v4  ;;  %v2973_v39 = vpop.eup %2972  ;;  %2998 = vtanh.f32 %v9093_v19  ;;  %v5485_v5 = vadd.f32 1e-10, %v842_v46  ;;  %v721_v14 = vmul.f32 0.5, %v2963_v24  ;;  %v845_v23 = vadd.f32 0.5, %v717_v9  ;;  %v9096_v40 = vld [vmem:[#allocation64_spill] sm:$0xff] }
 0x100   :  { %9092 = vst [vmem:[#allocation118_spill] sm:$0xff] %v5482_v18  ;;  %v2975_v49 = vpop.eup %2974  ;;  %3000 = vtanh.f32 %v9095_v55  ;;  %v722_v27 = vmul.f32 0.5, %v2965_v17  ;;  %v723_v62 = vmul.f32 0.5, %v2967_v35  ;;  %v5489_v47 = vadd.f32 1e-10, %v843_v1  ;;  %v9098_v4 = vld [vmem:[#allocation65_spill] sm:$0xff] }
 0x101   :  { %9094 = vst [vmem:[#allocation130_spill] sm:$0xff] %v5485_v5  ;;  %v2977_v12 = vpop.eup %2976  ;;  %3002 = vtanh.f32 %v9096_v40  ;;  %v724_v52 = vmul.f32 0.5, %v2969_v10  ;;  %v725_v56 = vmul.f32 0.5, %v2971_v11  ;;  %v846_v46 = vadd.f32 0.5, %v718_v20  ;;  %v9100_v5 = vld [vmem:[#allocation53_spill] sm:$0xff]  ;;  %v9102_v3 = vld [vmem:[#allocation71_spill] sm:$0xff] }
 0x102   :  { %9097 = vst [vmem:[#allocation21_spill] sm:$0xff] %v5489_v47  ;;  %v2979_v18 = vpop.eup %2978  ;;  %3004 = vtanh.f32 %v9098_v4  ;;  %v726_v55 = vmul.f32 0.5, %v2973_v39  ;;  %v847_v36 = vadd.f32 0.5, %v719_v34  ;;  %v5493_v24 = vadd.f32 1e-10, %v844_v57  ;;  %v9101_v47 = vld [vmem:[#allocation66_spill] sm:$0xff] }
 0x103   :  { %v2981_v19 = vpop.eup %2980  ;;  %3006 = vtanh.f32 %v5025_v8  ;;  %v848_v17 = vadd.f32 0.5, %v720_v30  ;;  %v849_v35 = vadd.f32 0.5, %v721_v14  ;;  %v5496_v1 = vadd.f32 1e-10, %v845_v23 }
 0x104   :  { %9099 = vst [vmem:[#allocation134_spill] sm:$0xff] %v5493_v24  ;;  %v2983_v9 = vpop.eup %2982  ;;  %3008 = vtanh.f32 %v9100_v5  ;;  %v727_v10 = vmul.f32 0.5, %v2975_v49  ;;  %v850_v11 = vadd.f32 0.5, %v722_v27  ;;  %v851_v20 = vadd.f32 0.5, %v723_v62  ;;  %v9103_v24 = vld [vmem:[#allocation72_spill] sm:$0xff] }
 0x105   :  { %v2985_v40 = vpop.eup %2984  ;;  %3010 = vtanh.f32 %v9101_v47  ;;  %v852_v8 = vadd.f32 0.5, %v724_v52  ;;  %v853_v39 = vadd.f32 0.5, %v725_v56  ;;  %v5500_v34 = vadd.f32 1e-10, %v846_v46  ;;  %v9108_v46 = vld [vmem:[#allocation58_spill] sm:$0xff] }
 0x106   :  { %v2987_v4 = vpop.eup %2986  ;;  %3012 = vtanh.f32 %v9102_v3  ;;  %v728_v5 = vmul.f32 0.5, %v2977_v12  ;;  %v854_v30 = vadd.f32 0.5, %v726_v55  ;;  %v5503_v23 = vadd.f32 1e-10, %v847_v36 }
 0x107   :  { %v2989_v57 = vpop.eup %2988  ;;  %3014 = vtanh.f32 %v9103_v24  ;;  %v729_v49 = vmul.f32 0.5, %v2979_v18  ;;  %v5506_v27 = vadd.f32 1e-10, %v848_v17  ;;  %v5508_v62 = vadd.f32 1e-10, %v849_v35  ;;  %v9111_v24 = vld [vmem:[#allocation73_spill] sm:$0xff] }
 0x108   :  { %v2991_v14 = vpop.eup %2990  ;;  %3016 = vtanh.f32 %v5051_v13  ;;  %v855_v47 = vadd.f32 0.5, %v727_v10  ;;  %v5511_v52 = vadd.f32 1e-10, %v850_v11  ;;  %v5513_v56 = vadd.f32 1e-10, %v851_v20  ;;  %v9113_v10 = vld [vmem:[#allocation77_spill] sm:$0xff] }
 0x109   :  { %9104 = vst [vmem:[#allocation122_spill] sm:$0xff] %v5506_v27  ;;  %9105 = vst [vmem:[#allocation135_spill] sm:$0xff] %v5508_v62  ;;  %v2993_v3 = vpop.eup %2992  ;;  %3018 = vtanh.f32 %v5056_v0  ;;  %v730_v55 = vmul.f32 0.5, %v2981_v19  ;;  %v5516_v36 = vadd.f32 1e-10, %v852_v8  ;;  %v731_v17 = vmul.f32 0.5, %v2983_v9 }
 0x10a   :  { %9106 = vst [vmem:[#allocation47_spill] sm:$0xff] %v5511_v52  ;;  %9107 = vst [vmem:[#allocation123_spill] sm:$0xff] %v5513_v56  ;;  %v2995_v12 = vpop.eup %2994  ;;  %3020 = vtanh.f32 %v9108_v46  ;;  %v5518_v13 = vadd.f32 1e-10, %v853_v39  ;;  %v856_v35 = vadd.f32 0.5, %v728_v5  ;;  %v732_v11 = vmul.f32 0.5, %v2985_v40 }
 0x10b   :  { %9109 = vst [vmem:[#allocation136_spill] sm:$0xff] %v5516_v36  ;;  %v2997_v18 = vpop.eup %2996  ;;  %3022 = vtanh.f32 %v9111_v24  ;;  %v5521_v62 = vadd.f32 1e-10, %v854_v30  ;;  %v733_v20 = vmul.f32 0.5, %v2987_v4  ;;  %v857_v56 = vadd.f32 0.5, %v729_v49  ;;  %v9114_v46 = vld [vmem:[#allocation78_spill] sm:$0xff] }
 0x10c   :  { %9110 = vst [vmem:[#allocation139_spill] sm:$0xff] %v5518_v13  ;;  %v2999_v0 = vpop.eup %2998  ;;  %3024 = vtanh.f32 %v9113_v10  ;;  %v734_v19 = vmul.f32 0.5, %v2989_v57  ;;  %v735_v8 = vmul.f32 0.5, %v2991_v14  ;;  %v5525_v39 = vadd.f32 1e-10, %v855_v47  ;;  %v9116_v36 = vld [vmem:[#allocation63_spill] sm:$0xff] }
 0x10d   :  { %9112 = vst [vmem:[#allocation22_spill] sm:$0xff] %v5521_v62  ;;  %v3001_v52 = vpop.eup %3000  ;;  %3026 = vtanh.f32 %v9114_v46  ;;  %v736_v9 = vmul.f32 0.5, %v2993_v3  ;;  %v737_v5 = vmul.f32 0.5, %v2995_v12  ;;  %v858_v30 = vadd.f32 0.5, %v730_v55  ;;  %v9117_v62 = vld [vmem:[#allocation79_spill] sm:$0xff]  ;;  %v9119_v27 = vld [vmem:[#allocation68_spill] sm:$0xff] }
 0x10e   :  { %9115 = vst [vmem:[#allocation140_spill] sm:$0xff] %v5525_v39  ;;  %v3003_v13 = vpop.eup %3002  ;;  %3028 = vtanh.f32 %v9116_v36  ;;  %v738_v10 = vmul.f32 0.5, %v2997_v18  ;;  %v859_v40 = vadd.f32 0.5, %v731_v17  ;;  %v5529_v4 = vadd.f32 1e-10, %v856_v35  ;;  %v9120_v39 = vld [vmem:[#allocation84_spill] sm:$0xff] }
 0x10f   :  { %v3005_v24 = vpop.eup %3004  ;;  %3030 = vtanh.f32 %v9117_v62  ;;  %v860_v57 = vadd.f32 0.5, %v732_v11  ;;  %v861_v14 = vadd.f32 0.5, %v733_v20  ;;  %v5532_v47 = vadd.f32 1e-10, %v857_v56 }
 0x110   :  { %9118 = vst [vmem:[#allocation52_spill] sm:$0xff] %v5529_v4  ;;  %v3007_v49 = vpop.eup %3006  ;;  %3032 = vtanh.f32 %v9119_v27  ;;  %v739_v3 = vmul.f32 0.5, %v2999_v0  ;;  %v862_v12 = vadd.f32 0.5, %v734_v19  ;;  %v863_v55 = vadd.f32 0.5, %v735_v8  ;;  %v9121_v4 = vld [vmem:[#allocation69_spill] sm:$0xff] }
 0x111   :  { %v3009_v46 = vpop.eup %3008  ;;  %3034 = vtanh.f32 %v5099_v63  ;;  %v864_v62 = vadd.f32 0.5, %v736_v9  ;;  %v865_v18 = vadd.f32 0.5, %v737_v5  ;;  %v5536_v17 = vadd.f32 1e-10, %v858_v30 }
 0x112   :  { %v3011_v36 = vpop.eup %3010  ;;  %3036 = vtanh.f32 %v9120_v39  ;;  %v740_v27 = vmul.f32 0.5, %v3001_v52  ;;  %v866_v11 = vadd.f32 0.5, %v738_v10  ;;  %v5539_v56 = vadd.f32 1e-10, %v859_v40  ;;  %v9124_v39 = vld [vmem:[#allocation85_spill] sm:$0xff]  ;;  %v9127_v10 = vld [vmem:[#allocation70_spill] sm:$0xff] }
 0x113   :  { %v3013_v35 = vpop.eup %3012  ;;  %3038 = vtanh.f32 %v9121_v4  ;;  %v741_v63 = vmul.f32 0.5, %v3003_v13  ;;  %v5542_v0 = vadd.f32 1e-10, %v860_v57  ;;  %v5544_v19 = vadd.f32 1e-10, %v861_v14  ;;  %v9130_v57 = vld [vmem:[#allocation86_spill] sm:$0xff] }
 0x114   :  { %v3015_v20 = vpop.eup %3014  ;;  %3040 = vtanh.f32 %v5115_v16  ;;  %v867_v9 = vadd.f32 0.5, %v739_v3  ;;  %v5547_v5 = vadd.f32 1e-10, %v862_v12  ;;  %v5549_v30 = vadd.f32 1e-10, %v863_v55  ;;  %v9132_v12 = vld [vmem:[#allocation91_spill] sm:$0xff] }
 0x115   :  { %9122 = vst [vmem:[#allocation127_spill] sm:$0xff] %v5542_v0  ;;  %9123 = vst [vmem:[#allocation141_spill] sm:$0xff] %v5544_v19  ;;  %v3017_v8 = vpop.eup %3016  ;;  %3042 = vtanh.f32 %v9124_v39  ;;  %v742_v40 = vmul.f32 0.5, %v3005_v24  ;;  %v5552_v4 = vadd.f32 1e-10, %v864_v62  ;;  %v743_v14 = vmul.f32 0.5, %v3007_v49 }
 0x116   :  { %9125 = vst [vmem:[#allocation143_spill] sm:$0xff] %v5547_v5  ;;  %9126 = vst [vmem:[#allocation132_spill] sm:$0xff] %v5549_v30  ;;  %v3019_v52 = vpop.eup %3018  ;;  %3044 = vtanh.f32 %v9127_v10  ;;  %v5554_v16 = vadd.f32 1e-10, %v865_v18  ;;  %v868_v19 = vadd.f32 0.5, %v740_v27  ;;  %v744_v55 = vmul.f32 0.5, %v3009_v46 }
 0x117   :  { %9128 = vst [vmem:[#allocation144_spill] sm:$0xff] %v5552_v4  ;;  %v3021_v13 = vpop.eup %3020  ;;  %3046 = vtanh.f32 %v9130_v57  ;;  %v5557_v0 = vadd.f32 1e-10, %v866_v11  ;;  %v745_v39 = vmul.f32 0.5, %v3011_v36  ;;  %v869_v30 = vadd.f32 0.5, %v741_v63  ;;  %v9133_v10 = vld [vmem:[#allocation75_spill] sm:$0xff] }
 0x118   :  { %9129 = vst [vmem:[#allocation57_spill] sm:$0xff] %v5554_v16  ;;  %v3023_v3 = vpop.eup %3022  ;;  %3048 = vtanh.f32 %v9132_v12  ;;  %v746_v24 = vmul.f32 0.5, %v3013_v35  ;;  %v747_v62 = vmul.f32 0.5, %v3015_v20  ;;  %v5561_v18 = vadd.f32 1e-10, %v867_v9  ;;  %v9137_v4 = vld [vmem:[#allocation76_spill] sm:$0xff] }
 0x119   :  { %9131 = vst [vmem:[#allocation133_spill] sm:$0xff] %v5557_v0  ;;  %v3025_v5 = vpop.eup %3024  ;;  %3050 = vtanh.f32 %v9133_v10  ;;  %v748_v49 = vmul.f32 0.5, %v3017_v8  ;;  %v749_v27 = vmul.f32 0.5, %v3019_v52  ;;  %v870_v11 = vadd.f32 0.5, %v742_v40  ;;  %v9135_v0 = vld [vmem:[#allocation92_spill] sm:$0xff] }
 0x11a   :  { %9134 = vst [vmem:[#allocation145_spill] sm:$0xff] %v5561_v18  ;;  %v3027_v16 = vpop.eup %3026  ;;  %3052 = vtanh.f32 %v5147_v26  ;;  %v750_v12 = vmul.f32 0.5, %v3021_v13  ;;  %v871_v46 = vadd.f32 0.5, %v743_v14  ;;  %v5565_v36 = vadd.f32 1e-10, %v868_v19  ;;  %v9139_v18 = vld [vmem:[#allocation93_spill] sm:$0xff] }
 0x11b   :  { %v3029_v57 = vpop.eup %3028  ;;  %3054 = vtanh.f32 %v9135_v0  ;;  %v872_v35 = vadd.f32 0.5, %v744_v55  ;;  %v873_v20 = vadd.f32 0.5, %v745_v39  ;;  %v5568_v9 = vadd.f32 1e-10, %v869_v30 }
 0x11c   :  { %9136 = vst [vmem:[#allocation25_spill] sm:$0xff] %v5565_v36  ;;  %v3031_v63 = vpop.eup %3030  ;;  %3056 = vtanh.f32 %v9137_v4  ;;  %v751_v26 = vmul.f32 0.5, %v3023_v3  ;;  %v874_v8 = vadd.f32 0.5, %v746_v24  ;;  %v875_v52 = vadd.f32 0.5, %v747_v62  ;;  %v9141_v36 = vld [vmem:[#allocation81_spill] sm:$0xff] }
 0x11d   :  { %9138 = vst [vmem:[#allocation148_spill] sm:$0xff] %v5568_v9  ;;  %v3033_v10 = vpop.eup %3032  ;;  %3058 = vtanh.f32 %v5163_v7  ;;  %v876_v0 = vadd.f32 0.5, %v748_v49  ;;  %v877_v13 = vadd.f32 0.5, %v749_v27  ;;  %v5572_v19 = vadd.f32 1e-10, %v870_v11  ;;  %v9143_v9 = vld [vmem:[#allocation96_spill] sm:$0xff] }
 0x11e   :  { %v3035_v40 = vpop.eup %3034  ;;  %3060 = vtanh.f32 %v9139_v18  ;;  %v752_v4 = vmul.f32 0.5, %v3025_v5  ;;  %v878_v55 = vadd.f32 0.5, %v750_v12  ;;  %v5575_v30 = vadd.f32 1e-10, %v871_v46  ;;  %v9146_v18 = vld [vmem:[#allocation82_spill] sm:$0xff]  ;;  %v9149_v12 = vld [vmem:[#allocation97_spill] sm:$0xff] }
 0x11f   :  { %9140 = vst [vmem:[#allocation137_spill] sm:$0xff] %v5572_v19  ;;  %v3037_v14 = vpop.eup %3036  ;;  %3062 = vtanh.f32 %v9141_v36  ;;  %v753_v7 = vmul.f32 0.5, %v3027_v16  ;;  %v5578_v3 = vadd.f32 1e-10, %v872_v35  ;;  %v5580_v24 = vadd.f32 1e-10, %v873_v20 }
 0x120   :  { %9142 = vst [vmem:[#allocation149_spill] sm:$0xff] %v5575_v30  ;;  %v3039_v39 = vpop.eup %3038  ;;  %3064 = vtanh.f32 %v9143_v9  ;;  %v879_v49 = vadd.f32 0.5, %v751_v26  ;;  %v5583_v27 = vadd.f32 1e-10, %v874_v8  ;;  %v5585_v11 = vadd.f32 1e-10, %v875_v52 }
 0x121   :  { %9144 = vst [vmem:[#allocation62_spill] sm:$0xff] %v5578_v3  ;;  %9145 = vst [vmem:[#allocation138_spill] sm:$0xff] %v5580_v24  ;;  %v3041_v62 = vpop.eup %3040  ;;  %3066 = vtanh.f32 %v9146_v18  ;;  %v754_v46 = vmul.f32 0.5, %v3029_v57  ;;  %v5588_v36 = vadd.f32 1e-10, %v876_v0  ;;  %v9152_v35 = vld [vmem:[#allocation14_spill] sm:$0xff] }
 0x122   :  { %9147 = vst [vmem:[#allocation150_spill] sm:$0xff] %v5583_v27  ;;  %9148 = vst [vmem:[#allocation154_spill] sm:$0xff] %v5585_v11  ;;  %v3043_v5 = vpop.eup %3042  ;;  %3068 = vtanh.f32 %v9149_v12  ;;  %v5590_v9 = vadd.f32 1e-10, %v877_v13  ;;  %v755_v20 = vmul.f32 0.5, %v3031_v63  ;;  %v880_v24 = vadd.f32 0.5, %v752_v4 }
 0x123   :  { %9150 = vst [vmem:[#allocation26_spill] sm:$0xff] %v5588_v36  ;;  %v3045_v16 = vpop.eup %3044  ;;  %3070 = vtanh.f32 %v9152_v35  ;;  %v5593_v3 = vadd.f32 1e-10, %v878_v55  ;;  %v9154_v8 = vld [vmem:[#allocation83_spill] sm:$0xff]  ;;  %v756_v52 = vmul.f32 0.5, %v3033_v10  ;;  %v757_v18 = vmul.f32 0.5, %v3035_v40 }
 0x124   :  { %9151 = vst [vmem:[#allocation155_spill] sm:$0xff] %v5590_v9  ;;  %v3047_v26 = vpop.eup %3046  ;;  %3072 = vtanh.f32 %v9154_v8  ;;  %v881_v11 = vadd.f32 0.5, %v753_v7  ;;  %v9155_v12 = vld [vmem:[#allocation98_spill] sm:$0xff]  ;;  %v758_v57 = vmul.f32 0.5, %v3037_v14  ;;  %v759_v0 = vmul.f32 0.5, %v3039_v39  ;;  %v9157_v36 = vld [vmem:[#allocation88_spill] sm:$0xff] }
 0x125   :  { %9153 = vst [vmem:[#allocation67_spill] sm:$0xff] %v5593_v3  ;;  %v3049_v27 = vpop.eup %3048  ;;  %3074 = vtanh.f32 %v9155_v12  ;;  %v5597_v13 = vadd.f32 1e-10, %v879_v49  ;;  %v760_v63 = vmul.f32 0.5, %v3041_v62  ;;  %v761_v4 = vmul.f32 0.5, %v3043_v5  ;;  %v9158_v3 = vld [vmem:[#allocation103_spill] sm:$0xff] }
 0x126   :  { %v3051_v9 = vpop.eup %3050  ;;  %3076 = vtanh.f32 %v9157_v36  ;;  %v882_v55 = vadd.f32 0.5, %v754_v46  ;;  %v762_v8 = vmul.f32 0.5, %v3045_v16  ;;  %v883_v10 = vadd.f32 0.5, %v755_v20  ;;  %v9160_v30 = vld [vmem:[#allocation89_spill] sm:$0xff]  ;;  %v9163_v19 = vld [vmem:[#allocation18_spill] sm:$0xff] }
 0x127   :  { %9156 = vst [vmem:[#allocation142_spill] sm:$0xff] %v5597_v13  ;;  %v3053_v35 = vpop.eup %3052  ;;  %3078 = vtanh.f32 %v9158_v3  ;;  %v5601_v40 = vadd.f32 1e-10, %v880_v24  ;;  %v884_v14 = vadd.f32 0.5, %v756_v52  ;;  %v885_v39 = vadd.f32 0.5, %v757_v18  ;;  %v9162_v13 = vld [vmem:[#allocation104_spill] sm:$0xff] }
 0x128   :  { %v3055_v7 = vpop.eup %3054  ;;  %3080 = vtanh.f32 %v9160_v30  ;;  %v5604_v49 = vadd.f32 1e-10, %v881_v11  ;;  %v763_v62 = vmul.f32 0.5, %v3047_v26  ;;  %v886_v5 = vadd.f32 0.5, %v758_v57 }
 0x129   :  { %9159 = vst [vmem:[#allocation156_spill] sm:$0xff] %v5601_v40  ;;  %v3057_v12 = vpop.eup %3056  ;;  %3082 = vtanh.f32 %v9162_v13  ;;  %v887_v46 = vadd.f32 0.5, %v759_v0  ;;  %v888_v3 = vadd.f32 0.5, %v760_v63  ;;  %v889_v16 = vadd.f32 0.5, %v761_v4  ;;  %v9164_v40 = vld [vmem:[#allocation90_spill] sm:$0xff] }
 0x12a   :  { %9161 = vst [vmem:[#allocation158_spill] sm:$0xff] %v5604_v49  ;;  %v3059_v36 = vpop.eup %3058  ;;  %3084 = vtanh.f32 %v9163_v19  ;;  %v5608_v24 = vadd.f32 1e-10, %v882_v55  ;;  %v764_v30 = vmul.f32 0.5, %v3049_v27  ;;  %v890_v52 = vadd.f32 0.5, %v762_v8  ;;  %v9165_v49 = vld [vmem:[#allocation105_spill] sm:$0xff] }
 0x12b   :  { %v3061_v20 = vpop.eup %3060  ;;  %3086 = vtanh.f32 %v9164_v40  ;;  %v5611_v11 = vadd.f32 1e-10, %v883_v10  ;;  %v765_v26 = vmul.f32 0.5, %v3051_v9  ;;  %v5614_v57 = vadd.f32 1e-10, %v884_v14  ;;  %v9167_v13 = vld [vmem:[#allocation110_spill] sm:$0xff] }
 0x12c   :  { %v3063_v18 = vpop.eup %3062  ;;  %3088 = vtanh.f32 %v9165_v49  ;;  %v5616_v0 = vadd.f32 1e-10, %v885_v39  ;;  %v891_v63 = vadd.f32 0.5, %v763_v62  ;;  %v5619_v4 = vadd.f32 1e-10, %v886_v5  ;;  %v9170_v8 = vld [vmem:[#allocation111_spill] sm:$0xff] }
 0x12d   :  { %v3065_v19 = vpop.eup %3064  ;;  %3090 = vtanh.f32 %v9167_v13  ;;  %v5621_v55 = vadd.f32 1e-10, %v887_v46  ;;  %v766_v10 = vmul.f32 0.5, %v3053_v35  ;;  %v5624_v40 = vadd.f32 1e-10, %v888_v3  ;;  %v9173_v5 = vld [vmem:[#allocation23_spill] sm:$0xff] }
 0x12e   :  { %9166 = vst [vmem:[#allocation146_spill] sm:$0xff] %v5616_v0  ;;  %9168 = vst [vmem:[#allocation159_spill] sm:$0xff] %v5619_v4  ;;  %v3067_v27 = vpop.eup %3066  ;;  %3092 = vtanh.f32 %v9170_v8  ;;  %v5626_v49 = vadd.f32 1e-10, %v889_v16  ;;  %v767_v14 = vmul.f32 0.5, %v3055_v7  ;;  %v892_v39 = vadd.f32 0.5, %v764_v30 }
 0x12f   :  { %9169 = vst [vmem:[#allocation74_spill] sm:$0xff] %v5621_v55  ;;  %v3069_v9 = vpop.eup %3068  ;;  %3094 = vtanh.f32 %v5259_v43  ;;  %v5629_v0 = vadd.f32 1e-10, %v890_v52  ;;  %v768_v46 = vmul.f32 0.5, %v3057_v12  ;;  %v769_v13 = vmul.f32 0.5, %v3059_v36  ;;  %v9174_v8 = vld [vmem:[#allocation95_spill] sm:$0xff] }
 0x130   :  { %9171 = vst [vmem:[#allocation147_spill] sm:$0xff] %v5626_v49  ;;  %v3071_v62 = vpop.eup %3070  ;;  %3096 = vtanh.f32 %v9173_v5  ;;  %v893_v55 = vadd.f32 0.5, %v765_v26  ;;  %v770_v35 = vmul.f32 0.5, %v3061_v20  ;;  %v771_v3 = vmul.f32 0.5, %v3063_v18 }
 0x131   :  { %9172 = vst [vmem:[#allocation160_spill] sm:$0xff] %v5629_v0  ;;  %v3073_v4 = vpop.eup %3072  ;;  %3098 = vtanh.f32 %v9174_v8  ;;  %v5633_v16 = vadd.f32 1e-10, %v891_v63  ;;  %v772_v43 = vmul.f32 0.5, %v3065_v19  ;;  %v773_v7 = vmul.f32 0.5, %v3067_v27  ;;  %v9175_v0 = vld [vmem:[#allocation112_spill] sm:$0xff] }
 0x132   :  { %v3075_v49 = vpop.eup %3074  ;;  %3100 = vtanh.f32 %v5275_v31  ;;  %v894_v30 = vadd.f32 0.5, %v766_v10  ;;  %v774_v5 = vmul.f32 0.5, %v3069_v9  ;;  %v895_v12 = vadd.f32 0.5, %v767_v14 }
 0x133   :  { %v3077_v52 = vpop.eup %3076  ;;  %3102 = vtanh.f32 %v5280_v61  ;;  %v5637_v36 = vadd.f32 1e-10, %v892_v39  ;;  %v896_v20 = vadd.f32 0.5, %v768_v46  ;;  %v897_v18 = vadd.f32 0.5, %v769_v13 }
 0x134   :  { %v3079_v26 = vpop.eup %3078  ;;  %3104 = vtanh.f32 %v9175_v0  ;;  %v5640_v63 = vadd.f32 1e-10, %v893_v55  ;;  %v775_v31 = vmul.f32 0.5, %v3071_v62  ;;  %v898_v19 = vadd.f32 0.5, %v770_v35 }
 0x135   :  { %v3081_v8 = vpop.eup %3080  ;;  %3106 = vtanh.f32 %v5291_v42  ;;  %v899_v27 = vadd.f32 0.5, %v771_v3  ;;  %v900_v61 = vadd.f32 0.5, %v772_v43  ;;  %v901_v9 = vadd.f32 0.5, %v773_v7 }
 0x136   :  { %v3083_v10 = vpop.eup %3082  ;;  %3108 = vtanh.f32 %v5296_v48  ;;  %v5644_v14 = vadd.f32 1e-10, %v894_v30  ;;  %v776_v0 = vmul.f32 0.5, %v3073_v4  ;;  %v902_v46 = vadd.f32 0.5, %v774_v5 }
 0x137   :  { %v3085_v39 = vpop.eup %3084  ;;  %3110 = vtanh.f32 %v5301_v51  ;;  %v5647_v55 = vadd.f32 1e-10, %v895_v12  ;;  %v777_v42 = vmul.f32 0.5, %v3075_v49  ;;  %v5650_v62 = vadd.f32 1e-10, %v896_v20 }
 0x138   :  { %v3087_v13 = vpop.eup %3086  ;;  %3112 = vtanh.f32 %v5307_v54  ;;  %v5652_v35 = vadd.f32 1e-10, %v897_v18  ;;  %v903_v3 = vadd.f32 0.5, %v775_v31  ;;  %v5655_v43 = vadd.f32 1e-10, %v898_v19 }
 0x139   :  { %v3089_v48 = vpop.eup %3088  ;;  %3114 = vtanh.f32 %v5312_v6  ;;  %v5657_v7 = vadd.f32 1e-10, %v899_v27  ;;  %v778_v4 = vmul.f32 0.5, %v3077_v52  ;;  %v5660_v30 = vadd.f32 1e-10, %v900_v61 }
 0x13a   :  { %v3091_v51 = vpop.eup %3090  ;;  %3116 = vtanh.f32 %v5317_v50  ;;  %v5662_v54 = vadd.f32 1e-10, %v901_v9  ;;  %v779_v5 = vmul.f32 0.5, %v3079_v26  ;;  %v904_v12 = vadd.f32 0.5, %v776_v0 }
 0x13b   :  { %v3093_v49 = vpop.eup %3092  ;;  %3118 = vtanh.f32 %v5323_v45  ;;  %v5665_v20 = vadd.f32 1e-10, %v902_v46  ;;  %v780_v18 = vmul.f32 0.5, %v3081_v8  ;;  %v781_v31 = vmul.f32 0.5, %v3083_v10 }
 0x13c   :  { %v3095_v6 = vpop.eup %3094  ;;  %3120 = vtanh.f32 %v5328_v60  ;;  %v905_v19 = vadd.f32 0.5, %v777_v42  ;;  %v782_v50 = vmul.f32 0.5, %v3085_v39  ;;  %v783_v52 = vmul.f32 0.5, %v3087_v13 }
 0x13d   :  { %v3097_v27 = vpop.eup %3096  ;;  %3122 = vtanh.f32 %v5333_v59  ;;  %v5669_v61 = vadd.f32 1e-10, %v903_v3  ;;  %v784_v45 = vmul.f32 0.5, %v3089_v48  ;;  %v785_v26 = vmul.f32 0.5, %v3091_v51 }
 0x13e   :  { %v3099_v9 = vpop.eup %3098  ;;  %3124 = vtanh.f32 %v5339_v58  ;;  %v906_v0 = vadd.f32 0.5, %v778_v4  ;;  %v786_v60 = vmul.f32 0.5, %v3093_v49  ;;  %v907_v8 = vadd.f32 0.5, %v779_v5 }
 0x13f   :  { %v3101_v46 = vpop.eup %3100  ;;  %3126 = vtanh.f32 %v5344_v21  ;;  %v5673_v10 = vadd.f32 1e-10, %v904_v12  ;;  %v908_v59 = vadd.f32 0.5, %v780_v18  ;;  %v909_v39 = vadd.f32 0.5, %v781_v31 }
 0x140   :  { %v3103_v42 = vpop.eup %3102  ;;  %3128 = vtanh.f32 %v5350_v53  ;;  %v5676_v13 = vadd.f32 1e-10, %v905_v19  ;;  %v787_v58 = vmul.f32 0.5, %v3095_v6  ;;  %v910_v48 = vadd.f32 0.5, %v782_v50 }
 0x141   :  { %v3105_v3 = vpop.eup %3104  ;;  %3130 = vtanh.f32 %v5356_v22  ;;  %v911_v51 = vadd.f32 0.5, %v783_v52  ;;  %v788_v21 = vmul.f32 0.5, %v3097_v27  ;;  %v912_v49 = vadd.f32 0.5, %v784_v45  ;;  %v9179_v27 = vld [vmem:[#allocation100_spill] sm:$0xff] }
 0x142   :  { %v3107_v4 = vpop.eup %3106  ;;  %3132 = vtanh.f32 %v5362_v28  ;;  %v913_v5 = vadd.f32 0.5, %v785_v26  ;;  %v914_v53 = vadd.f32 0.5, %v786_v60  ;;  %v5681_v18 = vadd.f32 1e-10, %v906_v0 }
 0x143   :  { %v3109_v12 = vpop.eup %3108  ;;  %3134 = vtanh.f32 %v5367_v44  ;;  %v5683_v31 = vadd.f32 1e-10, %v907_v8  ;;  %v789_v22 = vmul.f32 0.5, %v3099_v9  ;;  %v5686_v6 = vadd.f32 1e-10, %v908_v59  ;;  %v9184_v9 = vld [vmem:[#allocation114_spill] sm:$0xff] }
 0x144   :  { %v3111_v19 = vpop.eup %3110  ;;  %3136 = vtanh.f32 %v5373_v25  ;;  %v5688_v50 = vadd.f32 1e-10, %v909_v39  ;;  %v915_v52 = vadd.f32 0.5, %v787_v58  ;;  %v5691_v45 = vadd.f32 1e-10, %v910_v48  ;;  %v9186_v58 = vld [vmem:[#allocation101_spill] sm:$0xff] }
 0x145   :  { %9176 = vst [vmem:[#allocation151_spill] sm:$0xff] %v5683_v31  ;;  %9177 = vst [vmem:[#allocation162_spill] sm:$0xff] %v5686_v6  ;;  %v3113_v28 = vpop.eup %3112  ;;  %3138 = vtanh.f32 %v9179_v27  ;;  %v5693_v44 = vadd.f32 1e-10, %v911_v51  ;;  %v790_v0 = vmul.f32 0.5, %v3101_v46  ;;  %v916_v60 = vadd.f32 0.5, %v788_v21 }
 0x146   :  { %9178 = vst [vmem:[#allocation152_spill] sm:$0xff] %v5688_v50  ;;  %9180 = vst [vmem:[#allocation163_spill] sm:$0xff] %v5691_v45  ;;  %v3115_v26 = vpop.eup %3114  ;;  %v5695_v8 = vadd.f32 1e-10, %v912_v49  ;;  %v5697_v31 = vadd.f32 1e-10, %v913_v5  ;;  %3140 = vtanh.f32 %v9184_v9 }
 0x147   :  { %9181 = vst [vmem:[#allocation80_spill] sm:$0xff] %v5693_v44  ;;  %v3117_v25 = vpop.eup %3116  ;;  %v791_v59 = vmul.f32 0.5, %v3103_v42  ;;  %v792_v39 = vmul.f32 0.5, %v3105_v3  ;;  %v5700_v50 = vadd.f32 1e-10, %v914_v53  ;;  %3142 = vtanh.f32 %v9186_v58  ;;  %v9187_v46 = vld [vmem:[#allocation115_spill] sm:$0xff] }
 0x148   :  { %9182 = vst [vmem:[#allocation153_spill] sm:$0xff] %v5695_v8  ;;  %9183 = vst [vmem:[#allocation164_spill] sm:$0xff] %v5697_v31  ;;  %v3119_v27 = vpop.eup %3118  ;;  %v793_v48 = vmul.f32 0.5, %v3107_v4  ;;  %v794_v51 = vmul.f32 0.5, %v3109_v12  ;;  %v917_v44 = vadd.f32 0.5, %v789_v22  ;;  %3144 = vtanh.f32 %v9187_v46  ;;  %v9190_v3 = vld [vmem:[#allocation27_spill] sm:$0xff] }
 0x149   :  { %9185 = vst [vmem:[#allocation166_spill] sm:$0xff] %v5700_v50  ;;  %v3121_v45 = vpop.eup %3120  ;;  %v795_v21 = vmul.f32 0.5, %v3111_v19  ;;  %v796_v49 = vmul.f32 0.5, %v3113_v28  ;;  %v5704_v5 = vadd.f32 1e-10, %v915_v52  ;;  %v797_v8 = vmul.f32 0.5, %v3115_v26 }
 0x14a   :  { %v3123_v31 = vpop.eup %3122  ;;  %v918_v9 = vadd.f32 0.5, %v790_v0  ;;  %v5706_v42 = vadd.f32 1e-10, %v916_v60  ;;  %3146 = vlog2.f32 %v9190_v3  ;;  %v798_v50 = vmul.f32 0.5, %v3117_v25  ;;  %v9191_v12 = vld [vmem:[#allocation102_spill] sm:$0xff]  ;;  %v9192_v28 = vld [vmem:[#allocation116_spill] sm:$0xff] }
 0x14b   :  { %9188 = vst [vmem:[#allocation31_spill] sm:$0xff] %v5704_v5  ;;  %v3125_v53 = vpop.eup %3124  ;;  %v919_v58 = vadd.f32 0.5, %v791_v59  ;;  %v920_v4 = vadd.f32 0.5, %v792_v39  ;;  %3148 = vlog2.f32 %v9191_v12  ;;  %v921_v6 = vadd.f32 0.5, %v793_v48  ;;  %v9195_v39 = vld [vmem:[#allocation119_spill] sm:$0xff] }
 0x14c   :  { %9189 = vst [vmem:[#allocation167_spill] sm:$0xff] %v5706_v42  ;;  %v3127_v22 = vpop.eup %3126  ;;  %v922_v46 = vadd.f32 0.5, %v794_v51  ;;  %v5710_v19 = vadd.f32 1e-10, %v917_v44  ;;  %3150 = vlog2.f32 %v9192_v28  ;;  %v799_v26 = vmul.f32 0.5, %v3119_v27  ;;  %v9193_v42 = vld [vmem:[#allocation107_spill] sm:$0xff] }
 0x14d   :  { %v3129_v52 = vpop.eup %3128  ;;  %v923_v0 = vadd.f32 0.5, %v795_v21  ;;  %v924_v60 = vadd.f32 0.5, %v796_v49  ;;  %3152 = vlog2.f32 %v9193_v42  ;;  %v800_v5 = vmul.f32 0.5, %v3121_v45  ;;  %v9197_v28 = vld [vmem:[#allocation108_spill] sm:$0xff] }
 0x14e   :  { %v3131_v3 = vpop.eup %3130  ;;  %v925_v25 = vadd.f32 0.5, %v797_v8  ;;  %v5714_v59 = vadd.f32 1e-10, %v918_v9  ;;  %3154 = vlog2.f32 %v9195_v39  ;;  %v926_v48 = vadd.f32 0.5, %v798_v50  ;;  %v9199_v45 = vld [vmem:[#allocation120_spill] sm:$0xff] }
 0x14f   :  { %v3133_v12 = vpop.eup %3132  ;;  %v5717_v51 = vadd.f32 1e-10, %v919_v58  ;;  %v5719_v44 = vadd.f32 1e-10, %v920_v4  ;;  %3156 = vlog2.f32 %v9197_v28  ;;  %v801_v21 = vmul.f32 0.5, %v3123_v31  ;;  %v9201_v50 = vld [vmem:[#allocation32_spill] sm:$0xff] }
 0x150   :  { %9194 = vst [vmem:[#allocation87_spill] sm:$0xff] %v5714_v59  ;;  %v3135_v27 = vpop.eup %3134  ;;  %v5722_v49 = vadd.f32 1e-10, %v921_v6  ;;  %v5724_v42 = vadd.f32 1e-10, %v922_v46  ;;  %3158 = vlog2.f32 %v9199_v45  ;;  %v927_v9 = vadd.f32 0.5, %v799_v26 }
 0x151   :  { %9196 = vst [vmem:[#allocation157_spill] sm:$0xff] %v5719_v44  ;;  %v3137_v8 = vpop.eup %3136  ;;  %v5727_v59 = vadd.f32 1e-10, %v923_v0  ;;  %v5729_v39 = vadd.f32 1e-10, %v924_v60  ;;  %3160 = vlog2.f32 %v9201_v50  ;;  %v802_v4 = vmul.f32 0.5, %v3125_v53 }
 0x152   :  { %9198 = vst [vmem:[#allocation168_spill] sm:$0xff] %v5724_v42  ;;  %v3139_v58 = vpop.eup %3138  ;;  %v928_v44 = vadd.f32 0.5, %v800_v5  ;;  %v5732_v28 = vadd.f32 1e-10, %v925_v25  ;;  %v9202_v31 = vld [vmem:[#allocation109_spill] sm:$0xff]  ;;  %v803_v6 = vmul.f32 0.5, %v3127_v22 }
 0x153   :  { %9200 = vst [vmem:[#allocation169_spill] sm:$0xff] %v5729_v39  ;;  %3162 = vlog2.f32 %v9202_v31  ;;  %v804_v46 = vmul.f32 0.5, %v3129_v52  ;;  %v5735_v42 = vadd.f32 1e-10, %v926_v48  ;;  %v3141_v26 = vpop.eup %3140  ;;  %v805_v0 = vmul.f32 0.5, %v3131_v3 }
 0x154   :  { %3164 = vlog2.f32 %v5428_v15  ;;  %v806_v45 = vmul.f32 0.5, %v3133_v12  ;;  %v929_v60 = vadd.f32 0.5, %v801_v21  ;;  %v3143_v50 = vpop.eup %3142  ;;  %v807_v39 = vmul.f32 0.5, %v3135_v27  ;;  %v9206_v21 = vld [vmem:[#allocation121_spill] sm:$0xff] }
 0x155   :  { %9203 = vst [vmem:[#allocation170_spill] sm:$0xff] %v5735_v42  ;;  %3166 = vlog2.f32 %v5431_v41  ;;  %v808_v53 = vmul.f32 0.5, %v3137_v8  ;;  %v809_v5 = vmul.f32 0.5, %v3139_v58  ;;  %v3145_v25 = vpop.eup %3144  ;;  %v930_v31 = vadd.f32 0.5, %v802_v4  ;;  %v9207_v42 = vld [vmem:[#allocation124_spill] sm:$0xff] }
 0x156   :  { %3168 = vlog2.f32 %v5434_v32  ;;  %v5740_v22 = vadd.f32 1e-10, %v927_v9  ;;  %v5742_v52 = vadd.f32 1e-10, %v928_v44  ;;  %v810_v3 = vmul.f32 0.5, %v3141_v26 }
 0x157   :  { %3170 = vlog2.f32 %v5436_v33  ;;  %v3147_v15 = vpop.eup %3146  ;;  %v931_v12 = vadd.f32 0.5, %v803_v6  ;;  %v932_v48 = vadd.f32 0.5, %v804_v46  ;;  %v811_v27 = vmul.f32 0.5, %v3143_v50 }
 0x158   :  { %9204 = vst [vmem:[#allocation94_spill] sm:$0xff] %v5740_v22  ;;  %9205 = vst [vmem:[#allocation161_spill] sm:$0xff] %v5742_v52  ;;  %3172 = vlog2.f32 %v9206_v21  ;;  %v3149_v41 = vpop.eup %3148  ;;  %v933_v8 = vadd.f32 0.5, %v805_v0  ;;  %v934_v58 = vadd.f32 0.5, %v806_v45  ;;  %v935_v4 = vadd.f32 0.5, %v807_v39 }
 0x159   :  { %3174 = vlog2.f32 %v9207_v42  ;;  %v3151_v32 = vpop.eup %3150  ;;  %v936_v9 = vadd.f32 0.5, %v808_v53  ;;  %v937_v22 = vadd.f32 0.5, %v809_v5  ;;  %v812_v33 = vmul.f32 0.5, %v3145_v25  ;;  %v9211_v42 = vld [vmem:[#allocation17_spill] sm:$0xff]  ;;  %v5763_v5 = vld [vmem:[#allocation2 + $0x400] sm:$0xff] }
 0x15a   :  { %3176 = vlog2.f32 %v5444_v37  ;;  %v3153_v44 = vpop.eup %3152  ;;  %v5748_v52 = vadd.f32 1e-10, %v929_v60  ;;  %v5750_v6 = vadd.f32 1e-10, %v930_v31  ;;  %v938_v26 = vadd.f32 0.5, %v810_v3  ;;  %v9214_v60 = vld [vmem:[#allocation125_spill] sm:$0xff] }
 0x15b   :  { %3178 = vlog2.f32 %v5446_v38  ;;  %v3155_v46 = vpop.eup %3154  ;;  %v5753_v0 = vadd.f32 1e-10, %v931_v12  ;;  %v5755_v45 = vadd.f32 1e-10, %v932_v48  ;;  %v939_v50 = vadd.f32 0.5, %v811_v27  ;;  %9215 = vst [vmem:[#allocation106_spill] sm:$0xff] %v5763_v5 }
 0x15c   :  { %9208 = vst [vmem:[#allocation171_spill] sm:$0xff] %v5750_v6  ;;  %3180 = vlog2.f32 %v9211_v42  ;;  %v3157_v39 = vpop.eup %3156  ;;  %v5758_v53 = vadd.f32 1e-10, %v933_v8  ;;  %v5760_v37 = vadd.f32 1e-10, %v934_v58  ;;  %v5765_v25 = vld [vmem:[#allocation5 + $0x400] sm:$0xff] }
 0x15d   :  { %9209 = vst [vmem:[#allocation173_spill] sm:$0xff] %v5753_v0  ;;  %9210 = vst [vmem:[#allocation99_spill] sm:$0xff] %v5755_v45  ;;  %3182 = vlog2.f32 %v9214_v60  ;;  %v3159_v38 = vpop.eup %3158  ;;  %v5767_v31 = vadd.f32 1e-10, %v935_v4  ;;  %v5769_v3 = vadd.f32 1e-10, %v936_v9 }
 0x15e   :  { %9212 = vst [vmem:[#allocation165_spill] sm:$0xff] %v5758_v53  ;;  %9213 = vst [vmem:[#allocation174_spill] sm:$0xff] %v5760_v37  ;;  %v5771_v12 = vadd.f32 1e-10, %v937_v22  ;;  %v9220_v48 = vld [vmem:[#allocation37_spill] sm:$0xff]  ;;  %v3161_v21 = vpop.eup %3160  ;;  %v940_v27 = vadd.f32 0.5, %v812_v33 }
 0x15f   :  { %9216 = vst [vmem:[#allocation36_spill] sm:$0xff] %v5765_v25  ;;  %9217 = vst [vmem:[#allocation175_spill] sm:$0xff] %v5767_v31  ;;  %3184 = vlog2.f32 %v9220_v48  ;;  %v1070_v8 = vmul.f32 0.6931472, %v3147_v15  ;;  %v1078_v58 = vmul.f32 0.6931472, %v3155_v46 }
 0x160   :  { %9218 = vst [vmem:[#allocation11_spill] sm:$0xff] %v5769_v3  ;;  %9219 = vst [vmem:[#allocation172_spill] sm:$0xff] %v5771_v12  ;;  %v9221_v42 = vld [vmem:[#allocation113_spill] sm:$0xff]  ;;  %v5775_v60 = vld [vmem:[#allocation2 + $0x408] sm:$0xff]  ;;  %v3163_v53 = vpop.eup %3162  ;;  %v5779_v45 = vadd.f32 1e-10, %v938_v26 }
 0x161   :  { %3186 = vlog2.f32 %v9221_v42  ;;  %9222 = vst [vmem:[#allocation41_spill] sm:$0xff] %v5775_v60  ;;  %v5777_v37 = vld [vmem:[#allocation5 + $0x408] sm:$0xff]  ;;  %v1072_v4 = vmul.f32 0.6931472, %v3149_v41  ;;  %v1080_v9 = vmul.f32 0.6931472, %v3157_v39  ;;  %v3165_v22 = vpop.eup %3164 }
 0x162   :  { %9223 = vst [vmem:[#allocation20_spill] sm:$0xff] %v5777_v37  ;;  %9224 = vst [vmem:[#allocation177_spill] sm:$0xff] %v5779_v45  ;;  %3188 = vlog2.f32 %v5464_v2  ;;  %v5782_v12 = vadd.f32 1e-10, %v939_v50  ;;  %v1074_v48 = vmul.f32 0.6931472, %v3151_v32  ;;  %v3167_v15 = vpop.eup %3166 }
 0x163   :  { %v1082_v33 = vmul.f32 0.6931472, %v3159_v38  ;;  %3190 = vlog2.f32 %v5467_v29  ;;  %v1076_v46 = vmul.f32 0.6931472, %v3153_v44  ;;  %v1084_v42 = vmul.f32 0.6931472, %v3161_v21  ;;  %v3169_v2 = vpop.eup %3168 }
 0x164   :  { %9225 = vst [vmem:[#allocation12_spill] sm:$0xff] %v5782_v12  ;;  %v9226_v3 = vld [vmem:[#allocation126_spill] sm:$0xff]  ;;  %v5786_v31 = vld [vmem:[#allocation2 + $0x410] sm:$0xff]  ;;  %v5792_v39 = vadd.f32 1e-10, %v940_v27  ;;  %v1325_v38 = vadd.f32 %v1078_v58, %v1070_v8  ;;  %v5795_v29 = vld [vmem:[#allocation2 + $0x418] sm:$0xff]  ;;  %v3171_v21 = vpop.eup %3170  ;;  %v1356_v45 = vadd.f32 %v1080_v9, %v1072_v4 }
 0x165   :  { %3192 = vlog2.f32 %v9226_v3  ;;  %9227 = vst [vmem:[#allocation13_spill] sm:$0xff] %v5786_v31  ;;  %v5788_v26 = vld [vmem:[#allocation5 + $0x410] sm:$0xff]  ;;  %v1086_v50 = vmul.f32 0.6931472, %v3163_v53  ;;  %9231 = vst [vmem:[#allocation16_spill] sm:$0xff] %v5795_v29  ;;  %v5797_v44 = vld [vmem:[#allocation5 + $0x418] sm:$0xff]  ;;  %v3173_v53 = vpop.eup %3172  ;;  %v1387_v8 = vadd.f32 %v1082_v33, %v1074_v48  ;;  %v1418_v25 = vadd.f32 %v1084_v42, %v1076_v46 }
 0x166   :  { %9228 = vst [vmem:[#allocation131_spill] sm:$0xff] %v5788_v26  ;;  %9229 = vst [vmem:[#allocation15_spill] sm:$0xff] %v5792_v39  ;;  %v9230_v32 = vld [vmem:[#allocation128_spill] sm:$0xff]  ;;  %v1088_v3 = vmul.f32 0.6931472, %v3165_v22  ;;  %v9233_v12 = vld [vmem:[#allocation117_spill] sm:$0xff]  ;;  %v3175_v4 = vpop.eup %3174 }
 0x167   :  { %3194 = vlog2.f32 %v9230_v32  ;;  %9232 = vst [vmem:[#allocation29_spill] sm:$0xff] %v5797_v44  ;;  %v5800_v0 = vld [vmem:[#allocation2 + $0x420] sm:$0xff]  ;;  %v1090_v41 = vmul.f32 0.6931472, %v3167_v15  ;;  %v9236_v32 = vld [vmem:[#allocation129_spill] sm:$0xff]  ;;  %v5807_v58 = vld [vmem:[#allocation2 + $0x428] sm:$0xff]  ;;  %v3177_v48 = vpop.eup %3176  ;;  %v1326_v37 = vadd.f32 %v1325_v38, %v1086_v50 }
 0x168   :  { %3196 = vlog2.f32 %v9233_v12  ;;  %9234 = vst [vmem:[#allocation176_spill] sm:$0xff] %v5800_v0  ;;  %v5802_v6 = vld [vmem:[#allocation5 + $0x420] sm:$0xff]  ;;  %v5809_v39 = vld [vmem:[#allocation5 + $0x428] sm:$0xff]  ;;  %v1092_v9 = vmul.f32 0.6931472, %v3169_v2  ;;  %v5814_v5 = vld [vmem:[#allocation2 + $0x430] sm:$0xff]  ;;  %v3179_v46 = vpop.eup %3178  ;;  %v1357_v26 = vadd.f32 %v1356_v45, %v1088_v3 }
 0x169   :  { %9235 = vst [vmem:[#allocation46_spill] sm:$0xff] %v5802_v6  ;;  %3198 = vlog2.f32 %v9236_v32  ;;  %9237 = vst [vmem:[#allocation30_spill] sm:$0xff] %v5809_v39  ;;  %v9238_v22 = vld [vmem:[#allocation42_spill] sm:$0xff]  ;;  %v5816_v27 = vld [vmem:[#allocation5 + $0x430] sm:$0xff]  ;;  %v1094_v33 = vmul.f32 0.6931472, %v3171_v21  ;;  %v3181_v50 = vpop.eup %3180  ;;  %v1388_v44 = vadd.f32 %v1387_v8, %v1090_v41 }
 0x16a   :  { %3200 = vlog2.f32 %v9238_v22  ;;  %9239 = vst [vmem:[#allocation19_spill] sm:$0xff] %v5816_v27  ;;  %v9240_v32 = vld [vmem:[#allocation118_spill] sm:$0xff]  ;;  %v5821_v60 = vld [vmem:[#allocation2 + $0x438] sm:$0xff]  ;;  %v1096_v42 = vmul.f32 0.6931472, %v3173_v53  ;;  %v5835_v29 = vld [vmem:[#allocation2 + $0x448] sm:$0xff]  ;;  %v3183_v45 = vpop.eup %3182  ;;  %v1419_v6 = vadd.f32 %v1418_v25, %v1092_v9 }
 0x16b   :  { %3202 = vlog2.f32 %v9240_v32  ;;  %v5823_v12 = vld [vmem:[#allocation5 + $0x438] sm:$0xff]  ;;  %v9242_v22 = vld [vmem:[#allocation130_spill] sm:$0xff]  ;;  %v1098_v38 = vmul.f32 0.6931472, %v3175_v4  ;;  %9246 = vst [vmem:[#allocation39_spill] sm:$0xff] %v5835_v29  ;;  %v5837_v2 = vld [vmem:[#allocation5 + $0x448] sm:$0xff] }
 0x16c   :  { %9241 = vst [vmem:[#allocation34_spill] sm:$0xff] %v5823_v12  ;;  %3204 = vlog2.f32 %v9242_v22  ;;  %v5828_v31 = vld [vmem:[#allocation2 + $0x440] sm:$0xff]  ;;  %v9245_v32 = vld [vmem:[#allocation21_spill] sm:$0xff]  ;;  %9247 = vst [vmem:[#allocation40_spill] sm:$0xff] %v5837_v2  ;;  %v1100_v3 = vmul.f32 0.6931472, %v3177_v48  ;;  %v3185_v41 = vpop.eup %3184 }
 0x16d   :  { %9243 = vst [vmem:[#allocation35_spill] sm:$0xff] %v5828_v31  ;;  %v5830_v15 = vld [vmem:[#allocation5 + $0x440] sm:$0xff]  ;;  %3206 = vlog2.f32 %v9245_v32  ;;  %v5842_v0 = vld [vmem:[#allocation2 + $0x450] sm:$0xff]  ;;  %v1102_v8 = vmul.f32 0.6931472, %v3179_v46  ;;  %v1327_v32 = vadd.f32 %v1326_v37, %v1094_v33  ;;  %v5849_v39 = vld [vmem:[#allocation2 + $0x458] sm:$0xff]  ;;  %v1389_v46 = vadd.f32 %v1388_v44, %v1098_v38 }
 0x16e   :  { %9244 = vst [vmem:[#allocation24_spill] sm:$0xff] %v5830_v15  ;;  %v9248_v22 = vld [vmem:[#allocation134_spill] sm:$0xff]  ;;  %9249 = vst [vmem:[#allocation28_spill] sm:$0xff] %v5842_v0  ;;  %v5844_v21 = vld [vmem:[#allocation5 + $0x450] sm:$0xff]  ;;  %v3187_v25 = vpop.eup %3186  ;;  %v1104_v9 = vmul.f32 0.6931472, %v3181_v50  ;;  %v1420_v15 = vadd.f32 %v1419_v6, %v1100_v3 }
 0x16f   :  { %3208 = vlog2.f32 %v9248_v22  ;;  %9250 = vst [vmem:[#allocation44_spill] sm:$0xff] %v5844_v21  ;;  %9251 = vst [vmem:[#allocation45_spill] sm:$0xff] %v5849_v39  ;;  %v5851_v53 = vld [vmem:[#allocation5 + $0x458] sm:$0xff]  ;;  %v1358_v22 = vadd.f32 %v1357_v26, %v1096_v42  ;;  %v5856_v27 = vld [vmem:[#allocation2 + $0x460] sm:$0xff]  ;;  %v3189_v37 = vpop.eup %3188  ;;  %v1106_v33 = vmul.f32 0.6931472, %v3183_v45  ;;  %v1328_v2 = vadd.f32 %v1327_v32, %v1102_v8 }
 0x170   :  { %3210 = vlog2.f32 %v5496_v1  ;;  %9252 = vst [vmem:[#allocation33_spill] sm:$0xff] %v5851_v53  ;;  %9253 = vst [vmem:[#allocation49_spill] sm:$0xff] %v5856_v27  ;;  %v5858_v4 = vld [vmem:[#allocation5 + $0x460] sm:$0xff]  ;;  %v5863_v12 = vld [vmem:[#allocation2 + $0x468] sm:$0xff]  ;;  %v3191_v26 = vpop.eup %3190  ;;  %v1108_v42 = vmul.f32 0.6931472, %v3185_v41 }
 0x171   :  { %3212 = vlog2.f32 %v5500_v34  ;;  %9254 = vst [vmem:[#allocation50_spill] sm:$0xff] %v5858_v4  ;;  %9255 = vst [vmem:[#allocation38_spill] sm:$0xff] %v5863_v12  ;;  %v5865_v48 = vld [vmem:[#allocation5 + $0x468] sm:$0xff]  ;;  %v9257_v50 = vld [vmem:[#allocation122_spill] sm:$0xff]  ;;  %v1110_v38 = vmul.f32 0.6931472, %v3187_v25  ;;  %v1359_v21 = vadd.f32 %v1358_v22, %v1104_v9  ;;  %v1390_v53 = vadd.f32 %v1389_v46, %v1106_v33 }
 0x172   :  { %3214 = vlog2.f32 %v5503_v23  ;;  %9256 = vst [vmem:[#allocation51_spill] sm:$0xff] %v5865_v48  ;;  %v5870_v31 = vld [vmem:[#allocation2 + $0x470] sm:$0xff]  ;;  %v3193_v44 = vpop.eup %3192  ;;  %v9260_v45 = vld [vmem:[#allocation135_spill] sm:$0xff]  ;;  %v5877_v29 = vld [vmem:[#allocation2 + $0x478] sm:$0xff]  ;;  %v1112_v3 = vmul.f32 0.6931472, %v3189_v37  ;;  %v1421_v4 = vadd.f32 %v1420_v15, %v1108_v42 }
 0x173   :  { %3216 = vlog2.f32 %v9257_v50  ;;  %9258 = vst [vmem:[#allocation54_spill] sm:$0xff] %v5870_v31  ;;  %v5872_v1 = vld [vmem:[#allocation5 + $0x470] sm:$0xff]  ;;  %9261 = vst [vmem:[#allocation43_spill] sm:$0xff] %v5877_v29  ;;  %v5879_v34 = vld [vmem:[#allocation5 + $0x478] sm:$0xff]  ;;  %v1114_v32 = vmul.f32 0.6931472, %v3191_v26  ;;  %v1329_v48 = vadd.f32 %v1328_v2, %v1110_v38 }
 0x174   :  { %9259 = vst [vmem:[#allocation55_spill] sm:$0xff] %v5872_v1  ;;  %3218 = vlog2.f32 %v9260_v45  ;;  %9262 = vst [vmem:[#allocation56_spill] sm:$0xff] %v5879_v34  ;;  %v3195_v6 = vpop.eup %3194  ;;  %v9263_v50 = vld [vmem:[#allocation47_spill] sm:$0xff]  ;;  %v5884_v0 = vld [vmem:[#allocation2 + $0x480] sm:$0xff]  ;;  %v1116_v22 = vmul.f32 0.6931472, %v3193_v44  ;;  %v1360_v1 = vadd.f32 %v1359_v21, %v1112_v3 }
 0x175   :  { %3220 = vlog2.f32 %v9263_v50  ;;  %9264 = vst [vmem:[#allocation59_spill] sm:$0xff] %v5884_v0  ;;  %v5886_v23 = vld [vmem:[#allocation5 + $0x480] sm:$0xff]  ;;  %v3197_v8 = vpop.eup %3196  ;;  %v9266_v45 = vld [vmem:[#allocation123_spill] sm:$0xff]  ;;  %v9268_v50 = vld [vmem:[#allocation136_spill] sm:$0xff]  ;;  %v1118_v46 = vmul.f32 0.6931472, %v3195_v6  ;;  %v1391_v34 = vadd.f32 %v1390_v53, %v1114_v32 }
 0x176   :  { %9265 = vst [vmem:[#allocation60_spill] sm:$0xff] %v5886_v23  ;;  %3222 = vlog2.f32 %v9266_v45  ;;  %v5891_v39 = vld [vmem:[#allocation2 + $0x488] sm:$0xff]  ;;  %v3199_v9 = vpop.eup %3198  ;;  %v5898_v27 = vld [vmem:[#allocation2 + $0x490] sm:$0xff]  ;;  %v5905_v12 = vld [vmem:[#allocation2 + $0x498] sm:$0xff]  ;;  %v1120_v42 = vmul.f32 0.6931472, %v3197_v8  ;;  %v1422_v23 = vadd.f32 %v1421_v4, %v1116_v22 }
 0x177   :  { %v5893_v41 = vld [vmem:[#allocation5 + $0x488] sm:$0xff]  ;;  %3224 = vlog2.f32 %v9268_v50  ;;  %v5900_v25 = vld [vmem:[#allocation5 + $0x490] sm:$0xff]  ;;  %v3201_v33 = vpop.eup %3200  ;;  %v5907_v37 = vld [vmem:[#allocation5 + $0x498] sm:$0xff]  ;;  %v1122_v38 = vmul.f32 0.6931472, %v3199_v9 }
 0x178   :  { %9267 = vst [vmem:[#allocation48_spill] sm:$0xff] %v5893_v41  ;;  %9269 = vst [vmem:[#allocation61_spill] sm:$0xff] %v5900_v25  ;;  %v9270_v45 = vld [vmem:[#allocation139_spill] sm:$0xff]  ;;  %v3203_v15 = vpop.eup %3202  ;;  %v9272_v50 = vld [vmem:[#allocation22_spill] sm:$0xff]  ;;  %v1124_v3 = vmul.f32 0.6931472, %v3201_v33 }
 0x179   :  { %3226 = vlog2.f32 %v9270_v45  ;;  %9271 = vst [vmem:[#allocation64_spill] sm:$0xff] %v5907_v37  ;;  %v5912_v31 = vld [vmem:[#allocation2 + $0x4a0] sm:$0xff]  ;;  %v3205_v2 = vpop.eup %3204  ;;  %v9275_v45 = vld [vmem:[#allocation140_spill] sm:$0xff]  ;;  %v5919_v29 = vld [vmem:[#allocation2 + $0x4a8] sm:$0xff]  ;;  %v1126_v32 = vmul.f32 0.6931472, %v3203_v15  ;;  %v1392_v15 = vadd.f32 %v1391_v34, %v1122_v38 }
 0x17a   :  { %3228 = vlog2.f32 %v9272_v50  ;;  %9273 = vst [vmem:[#allocation65_spill] sm:$0xff] %v5912_v31  ;;  %v5914_v26 = vld [vmem:[#allocation5 + $0x4a0] sm:$0xff]  ;;  %9276 = vst [vmem:[#allocation66_spill] sm:$0xff] %v5919_v29  ;;  %v5921_v44 = vld [vmem:[#allocation5 + $0x4a8] sm:$0xff]  ;;  %v3207_v21 = vpop.eup %3206  ;;  %v1128_v22 = vmul.f32 0.6931472, %v3205_v2 }
 0x17b   :  { %9274 = vst [vmem:[#allocation53_spill] sm:$0xff] %v5914_v26  ;;  %3230 = vlog2.f32 %v9275_v45  ;;  %9277 = vst [vmem:[#allocation71_spill] sm:$0xff] %v5921_v44  ;;  %v9278_v50 = vld [vmem:[#allocation52_spill] sm:$0xff]  ;;  %v1330_v45 = vadd.f32 %v1329_v48, %v1118_v46  ;;  %v5933_v41 = vld [vmem:[#allocation2 + $0x4b8] sm:$0xff]  ;;  %v1130_v46 = vmul.f32 0.6931472, %v3207_v21  ;;  %v1423_v26 = vadd.f32 %v1422_v23, %v1124_v3 }
 0x17c   :  { %3232 = vlog2.f32 %v9278_v50  ;;  %v5926_v0 = vld [vmem:[#allocation2 + $0x4b0] sm:$0xff]  ;;  %v3209_v53 = vpop.eup %3208  ;;  %9281 = vst [vmem:[#allocation73_spill] sm:$0xff] %v5933_v41  ;;  %v5935_v8 = vld [vmem:[#allocation5 + $0x4b8] sm:$0xff]  ;;  %v1361_v50 = vadd.f32 %v1360_v1, %v1120_v42  ;;  %v5940_v25 = vld [vmem:[#allocation2 + $0x4c0] sm:$0xff] }
 0x17d   :  { %9279 = vst [vmem:[#allocation72_spill] sm:$0xff] %v5926_v0  ;;  %v5928_v6 = vld [vmem:[#allocation5 + $0x4b0] sm:$0xff]  ;;  %3234 = vlog2.f32 %v5532_v47  ;;  %9282 = vst [vmem:[#allocation77_spill] sm:$0xff] %v5935_v8  ;;  %v3211_v4 = vpop.eup %3210  ;;  %v5942_v9 = vld [vmem:[#allocation5 + $0x4c0] sm:$0xff]  ;;  %v1132_v42 = vmul.f32 0.6931472, %v3209_v53  ;;  %v1331_v44 = vadd.f32 %v1330_v45, %v1126_v32  ;;  %v1393_v8 = vadd.f32 %v1392_v15, %v1130_v46 }
 0x17e   :  { %9280 = vst [vmem:[#allocation58_spill] sm:$0xff] %v5928_v6  ;;  %3236 = vlog2.f32 %v5536_v17  ;;  %9283 = vst [vmem:[#allocation78_spill] sm:$0xff] %v5940_v25  ;;  %v3213_v48 = vpop.eup %3212  ;;  %v5947_v37 = vld [vmem:[#allocation2 + $0x4c8] sm:$0xff]  ;;  %v5954_v31 = vld [vmem:[#allocation2 + $0x4d0] sm:$0xff]  ;;  %v1134_v38 = vmul.f32 0.6931472, %v3211_v4  ;;  %v1362_v6 = vadd.f32 %v1361_v50, %v1128_v22 }
 0x17f   :  { %9284 = vst [vmem:[#allocation63_spill] sm:$0xff] %v5942_v9  ;;  %3238 = vlog2.f32 %v5539_v56  ;;  %9285 = vst [vmem:[#allocation79_spill] sm:$0xff] %v5947_v37  ;;  %v5949_v33 = vld [vmem:[#allocation5 + $0x4c8] sm:$0xff]  ;;  %v3215_v1 = vpop.eup %3214  ;;  %v5956_v47 = vld [vmem:[#allocation5 + $0x4d0] sm:$0xff]  ;;  %v1136_v3 = vmul.f32 0.6931472, %v3213_v48  ;;  %v1424_v9 = vadd.f32 %v1423_v26, %v1132_v42 }
 0x180   :  { %9286 = vst [vmem:[#allocation68_spill] sm:$0xff] %v5949_v33  ;;  %v9287_v2 = vld [vmem:[#allocation127_spill] sm:$0xff]  ;;  %9288 = vst [vmem:[#allocation84_spill] sm:$0xff] %v5954_v31  ;;  %v3217_v34 = vpop.eup %3216  ;;  %v9290_v21 = vld [vmem:[#allocation141_spill] sm:$0xff]  ;;  %v1138_v45 = vmul.f32 0.6931472, %v3215_v1  ;;  %v1332_v33 = vadd.f32 %v1331_v44, %v1134_v38 }
 0x181   :  { %3240 = vlog2.f32 %v9287_v2  ;;  %9289 = vst [vmem:[#allocation69_spill] sm:$0xff] %v5956_v47  ;;  %v5961_v29 = vld [vmem:[#allocation2 + $0x4d8] sm:$0xff]  ;;  %v3219_v23 = vpop.eup %3218  ;;  %v9293_v2 = vld [vmem:[#allocation143_spill] sm:$0xff]  ;;  %v5968_v0 = vld [vmem:[#allocation2 + $0x4e0] sm:$0xff]  ;;  %v1140_v50 = vmul.f32 0.6931472, %v3217_v34  ;;  %v1363_v47 = vadd.f32 %v1362_v6, %v1136_v3 }
 0x182   :  { %3242 = vlog2.f32 %v9290_v21  ;;  %9291 = vst [vmem:[#allocation85_spill] sm:$0xff] %v5961_v29  ;;  %v5963_v17 = vld [vmem:[#allocation5 + $0x4d8] sm:$0xff]  ;;  %9294 = vst [vmem:[#allocation86_spill] sm:$0xff] %v5968_v0  ;;  %v5970_v56 = vld [vmem:[#allocation5 + $0x4e0] sm:$0xff]  ;;  %v3221_v32 = vpop.eup %3220  ;;  %v1142_v15 = vmul.f32 0.6931472, %v3219_v23 }
 0x183   :  { %9292 = vst [vmem:[#allocation70_spill] sm:$0xff] %v5963_v17  ;;  %3244 = vlog2.f32 %v9293_v2  ;;  %9295 = vst [vmem:[#allocation91_spill] sm:$0xff] %v5970_v56  ;;  %v9296_v21 = vld [vmem:[#allocation132_spill] sm:$0xff]  ;;  %v5975_v41 = vld [vmem:[#allocation2 + $0x4e8] sm:$0xff]  ;;  %v3223_v22 = vpop.eup %3222  ;;  %v1144_v42 = vmul.f32 0.6931472, %v3221_v32  ;;  %v1394_v17 = vadd.f32 %v1393_v8, %v1138_v45  ;;  %v1425_v56 = vadd.f32 %v1424_v9, %v1140_v50 }
 0x184   :  { %3246 = vlog2.f32 %v9296_v21  ;;  %9297 = vst [vmem:[#allocation75_spill] sm:$0xff] %v5975_v41  ;;  %v5977_v53 = vld [vmem:[#allocation5 + $0x4e8] sm:$0xff]  ;;  %v9299_v2 = vld [vmem:[#allocation144_spill] sm:$0xff]  ;;  %v3225_v46 = vpop.eup %3224  ;;  %v9302_v21 = vld [vmem:[#allocation57_spill] sm:$0xff]  ;;  %v1146_v38 = vmul.f32 0.6931472, %v3223_v22 }
 0x185   :  { %9298 = vst [vmem:[#allocation92_spill] sm:$0xff] %v5977_v53  ;;  %3248 = vlog2.f32 %v9299_v2  ;;  %v5982_v25 = vld [vmem:[#allocation2 + $0x4f0] sm:$0xff]  ;;  %v5989_v37 = vld [vmem:[#allocation2 + $0x4f8] sm:$0xff]  ;;  %v5996_v31 = vld [vmem:[#allocation2 + $0x500] sm:$0xff]  ;;  %v1148_v3 = vmul.f32 0.6931472, %v3225_v46  ;;  %v1333_v53 = vadd.f32 %v1332_v33, %v1142_v15 }
 0x186   :  { %9300 = vst [vmem:[#allocation76_spill] sm:$0xff] %v5982_v25  ;;  %v5984_v4 = vld [vmem:[#allocation5 + $0x4f0] sm:$0xff]  ;;  %3250 = vlog2.f32 %v9302_v21  ;;  %9303 = vst [vmem:[#allocation81_spill] sm:$0xff] %v5989_v37  ;;  %v5991_v48 = vld [vmem:[#allocation5 + $0x4f8] sm:$0xff]  ;;  %v3227_v26 = vpop.eup %3226 }
 0x187   :  { %9301 = vst [vmem:[#allocation93_spill] sm:$0xff] %v5984_v4  ;;  %9304 = vst [vmem:[#allocation96_spill] sm:$0xff] %v5991_v48  ;;  %v9305_v2 = vld [vmem:[#allocation133_spill] sm:$0xff]  ;;  %v5998_v1 = vld [vmem:[#allocation5 + $0x500] sm:$0xff]  ;;  %v3229_v44 = vpop.eup %3228  ;;  %v1150_v45 = vmul.f32 0.6931472, %v3227_v26  ;;  %v1364_v4 = vadd.f32 %v1363_v47, %v1144_v42  ;;  %v1395_v48 = vadd.f32 %v1394_v17, %v1146_v38 }
 0x188   :  { %3252 = vlog2.f32 %v9305_v2  ;;  %9306 = vst [vmem:[#allocation82_spill] sm:$0xff] %v5996_v31  ;;  %9307 = vst [vmem:[#allocation97_spill] sm:$0xff] %v5998_v1  ;;  %v9308_v21 = vld [vmem:[#allocation145_spill] sm:$0xff]  ;;  %v6003_v29 = vld [vmem:[#allocation2 + $0x508] sm:$0xff]  ;;  %v3231_v6 = vpop.eup %3230  ;;  %v1152_v50 = vmul.f32 0.6931472, %v3229_v44  ;;  %v1426_v1 = vadd.f32 %v1425_v56, %v1148_v3 }
 0x189   :  { %3254 = vlog2.f32 %v9308_v21  ;;  %9309 = vst [vmem:[#allocation14_spill] sm:$0xff] %v6003_v29  ;;  %v6005_v34 = vld [vmem:[#allocation5 + $0x508] sm:$0xff]  ;;  %v9311_v2 = vld [vmem:[#allocation25_spill] sm:$0xff]  ;;  %v6010_v0 = vld [vmem:[#allocation2 + $0x510] sm:$0xff]  ;;  %v3233_v8 = vpop.eup %3232  ;;  %v1154_v15 = vmul.f32 0.6931472, %v3231_v6 }
 0x18a   :  { %9310 = vst [vmem:[#allocation83_spill] sm:$0xff] %v6005_v34  ;;  %3256 = vlog2.f32 %v9311_v2  ;;  %9312 = vst [vmem:[#allocation98_spill] sm:$0xff] %v6010_v0  ;;  %v6012_v23 = vld [vmem:[#allocation5 + $0x510] sm:$0xff]  ;;  %v6017_v41 = vld [vmem:[#allocation2 + $0x518] sm:$0xff]  ;;  %v3235_v9 = vpop.eup %3234  ;;  %v1156_v42 = vmul.f32 0.6931472, %v3233_v8  ;;  %v1334_v34 = vadd.f32 %v1333_v53, %v1150_v45 }
 0x18b   :  { %9313 = vst [vmem:[#allocation88_spill] sm:$0xff] %v6012_v23  ;;  %v9314_v21 = vld [vmem:[#allocation148_spill] sm:$0xff]  ;;  %9315 = vst [vmem:[#allocation103_spill] sm:$0xff] %v6017_v41  ;;  %v6019_v32 = vld [vmem:[#allocation5 + $0x518] sm:$0xff]  ;;  %v3237_v33 = vpop.eup %3236  ;;  %v1158_v38 = vmul.f32 0.6931472, %v3235_v9  ;;  %v1365_v23 = vadd.f32 %v1364_v4, %v1152_v50 }
 0x18c   :  { %3258 = vlog2.f32 %v9314_v21  ;;  %9316 = vst [vmem:[#allocation89_spill] sm:$0xff] %v6019_v32  ;;  %v9317_v2 = vld [vmem:[#allocation137_spill] sm:$0xff]  ;;  %v6024_v25 = vld [vmem:[#allocation2 + $0x520] sm:$0xff]  ;;  %v6031_v37 = vld [vmem:[#allocation2 + $0x528] sm:$0xff]  ;;  %v3239_v47 = vpop.eup %3238  ;;  %v1160_v3 = vmul.f32 0.6931472, %v3237_v33  ;;  %v1396_v32 = vadd.f32 %v1395_v48, %v1154_v15 }
 0x18d   :  { %3260 = vlog2.f32 %v9317_v2  ;;  %9318 = vst [vmem:[#allocation104_spill] sm:$0xff] %v6024_v25  ;;  %v6026_v22 = vld [vmem:[#allocation5 + $0x520] sm:$0xff]  ;;  %v9320_v21 = vld [vmem:[#allocation149_spill] sm:$0xff]  ;;  %9321 = vst [vmem:[#allocation90_spill] sm:$0xff] %v6031_v37  ;;  %v1162_v45 = vmul.f32 0.6931472, %v3239_v47 }
 0x18e   :  { %9319 = vst [vmem:[#allocation18_spill] sm:$0xff] %v6026_v22  ;;  %3262 = vlog2.f32 %v9320_v21  ;;  %v6033_v46 = vld [vmem:[#allocation5 + $0x528] sm:$0xff]  ;;  %v9323_v2 = vld [vmem:[#allocation62_spill] sm:$0xff]  ;;  %v6038_v31 = vld [vmem:[#allocation2 + $0x530] sm:$0xff]  ;;  %v3241_v17 = vpop.eup %3240  ;;  %v1427_v22 = vadd.f32 %v1426_v1, %v1156_v42 }
 0x18f   :  { %9322 = vst [vmem:[#allocation105_spill] sm:$0xff] %v6033_v46  ;;  %3264 = vlog2.f32 %v9323_v2  ;;  %9324 = vst [vmem:[#allocation110_spill] sm:$0xff] %v6038_v31  ;;  %v6040_v26 = vld [vmem:[#allocation5 + $0x530] sm:$0xff]  ;;  %v9326_v21 = vld [vmem:[#allocation138_spill] sm:$0xff]  ;;  %v3243_v56 = vpop.eup %3242  ;;  %v1164_v50 = vmul.f32 0.6931472, %v3241_v17  ;;  %v1335_v46 = vadd.f32 %v1334_v34, %v1158_v38 }
 0x190   :  { %9325 = vst [vmem:[#allocation111_spill] sm:$0xff] %v6040_v26  ;;  %3266 = vlog2.f32 %v9326_v21  ;;  %v6045_v29 = vld [vmem:[#allocation2 + $0x538] sm:$0xff]  ;;  %v9329_v2 = vld [vmem:[#allocation150_spill] sm:$0xff]  ;;  %v3245_v53 = vpop.eup %3244  ;;  %v6059_v41 = vld [vmem:[#allocation2 + $0x548] sm:$0xff]  ;;  %v1166_v15 = vmul.f32 0.6931472, %v3243_v56  ;;  %v1366_v26 = vadd.f32 %v1365_v23, %v1160_v3 }
 0x191   :  { %9327 = vst [vmem:[#allocation23_spill] sm:$0xff] %v6045_v29  ;;  %v6047_v44 = vld [vmem:[#allocation5 + $0x538] sm:$0xff]  ;;  %3268 = vlog2.f32 %v9329_v2  ;;  %v6052_v0 = vld [vmem:[#allocation2 + $0x540] sm:$0xff]  ;;  %9333 = vst [vmem:[#allocation114_spill] sm:$0xff] %v6059_v41  ;;  %v3247_v4 = vpop.eup %3246  ;;  %v1168_v42 = vmul.f32 0.6931472, %v3245_v53 }
 0x192   :  { %9328 = vst [vmem:[#allocation95_spill] sm:$0xff] %v6047_v44  ;;  %9330 = vst [vmem:[#allocation112_spill] sm:$0xff] %v6052_v0  ;;  %v6054_v6 = vld [vmem:[#allocation5 + $0x540] sm:$0xff]  ;;  %v6061_v8 = vld [vmem:[#allocation5 + $0x548] sm:$0xff]  ;;  %v3249_v48 = vpop.eup %3248  ;;  %v1170_v38 = vmul.f32 0.6931472, %v3247_v4  ;;  %v1397_v44 = vadd.f32 %v1396_v32, %v1162_v45 }
 0x193   :  { %9331 = vst [vmem:[#allocation100_spill] sm:$0xff] %v6054_v6  ;;  %v9332_v21 = vld [vmem:[#allocation154_spill] sm:$0xff]  ;;  %9334 = vst [vmem:[#allocation101_spill] sm:$0xff] %v6061_v8  ;;  %v6066_v25 = vld [vmem:[#allocation2 + $0x550] sm:$0xff]  ;;  %v3251_v1 = vpop.eup %3250  ;;  %v1172_v3 = vmul.f32 0.6931472, %v3249_v48  ;;  %v1428_v6 = vadd.f32 %v1427_v22, %v1164_v50  ;;  %v1336_v8 = vadd.f32 %v1335_v46, %v1166_v15 }
 0x194   :  { %3270 = vlog2.f32 %v9332_v21  ;;  %v9335_v2 = vld [vmem:[#allocation26_spill] sm:$0xff]  ;;  %v6068_v9 = vld [vmem:[#allocation5 + $0x550] sm:$0xff]  ;;  %v9337_v21 = vld [vmem:[#allocation155_spill] sm:$0xff]  ;;  %v1174_v45 = vmul.f32 0.6931472, %v3251_v1 }
 0x195   :  { %3272 = vlog2.f32 %v9335_v2  ;;  %9336 = vst [vmem:[#allocation115_spill] sm:$0xff] %v6068_v9  ;;  %v6073_v37 = vld [vmem:[#allocation2 + $0x558] sm:$0xff]  ;;  %v9339_v2 = vld [vmem:[#allocation67_spill] sm:$0xff]  ;;  %v6080_v31 = vld [vmem:[#allocation2 + $0x560] sm:$0xff]  ;;  %v3253_v34 = vpop.eup %3252 }
 0x196   :  { %3274 = vlog2.f32 %v9337_v21  ;;  %v6075_v33 = vld [vmem:[#allocation5 + $0x558] sm:$0xff]  ;;  %v6082_v47 = vld [vmem:[#allocation5 + $0x560] sm:$0xff]  ;;  %v6087_v29 = vld [vmem:[#allocation2 + $0x568] sm:$0xff]  ;;  %v3255_v23 = vpop.eup %3254  ;;  %v1176_v50 = vmul.f32 0.6931472, %v3253_v34  ;;  %v1429_v34 = vadd.f32 %v1428_v6, %v1172_v3 }
 0x197   :  { %9338 = vst [vmem:[#allocation27_spill] sm:$0xff] %v6075_v33  ;;  %3276 = vlog2.f32 %v9339_v2  ;;  %9340 = vst [vmem:[#allocation102_spill] sm:$0xff] %v6082_v47  ;;  %v9341_v21 = vld [vmem:[#allocation142_spill] sm:$0xff]  ;;  %v6089_v17 = vld [vmem:[#allocation5 + $0x568] sm:$0xff]  ;;  %v3257_v32 = vpop.eup %3256  ;;  %v1178_v15 = vmul.f32 0.6931472, %v3255_v23 }
 0x198   :  { %3278 = vlog2.f32 %v9341_v21  ;;  %9342 = vst [vmem:[#allocation116_spill] sm:$0xff] %v6087_v29  ;;  %9343 = vst [vmem:[#allocation107_spill] sm:$0xff] %v6089_v17  ;;  %v9344_v2 = vld [vmem:[#allocation156_spill] sm:$0xff]  ;;  %v9347_v21 = vld [vmem:[#allocation158_spill] sm:$0xff]  ;;  %v1337_v17 = vadd.f32 %v1336_v8, %v1174_v45 }
 0x199   :  { %3280 = vlog2.f32 %v9344_v2  ;;  %v6094_v0 = vld [vmem:[#allocation2 + $0x570] sm:$0xff]  ;;  %v6101_v41 = vld [vmem:[#allocation2 + $0x578] sm:$0xff]  ;;  %v3259_v22 = vpop.eup %3258  ;;  %v1367_v2 = vadd.f32 %v1366_v26, %v1168_v42  ;;  %v6108_v9 = vld [vmem:[#allocation2 + $0x580] sm:$0xff]  ;;  %v1180_v42 = vmul.f32 0.6931472, %v3257_v32 }
 0x19a   :  { %9345 = vst [vmem:[#allocation119_spill] sm:$0xff] %v6094_v0  ;;  %v6096_v56 = vld [vmem:[#allocation5 + $0x570] sm:$0xff]  ;;  %3282 = vlog2.f32 %v9347_v21  ;;  %9348 = vst [vmem:[#allocation120_spill] sm:$0xff] %v6101_v41  ;;  %v6103_v53 = vld [vmem:[#allocation5 + $0x578] sm:$0xff]  ;;  %v3261_v46 = vpop.eup %3260  ;;  %v1398_v21 = vadd.f32 %v1397_v44, %v1170_v38  ;;  %v1182_v38 = vmul.f32 0.6931472, %v3259_v22 }
 0x19b   :  { %9346 = vst [vmem:[#allocation108_spill] sm:$0xff] %v6096_v56  ;;  %9349 = vst [vmem:[#allocation32_spill] sm:$0xff] %v6103_v53  ;;  %3284 = vlog2.f32 %v5608_v24  ;;  %v6110_v4 = vld [vmem:[#allocation5 + $0x580] sm:$0xff]  ;;  %v6115_v33 = vld [vmem:[#allocation2 + $0x588] sm:$0xff]  ;;  %v3263_v26 = vpop.eup %3262  ;;  %v1184_v3 = vmul.f32 0.6931472, %v3261_v46  ;;  %v1368_v56 = vadd.f32 %v1367_v2, %v1176_v50 }
 0x19c   :  { %9350 = vst [vmem:[#allocation109_spill] sm:$0xff] %v6110_v4  ;;  %3286 = vlog2.f32 %v5611_v11  ;;  %9351 = vst [vmem:[#allocation121_spill] sm:$0xff] %v6115_v33  ;;  %v6117_v48 = vld [vmem:[#allocation5 + $0x588] sm:$0xff]  ;;  %v6122_v47 = vld [vmem:[#allocation2 + $0x590] sm:$0xff]  ;;  %v3265_v44 = vpop.eup %3264  ;;  %v1186_v45 = vmul.f32 0.6931472, %v3263_v26  ;;  %v1399_v53 = vadd.f32 %v1398_v21, %v1178_v15 }
 0x19d   :  { %9352 = vst [vmem:[#allocation124_spill] sm:$0xff] %v6117_v48  ;;  %3288 = vlog2.f32 %v5614_v57  ;;  %9353 = vst [vmem:[#allocation17_spill] sm:$0xff] %v6122_v47  ;;  %v6124_v1 = vld [vmem:[#allocation5 + $0x590] sm:$0xff]  ;;  %v9355_v23 = vld [vmem:[#allocation146_spill] sm:$0xff]  ;;  %v3267_v6 = vpop.eup %3266  ;;  %v1188_v2 = vmul.f32 0.6931472, %v3265_v44  ;;  %v1338_v48 = vadd.f32 %v1337_v17, %v1182_v38 }
 0x19e   :  { %9354 = vst [vmem:[#allocation125_spill] sm:$0xff] %v6124_v1  ;;  %3290 = vlog2.f32 %v9355_v23  ;;  %v6129_v29 = vld [vmem:[#allocation2 + $0x598] sm:$0xff]  ;;  %v9357_v32 = vld [vmem:[#allocation159_spill] sm:$0xff]  ;;  %v6136_v0 = vld [vmem:[#allocation2 + $0x5a0] sm:$0xff]  ;;  %v3269_v8 = vpop.eup %3268  ;;  %v1190_v21 = vmul.f32 0.6931472, %v3267_v6  ;;  %v1369_v1 = vadd.f32 %v1368_v56, %v1184_v3 }
 0x19f   :  { %v6131_v24 = vld [vmem:[#allocation5 + $0x598] sm:$0xff]  ;;  %3292 = vlog2.f32 %v9357_v32  ;;  %v6138_v11 = vld [vmem:[#allocation5 + $0x5a0] sm:$0xff]  ;;  %v6143_v41 = vld [vmem:[#allocation2 + $0x5a8] sm:$0xff]  ;;  %v1430_v32 = vadd.f32 %v1429_v34, %v1180_v42  ;;  %v1192_v34 = vmul.f32 0.6931472, %v3269_v8 }
 0x1a0   :  { %9356 = vst [vmem:[#allocation37_spill] sm:$0xff] %v6131_v24  ;;  %9358 = vst [vmem:[#allocation113_spill] sm:$0xff] %v6138_v11  ;;  %v9359_v23 = vld [vmem:[#allocation74_spill] sm:$0xff]  ;;  %v6145_v57 = vld [vmem:[#allocation5 + $0x5a8] sm:$0xff] }
 0x1a1   :  { %3294 = vlog2.f32 %v9359_v23  ;;  %9360 = vst [vmem:[#allocation126_spill] sm:$0xff] %v6145_v57  ;;  %v3271_v50 = vpop.eup %3270  ;;  %v6150_v4 = vld [vmem:[#allocation2 + $0x5b0] sm:$0xff]  ;;  %v9362_v23 = vld [vmem:[#allocation147_spill] sm:$0xff]  ;;  %v6157_v33 = vld [vmem:[#allocation2 + $0x5b8] sm:$0xff] }
 0x1a2   :  { %3296 = vlog2.f32 %v5624_v40  ;;  %v6152_v22 = vld [vmem:[#allocation5 + $0x5b0] sm:$0xff]  ;;  %v3273_v15 = vpop.eup %3272  ;;  %v6159_v46 = vld [vmem:[#allocation5 + $0x5b8] sm:$0xff]  ;;  %v6164_v47 = vld [vmem:[#allocation2 + $0x5c0] sm:$0xff]  ;;  %v1194_v38 = vmul.f32 0.6931472, %v3271_v50  ;;  %v1339_v50 = vadd.f32 %v1338_v48, %v1190_v21 }
 0x1a3   :  { %9361 = vst [vmem:[#allocation128_spill] sm:$0xff] %v6152_v22  ;;  %3298 = vlog2.f32 %v9362_v23  ;;  %9363 = vst [vmem:[#allocation117_spill] sm:$0xff] %v6159_v46  ;;  %v3275_v42 = vpop.eup %3274  ;;  %v9364_v44 = vld [vmem:[#allocation160_spill] sm:$0xff]  ;;  %v6166_v26 = vld [vmem:[#allocation5 + $0x5c0] sm:$0xff]  ;;  %v1400_v23 = vadd.f32 %v1399_v53, %v1186_v45  ;;  %v1196_v3 = vmul.f32 0.6931472, %v3273_v15  ;;  %v1370_v15 = vadd.f32 %v1369_v1, %v1192_v34 }
 0x1a4   :  { %3300 = vlog2.f32 %v9364_v44  ;;  %9365 = vst [vmem:[#allocation129_spill] sm:$0xff] %v6166_v26  ;;  %v3277_v17 = vpop.eup %3276  ;;  %v6171_v24 = vld [vmem:[#allocation2 + $0x5c8] sm:$0xff]  ;;  %v1431_v44 = vadd.f32 %v1430_v32, %v1188_v2  ;;  %v6178_v11 = vld [vmem:[#allocation2 + $0x5d0] sm:$0xff]  ;;  %v1198_v45 = vmul.f32 0.6931472, %v3275_v42  ;;  %v6185_v57 = vld [vmem:[#allocation2 + $0x5d8] sm:$0xff] }
 0x1a5   :  { %3302 = vlog2.f32 %v5633_v16  ;;  %v6173_v40 = vld [vmem:[#allocation5 + $0x5c8] sm:$0xff]  ;;  %v3279_v56 = vpop.eup %3278  ;;  %v6180_v6 = vld [vmem:[#allocation5 + $0x5d0] sm:$0xff]  ;;  %v6187_v8 = vld [vmem:[#allocation5 + $0x5d8] sm:$0xff]  ;;  %v1200_v32 = vmul.f32 0.6931472, %v3277_v17  ;;  %v1401_v42 = vadd.f32 %v1400_v23, %v1194_v38 }
 0x1a6   :  { %9366 = vst [vmem:[#allocation42_spill] sm:$0xff] %v6173_v40  ;;  %3304 = vlog2.f32 %v5637_v36  ;;  %9367 = vst [vmem:[#allocation118_spill] sm:$0xff] %v6180_v6  ;;  %v3281_v53 = vpop.eup %3280  ;;  %v6192_v22 = vld [vmem:[#allocation2 + $0x5e0] sm:$0xff]  ;;  %v1202_v21 = vmul.f32 0.6931472, %v3279_v56  ;;  %v6199_v46 = vld [vmem:[#allocation2 + $0x5e8] sm:$0xff]  ;;  %v1432_v17 = vadd.f32 %v1431_v44, %v1196_v3  ;;  %v1340_v56 = vadd.f32 %v1339_v50, %v1198_v45 }
 0x1a7   :  { %3306 = vlog2.f32 %v5640_v63  ;;  %9368 = vst [vmem:[#allocation130_spill] sm:$0xff] %v6187_v8  ;;  %v3283_v2 = vpop.eup %3282  ;;  %v6194_v16 = vld [vmem:[#allocation5 + $0x5e0] sm:$0xff]  ;;  %v6201_v36 = vld [vmem:[#allocation5 + $0x5e8] sm:$0xff]  ;;  %v1204_v34 = vmul.f32 0.6931472, %v3281_v53  ;;  %v6206_v26 = vld [vmem:[#allocation2 + $0x5f0] sm:$0xff]  ;;  %v1371_v53 = vadd.f32 %v1370_v15, %v1200_v32 }
 0x1a8   :  { %3308 = vlog2.f32 %v5644_v14  ;;  %9369 = vst [vmem:[#allocation21_spill] sm:$0xff] %v6194_v16  ;;  %v3285_v48 = vpop.eup %3284  ;;  %9370 = vst [vmem:[#allocation134_spill] sm:$0xff] %v6201_v36  ;;  %v6208_v63 = vld [vmem:[#allocation5 + $0x5f0] sm:$0xff]  ;;  %v1206_v23 = vmul.f32 0.6931472, %v3283_v2  ;;  %v6213_v40 = vld [vmem:[#allocation2 + $0x5f8] sm:$0xff]  ;;  %v1402_v2 = vadd.f32 %v1401_v42, %v1202_v21 }
 0x1a9   :  { %3310 = vlog2.f32 %v5647_v55  ;;  %v3287_v1 = vpop.eup %3286  ;;  %9371 = vst [vmem:[#allocation122_spill] sm:$0xff] %v6208_v63  ;;  %v6215_v14 = vld [vmem:[#allocation5 + $0x5f8] sm:$0xff]  ;;  %v1208_v44 = vmul.f32 0.6931472, %v3285_v48  ;;  %v6220_v6 = vld [vmem:[#allocation2 + $0x600] sm:$0xff]  ;;  %v6227_v8 = vld [vmem:[#allocation2 + $0x608] sm:$0xff]  ;;  %v1433_v48 = vadd.f32 %v1432_v17, %v1204_v34 }
 0x1aa   :  { %3312 = vlog2.f32 %v5650_v62  ;;  %v3289_v38 = vpop.eup %3288  ;;  %9372 = vst [vmem:[#allocation135_spill] sm:$0xff] %v6215_v14  ;;  %v6222_v55 = vld [vmem:[#allocation5 + $0x600] sm:$0xff]  ;;  %v1210_v50 = vmul.f32 0.6931472, %v3287_v1  ;;  %9374 = vst [vmem:[#allocation123_spill] sm:$0xff] %v6227_v8  ;;  %v6229_v62 = vld [vmem:[#allocation5 + $0x608] sm:$0xff]  ;;  %v1341_v1 = vadd.f32 %v1340_v56, %v1206_v23 }
 0x1ab   :  { %3314 = vlog2.f32 %v5652_v35  ;;  %v3291_v3 = vpop.eup %3290  ;;  %9373 = vst [vmem:[#allocation47_spill] sm:$0xff] %v6222_v55  ;;  %9375 = vst [vmem:[#allocation136_spill] sm:$0xff] %v6229_v62  ;;  %v1212_v15 = vmul.f32 0.6931472, %v3289_v38  ;;  %v6234_v16 = vld [vmem:[#allocation2 + $0x610] sm:$0xff]  ;;  %v6241_v36 = vld [vmem:[#allocation2 + $0x618] sm:$0xff]  ;;  %v1372_v38 = vadd.f32 %v1371_v53, %v1208_v44 }
 0x1ac   :  { %3316 = vlog2.f32 %v5655_v43  ;;  %v3293_v45 = vpop.eup %3292  ;;  %9376 = vst [vmem:[#allocation139_spill] sm:$0xff] %v6234_v16  ;;  %v6236_v35 = vld [vmem:[#allocation5 + $0x610] sm:$0xff]  ;;  %v1214_v42 = vmul.f32 0.6931472, %v3291_v3  ;;  %9378 = vst [vmem:[#allocation140_spill] sm:$0xff] %v6241_v36  ;;  %v6243_v43 = vld [vmem:[#allocation5 + $0x618] sm:$0xff]  ;;  %v1403_v3 = vadd.f32 %v1402_v2, %v1210_v50 }
 0x1ad   :  { %3318 = vlog2.f32 %v5657_v7  ;;  %9377 = vst [vmem:[#allocation22_spill] sm:$0xff] %v6236_v35  ;;  %9379 = vst [vmem:[#allocation52_spill] sm:$0xff] %v6243_v43  ;;  %v1216_v17 = vmul.f32 0.6931472, %v3293_v45  ;;  %v6248_v63 = vld [vmem:[#allocation2 + $0x620] sm:$0xff]  ;;  %v6255_v14 = vld [vmem:[#allocation2 + $0x628] sm:$0xff]  ;;  %v1434_v45 = vadd.f32 %v1433_v48, %v1212_v15 }
 0x1ae   :  { %v3295_v32 = vpop.eup %3294  ;;  %3320 = vlog2.f32 %v5660_v30  ;;  %9380 = vst [vmem:[#allocation127_spill] sm:$0xff] %v6248_v63  ;;  %v6250_v7 = vld [vmem:[#allocation5 + $0x620] sm:$0xff]  ;;  %9382 = vst [vmem:[#allocation143_spill] sm:$0xff] %v6255_v14  ;;  %v6257_v30 = vld [vmem:[#allocation5 + $0x628] sm:$0xff] }
 0x1af   :  { %v3297_v21 = vpop.eup %3296  ;;  %3322 = vlog2.f32 %v5662_v54  ;;  %9381 = vst [vmem:[#allocation141_spill] sm:$0xff] %v6250_v7  ;;  %v1218_v56 = vmul.f32 0.6931472, %v3295_v32  ;;  %9383 = vst [vmem:[#allocation132_spill] sm:$0xff] %v6257_v30  ;;  %v6262_v55 = vld [vmem:[#allocation2 + $0x630] sm:$0xff]  ;;  %v1342_v32 = vadd.f32 %v1341_v1, %v1214_v42  ;;  %v6269_v62 = vld [vmem:[#allocation2 + $0x638] sm:$0xff] }
 0x1b0   :  { %v3299_v34 = vpop.eup %3298  ;;  %3324 = vlog2.f32 %v5665_v20  ;;  %v1220_v53 = vmul.f32 0.6931472, %v3297_v21  ;;  %9384 = vst [vmem:[#allocation144_spill] sm:$0xff] %v6262_v55  ;;  %v6264_v54 = vld [vmem:[#allocation5 + $0x630] sm:$0xff]  ;;  %9386 = vst [vmem:[#allocation133_spill] sm:$0xff] %v6269_v62  ;;  %v6271_v20 = vld [vmem:[#allocation5 + $0x638] sm:$0xff]  ;;  %v1373_v21 = vadd.f32 %v1372_v38, %v1216_v17 }
 0x1b1   :  { %v3301_v23 = vpop.eup %3300  ;;  %3326 = vlog2.f32 %v5669_v61  ;;  %9385 = vst [vmem:[#allocation57_spill] sm:$0xff] %v6264_v54  ;;  %v1222_v2 = vmul.f32 0.6931472, %v3299_v34  ;;  %9387 = vst [vmem:[#allocation145_spill] sm:$0xff] %v6271_v20  ;;  %v6276_v35 = vld [vmem:[#allocation2 + $0x640] sm:$0xff]  ;;  %v9390_v34 = vld [vmem:[#allocation151_spill] sm:$0xff]  ;;  %v1404_v43 = vadd.f32 %v1403_v3, %v1218_v56 }
 0x1b2   :  { %v3303_v44 = vpop.eup %3302  ;;  %3328 = vlog2.f32 %v5673_v10  ;;  %v1224_v48 = vmul.f32 0.6931472, %v3301_v23  ;;  %9388 = vst [vmem:[#allocation25_spill] sm:$0xff] %v6276_v35  ;;  %v6278_v61 = vld [vmem:[#allocation5 + $0x640] sm:$0xff]  ;;  %v6283_v36 = vld [vmem:[#allocation2 + $0x648] sm:$0xff]  ;;  %v1435_v7 = vadd.f32 %v1434_v45, %v1220_v53  ;;  %v6290_v63 = vld [vmem:[#allocation2 + $0x650] sm:$0xff] }
 0x1b3   :  { %v3305_v50 = vpop.eup %3304  ;;  %3330 = vlog2.f32 %v5676_v13  ;;  %9389 = vst [vmem:[#allocation148_spill] sm:$0xff] %v6278_v61  ;;  %v1226_v1 = vmul.f32 0.6931472, %v3303_v44  ;;  %9391 = vst [vmem:[#allocation137_spill] sm:$0xff] %v6283_v36  ;;  %v6285_v10 = vld [vmem:[#allocation5 + $0x648] sm:$0xff]  ;;  %v9393_v23 = vld [vmem:[#allocation162_spill] sm:$0xff]  ;;  %v1343_v30 = vadd.f32 %v1342_v32, %v1222_v2 }
 0x1b4   :  { %v3307_v15 = vpop.eup %3306  ;;  %3332 = vlog2.f32 %v5681_v18  ;;  %9392 = vst [vmem:[#allocation149_spill] sm:$0xff] %v6285_v10  ;;  %v1228_v38 = vmul.f32 0.6931472, %v3305_v50  ;;  %9394 = vst [vmem:[#allocation62_spill] sm:$0xff] %v6290_v63  ;;  %v6292_v13 = vld [vmem:[#allocation5 + $0x650] sm:$0xff]  ;;  %v6297_v14 = vld [vmem:[#allocation2 + $0x658] sm:$0xff]  ;;  %v1374_v54 = vadd.f32 %v1373_v21, %v1224_v48 }
 0x1b5   :  { %v3309_v42 = vpop.eup %3308  ;;  %3334 = vlog2.f32 %v9390_v34  ;;  %9395 = vst [vmem:[#allocation138_spill] sm:$0xff] %v6292_v13  ;;  %v1230_v3 = vmul.f32 0.6931472, %v3307_v15  ;;  %v9396_v34 = vld [vmem:[#allocation152_spill] sm:$0xff]  ;;  %9397 = vst [vmem:[#allocation150_spill] sm:$0xff] %v6297_v14  ;;  %v6299_v18 = vld [vmem:[#allocation5 + $0x658] sm:$0xff]  ;;  %v1405_v20 = vadd.f32 %v1404_v43, %v1226_v1 }
 0x1b6   :  { %v3311_v17 = vpop.eup %3310  ;;  %3336 = vlog2.f32 %v9393_v23  ;;  %9398 = vst [vmem:[#allocation154_spill] sm:$0xff] %v6299_v18  ;;  %v1232_v45 = vmul.f32 0.6931472, %v3309_v42  ;;  %v9399_v23 = vld [vmem:[#allocation163_spill] sm:$0xff]  ;;  %v6304_v55 = vld [vmem:[#allocation2 + $0x660] sm:$0xff]  ;;  %v1436_v61 = vadd.f32 %v1435_v7, %v1228_v38  ;;  %v6318_v35 = vld [vmem:[#allocation2 + $0x670] sm:$0xff] }
 0x1b7   :  { %v3313_v56 = vpop.eup %3312  ;;  %3338 = vlog2.f32 %v9396_v34  ;;  %9400 = vst [vmem:[#allocation26_spill] sm:$0xff] %v6304_v55  ;;  %v6306_v44 = vld [vmem:[#allocation5 + $0x660] sm:$0xff]  ;;  %v1234_v32 = vmul.f32 0.6931472, %v3311_v17  ;;  %v9402_v34 = vld [vmem:[#allocation80_spill] sm:$0xff]  ;;  %v6311_v62 = vld [vmem:[#allocation2 + $0x668] sm:$0xff]  ;;  %v1344_v10 = vadd.f32 %v1343_v30, %v1230_v3 }
 0x1b8   :  { %v3315_v53 = vpop.eup %3314  ;;  %3340 = vlog2.f32 %v9399_v23  ;;  %9401 = vst [vmem:[#allocation155_spill] sm:$0xff] %v6306_v44  ;;  %9403 = vst [vmem:[#allocation67_spill] sm:$0xff] %v6311_v62  ;;  %v6313_v50 = vld [vmem:[#allocation5 + $0x668] sm:$0xff]  ;;  %v1236_v21 = vmul.f32 0.6931472, %v3313_v56  ;;  %v9405_v23 = vld [vmem:[#allocation153_spill] sm:$0xff]  ;;  %v1375_v13 = vadd.f32 %v1374_v54, %v1232_v45 }
 0x1b9   :  { %v3317_v2 = vpop.eup %3316  ;;  %3342 = vlog2.f32 %v9402_v34  ;;  %9404 = vst [vmem:[#allocation142_spill] sm:$0xff] %v6313_v50  ;;  %9406 = vst [vmem:[#allocation156_spill] sm:$0xff] %v6318_v35  ;;  %v6320_v15 = vld [vmem:[#allocation5 + $0x670] sm:$0xff]  ;;  %v1238_v1 = vmul.f32 0.6931472, %v3315_v53  ;;  %v6325_v36 = vld [vmem:[#allocation2 + $0x678] sm:$0xff]  ;;  %v1406_v18 = vadd.f32 %v1405_v20, %v1234_v32 }
 0x1ba   :  { %v3319_v48 = vpop.eup %3318  ;;  %3344 = vlog2.f32 %v9405_v23  ;;  %9407 = vst [vmem:[#allocation158_spill] sm:$0xff] %v6320_v15  ;;  %v9408_v34 = vld [vmem:[#allocation164_spill] sm:$0xff]  ;;  %9409 = vst [vmem:[#allocation146_spill] sm:$0xff] %v6325_v36  ;;  %v6327_v42 = vld [vmem:[#allocation5 + $0x678] sm:$0xff]  ;;  %v1240_v38 = vmul.f32 0.6931472, %v3317_v2  ;;  %v1437_v44 = vadd.f32 %v1436_v61, %v1236_v21 }
 0x1bb   :  { %v3321_v43 = vpop.eup %3320  ;;  %3346 = vlog2.f32 %v9408_v34  ;;  %9410 = vst [vmem:[#allocation159_spill] sm:$0xff] %v6327_v42  ;;  %v9411_v23 = vld [vmem:[#allocation166_spill] sm:$0xff]  ;;  %v1242_v3 = vmul.f32 0.6931472, %v3319_v48  ;;  %v9414_v34 = vld [vmem:[#allocation31_spill] sm:$0xff]  ;;  %v6346_v55 = vld [vmem:[#allocation2 + $0x690] sm:$0xff]  ;;  %v1345_v50 = vadd.f32 %v1344_v10, %v1238_v1 }
 0x1bc   :  { %v3323_v7 = vpop.eup %3322  ;;  %3348 = vlog2.f32 %v9411_v23  ;;  %v6332_v63 = vld [vmem:[#allocation2 + $0x680] sm:$0xff]  ;;  %v6339_v14 = vld [vmem:[#allocation2 + $0x688] sm:$0xff]  ;;  %v1244_v45 = vmul.f32 0.6931472, %v3321_v43  ;;  %9418 = vst [vmem:[#allocation162_spill] sm:$0xff] %v6346_v55  ;;  %v6350_v48 = vld [vmem:[#allocation5 + $0x690] sm:$0xff]  ;;  %v1376_v62 = vadd.f32 %v1375_v13, %v1240_v38 }
 0x1bd   :  { %9412 = vst [vmem:[#allocation74_spill] sm:$0xff] %v6332_v63  ;;  %v6334_v17 = vld [vmem:[#allocation5 + $0x680] sm:$0xff]  ;;  %v3325_v30 = vpop.eup %3324  ;;  %3350 = vlog2.f32 %v9414_v34  ;;  %9415 = vst [vmem:[#allocation160_spill] sm:$0xff] %v6339_v14  ;;  %v6341_v56 = vld [vmem:[#allocation5 + $0x688] sm:$0xff]  ;;  %v1246_v34 = vmul.f32 0.6931472, %v3323_v7  ;;  %v1407_v36 = vadd.f32 %v1406_v18, %v1242_v3 }
 0x1be   :  { %9413 = vst [vmem:[#allocation147_spill] sm:$0xff] %v6334_v17  ;;  %9416 = vst [vmem:[#allocation151_spill] sm:$0xff] %v6341_v56  ;;  %v3327_v54 = vpop.eup %3326  ;;  %v9417_v23 = vld [vmem:[#allocation167_spill] sm:$0xff]  ;;  %v6348_v53 = vld [vmem:[#allocation2 + $0x6a0] sm:$0xff]  ;;  %v1248_v15 = vmul.f32 0.6931472, %v3325_v30  ;;  %v1438_v63 = vadd.f32 %v1437_v44, %v1244_v45 }
 0x1bf   :  { %3352 = vlog2.f32 %v9417_v23  ;;  %9419 = vst [vmem:[#allocation152_spill] sm:$0xff] %v6348_v53  ;;  %9420 = vst [vmem:[#allocation163_spill] sm:$0xff] %v6350_v48  ;;  %v3329_v32 = vpop.eup %3328  ;;  %v6355_v2 = vld [vmem:[#allocation2 + $0x698] sm:$0xff]  ;;  %v6359_v23 = vld [vmem:[#allocation5 + $0x6a0] sm:$0xff]  ;;  %v1250_v42 = vmul.f32 0.6931472, %v3327_v54  ;;  %v1346_v13 = vadd.f32 %v1345_v50, %v1246_v34 }
 0x1c0   :  { %3354 = vlog2.f32 %v5710_v19  ;;  %9421 = vst [vmem:[#allocation80_spill] sm:$0xff] %v6355_v2  ;;  %v6357_v43 = vld [vmem:[#allocation5 + $0x698] sm:$0xff]  ;;  %9423 = vst [vmem:[#allocation164_spill] sm:$0xff] %v6359_v23  ;;  %v3331_v21 = vpop.eup %3330  ;;  %v9424_v35 = vld [vmem:[#allocation87_spill] sm:$0xff]  ;;  %v1252_v17 = vmul.f32 0.6931472, %v3329_v32 }
 0x1c1   :  { %9422 = vst [vmem:[#allocation153_spill] sm:$0xff] %v6357_v43  ;;  %3356 = vlog2.f32 %v9424_v35  ;;  %v6364_v20 = vld [vmem:[#allocation2 + $0x6a8] sm:$0xff]  ;;  %v6366_v7 = vld [vmem:[#allocation2 + $0x6b0] sm:$0xff]  ;;  %v3333_v1 = vpop.eup %3332  ;;  %v6373_v61 = vld [vmem:[#allocation2 + $0x6b8] sm:$0xff]  ;;  %v1254_v56 = vmul.f32 0.6931472, %v3331_v21  ;;  %v1408_v53 = vadd.f32 %v1407_v36, %v1250_v42 }
 0x1c2   :  { %9425 = vst [vmem:[#allocation166_spill] sm:$0xff] %v6364_v20  ;;  %9426 = vst [vmem:[#allocation31_spill] sm:$0xff] %v6366_v7  ;;  %v6368_v19 = vld [vmem:[#allocation5 + $0x6a8] sm:$0xff]  ;;  %3358 = vlog2.f32 %v5717_v51  ;;  %v6375_v30 = vld [vmem:[#allocation2 + $0x6c0] sm:$0xff]  ;;  %v3335_v38 = vpop.eup %3334  ;;  %v1256_v8 = vmul.f32 0.6931472, %v3333_v1  ;;  %v1377_v51 = vadd.f32 %v1376_v62, %v1248_v15  ;;  %v1439_v50 = vadd.f32 %v1438_v63, %v1252_v17 }
 0x1c3   :  { %9427 = vst [vmem:[#allocation167_spill] sm:$0xff] %v6368_v19  ;;  %9428 = vst [vmem:[#allocation87_spill] sm:$0xff] %v6373_v61  ;;  %v6377_v35 = vld [vmem:[#allocation5 + $0x6b0] sm:$0xff]  ;;  %v6381_v16 = vld [vmem:[#allocation2 + $0x6c8] sm:$0xff]  ;;  %v3337_v3 = vpop.eup %3336  ;;  %v1258_v23 = vmul.f32 0.6931472, %v3335_v38  ;;  %v1347_v15 = vadd.f32 %v1346_v13, %v1254_v56 }
 0x1c4   :  { %9429 = vst [vmem:[#allocation178_spill] sm:$0xff] %v6375_v30  ;;  %9430 = vst [vmem:[#allocation179_spill] sm:$0xff] %v6377_v35  ;;  %v6383_v10 = vld [vmem:[#allocation5 + $0x6b8] sm:$0xff]  ;;  %v6385_v54 = vld [vmem:[#allocation5 + $0x6c0] sm:$0xff]  ;;  %v3339_v55 = vpop.eup %3338  ;;  %v1378_v30 = vadd.f32 %v1377_v51, %v1256_v8 }
 0x1c5   :  { %9431 = vst [vmem:[#allocation180_spill] sm:$0xff] %v6383_v10  ;;  %9432 = vst [vmem:[#allocation181_spill] sm:$0xff] %v6385_v54  ;;  %v9433_v14 = vld [vmem:[#allocation157_spill] sm:$0xff]  ;;  %v6392_v48 = vld [vmem:[#allocation2 + $0x6d0] sm:$0xff]  ;;  %v3341_v34 = vpop.eup %3340  ;;  %v1260_v10 = vmul.f32 0.6931472, %v3337_v3 }
 0x1c6   :  { %3360 = vlog2.f32 %v9433_v14  ;;  %v6394_v44 = vld [vmem:[#allocation5 + $0x6c8] sm:$0xff]  ;;  %v6396_v45 = vld [vmem:[#allocation5 + $0x6d0] sm:$0xff]  ;;  %v6401_v18 = vld [vmem:[#allocation2 + $0x6d8] sm:$0xff]  ;;  %v3343_v19 = vpop.eup %3342  ;;  %v1262_v61 = vmul.f32 0.6931472, %v3339_v55  ;;  %v1409_v55 = vadd.f32 %v1408_v53, %v1258_v23 }
 0x1c7   :  { %9434 = vst [vmem:[#allocation157_spill] sm:$0xff] %v6396_v45  ;;  %3362 = vlog2.f32 %v5722_v49  ;;  %v6403_v21 = vld [vmem:[#allocation2 + $0x6e0] sm:$0xff]  ;;  %v6405_v14 = vld [vmem:[#allocation2 + $0x6e8] sm:$0xff]  ;;  %v6409_v43 = vld [vmem:[#allocation2 + $0x6f0] sm:$0xff]  ;;  %v3345_v62 = vpop.eup %3344  ;;  %v1264_v54 = vmul.f32 0.6931472, %v3341_v34 }
 0x1c8   :  { %9435 = vst [vmem:[#allocation182_spill] sm:$0xff] %v6403_v21  ;;  %9436 = vst [vmem:[#allocation183_spill] sm:$0xff] %v6405_v14  ;;  %v6411_v32 = vld [vmem:[#allocation2 + $0x700] sm:$0xff]  ;;  %v6413_v1 = vld [vmem:[#allocation5 + $0x6d8] sm:$0xff]  ;;  %v3347_v17 = vpop.eup %3346  ;;  %v1266_v45 = vmul.f32 0.6931472, %v3343_v19 }
 0x1c9   :  { %9437 = vst [vmem:[#allocation184_spill] sm:$0xff] %v6409_v43  ;;  %9438 = vst [vmem:[#allocation185_spill] sm:$0xff] %v6411_v32  ;;  %v6415_v49 = vld [vmem:[#allocation5 + $0x6e0] sm:$0xff]  ;;  %v9441_v20 = vld [vmem:[#allocation168_spill] sm:$0xff]  ;;  %v3349_v7 = vpop.eup %3348  ;;  %v1268_v13 = vmul.f32 0.6931472, %v3345_v62  ;;  %v1379_v53 = vadd.f32 %v1378_v30, %v1264_v54 }
 0x1ca   :  { %9439 = vst [vmem:[#allocation186_spill] sm:$0xff] %v6413_v1  ;;  %9440 = vst [vmem:[#allocation187_spill] sm:$0xff] %v6415_v49  ;;  %3364 = vlog2.f32 %v9441_v20  ;;  %v6422_v38 = vld [vmem:[#allocation2 + $0x6f8] sm:$0xff]  ;;  %v6424_v36 = vld [vmem:[#allocation5 + $0x6e8] sm:$0xff]  ;;  %v3351_v34 = vpop.eup %3350  ;;  %v1270_v19 = vmul.f32 0.6931472, %v3347_v17 }
 0x1cb   :  { %9442 = vst [vmem:[#allocation168_spill] sm:$0xff] %v6422_v38  ;;  %9443 = vst [vmem:[#allocation188_spill] sm:$0xff] %v6424_v36  ;;  %v6426_v42 = vld [vmem:[#allocation5 + $0x6f0] sm:$0xff]  ;;  %3366 = vlog2.f32 %v5727_v59  ;;  %v6433_v20 = vld [vmem:[#allocation5 + $0x6f8] sm:$0xff]  ;;  %v1440_v36 = vadd.f32 %v1439_v50, %v1260_v10  ;;  %v1410_v10 = vadd.f32 %v1409_v55, %v1266_v45 }
 0x1cc   :  { %9444 = vst [vmem:[#allocation189_spill] sm:$0xff] %v6426_v42  ;;  %9445 = vst [vmem:[#allocation190_spill] sm:$0xff] %v6433_v20  ;;  %v6435_v63 = vld [vmem:[#allocation5 + $0x700] sm:$0xff]  ;;  %v9447_v3 = vld [vmem:[#allocation169_spill] sm:$0xff]  ;;  %v1272_v42 = vmul.f32 0.6931472, %v3349_v7 }
 0x1cd   :  { %9446 = vst [vmem:[#allocation191_spill] sm:$0xff] %v6435_v63  ;;  %3368 = vlog2.f32 %v9447_v3  ;;  %v6442_v59 = vld [vmem:[#allocation2 + $0x708] sm:$0xff]  ;;  %v6444_v56 = vld [vmem:[#allocation2 + $0x710] sm:$0xff]  ;;  %v6449_v8 = vld [vmem:[#allocation2 + $0x718] sm:$0xff]  ;;  %v3353_v3 = vpop.eup %3352 }
 0x1ce   :  { %9448 = vst [vmem:[#allocation169_spill] sm:$0xff] %v6442_v59  ;;  %9449 = vst [vmem:[#allocation192_spill] sm:$0xff] %v6444_v56  ;;  %3370 = vlog2.f32 %v5732_v28  ;;  %v6451_v51 = vld [vmem:[#allocation2 + $0x720] sm:$0xff]  ;;  %v6453_v35 = vld [vmem:[#allocation5 + $0x708] sm:$0xff]  ;;  %v1348_v28 = vadd.f32 %v1347_v15, %v1262_v61  ;;  %v3355_v1 = vpop.eup %3354  ;;  %v1276_v55 = vmul.f32 0.6931472, %v3353_v3 }
 0x1cf   :  { %9450 = vst [vmem:[#allocation193_spill] sm:$0xff] %v6449_v8  ;;  %9451 = vst [vmem:[#allocation194_spill] sm:$0xff] %v6451_v51  ;;  %v9453_v2 = vld [vmem:[#allocation170_spill] sm:$0xff]  ;;  %v6462_v14 = vld [vmem:[#allocation5 + $0x710] sm:$0xff]  ;;  %v3357_v62 = vpop.eup %3356 }
 0x1d0   :  { %9452 = vst [vmem:[#allocation195_spill] sm:$0xff] %v6453_v35  ;;  %3372 = vlog2.f32 %v9453_v2  ;;  %9454 = vst [vmem:[#allocation170_spill] sm:$0xff] %v6462_v14  ;;  %v6464_v49 = vld [vmem:[#allocation5 + $0x718] sm:$0xff]  ;;  %v6466_v21 = vld [vmem:[#allocation5 + $0x720] sm:$0xff]  ;;  %v1274_v2 = vmul.f32 0.6931472, %v3351_v34  ;;  %v3359_v15 = vpop.eup %3358  ;;  %v1349_v54 = vadd.f32 %v1348_v28, %v1270_v19 }
 0x1d1   :  { %9455 = vst [vmem:[#allocation196_spill] sm:$0xff] %v6464_v49  ;;  %9456 = vst [vmem:[#allocation197_spill] sm:$0xff] %v6466_v21  ;;  %v9457_v43 = vld [vmem:[#allocation94_spill] sm:$0xff]  ;;  %v6469_v20 = vld [vmem:[#allocation2 + $0x728] sm:$0xff]  ;;  %v1278_v14 = vmul.f32 0.6931472, %v3355_v1  ;;  %v1380_v49 = vadd.f32 %v1379_v53, %v1272_v42 }
 0x1d2   :  { %3374 = vlog2.f32 %v9457_v43  ;;  %9458 = vst [vmem:[#allocation94_spill] sm:$0xff] %v6469_v20  ;;  %v6471_v23 = vld [vmem:[#allocation5 + $0x728] sm:$0xff]  ;;  %v9460_v61 = vld [vmem:[#allocation161_spill] sm:$0xff]  ;;  %v6477_v17 = vld [vmem:[#allocation2 + $0x730] sm:$0xff]  ;;  %v1411_v51 = vadd.f32 %v1410_v10, %v1274_v2 }
 0x1d3   :  { %9459 = vst [vmem:[#allocation198_spill] sm:$0xff] %v6471_v23  ;;  %3376 = vlog2.f32 %v9460_v61  ;;  %9461 = vst [vmem:[#allocation161_spill] sm:$0xff] %v6477_v17  ;;  %v6479_v7 = vld [vmem:[#allocation2 + $0x738] sm:$0xff]  ;;  %v6481_v43 = vld [vmem:[#allocation2 + $0x740] sm:$0xff]  ;;  %v1441_v61 = vadd.f32 %v1440_v36, %v1268_v13  ;;  %v3361_v30 = vpop.eup %3360  ;;  %v1280_v13 = vmul.f32 0.6931472, %v3357_v62  ;;  %v1350_v19 = vadd.f32 %v1349_v54, %v1278_v14 }
 0x1d4   :  { %3378 = vlog2.f32 %v5748_v52  ;;  %9462 = vst [vmem:[#allocation199_spill] sm:$0xff] %v6479_v7  ;;  %9463 = vst [vmem:[#allocation200_spill] sm:$0xff] %v6481_v43  ;;  %v9464_v34 = vld [vmem:[#allocation171_spill] sm:$0xff]  ;;  %v6490_v52 = vld [vmem:[#allocation5 + $0x730] sm:$0xff]  ;;  %v3363_v36 = vpop.eup %3362  ;;  %v1284_v28 = vmul.f32 0.6931472, %v3361_v30 }
 0x1d5   :  { %3380 = vlog2.f32 %v9464_v34  ;;  %9465 = vst [vmem:[#allocation171_spill] sm:$0xff] %v6490_v52  ;;  %v6492_v50 = vld [vmem:[#allocation5 + $0x738] sm:$0xff]  ;;  %v6494_v35 = vld [vmem:[#allocation5 + $0x740] sm:$0xff]  ;;  %v6499_v45 = vld [vmem:[#allocation2 + $0x748] sm:$0xff]  ;;  %v1282_v34 = vmul.f32 0.6931472, %v3359_v15  ;;  %v1442_v2 = vadd.f32 %v1441_v61, %v1276_v55  ;;  %v1381_v30 = vadd.f32 %v1380_v49, %v1280_v13 }
 0x1d6   :  { %9466 = vst [vmem:[#allocation201_spill] sm:$0xff] %v6492_v50  ;;  %9467 = vst [vmem:[#allocation202_spill] sm:$0xff] %v6494_v35  ;;  %v9468_v56 = vld [vmem:[#allocation173_spill] sm:$0xff]  ;;  %v6501_v3 = vld [vmem:[#allocation5 + $0x748] sm:$0xff]  ;;  %v1286_v42 = vmul.f32 0.6931472, %v3363_v36 }
 0x1d7   :  { %3382 = vlog2.f32 %v9468_v56  ;;  %9469 = vst [vmem:[#allocation173_spill] sm:$0xff] %v6499_v45  ;;  %9470 = vst [vmem:[#allocation203_spill] sm:$0xff] %v6501_v3  ;;  %v9471_v21 = vld [vmem:[#allocation99_spill] sm:$0xff]  ;;  %v6504_v8 = vld [vmem:[#allocation2 + $0x750] sm:$0xff]  ;;  %v3365_v53 = vpop.eup %3364  ;;  %v1443_v43 = vadd.f32 %v1442_v2, %v1284_v28 }
 0x1d8   :  { %3384 = vlog2.f32 %v9471_v21  ;;  %9472 = vst [vmem:[#allocation99_spill] sm:$0xff] %v6504_v8  ;;  %v6506_v63 = vld [vmem:[#allocation5 + $0x750] sm:$0xff]  ;;  %v9474_v59 = vld [vmem:[#allocation165_spill] sm:$0xff]  ;;  %v9477_v62 = vld [vmem:[#allocation174_spill] sm:$0xff]  ;;  %v3367_v23 = vpop.eup %3366  ;;  %v1288_v3 = vmul.f32 0.6931472, %v3365_v53  ;;  %v1351_v50 = vadd.f32 %v1350_v19, %v1286_v42 }
 0x1d9   :  { %9473 = vst [vmem:[#allocation204_spill] sm:$0xff] %v6506_v63  ;;  %3386 = vlog2.f32 %v9474_v59  ;;  %v6509_v1 = vld [vmem:[#allocation2 + $0x758] sm:$0xff]  ;;  %v6520_v10 = vld [vmem:[#allocation2 + $0x760] sm:$0xff]  ;;  %v9480_v52 = vld [vmem:[#allocation175_spill] sm:$0xff]  ;;  %v1290_v21 = vmul.f32 0.6931472, %v3367_v23 }
 0x1da   :  { %9475 = vst [vmem:[#allocation165_spill] sm:$0xff] %v6509_v1  ;;  %v6511_v56 = vld [vmem:[#allocation5 + $0x758] sm:$0xff]  ;;  %3388 = vlog2.f32 %v9477_v62  ;;  %9478 = vst [vmem:[#allocation174_spill] sm:$0xff] %v6520_v10  ;;  %v6522_v59 = vld [vmem:[#allocation5 + $0x760] sm:$0xff]  ;;  %v1412_v62 = vadd.f32 %v1411_v51, %v1282_v34  ;;  %v3369_v15 = vpop.eup %3368 }
 0x1db   :  { %9476 = vst [vmem:[#allocation205_spill] sm:$0xff] %v6511_v56  ;;  %9479 = vst [vmem:[#allocation206_spill] sm:$0xff] %v6522_v59  ;;  %3390 = vlog2.f32 %v9480_v52  ;;  %v9481_v35 = vld [vmem:[#allocation11_spill] sm:$0xff]  ;;  %v9484_v36 = vld [vmem:[#allocation172_spill] sm:$0xff]  ;;  %v3371_v34 = vpop.eup %3370  ;;  %v1292_v2 = vmul.f32 0.6931472, %v3369_v15 }
 0x1dc   :  { %3392 = vlog2.f32 %v9481_v35  ;;  %v6530_v55 = vld [vmem:[#allocation2 + $0x768] sm:$0xff]  ;;  %v6537_v52 = vld [vmem:[#allocation2 + $0x770] sm:$0xff]  ;;  %v9486_v49 = vld [vmem:[#allocation106_spill] sm:$0xff]  ;;  %v1413_v32 = vadd.f32 %v1412_v62, %v1290_v21 }
 0x1dd   :  { %9482 = vst [vmem:[#allocation175_spill] sm:$0xff] %v6530_v55  ;;  %v6532_v61 = vld [vmem:[#allocation5 + $0x768] sm:$0xff]  ;;  %3394 = vlog2.f32 %v9484_v36  ;;  %v6539_v14 = vld [vmem:[#allocation5 + $0x770] sm:$0xff]  ;;  %v9489_v63 = vld [vmem:[#allocation177_spill] sm:$0xff]  ;;  %v3373_v8 = vpop.eup %3372  ;;  %v1382_v55 = vadd.f32 %v1381_v30, %v1288_v3 }
 0x1de   :  { %9483 = vst [vmem:[#allocation11_spill] sm:$0xff] %v6532_v61  ;;  %9485 = vst [vmem:[#allocation172_spill] sm:$0xff] %v6539_v14  ;;  %v9487_v51 = vld [vmem:[#allocation36_spill] sm:$0xff]  ;;  %3396 = vlog2.f32 %v9489_v63  ;;  %v9490_v56 = vld [vmem:[#allocation41_spill] sm:$0xff]  ;;  %v1294_v61 = vmul.f32 0.6931472, %v3371_v34 }
 0x1df   :  { %v9488_v54 = vsub.f32 %v9486_v49, %v9487_v51  ;;  %v9491_v53 = vld [vmem:[#allocation20_spill] sm:$0xff]  ;;  %v6551_v7 = vld [vmem:[#allocation2 + $0x778] sm:$0xff]  ;;  %v9496_v23 = vld [vmem:[#allocation131_spill] sm:$0xff]  ;;  %v3375_v28 = vpop.eup %3374 }
 0x1e0   :  { %v9492_v1 = vsub.f32 %v9490_v56, %v9491_v53  ;;  %v9493_v45 = vld [vmem:[#allocation12_spill] sm:$0xff]  ;;  %v6553_v35 = vld [vmem:[#allocation5 + $0x778] sm:$0xff]  ;;  %v9498_v59 = vld [vmem:[#allocation15_spill] sm:$0xff]  ;;  %v3377_v49 = vpop.eup %3376  ;;  %v1298_v21 = vmul.f32 0.6931472, %v3375_v28 }
 0x1e1   :  { %v1842_v13 = vmul.f32 0.5, %v9488_v54  ;;  %3398 = vlog2.f32 %v9493_v45  ;;  %9494 = vst [vmem:[#allocation106_spill] sm:$0xff] %v6553_v35  ;;  %v9495_v51 = vld [vmem:[#allocation13_spill] sm:$0xff]  ;;  %v6563_v56 = vld [vmem:[#allocation5 + $0x780] sm:$0xff]  ;;  %v9501_v42 = vld [vmem:[#allocation16_spill] sm:$0xff]  ;;  %v3379_v20 = vpop.eup %3378 }
 0x1e2   :  { %v1843_v36 = vmul.f32 0.5, %v9492_v1  ;;  %v9497_v54 = vsub.f32 %v9495_v51, %v9496_v23  ;;  %3400 = vlog2.f32 %v9498_v59  ;;  %v6561_v1 = vld [vmem:[#allocation2 + $0x780] sm:$0xff]  ;;  %9500 = vst [vmem:[#allocation177_spill] sm:$0xff] %v6563_v56  ;;  %v9502_v19 = vld [vmem:[#allocation29_spill] sm:$0xff]  ;;  %v6570_v51 = vld [vmem:[#allocation2 + $0x788] sm:$0xff]  ;;  %v3381_v30 = vpop.eup %3380  ;;  %v1352_v56 = vadd.f32 %v1351_v50, %v1294_v61 }
 0x1e3   :  { %9499 = vst [vmem:[#allocation36_spill] sm:$0xff] %v6561_v1  ;;  %v9503_v53 = vsub.f32 %v9501_v42, %v9502_v19  ;;  %9504 = vst [vmem:[#allocation41_spill] sm:$0xff] %v6570_v51  ;;  %v6572_v23 = vld [vmem:[#allocation5 + $0x788] sm:$0xff]  ;;  %v9506_v15 = vld [vmem:[#allocation176_spill] sm:$0xff]  ;;  %3402 = vtanh.f32 %v1842_v13 }
 0x1e4   :  { %v1844_v63 = vmul.f32 0.5, %v9497_v54  ;;  %9505 = vst [vmem:[#allocation20_spill] sm:$0xff] %v6572_v23  ;;  %v9507_v59 = vld [vmem:[#allocation46_spill] sm:$0xff]  ;;  %v6577_v38 = vld [vmem:[#allocation2 + $0x790] sm:$0xff]  ;;  %3404 = vtanh.f32 %v1843_v36  ;;  %v6584_v45 = vld [vmem:[#allocation2 + $0x798] sm:$0xff] }
 0x1e5   :  { %v1845_v10 = vmul.f32 0.5, %v9503_v53  ;;  %v9508_v54 = vsub.f32 %v9506_v15, %v9507_v59  ;;  %9509 = vst [vmem:[#allocation12_spill] sm:$0xff] %v6577_v38  ;;  %v9510_v19 = vld [vmem:[#allocation30_spill] sm:$0xff]  ;;  %v1296_v53 = vmul.f32 0.6931472, %v3373_v8  ;;  %v6586_v14 = vld [vmem:[#allocation5 + $0x790] sm:$0xff] }
 0x1e6   :  { %v9511_v34 = vsub.f32 %v5807_v58, %v9510_v19  ;;  %9512 = vst [vmem:[#allocation13_spill] sm:$0xff] %v6586_v14  ;;  %v6588_v15 = vld [vmem:[#allocation5 + $0x798] sm:$0xff]  ;;  %v9513_v62 = vld [vmem:[#allocation19_spill] sm:$0xff]  ;;  %3406 = vtanh.f32 %v1844_v63  ;;  %v1444_v58 = vadd.f32 %v1443_v43, %v1292_v2  ;;  %v6597_v36 = vld [vmem:[#allocation2 + $0x7a0] sm:$0xff] }
 0x1e7   :  { %v1846_v17 = vmul.f32 0.5, %v9508_v54  ;;  %v9514_v13 = vsub.f32 %v5814_v5, %v9513_v62  ;;  %v6595_v54 = vpop.eup %3382  ;;  %9515 = vst [vmem:[#allocation131_spill] sm:$0xff] %v6597_v36  ;;  %v9516_v19 = vld [vmem:[#allocation34_spill] sm:$0xff]  ;;  %3408 = vtanh.f32 %v1845_v10  ;;  %v6606_v5 = vld [vmem:[#allocation2 + $0x7a8] sm:$0xff]  ;;  %v9522_v2 = vld [vmem:[#allocation24_spill] sm:$0xff] }
 0x1e8   :  { %v1847_v3 = vmul.f32 0.5, %v9511_v34  ;;  %v9517_v34 = vsub.f32 %v5821_v60, %v9516_v19  ;;  %v6604_v35 = vpop.eup %3384  ;;  %v6608_v63 = vld [vmem:[#allocation5 + $0x7a0] sm:$0xff]  ;;  %v6610_v62 = vld [vmem:[#allocation5 + $0x7a8] sm:$0xff]  ;;  %v6617_v60 = vld [vmem:[#allocation2 + $0x7b0] sm:$0xff] }
 0x1e9   :  { %v1848_v59 = vmul.f32 0.5, %v9514_v13  ;;  %9518 = vst [vmem:[#allocation15_spill] sm:$0xff] %v6604_v35  ;;  %9519 = vst [vmem:[#allocation16_spill] sm:$0xff] %v6608_v63  ;;  %v9521_v43 = vld [vmem:[#allocation35_spill] sm:$0xff]  ;;  %3410 = vtanh.f32 %v1846_v17  ;;  %v6615_v8 = vpop.eup %3386  ;;  %v9525_v28 = vld [vmem:[#allocation40_spill] sm:$0xff] }
 0x1ea   :  { %v1849_v42 = vmul.f32 0.5, %v9517_v34  ;;  %9520 = vst [vmem:[#allocation29_spill] sm:$0xff] %v6610_v62  ;;  %v9523_v13 = vsub.f32 %v9521_v43, %v9522_v2  ;;  %v9524_v61 = vld [vmem:[#allocation39_spill] sm:$0xff]  ;;  %3412 = vtanh.f32 %v1847_v3  ;;  %v6626_v35 = vpop.eup %3388  ;;  %v1300_v43 = vmul.f32 0.6931472, %v3377_v49  ;;  %v6628_v17 = vld [vmem:[#allocation2 + $0x7b8] sm:$0xff] }
 0x1eb   :  { %v9526_v19 = vsub.f32 %v9524_v61, %v9525_v28  ;;  %9527 = vst [vmem:[#allocation176_spill] sm:$0xff] %v6626_v35  ;;  %v1383_v2 = vadd.f32 %v1382_v55, %v1296_v53  ;;  %9528 = vst [vmem:[#allocation46_spill] sm:$0xff] %v6628_v17  ;;  %v6632_v23 = vld [vmem:[#allocation5 + $0x7b8] sm:$0xff]  ;;  %v9531_v51 = vld [vmem:[#allocation28_spill] sm:$0xff]  ;;  %3414 = vtanh.f32 %v1848_v59  ;;  %v6637_v50 = vpop.eup %3390 }
 0x1ec   :  { %v1850_v1 = vmul.f32 0.5, %v9523_v13  ;;  %v6630_v13 = vld [vmem:[#allocation5 + $0x7b0] sm:$0xff]  ;;  %9530 = vst [vmem:[#allocation19_spill] sm:$0xff] %v6632_v23  ;;  %9534 = vst [vmem:[#allocation34_spill] sm:$0xff] %v6637_v50  ;;  %v6639_v61 = vld [vmem:[#allocation2 + $0x7c0] sm:$0xff]  ;;  %3416 = vtanh.f32 %v1849_v42  ;;  %v6648_v35 = vpop.eup %3392 }
 0x1ed   :  { %v1851_v34 = vmul.f32 0.5, %v9526_v19  ;;  %9529 = vst [vmem:[#allocation30_spill] sm:$0xff] %v6630_v13  ;;  %v9532_v10 = vld [vmem:[#allocation44_spill] sm:$0xff]  ;;  %9535 = vst [vmem:[#allocation35_spill] sm:$0xff] %v6639_v61  ;;  %v9536_v49 = vld [vmem:[#allocation45_spill] sm:$0xff]  ;;  %v6661_v62 = vpop.eup %3394 }
 0x1ee   :  { %v9533_v14 = vsub.f32 %v9531_v51, %v9532_v10  ;;  %v9537_v53 = vld [vmem:[#allocation33_spill] sm:$0xff]  ;;  %9539 = vst [vmem:[#allocation24_spill] sm:$0xff] %v6648_v35  ;;  %v1302_v51 = vmul.f32 0.6931472, %v3379_v20  ;;  %v6652_v59 = vld [vmem:[#allocation2 + $0x7c8] sm:$0xff]  ;;  %v6654_v10 = vld [vmem:[#allocation5 + $0x7c0] sm:$0xff]  ;;  %3418 = vtanh.f32 %v1850_v1  ;;  %v6672_v35 = vpop.eup %3396 }
 0x1ef   :  { %v9538_v28 = vsub.f32 %v9536_v49, %v9537_v53  ;;  %9541 = vst [vmem:[#allocation40_spill] sm:$0xff] %v6652_v59  ;;  %9542 = vst [vmem:[#allocation28_spill] sm:$0xff] %v6654_v10  ;;  %v6656_v50 = vld [vmem:[#allocation5 + $0x7c8] sm:$0xff]  ;;  %v9544_v3 = vld [vmem:[#allocation49_spill] sm:$0xff]  ;;  %3420 = vtanh.f32 %v1851_v34  ;;  %v6685_v23 = vpop.eup %3398 }
 0x1f0   :  { %v1852_v38 = vmul.f32 0.5, %v9533_v14  ;;  %v6650_v14 = vadd.f32 %v1413_v32, %v1298_v21  ;;  %9543 = vst [vmem:[#allocation44_spill] sm:$0xff] %v6656_v50  ;;  %v9545_v63 = vld [vmem:[#allocation50_spill] sm:$0xff]  ;;  %9547 = vst [vmem:[#allocation45_spill] sm:$0xff] %v6661_v62  ;;  %v6663_v49 = vld [vmem:[#allocation2 + $0x7d0] sm:$0xff] }
 0x1f1   :  { %v1853_v19 = vmul.f32 0.5, %v9538_v28  ;;  %v9546_v36 = vsub.f32 %v9544_v3, %v9545_v63  ;;  %9548 = vst [vmem:[#allocation33_spill] sm:$0xff] %v6663_v49  ;;  %v9549_v42 = vld [vmem:[#allocation38_spill] sm:$0xff]  ;;  %v9550_v21 = vld [vmem:[#allocation51_spill] sm:$0xff]  ;;  %9552 = vst [vmem:[#allocation49_spill] sm:$0xff] %v6672_v35 }
 0x1f2   :  { %9540 = vst [vmem:[#allocation39_spill] sm:$0xff] %v6650_v14  ;;  %v9551_v53 = vsub.f32 %v9549_v42, %v9550_v21  ;;  %v1304_v63 = vmul.f32 0.6931472, %v3381_v30  ;;  %v6676_v1 = vld [vmem:[#allocation2 + $0x7d8] sm:$0xff]  ;;  %v6678_v3 = vld [vmem:[#allocation5 + $0x7d0] sm:$0xff]  ;;  %v9557_v20 = vld [vmem:[#allocation54_spill] sm:$0xff]  ;;  %3422 = vtanh.f32 %v1852_v38 }
 0x1f3   :  { %v1854_v55 = vmul.f32 0.5, %v9546_v36  ;;  %v6674_v36 = vadd.f32 %v1444_v58, %v1300_v43  ;;  %9554 = vst [vmem:[#allocation38_spill] sm:$0xff] %v6676_v1  ;;  %9555 = vst [vmem:[#allocation51_spill] sm:$0xff] %v6678_v3  ;;  %v6680_v62 = vld [vmem:[#allocation5 + $0x7d8] sm:$0xff]  ;;  %v9558_v14 = vld [vmem:[#allocation55_spill] sm:$0xff]  ;;  %3424 = vtanh.f32 %v1853_v19 }
 0x1f4   :  { %v1855_v28 = vmul.f32 0.5, %v9551_v53  ;;  %9556 = vst [vmem:[#allocation207_spill] sm:$0xff] %v6680_v62  ;;  %v9559_v13 = vsub.f32 %v9557_v20, %v9558_v14  ;;  %9560 = vst [vmem:[#allocation54_spill] sm:$0xff] %v6685_v23  ;;  %v6687_v42 = vld [vmem:[#allocation2 + $0x7e0] sm:$0xff]  ;;  %v9563_v43 = vld [vmem:[#allocation43_spill] sm:$0xff]  ;;  %v6698_v14 = vpop.eup %3400 }
 0x1f5   :  { %9553 = vst [vmem:[#allocation50_spill] sm:$0xff] %v6674_v36  ;;  %9561 = vst [vmem:[#allocation55_spill] sm:$0xff] %v6687_v42  ;;  %v6689_v34 = vld [vmem:[#allocation5 + $0x7e0] sm:$0xff]  ;;  %v9564_v21 = vld [vmem:[#allocation56_spill] sm:$0xff]  ;;  %v6701_v38 = vmul.f32 0.6931472, %v6595_v54  ;;  %3426 = vtanh.f32 %v1854_v55  ;;  %v6731_v55 = vadd.f32 %v1383_v2, %v1304_v63 }
 0x1f6   :  { %v1856_v32 = vmul.f32 0.5, %v9559_v13  ;;  %9562 = vst [vmem:[#allocation208_spill] sm:$0xff] %v6689_v34  ;;  %v9565_v53 = vsub.f32 %v9563_v43, %v9564_v21  ;;  %9566 = vst [vmem:[#allocation43_spill] sm:$0xff] %v6698_v14  ;;  %v6703_v13 = vadd.f32 %v1352_v56, %v1302_v51  ;;  %v6705_v20 = vld [vmem:[#allocation2 + $0x7e8] sm:$0xff]  ;;  %v6707_v23 = vld [vmem:[#allocation2 + $0x7f0] sm:$0xff]  ;;  %v6714_v43 = vpop.eup %3402  ;;  %3428 = vtanh.f32 %v1855_v28 }
 0x1f7   :  { %9567 = vst [vmem:[#allocation56_spill] sm:$0xff] %v6701_v38  ;;  %9569 = vst [vmem:[#allocation210_spill] sm:$0xff] %v6705_v20  ;;  %v6709_v30 = vld [vmem:[#allocation5 + $0x7e8] sm:$0xff]  ;;  %v9573_v58 = vld [vmem:[#allocation60_spill] sm:$0xff]  ;;  %v6741_v51 = vmul.f32 0.6931472, %v6615_v8 }
 0x1f8   :  { %v1857_v36 = vmul.f32 0.5, %v9565_v53  ;;  %9568 = vst [vmem:[#allocation209_spill] sm:$0xff] %v6703_v13  ;;  %9570 = vst [vmem:[#allocation211_spill] sm:$0xff] %v6707_v23  ;;  %v9572_v35 = vld [vmem:[#allocation59_spill] sm:$0xff]  ;;  %v6716_v19 = vld [vmem:[#allocation2 + $0x7f8] sm:$0xff]  ;;  %3430 = vtanh.f32 %v1856_v32 }
 0x1f9   :  { %9571 = vst [vmem:[#allocation212_spill] sm:$0xff] %v6709_v30  ;;  %v9574_v50 = vsub.f32 %v9572_v35, %v9573_v58  ;;  %9575 = vst [vmem:[#allocation59_spill] sm:$0xff] %v6716_v19  ;;  %v6718_v21 = vld [vmem:[#allocation5 + $0x7f0] sm:$0xff]  ;;  %v6720_v54 = vld [vmem:[#allocation5 + $0x7f8] sm:$0xff] }
 0x1fa   :  { %9576 = vst [vmem:[#allocation60_spill] sm:$0xff] %v6718_v21  ;;  %9577 = vst [vmem:[#allocation213_spill] sm:$0xff] %v6720_v54  ;;  %v9578_v53 = vld [vmem:[#allocation48_spill] sm:$0xff]  ;;  %v9582_v13 = vld [vmem:[#allocation61_spill] sm:$0xff]  ;;  %3432 = vtanh.f32 %v1857_v36 }
 0x1fb   :  { %v1858_v59 = vmul.f32 0.5, %v9574_v50  ;;  %v9579_v14 = vsub.f32 %v5891_v39, %v9578_v53  ;;  %v6729_v50 = vpop.eup %3404  ;;  %9581 = vst [vmem:[#allocation214_spill] sm:$0xff] %v6731_v55  ;;  %v9583_v38 = vsub.f32 %v5898_v27, %v9582_v13  ;;  %9585 = vst [vmem:[#allocation215_spill] sm:$0xff] %v6741_v51  ;;  %v9586_v28 = vld [vmem:[#allocation64_spill] sm:$0xff]  ;;  %v9590_v13 = vld [vmem:[#allocation53_spill] sm:$0xff] }
 0x1fc   :  { %9580 = vst [vmem:[#allocation48_spill] sm:$0xff] %v6729_v50  ;;  %v6738_v56 = vpop.eup %3406  ;;  %v9587_v2 = vsub.f32 %v5905_v12, %v9586_v28  ;;  %v9593_v39 = vld [vmem:[#allocation66_spill] sm:$0xff]  ;;  %v9594_v55 = vld [vmem:[#allocation71_spill] sm:$0xff]  ;;  %v9596_v36 = vld [vmem:[#allocation72_spill] sm:$0xff] }
 0x1fd   :  { %v1859_v35 = vmul.f32 0.5, %v9579_v14  ;;  %v1860_v10 = vmul.f32 0.5, %v9583_v38  ;;  %9584 = vst [vmem:[#allocation61_spill] sm:$0xff] %v6738_v56  ;;  %v6748_v14 = vpop.eup %3408  ;;  %v9589_v38 = vld [vmem:[#allocation65_spill] sm:$0xff]  ;;  %3434 = vtanh.f32 %v1858_v59  ;;  %v9595_v12 = vsub.f32 %v9593_v39, %v9594_v55  ;;  %v9606_v54 = vld [vmem:[#allocation79_spill] sm:$0xff]  ;;  %v9607_v19 = vld [vmem:[#allocation68_spill] sm:$0xff] }
 0x1fe   :  { %v1861_v63 = vmul.f32 0.5, %v9587_v2  ;;  %9588 = vst [vmem:[#allocation64_spill] sm:$0xff] %v6748_v14  ;;  %v9591_v8 = vsub.f32 %v9589_v38, %v9590_v13  ;;  %v6757_v58 = vpop.eup %3410  ;;  %v9597_v2 = vld [vmem:[#allocation58_spill] sm:$0xff]  ;;  %v9599_v20 = vld [vmem:[#allocation73_spill] sm:$0xff]  ;;  %v9604_v13 = vld [vmem:[#allocation63_spill] sm:$0xff]  ;;  %v9608_v34 = vsub.f32 %v9606_v54, %v9607_v19 }
 0x1ff   :  { %9592 = vst [vmem:[#allocation65_spill] sm:$0xff] %v6757_v58  ;;  %v1863_v28 = vmul.f32 0.5, %v9595_v12  ;;  %v9598_v51 = vsub.f32 %v9596_v36, %v9597_v2  ;;  %v9600_v27 = vld [vmem:[#allocation77_spill] sm:$0xff]  ;;  %3436 = vtanh.f32 %v1859_v35  ;;  %v6768_v32 = vpop.eup %3412  ;;  %v9603_v38 = vld [vmem:[#allocation78_spill] sm:$0xff]  ;;  %v9609_v39 = vld [vmem:[#allocation84_spill] sm:$0xff] }
 0x200   :  { %v1862_v53 = vmul.f32 0.5, %v9591_v8  ;;  %v9601_v21 = vsub.f32 %v9599_v20, %v9600_v27  ;;  %9602 = vst [vmem:[#allocation53_spill] sm:$0xff] %v6768_v32  ;;  %v9605_v59 = vsub.f32 %v9603_v38, %v9604_v13  ;;  %v1867_v55 = vmul.f32 0.5, %v9608_v34  ;;  %v9610_v12 = vld [vmem:[#allocation69_spill] sm:$0xff]  ;;  %v9616_v2 = vld [vmem:[#allocation86_spill] sm:$0xff]  ;;  %v9617_v62 = vld [vmem:[#allocation91_spill] sm:$0xff] }
 0x201   :  { %v1864_v30 = vmul.f32 0.5, %v9598_v51  ;;  %v9611_v42 = vsub.f32 %v9609_v39, %v9610_v12  ;;  %3438 = vtanh.f32 %v1860_v10  ;;  %v6779_v51 = vpop.eup %3414  ;;  %v9613_v20 = vld [vmem:[#allocation85_spill] sm:$0xff]  ;;  %v9618_v1 = vsub.f32 %v9616_v2, %v9617_v62  ;;  %v9619_v13 = vld [vmem:[#allocation75_spill] sm:$0xff]  ;;  %v9623_v54 = vld [vmem:[#allocation76_spill] sm:$0xff] }
 0x202   :  { %v1865_v23 = vmul.f32 0.5, %v9601_v21  ;;  %v1866_v8 = vmul.f32 0.5, %v9605_v59  ;;  %9612 = vst [vmem:[#allocation66_spill] sm:$0xff] %v6779_v51  ;;  %v9614_v21 = vld [vmem:[#allocation70_spill] sm:$0xff]  ;;  %v9620_v59 = vld [vmem:[#allocation92_spill] sm:$0xff]  ;;  %3440 = vtanh.f32 %v1861_v63  ;;  %v6790_v34 = vpop.eup %3416  ;;  %v9626_v12 = vld [vmem:[#allocation81_spill] sm:$0xff] }
 0x203   :  { %v1868_v36 = vmul.f32 0.5, %v9611_v42  ;;  %v9615_v35 = vsub.f32 %v9613_v20, %v9614_v21  ;;  %v1870_v38 = vmul.f32 0.5, %v9618_v1  ;;  %v9621_v32 = vsub.f32 %v9619_v13, %v9620_v59  ;;  %9622 = vst [vmem:[#allocation71_spill] sm:$0xff] %v6790_v34  ;;  %v9624_v42 = vld [vmem:[#allocation93_spill] sm:$0xff]  ;;  %v9627_v51 = vld [vmem:[#allocation96_spill] sm:$0xff]  ;;  %v9629_v21 = vld [vmem:[#allocation82_spill] sm:$0xff]  ;;  %v6801_v1 = vpop.eup %3418 }
 0x204   :  { %v9625_v10 = vsub.f32 %v9623_v54, %v9624_v42  ;;  %v9628_v3 = vsub.f32 %v9626_v12, %v9627_v51  ;;  %3442 = vtanh.f32 %v1862_v53  ;;  %9632 = vst [vmem:[#allocation72_spill] sm:$0xff] %v6801_v1  ;;  %v9633_v2 = vld [vmem:[#allocation14_spill] sm:$0xff]  ;;  %v9637_v34 = vld [vmem:[#allocation88_spill] sm:$0xff]  ;;  %v9639_v42 = vld [vmem:[#allocation103_spill] sm:$0xff]  ;;  %v6816_v12 = vpop.eup %3420 }
 0x205   :  { %v1869_v27 = vmul.f32 0.5, %v9615_v35  ;;  %v1871_v19 = vmul.f32 0.5, %v9621_v32  ;;  %v9630_v35 = vld [vmem:[#allocation97_spill] sm:$0xff]  ;;  %v9634_v32 = vld [vmem:[#allocation83_spill] sm:$0xff]  ;;  %v9636_v59 = vld [vmem:[#allocation98_spill] sm:$0xff]  ;;  %3444 = vtanh.f32 %v1863_v28  ;;  %9642 = vst [vmem:[#allocation58_spill] sm:$0xff] %v6816_v12 }
 0x206   :  { %v1872_v39 = vmul.f32 0.5, %v9625_v10  ;;  %v1873_v20 = vmul.f32 0.5, %v9628_v3  ;;  %v9631_v49 = vsub.f32 %v9629_v21, %v9630_v35  ;;  %v9635_v63 = vsub.f32 %v9633_v2, %v9634_v32  ;;  %v9640_v10 = vld [vmem:[#allocation89_spill] sm:$0xff]  ;;  %v9644_v53 = vld [vmem:[#allocation18_spill] sm:$0xff]  ;;  %v9653_v28 = vld [vmem:[#allocation23_spill] sm:$0xff] }
 0x207   :  { %v9638_v58 = vsub.f32 %v9636_v59, %v9637_v34  ;;  %v9641_v51 = vsub.f32 %v9639_v42, %v9640_v10  ;;  %v9646_v2 = vld [vmem:[#allocation90_spill] sm:$0xff]  ;;  %v9647_v32 = vld [vmem:[#allocation105_spill] sm:$0xff]  ;;  %v9650_v34 = vld [vmem:[#allocation111_spill] sm:$0xff]  ;;  %3446 = vtanh.f32 %v1864_v30  ;;  %v6833_v42 = vpop.eup %3422 }
 0x208   :  { %v1874_v62 = vmul.f32 0.5, %v9631_v49  ;;  %v1875_v13 = vmul.f32 0.5, %v9635_v63  ;;  %v9643_v49 = vld [vmem:[#allocation104_spill] sm:$0xff]  ;;  %v9648_v63 = vsub.f32 %v9646_v2, %v9647_v32  ;;  %9652 = vst [vmem:[#allocation73_spill] sm:$0xff] %v6833_v42  ;;  %v9654_v10 = vld [vmem:[#allocation95_spill] sm:$0xff]  ;;  %v9659_v2 = vld [vmem:[#allocation114_spill] sm:$0xff]  ;;  %3448 = vtanh.f32 %v1865_v23 }
 0x209   :  { %v6809_v54 = vmul.f32 0.5, %v9638_v58  ;;  %v6814_v3 = vmul.f32 0.5, %v9641_v51  ;;  %v9645_v21 = vsub.f32 %v9643_v49, %v9644_v53  ;;  %v9649_v58 = vld [vmem:[#allocation110_spill] sm:$0xff]  ;;  %v9655_v51 = vsub.f32 %v9653_v28, %v9654_v10  ;;  %v9656_v49 = vld [vmem:[#allocation112_spill] sm:$0xff]  ;;  %v9660_v32 = vld [vmem:[#allocation101_spill] sm:$0xff] }
 0x20a   :  { %v6826_v1 = vmul.f32 0.5, %v9648_v63  ;;  %v9651_v59 = vsub.f32 %v9649_v58, %v9650_v34  ;;  %v9657_v53 = vld [vmem:[#allocation100_spill] sm:$0xff]  ;;  %v9661_v63 = vsub.f32 %v9659_v2, %v9660_v32  ;;  %v6850_v58 = vpop.eup %3424  ;;  %v9663_v30 = vld [vmem:[#allocation115_spill] sm:$0xff]  ;;  %3450 = vtanh.f32 %v1866_v8  ;;  %v9679_v8 = vld [vmem:[#allocation109_spill] sm:$0xff] }
 0x20b   :  { %v6821_v35 = vmul.f32 0.5, %v9645_v21  ;;  %v6838_v12 = vmul.f32 0.5, %v9655_v51  ;;  %v9658_v21 = vsub.f32 %v9656_v49, %v9657_v53  ;;  %9662 = vst [vmem:[#allocation77_spill] sm:$0xff] %v6850_v58  ;;  %v9664_v34 = vsub.f32 %v6066_v25, %v9663_v30  ;;  %v9665_v28 = vld [vmem:[#allocation27_spill] sm:$0xff]  ;;  %v9667_v49 = vld [vmem:[#allocation102_spill] sm:$0xff]  ;;  %v6867_v2 = vpop.eup %3426  ;;  %v9670_v23 = vld [vmem:[#allocation116_spill] sm:$0xff] }
 0x20c   :  { %v6831_v14 = vmul.f32 0.5, %v9651_v59  ;;  %v6848_v56 = vmul.f32 0.5, %v9661_v63  ;;  %v9666_v10 = vsub.f32 %v6073_v37, %v9665_v28  ;;  %v9668_v53 = vsub.f32 %v6080_v31, %v9667_v49  ;;  %9669 = vst [vmem:[#allocation78_spill] sm:$0xff] %v6867_v2  ;;  %v9671_v32 = vld [vmem:[#allocation107_spill] sm:$0xff]  ;;  %v9674_v30 = vld [vmem:[#allocation108_spill] sm:$0xff]  ;;  %v6884_v31 = vpop.eup %3428 }
 0x20d   :  { %v6843_v61 = vmul.f32 0.5, %v9658_v21  ;;  %v6855_v59 = vmul.f32 0.5, %v9664_v34  ;;  %v9672_v63 = vsub.f32 %v9670_v23, %v9671_v32  ;;  %v9673_v25 = vld [vmem:[#allocation119_spill] sm:$0xff]  ;;  %v9676_v37 = vld [vmem:[#allocation120_spill] sm:$0xff]  ;;  %3452 = vtanh.f32 %v1867_v55  ;;  %v9681_v23 = vld [vmem:[#allocation121_spill] sm:$0xff] }
 0x20e   :  { %v6860_v51 = vmul.f32 0.5, %v9666_v10  ;;  %v6865_v21 = vmul.f32 0.5, %v9668_v53  ;;  %v9675_v34 = vsub.f32 %v9673_v25, %v9674_v30  ;;  %v9677_v28 = vld [vmem:[#allocation32_spill] sm:$0xff]  ;;  %v9680_v49 = vsub.f32 %v6108_v9, %v9679_v8  ;;  %v9684_v25 = vld [vmem:[#allocation17_spill] sm:$0xff] }
 0x20f   :  { %v6872_v58 = vmul.f32 0.5, %v9672_v63  ;;  %v9678_v10 = vsub.f32 %v9676_v37, %v9677_v28  ;;  %v9682_v32 = vld [vmem:[#allocation124_spill] sm:$0xff]  ;;  %v9685_v30 = vld [vmem:[#allocation125_spill] sm:$0xff]  ;;  %3454 = vtanh.f32 %v1868_v36  ;;  %v6901_v37 = vpop.eup %3430 }
 0x210   :  { %v6877_v42 = vmul.f32 0.5, %v9675_v34  ;;  %v6889_v53 = vmul.f32 0.5, %v9680_v49  ;;  %v9683_v63 = vsub.f32 %v9681_v23, %v9682_v32  ;;  %v9686_v34 = vsub.f32 %v9684_v25, %v9685_v30  ;;  %v9687_v55 = vld [vmem:[#allocation37_spill] sm:$0xff]  ;;  %v9691_v23 = vld [vmem:[#allocation126_spill] sm:$0xff]  ;;  %v6918_v25 = vpop.eup %3432  ;;  %v9693_v36 = vld [vmem:[#allocation128_spill] sm:$0xff] }
 0x211   :  { %v6882_v50 = vmul.f32 0.5, %v9678_v10  ;;  %v9688_v28 = vsub.f32 %v6129_v29, %v9687_v55  ;;  %v9689_v9 = vld [vmem:[#allocation113_spill] sm:$0xff]  ;;  %v9692_v32 = vsub.f32 %v6143_v41, %v9691_v23  ;;  %3456 = vtanh.f32 %v1869_v27  ;;  %v6935_v41 = vpop.eup %3434  ;;  %v9700_v27 = vld [vmem:[#allocation42_spill] sm:$0xff] }
 0x212   :  { %v6894_v2 = vmul.f32 0.5, %v9683_v63  ;;  %v6899_v17 = vmul.f32 0.5, %v9686_v34  ;;  %v9690_v8 = vsub.f32 %v6136_v0, %v9689_v9  ;;  %v9694_v30 = vsub.f32 %v6150_v4, %v9693_v36  ;;  %v9695_v29 = vld [vmem:[#allocation117_spill] sm:$0xff]  ;;  %9699 = vst [vmem:[#allocation63_spill] sm:$0xff] %v6935_v41  ;;  %v9702_v4 = vld [vmem:[#allocation118_spill] sm:$0xff] }
 0x213   :  { %v6906_v10 = vmul.f32 0.5, %v9688_v28  ;;  %v6916_v63 = vmul.f32 0.5, %v9692_v32  ;;  %v9696_v55 = vsub.f32 %v6157_v33, %v9695_v29  ;;  %v9697_v0 = vld [vmem:[#allocation129_spill] sm:$0xff]  ;;  %3458 = vtanh.f32 %v1870_v38  ;;  %v9704_v33 = vld [vmem:[#allocation130_spill] sm:$0xff] }
 0x214   :  { %v6911_v49 = vmul.f32 0.5, %v9690_v8  ;;  %v6923_v34 = vmul.f32 0.5, %v9694_v30  ;;  %v9698_v9 = vsub.f32 %v6164_v47, %v9697_v0  ;;  %v9701_v23 = vsub.f32 %v6171_v24, %v9700_v27  ;;  %v6952_v47 = vpop.eup %3436  ;;  %v9707_v38 = vld [vmem:[#allocation21_spill] sm:$0xff]  ;;  %v9709_v24 = vld [vmem:[#allocation134_spill] sm:$0xff] }
 0x215   :  { %v6928_v28 = vmul.f32 0.5, %v9696_v55  ;;  %v9703_v36 = vsub.f32 %v6178_v11, %v9702_v4  ;;  %v9705_v29 = vsub.f32 %v6185_v57, %v9704_v33  ;;  %3460 = vtanh.f32 %v1871_v19  ;;  %9706 = vst [vmem:[#allocation79_spill] sm:$0xff] %v6952_v47  ;;  %v9711_v11 = vld [vmem:[#allocation122_spill] sm:$0xff]  ;;  %v6969_v57 = vpop.eup %3438  ;;  %v9714_v19 = vld [vmem:[#allocation135_spill] sm:$0xff] }
 0x216   :  { %v6933_v8 = vmul.f32 0.5, %v9698_v9  ;;  %v6940_v32 = vmul.f32 0.5, %v9701_v23  ;;  %v9708_v0 = vsub.f32 %v6192_v22, %v9707_v38  ;;  %v9710_v27 = vsub.f32 %v6199_v46, %v9709_v24  ;;  %9713 = vst [vmem:[#allocation68_spill] sm:$0xff] %v6969_v57  ;;  %v9716_v22 = vld [vmem:[#allocation47_spill] sm:$0xff]  ;;  %v9720_v24 = vld [vmem:[#allocation136_spill] sm:$0xff] }
 0x217   :  { %v6945_v30 = vmul.f32 0.5, %v9703_v36  ;;  %v6950_v55 = vmul.f32 0.5, %v9705_v29  ;;  %v9712_v4 = vsub.f32 %v6206_v26, %v9711_v11  ;;  %3462 = vtanh.f32 %v1872_v39  ;;  %v9719_v46 = vld [vmem:[#allocation123_spill] sm:$0xff]  ;;  %v6986_v26 = vpop.eup %3440  ;;  %v9724_v11 = vld [vmem:[#allocation22_spill] sm:$0xff] }
 0x218   :  { %v6957_v9 = vmul.f32 0.5, %v9708_v0  ;;  %v6962_v23 = vmul.f32 0.5, %v9710_v27  ;;  %v9715_v33 = vsub.f32 %v6213_v40, %v9714_v19  ;;  %v9717_v38 = vsub.f32 %v6220_v6, %v9716_v22  ;;  %9722 = vst [vmem:[#allocation69_spill] sm:$0xff] %v6986_v26  ;;  %v9723_v39 = vld [vmem:[#allocation139_spill] sm:$0xff]  ;;  %v9727_v40 = vld [vmem:[#allocation140_spill] sm:$0xff]  ;;  %v9732_v22 = vld [vmem:[#allocation141_spill] sm:$0xff] }
 0x219   :  { %v6967_v36 = vmul.f32 0.5, %v9712_v4  ;;  %v9721_v27 = vsub.f32 %v9719_v46, %v9720_v24  ;;  %3464 = vtanh.f32 %v1873_v20  ;;  %v9725_v4 = vsub.f32 %v9723_v39, %v9724_v11  ;;  %v9728_v19 = vld [vmem:[#allocation52_spill] sm:$0xff]  ;;  %v9731_v6 = vld [vmem:[#allocation127_spill] sm:$0xff]  ;;  %v7003_v46 = vpop.eup %3442  ;;  %v9740_v11 = vld [vmem:[#allocation57_spill] sm:$0xff] }
 0x21a   :  { %v6974_v29 = vmul.f32 0.5, %v9715_v33  ;;  %v6979_v0 = vmul.f32 0.5, %v9717_v38  ;;  %v9729_v33 = vsub.f32 %v9727_v40, %v9728_v19  ;;  %v9733_v38 = vsub.f32 %v9731_v6, %v9732_v22  ;;  %9734 = vst [vmem:[#allocation86_spill] sm:$0xff] %v7003_v46  ;;  %v9735_v20 = vld [vmem:[#allocation143_spill] sm:$0xff]  ;;  %v9736_v24 = vld [vmem:[#allocation132_spill] sm:$0xff]  ;;  %v9743_v40 = vld [vmem:[#allocation133_spill] sm:$0xff]  ;;  %v7020_v6 = vpop.eup %3444 }
 0x21b   :  { %v6984_v47 = vmul.f32 0.5, %v9721_v27  ;;  %v6991_v57 = vmul.f32 0.5, %v9725_v4  ;;  %3466 = vtanh.f32 %v1874_v62  ;;  %v9737_v27 = vsub.f32 %v9735_v20, %v9736_v24  ;;  %v9739_v39 = vld [vmem:[#allocation144_spill] sm:$0xff]  ;;  %v9744_v19 = vld [vmem:[#allocation145_spill] sm:$0xff] }
 0x21c   :  { %9718 = vst [vmem:[#allocation84_spill] sm:$0xff] %v6979_v0  ;;  %v6996_v41 = vmul.f32 0.5, %v9729_v33  ;;  %v7001_v0 = vmul.f32 0.5, %v9733_v38  ;;  %v9741_v4 = vsub.f32 %v9739_v39, %v9740_v11  ;;  %v9745_v33 = vsub.f32 %v9743_v40, %v9744_v19  ;;  %v9746_v62 = vld [vmem:[#allocation25_spill] sm:$0xff]  ;;  %v9747_v22 = vld [vmem:[#allocation148_spill] sm:$0xff]  ;;  %v9754_v39 = vld [vmem:[#allocation62_spill] sm:$0xff] }
 0x21d   :  { %9726 = vst [vmem:[#allocation85_spill] sm:$0xff] %v6991_v57  ;;  %v7008_v26 = vmul.f32 0.5, %v9737_v27  ;;  %3468 = vtanh.f32 %v1875_v13  ;;  %v9748_v38 = vsub.f32 %v9746_v62, %v9747_v22  ;;  %v9750_v20 = vld [vmem:[#allocation137_spill] sm:$0xff]  ;;  %v9755_v11 = vld [vmem:[#allocation138_spill] sm:$0xff]  ;;  %v7038_v13 = vpop.eup %3446 }
 0x21e   :  { %9730 = vst [vmem:[#allocation70_spill] sm:$0xff] %v6996_v41  ;;  %v7013_v57 = vmul.f32 0.5, %v9741_v4  ;;  %v7018_v41 = vmul.f32 0.5, %v9745_v33  ;;  %v9751_v24 = vld [vmem:[#allocation149_spill] sm:$0xff]  ;;  %v9756_v4 = vsub.f32 %v9754_v39, %v9755_v11  ;;  %3470 = vtanh.f32 %v6809_v54  ;;  %v9758_v40 = vld [vmem:[#allocation150_spill] sm:$0xff]  ;;  %v7056_v54 = vpop.eup %3448  ;;  %v9770_v11 = vld [vmem:[#allocation156_spill] sm:$0xff] }
 0x21f   :  { %9738 = vst [vmem:[#allocation91_spill] sm:$0xff] %v7008_v26  ;;  %v7025_v46 = vmul.f32 0.5, %v9748_v38  ;;  %v9752_v27 = vsub.f32 %v9750_v20, %v9751_v24  ;;  %v9759_v19 = vld [vmem:[#allocation154_spill] sm:$0xff]  ;;  %v9763_v38 = vld [vmem:[#allocation155_spill] sm:$0xff]  ;;  %3472 = vtanh.f32 %v6814_v3  ;;  %v7074_v3 = vpop.eup %3450 }
 0x220   :  { %9742 = vst [vmem:[#allocation75_spill] sm:$0xff] %v7013_v57  ;;  %v7035_v57 = vmul.f32 0.5, %v9756_v4  ;;  %v9760_v33 = vsub.f32 %v9758_v40, %v9759_v19  ;;  %v9762_v22 = vld [vmem:[#allocation26_spill] sm:$0xff]  ;;  %v9766_v24 = vld [vmem:[#allocation67_spill] sm:$0xff]  ;;  %3474 = vtanh.f32 %v6821_v35  ;;  %v7092_v35 = vpop.eup %3452 }
 0x221   :  { %9749 = vst [vmem:[#allocation92_spill] sm:$0xff] %v7025_v46  ;;  %v7030_v26 = vmul.f32 0.5, %v9752_v27  ;;  %v9764_v46 = vsub.f32 %v9762_v22, %v9763_v38  ;;  %v9767_v27 = vld [vmem:[#allocation142_spill] sm:$0xff]  ;;  %v9779_v38 = vld [vmem:[#allocation147_spill] sm:$0xff]  ;;  %3476 = vtanh.f32 %v6826_v1  ;;  %v7110_v1 = vpop.eup %3454 }
 0x222   :  { %9757 = vst [vmem:[#allocation93_spill] sm:$0xff] %v7035_v57  ;;  %v7043_v62 = vmul.f32 0.5, %v9760_v33  ;;  %v9771_v4 = vld [vmem:[#allocation158_spill] sm:$0xff]  ;;  %v9775_v33 = vld [vmem:[#allocation159_spill] sm:$0xff]  ;;  %3478 = vtanh.f32 %v6831_v14  ;;  %v7128_v14 = vpop.eup %3456 }
 0x223   :  { %9753 = vst [vmem:[#allocation76_spill] sm:$0xff] %v7030_v26  ;;  %v7048_v20 = vmul.f32 0.5, %v9764_v46  ;;  %v9768_v26 = vsub.f32 %v9766_v24, %v9767_v27  ;;  %v9772_v57 = vsub.f32 %v9770_v11, %v9771_v4  ;;  %v9774_v19 = vld [vmem:[#allocation146_spill] sm:$0xff]  ;;  %v9783_v27 = vld [vmem:[#allocation151_spill] sm:$0xff]  ;;  %3480 = vtanh.f32 %v6838_v12 }
 0x224   :  { %9761 = vst [vmem:[#allocation81_spill] sm:$0xff] %v7043_v62  ;;  %v9776_v62 = vsub.f32 %v9774_v19, %v9775_v33  ;;  %v9778_v46 = vld [vmem:[#allocation74_spill] sm:$0xff]  ;;  %v9787_v4 = vld [vmem:[#allocation163_spill] sm:$0xff]  ;;  %v9791_v33 = vld [vmem:[#allocation153_spill] sm:$0xff]  ;;  %3482 = vtanh.f32 %v6843_v61 }
 0x225   :  { %9765 = vst [vmem:[#allocation96_spill] sm:$0xff] %v7048_v20  ;;  %v7053_v39 = vmul.f32 0.5, %v9768_v26  ;;  %v7061_v40 = vmul.f32 0.5, %v9772_v57  ;;  %v9780_v20 = vsub.f32 %v9778_v46, %v9779_v38  ;;  %v9782_v26 = vld [vmem:[#allocation160_spill] sm:$0xff]  ;;  %v9786_v57 = vld [vmem:[#allocation162_spill] sm:$0xff]  ;;  %v9822_v12 = vld [vmem:[#allocation183_spill] sm:$0xff]  ;;  %3484 = vtanh.f32 %v6848_v56 }
 0x226   :  { %v7066_v22 = vmul.f32 0.5, %v9776_v62  ;;  %v9790_v62 = vld [vmem:[#allocation80_spill] sm:$0xff]  ;;  %3486 = vtanh.f32 %v6855_v59 }
 0x227   :  { %9769 = vst [vmem:[#allocation82_spill] sm:$0xff] %v7053_v39  ;;  %9773 = vst [vmem:[#allocation97_spill] sm:$0xff] %v7061_v40  ;;  %v7071_v24 = vmul.f32 0.5, %v9780_v20  ;;  %v9784_v39 = vsub.f32 %v9782_v26, %v9783_v27  ;;  %v9788_v40 = vsub.f32 %v9786_v57, %v9787_v4  ;;  %v9794_v20 = vld [vmem:[#allocation152_spill] sm:$0xff]  ;;  %v9799_v27 = vld [vmem:[#allocation167_spill] sm:$0xff]  ;;  %3488 = vtanh.f32 %v6860_v51 }
 0x228   :  { %9777 = vst [vmem:[#allocation14_spill] sm:$0xff] %v7066_v22  ;;  %v9792_v22 = vsub.f32 %v9790_v62, %v9791_v33  ;;  %v9795_v38 = vld [vmem:[#allocation164_spill] sm:$0xff]  ;;  %v9802_v4 = vld [vmem:[#allocation179_spill] sm:$0xff] }
 0x229   :  { %9781 = vst [vmem:[#allocation83_spill] sm:$0xff] %v7071_v24  ;;  %v7079_v11 = vmul.f32 0.5, %v9784_v39  ;;  %v7084_v19 = vmul.f32 0.5, %v9788_v40  ;;  %v9796_v24 = vsub.f32 %v9794_v20, %v9795_v38  ;;  %v9798_v39 = vld [vmem:[#allocation166_spill] sm:$0xff]  ;;  %v9801_v40 = vld [vmem:[#allocation31_spill] sm:$0xff]  ;;  %v9805_v33 = vld [vmem:[#allocation180_spill] sm:$0xff] }
 0x22a   :  { %v7089_v46 = vmul.f32 0.5, %v9792_v22  ;;  %v9804_v22 = vld [vmem:[#allocation87_spill] sm:$0xff]  ;;  %v9808_v38 = vld [vmem:[#allocation181_spill] sm:$0xff] }
 0x22b   :  { %9785 = vst [vmem:[#allocation98_spill] sm:$0xff] %v7079_v11  ;;  %9789 = vst [vmem:[#allocation88_spill] sm:$0xff] %v7084_v19  ;;  %v7097_v26 = vmul.f32 0.5, %v9796_v24  ;;  %v9800_v11 = vsub.f32 %v9798_v39, %v9799_v27  ;;  %v9803_v19 = vsub.f32 %v9801_v40, %v9802_v4  ;;  %v9807_v24 = vld [vmem:[#allocation178_spill] sm:$0xff] }
 0x22c   :  { %9793 = vst [vmem:[#allocation103_spill] sm:$0xff] %v7089_v46  ;;  %v9806_v46 = vsub.f32 %v9804_v22, %v9805_v33 }
 0x22d   :  { %9797 = vst [vmem:[#allocation89_spill] sm:$0xff] %v7097_v26  ;;  %v7102_v57 = vmul.f32 0.5, %v9800_v11  ;;  %v7107_v62 = vmul.f32 0.5, %v9803_v19  ;;  %v9809_v26 = vsub.f32 %v9807_v24, %v9808_v38  ;;  %v9810_v11 = vsub.f32 %v6381_v16, %v6394_v44  ;;  %v9812_v19 = vld [vmem:[#allocation157_spill] sm:$0xff]  ;;  %v9819_v24 = vld [vmem:[#allocation187_spill] sm:$0xff]  ;;  %v7146_v44 = vpop.eup %3458 }
 0x22e   :  { %v7115_v20 = vmul.f32 0.5, %v9806_v46  ;;  %v9813_v40 = vsub.f32 %v6392_v48, %v9812_v19  ;;  %v9815_v46 = vld [vmem:[#allocation186_spill] sm:$0xff]  ;;  %v9826_v19 = vld [vmem:[#allocation184_spill] sm:$0xff]  ;;  %v7164_v61 = vpop.eup %3460  ;;  %3490 = vtanh.f32 %v6865_v21 }
 0x22f   :  { %v7120_v39 = vmul.f32 0.5, %v9809_v26  ;;  %v7125_v27 = vmul.f32 0.5, %v9810_v11  ;;  %v9816_v22 = vsub.f32 %v6401_v18, %v9815_v46  ;;  %v9818_v26 = vld [vmem:[#allocation182_spill] sm:$0xff]  ;;  %v9823_v11 = vld [vmem:[#allocation188_spill] sm:$0xff]  ;;  %v7182_v56 = vpop.eup %3462  ;;  %3492 = vtanh.f32 %v6872_v58 }
 0x230   :  { %v7133_v4 = vmul.f32 0.5, %v9813_v40  ;;  %v9820_v38 = vsub.f32 %v9818_v26, %v9819_v24  ;;  %v9827_v40 = vld [vmem:[#allocation189_spill] sm:$0xff]  ;;  %v9830_v46 = vld [vmem:[#allocation168_spill] sm:$0xff]  ;;  %v7200_v59 = vpop.eup %3464  ;;  %3494 = vtanh.f32 %v6877_v42 }
 0x231   :  { %9811 = vst [vmem:[#allocation104_spill] sm:$0xff] %v7125_v27  ;;  %v7138_v33 = vmul.f32 0.5, %v9816_v22  ;;  %v9824_v27 = vsub.f32 %v9822_v12, %v9823_v11  ;;  %v9831_v22 = vld [vmem:[#allocation190_spill] sm:$0xff]  ;;  %v9834_v24 = vld [vmem:[#allocation185_spill] sm:$0xff]  ;;  %v9839_v11 = vld [vmem:[#allocation195_spill] sm:$0xff]  ;;  %v7218_v51 = vpop.eup %3466  ;;  %3496 = vtanh.f32 %v6882_v50 }
 0x232   :  { %9814 = vst [vmem:[#allocation18_spill] sm:$0xff] %v7133_v4  ;;  %v7143_v16 = vmul.f32 0.5, %v9820_v38  ;;  %v9828_v4 = vsub.f32 %v9826_v19, %v9827_v40  ;;  %v9835_v38 = vld [vmem:[#allocation191_spill] sm:$0xff]  ;;  %v9843_v40 = vld [vmem:[#allocation170_spill] sm:$0xff]  ;;  %v7236_v21 = vpop.eup %3468  ;;  %3498 = vtanh.f32 %v6889_v53 }
 0x233   :  { %9817 = vst [vmem:[#allocation90_spill] sm:$0xff] %v7138_v33  ;;  %v7151_v48 = vmul.f32 0.5, %v9824_v27  ;;  %v9832_v33 = vsub.f32 %v9830_v46, %v9831_v22  ;;  %v9838_v27 = vld [vmem:[#allocation169_spill] sm:$0xff]  ;;  %v9847_v22 = vld [vmem:[#allocation196_spill] sm:$0xff]  ;;  %v7254_v58 = vpop.eup %3470  ;;  %3500 = vtanh.f32 %v6894_v2  ;;  %v9920_v53 = vld [vmem:[#allocation19_spill] sm:$0xff] }
 0x234   :  { %9821 = vst [vmem:[#allocation105_spill] sm:$0xff] %v7143_v16  ;;  %v7156_v18 = vmul.f32 0.5, %v9828_v4  ;;  %v9836_v16 = vsub.f32 %v9834_v24, %v9835_v38  ;;  %v9842_v4 = vld [vmem:[#allocation192_spill] sm:$0xff]  ;;  %v9851_v38 = vld [vmem:[#allocation197_spill] sm:$0xff]  ;;  %v7272_v42 = vpop.eup %3472  ;;  %3502 = vtanh.f32 %v6899_v17 }
 0x235   :  { %9825 = vst [vmem:[#allocation110_spill] sm:$0xff] %v7151_v48  ;;  %v7161_v26 = vmul.f32 0.5, %v9832_v33  ;;  %v9840_v48 = vsub.f32 %v9838_v27, %v9839_v11  ;;  %v9846_v33 = vld [vmem:[#allocation193_spill] sm:$0xff]  ;;  %v9855_v11 = vld [vmem:[#allocation198_spill] sm:$0xff]  ;;  %v7290_v50 = vpop.eup %3474  ;;  %3504 = vtanh.f32 %v6906_v10  ;;  %v9931_v17 = vld [vmem:[#allocation40_spill] sm:$0xff] }
 0x236   :  { %9829 = vst [vmem:[#allocation111_spill] sm:$0xff] %v7156_v18  ;;  %v7169_v12 = vmul.f32 0.5, %v9836_v16  ;;  %v9844_v18 = vsub.f32 %v9842_v4, %v9843_v40  ;;  %v9850_v16 = vld [vmem:[#allocation194_spill] sm:$0xff]  ;;  %v9859_v40 = vld [vmem:[#allocation171_spill] sm:$0xff]  ;;  %3506 = vtanh.f32 %v6911_v49 }
 0x237   :  { %9833 = vst [vmem:[#allocation23_spill] sm:$0xff] %v7161_v26  ;;  %v7174_v19 = vmul.f32 0.5, %v9840_v48  ;;  %v9848_v26 = vsub.f32 %v9846_v33, %v9847_v22  ;;  %v9854_v48 = vld [vmem:[#allocation94_spill] sm:$0xff]  ;;  %v9863_v22 = vld [vmem:[#allocation201_spill] sm:$0xff] }
 0x238   :  { %9837 = vst [vmem:[#allocation95_spill] sm:$0xff] %v7169_v12  ;;  %v7179_v46 = vmul.f32 0.5, %v9844_v18  ;;  %v9852_v12 = vsub.f32 %v9850_v16, %v9851_v38  ;;  %v9858_v18 = vld [vmem:[#allocation161_spill] sm:$0xff]  ;;  %v9867_v38 = vld [vmem:[#allocation202_spill] sm:$0xff] }
 0x239   :  { %9841 = vst [vmem:[#allocation112_spill] sm:$0xff] %v7174_v19  ;;  %v7187_v24 = vmul.f32 0.5, %v9848_v26  ;;  %v9856_v19 = vsub.f32 %v9854_v48, %v9855_v11  ;;  %v9862_v26 = vld [vmem:[#allocation199_spill] sm:$0xff]  ;;  %v9948_v49 = vld [vmem:[#allocation66_spill] sm:$0xff] }
 0x23a   :  { %9845 = vst [vmem:[#allocation100_spill] sm:$0xff] %v7179_v46  ;;  %v7192_v27 = vmul.f32 0.5, %v9852_v12  ;;  %v9860_v46 = vsub.f32 %v9858_v18, %v9859_v40  ;;  %v9866_v12 = vld [vmem:[#allocation200_spill] sm:$0xff]  ;;  %v9871_v11 = vld [vmem:[#allocation203_spill] sm:$0xff] }
 0x23b   :  { %9849 = vst [vmem:[#allocation114_spill] sm:$0xff] %v7187_v24  ;;  %v7197_v4 = vmul.f32 0.5, %v9856_v19  ;;  %v9864_v24 = vsub.f32 %v9862_v26, %v9863_v22  ;;  %v9870_v19 = vld [vmem:[#allocation173_spill] sm:$0xff]  ;;  %v9875_v40 = vld [vmem:[#allocation204_spill] sm:$0xff] }
 0x23c   :  { %9853 = vst [vmem:[#allocation101_spill] sm:$0xff] %v7192_v27  ;;  %v7205_v33 = vmul.f32 0.5, %v9860_v46  ;;  %v9868_v27 = vsub.f32 %v9866_v12, %v9867_v38  ;;  %v9874_v46 = vld [vmem:[#allocation99_spill] sm:$0xff]  ;;  %v9878_v22 = vld [vmem:[#allocation205_spill] sm:$0xff]  ;;  %v9882_v38 = vld [vmem:[#allocation206_spill] sm:$0xff] }
 0x23d   :  { %9857 = vst [vmem:[#allocation115_spill] sm:$0xff] %v7197_v4  ;;  %v7210_v16 = vmul.f32 0.5, %v9864_v24  ;;  %v9872_v4 = vsub.f32 %v9870_v19, %v9871_v11  ;;  %v9877_v24 = vld [vmem:[#allocation165_spill] sm:$0xff]  ;;  %v9886_v11 = vld [vmem:[#allocation11_spill] sm:$0xff] }
 0x23e   :  { %9861 = vst [vmem:[#allocation27_spill] sm:$0xff] %v7205_v33  ;;  %v7215_v48 = vmul.f32 0.5, %v9868_v27  ;;  %v9876_v33 = vsub.f32 %v9874_v46, %v9875_v40  ;;  %v9881_v27 = vld [vmem:[#allocation174_spill] sm:$0xff] }
 0x23f   :  { %9865 = vst [vmem:[#allocation102_spill] sm:$0xff] %v7210_v16  ;;  %v7223_v18 = vmul.f32 0.5, %v9872_v4  ;;  %v9879_v16 = vsub.f32 %v9877_v24, %v9878_v22  ;;  %v9885_v4 = vld [vmem:[#allocation175_spill] sm:$0xff] }
 0x240   :  { %9869 = vst [vmem:[#allocation116_spill] sm:$0xff] %v7215_v48  ;;  %v7228_v26 = vmul.f32 0.5, %v9876_v33  ;;  %v9883_v48 = vsub.f32 %v9881_v27, %v9882_v38  ;;  %v9889_v33 = vld [vmem:[#allocation172_spill] sm:$0xff]  ;;  %v9896_v38 = vld [vmem:[#allocation177_spill] sm:$0xff] }
 0x241   :  { %9873 = vst [vmem:[#allocation107_spill] sm:$0xff] %v7223_v18  ;;  %v7233_v12 = vmul.f32 0.5, %v9879_v16  ;;  %v9887_v18 = vsub.f32 %v9885_v4, %v9886_v11  ;;  %v9890_v40 = vsub.f32 %v6537_v52, %v9889_v33  ;;  %v9892_v16 = vld [vmem:[#allocation106_spill] sm:$0xff]  ;;  %v9900_v11 = vld [vmem:[#allocation20_spill] sm:$0xff] }
 0x242   :  { %v7241_v19 = vmul.f32 0.5, %v9883_v48  ;;  %v9893_v22 = vsub.f32 %v6551_v7, %v9892_v16  ;;  %v9895_v48 = vld [vmem:[#allocation36_spill] sm:$0xff]  ;;  %v9907_v16 = vsub.f32 %v6584_v45, %v6588_v15  ;;  %v2098_v15 = vmul.f32 0.5, %v6714_v43 }
 0x243   :  { %9880 = vst [vmem:[#allocation119_spill] sm:$0xff] %v7233_v12  ;;  %v7246_v46 = vmul.f32 0.5, %v9887_v18  ;;  %v7251_v24 = vmul.f32 0.5, %v9890_v40  ;;  %v9899_v18 = vld [vmem:[#allocation41_spill] sm:$0xff]  ;;  %v9903_v33 = vld [vmem:[#allocation12_spill] sm:$0xff] }
 0x244   :  { %9884 = vst [vmem:[#allocation108_spill] sm:$0xff] %v7241_v19  ;;  %v7259_v27 = vmul.f32 0.5, %v9893_v22  ;;  %v9897_v19 = vsub.f32 %v9895_v48, %v9896_v38  ;;  %v9904_v40 = vld [vmem:[#allocation13_spill] sm:$0xff]  ;;  %v7282_v22 = vmul.f32 0.5, %v9907_v16  ;;  %v9910_v48 = vld [vmem:[#allocation16_spill] sm:$0xff]  ;;  %v7304_v16 = vpop.eup %3476  ;;  %3508 = vtanh.f32 %v6916_v63 }
 0x245   :  { %9888 = vst [vmem:[#allocation120_spill] sm:$0xff] %v7246_v46  ;;  %9891 = vst [vmem:[#allocation32_spill] sm:$0xff] %v7251_v24  ;;  %v9901_v46 = vsub.f32 %v9899_v18, %v9900_v11  ;;  %v9905_v24 = vsub.f32 %v9903_v33, %v9904_v40  ;;  %v9929_v43 = vld [vmem:[#allocation64_spill] sm:$0xff] }
 0x246   :  { %9894 = vst [vmem:[#allocation109_spill] sm:$0xff] %v7259_v27  ;;  %v7264_v4 = vmul.f32 0.5, %v9897_v19  ;;  %9908 = vst [vmem:[#allocation125_spill] sm:$0xff] %v7282_v22  ;;  %v9909_v19 = vld [vmem:[#allocation131_spill] sm:$0xff] }
 0x247   :  { %v7269_v52 = vmul.f32 0.5, %v9901_v46  ;;  %v7277_v7 = vmul.f32 0.5, %v9905_v24  ;;  %v9911_v38 = vsub.f32 %v9909_v19, %v9910_v48  ;;  %v9913_v46 = vld [vmem:[#allocation29_spill] sm:$0xff]  ;;  %v9916_v24 = vld [vmem:[#allocation30_spill] sm:$0xff]  ;;  %v9944_v27 = vld [vmem:[#allocation55_spill] sm:$0xff] }
 0x248   :  { %9898 = vst [vmem:[#allocation121_spill] sm:$0xff] %v7264_v4  ;;  %v9914_v11 = vsub.f32 %v6606_v5, %v9913_v46  ;;  %v9917_v40 = vsub.f32 %v6617_v60, %v9916_v24  ;;  %v9919_v19 = vld [vmem:[#allocation46_spill] sm:$0xff]  ;;  %v9923_v5 = vld [vmem:[#allocation48_spill] sm:$0xff]  ;;  %v7314_v60 = vpop.eup %3478  ;;  %v9925_v24 = vld [vmem:[#allocation35_spill] sm:$0xff]  ;;  %3510 = vtanh.f32 %v6923_v34 }
 0x249   :  { %9902 = vst [vmem:[#allocation124_spill] sm:$0xff] %v7269_v52  ;;  %9906 = vst [vmem:[#allocation17_spill] sm:$0xff] %v7277_v7  ;;  %v7287_v18 = vmul.f32 0.5, %v9911_v38  ;;  %v9921_v48 = vsub.f32 %v9919_v19, %v9920_v53  ;;  %v2099_v46 = vmul.f32 0.5, %v9923_v5  ;;  %v9930_v19 = vld [vmem:[#allocation65_spill] sm:$0xff]  ;;  %v9936_v7 = vld [vmem:[#allocation51_spill] sm:$0xff] }
 0x24a   :  { %v7295_v33 = vmul.f32 0.5, %v9914_v11  ;;  %v7300_v45 = vmul.f32 0.5, %v9917_v40  ;;  %v9924_v11 = vld [vmem:[#allocation61_spill] sm:$0xff]  ;;  %v9926_v40 = vld [vmem:[#allocation28_spill] sm:$0xff]  ;;  %v2102_v53 = vmul.f32 0.5, %v9930_v19 }
 0x24b   :  { %9912 = vst [vmem:[#allocation37_spill] sm:$0xff] %v7287_v18  ;;  %v7309_v38 = vmul.f32 0.5, %v9921_v48  ;;  %v9927_v2 = vsub.f32 %v9925_v24, %v9926_v40  ;;  %v2101_v18 = vmul.f32 0.5, %v9929_v43  ;;  %v7324_v48 = vpop.eup %3480  ;;  %v9939_v24 = vld [vmem:[#allocation53_spill] sm:$0xff]  ;;  %v9941_v43 = vld [vmem:[#allocation207_spill] sm:$0xff]  ;;  %3512 = vtanh.f32 %v6928_v28 }
 0x24c   :  { %9915 = vst [vmem:[#allocation113_spill] sm:$0xff] %v7295_v33  ;;  %9918 = vst [vmem:[#allocation126_spill] sm:$0xff] %v7300_v45  ;;  %v2100_v33 = vmul.f32 0.5, %v9924_v11  ;;  %v9935_v11 = vld [vmem:[#allocation33_spill] sm:$0xff]  ;;  %v2103_v10 = vmul.f32 0.5, %v9939_v24  ;;  %v7338_v40 = vpop.eup %3482  ;;  %v2227_v24 = vadd.f32 0.5, %v2099_v46  ;;  %3514 = vtanh.f32 %v6933_v8 }
 0x24d   :  { %9922 = vst [vmem:[#allocation128_spill] sm:$0xff] %v7309_v38  ;;  %v7319_v45 = vmul.f32 0.5, %v9927_v2  ;;  %v9932_v38 = vld [vmem:[#allocation44_spill] sm:$0xff]  ;;  %v9937_v52 = vsub.f32 %v9935_v11, %v9936_v7  ;;  %v9940_v2 = vld [vmem:[#allocation38_spill] sm:$0xff]  ;;  %v7351_v7 = vpop.eup %3484  ;;  %v2104_v11 = vmul.f32 0.5, %v9948_v49  ;;  %v2230_v63 = vadd.f32 0.5, %v2102_v53 }
 0x24e   :  { %v9933_v5 = vsub.f32 %v9931_v17, %v9932_v38  ;;  %v9942_v19 = vsub.f32 %v9940_v2, %v9941_v43  ;;  %v9945_v38 = vld [vmem:[#allocation208_spill] sm:$0xff]  ;;  %v9949_v2 = vld [vmem:[#allocation210_spill] sm:$0xff]  ;;  %v2231_v49 = vadd.f32 0.5, %v2103_v10  ;;  %3516 = vtanh.f32 %v6940_v32 }
 0x24f   :  { %9928 = vst [vmem:[#allocation117_spill] sm:$0xff] %v7319_v45  ;;  %v7334_v4 = vmul.f32 0.5, %v9937_v52  ;;  %v9946_v17 = vsub.f32 %v9944_v27, %v9945_v38  ;;  %v2226_v52 = vadd.f32 0.5, %v2098_v15  ;;  %v9950_v43 = vld [vmem:[#allocation212_spill] sm:$0xff]  ;;  %v2229_v27 = vadd.f32 0.5, %v2101_v18  ;;  %v9953_v38 = vld [vmem:[#allocation211_spill] sm:$0xff] }
 0x250   :  { %v7329_v22 = vmul.f32 0.5, %v9933_v5  ;;  %v7343_v45 = vmul.f32 0.5, %v9942_v19  ;;  %v9951_v19 = vsub.f32 %v9949_v2, %v9950_v43  ;;  %v9958_v2 = vld [vmem:[#allocation59_spill] sm:$0xff]  ;;  %v9959_v43 = vld [vmem:[#allocation213_spill] sm:$0xff]  ;;  %v9962_v18 = vld [vmem:[#allocation72_spill] sm:$0xff]  ;;  %v2232_v8 = vadd.f32 0.5, %v2104_v11 }
 0x251   :  { %9938 = vst [vmem:[#allocation42_spill] sm:$0xff] %v7334_v4  ;;  %v7348_v5 = vmul.f32 0.5, %v9946_v17  ;;  %v2228_v4 = vadd.f32 0.5, %v2100_v33  ;;  %v9954_v17 = vld [vmem:[#allocation60_spill] sm:$0xff]  ;;  %v9957_v33 = vld [vmem:[#allocation71_spill] sm:$0xff]  ;;  %v2106_v53 = vmul.f32 0.5, %v9962_v18 }
 0x252   :  { %9934 = vst [vmem:[#allocation129_spill] sm:$0xff] %v7329_v22  ;;  %9943 = vst [vmem:[#allocation118_spill] sm:$0xff] %v7343_v45  ;;  %v7355_v22 = vpop.eup %3486  ;;  %v7360_v45 = vmul.f32 0.5, %v9951_v19  ;;  %v9955_v34 = vsub.f32 %v9953_v38, %v9954_v17  ;;  %v2105_v46 = vmul.f32 0.5, %v9957_v33  ;;  %v9960_v19 = vsub.f32 %v9958_v2, %v9959_v43  ;;  %v9966_v33 = vld [vmem:[#allocation58_spill] sm:$0xff] }
 0x253   :  { %9947 = vst [vmem:[#allocation130_spill] sm:$0xff] %v7348_v5  ;;  %v7363_v15 = vpop.eup %3488  ;;  %3518 = vtanh.f32 %v6945_v30  ;;  %v7386_v17 = vadd.f32 1e-10, %v2227_v24  ;;  %v7388_v10 = vadd.f32 1e-10, %v2228_v4  ;;  %v2107_v2 = vmul.f32 0.5, %v9966_v33 }
 0x254   :  { %9952 = vst [vmem:[#allocation21_spill] sm:$0xff] %v7360_v45  ;;  %v7368_v5 = vmul.f32 0.5, %v9955_v34  ;;  %v7372_v12 = vpop.eup %3490  ;;  %v7377_v28 = vmul.f32 0.5, %v9960_v19  ;;  %v7381_v45 = vadd.f32 1e-10, %v2226_v52  ;;  %3520 = vtanh.f32 %v6950_v55  ;;  %v9969_v30 = vld [vmem:[#allocation73_spill] sm:$0xff] }
 0x255   :  { %v7383_v38 = vpop.eup %3492  ;;  %9964 = vst [vmem:[#allocation47_spill] sm:$0xff] %v7386_v17  ;;  %9965 = vst [vmem:[#allocation123_spill] sm:$0xff] %v7388_v10  ;;  %v7394_v32 = vadd.f32 1e-10, %v2229_v27  ;;  %v7396_v43 = vadd.f32 1e-10, %v2230_v63  ;;  %3522 = vtanh.f32 %v6957_v9 }
 0x256   :  { %9956 = vst [vmem:[#allocation134_spill] sm:$0xff] %v7368_v5  ;;  %9961 = vst [vmem:[#allocation122_spill] sm:$0xff] %v7377_v28  ;;  %v7390_v34 = vpop.eup %3494  ;;  %v2108_v11 = vmul.f32 0.5, %v9969_v30  ;;  %v2233_v24 = vadd.f32 0.5, %v2105_v46  ;;  %v7402_v19 = vadd.f32 1e-10, %v2231_v49  ;;  %3524 = vtanh.f32 %v6962_v23 }
 0x257   :  { %9963 = vst [vmem:[#allocation135_spill] sm:$0xff] %v7381_v45  ;;  %9967 = vst [vmem:[#allocation136_spill] sm:$0xff] %v7394_v32  ;;  %v7398_v52 = vpop.eup %3496  ;;  %v9971_v55 = vld [vmem:[#allocation77_spill] sm:$0xff]  ;;  %v9972_v33 = vld [vmem:[#allocation78_spill] sm:$0xff]  ;;  %v2234_v32 = vadd.f32 0.5, %v2106_v53  ;;  %3526 = vtanh.f32 %v6967_v36  ;;  %v2111_v9 = vmul.f32 0.5, %v6884_v31 }
 0x258   :  { %9968 = vst [vmem:[#allocation139_spill] sm:$0xff] %v7396_v43  ;;  %9970 = vst [vmem:[#allocation22_spill] sm:$0xff] %v7402_v19  ;;  %v7404_v4 = vpop.eup %3498  ;;  %v2109_v18 = vmul.f32 0.5, %v9971_v55  ;;  %v2110_v27 = vmul.f32 0.5, %v9972_v33  ;;  %v2112_v30 = vmul.f32 0.5, %v6901_v37  ;;  %3528 = vtanh.f32 %v6974_v29  ;;  %v9974_v55 = vld [vmem:[#allocation63_spill] sm:$0xff] }
 0x259   :  { %v7409_v63 = vpop.eup %3500  ;;  %v7414_v46 = vadd.f32 1e-10, %v2232_v8  ;;  %v2113_v23 = vmul.f32 0.5, %v6918_v25  ;;  %v2114_v19 = vmul.f32 0.5, %v9974_v55  ;;  %v2235_v33 = vadd.f32 0.5, %v2107_v2  ;;  %v9975_v43 = vld [vmem:[#allocation84_spill] sm:$0xff] }
 0x25a   :  { %v7416_v49 = vpop.eup %3502  ;;  %3530 = vtanh.f32 %v9975_v43  ;;  %v9976_v36 = vld [vmem:[#allocation79_spill] sm:$0xff]  ;;  %v2236_v31 = vadd.f32 0.5, %v2108_v11  ;;  %v7425_v17 = vadd.f32 1e-10, %v2233_v24  ;;  %v2237_v8 = vadd.f32 0.5, %v2109_v18  ;;  %v9979_v2 = vld [vmem:[#allocation85_spill] sm:$0xff] }
 0x25b   :  { %9973 = vst [vmem:[#allocation140_spill] sm:$0xff] %v7414_v46  ;;  %v7421_v53 = vpop.eup %3504  ;;  %v2115_v10 = vmul.f32 0.5, %v9976_v36  ;;  %3532 = vtanh.f32 %v6984_v47  ;;  %v2238_v29 = vadd.f32 0.5, %v2110_v27  ;;  %v7430_v46 = vadd.f32 1e-10, %v2234_v32  ;;  %v9980_v55 = vld [vmem:[#allocation68_spill] sm:$0xff] }
 0x25c   :  { %9977 = vst [vmem:[#allocation52_spill] sm:$0xff] %v7425_v17  ;;  %v7427_v37 = vpop.eup %3506  ;;  %3534 = vtanh.f32 %v9979_v2  ;;  %v2116_v45 = vmul.f32 0.5, %v9980_v55  ;;  %v2239_v43 = vadd.f32 0.5, %v2111_v9  ;;  %v2240_v28 = vadd.f32 0.5, %v2112_v30  ;;  %v9981_v11 = vld [vmem:[#allocation70_spill] sm:$0xff]  ;;  %v9983_v32 = vld [vmem:[#allocation69_spill] sm:$0xff] }
 0x25d   :  { %9978 = vst [vmem:[#allocation127_spill] sm:$0xff] %v7430_v46  ;;  %v7432_v25 = vpop.eup %3508  ;;  %3536 = vtanh.f32 %v9981_v11  ;;  %v2241_v24 = vadd.f32 0.5, %v2113_v23  ;;  %v2242_v17 = vadd.f32 0.5, %v2114_v19  ;;  %v7439_v5 = vadd.f32 1e-10, %v2235_v33  ;;  %v9985_v9 = vld [vmem:[#allocation91_spill] sm:$0xff] }
 0x25e   :  { %v7436_v36 = vpop.eup %3510  ;;  %3538 = vtanh.f32 %v7001_v0  ;;  %v2117_v18 = vmul.f32 0.5, %v9983_v32  ;;  %v2243_v27 = vadd.f32 0.5, %v2115_v10  ;;  %v7445_v2 = vadd.f32 1e-10, %v2236_v31  ;;  %v9986_v30 = vld [vmem:[#allocation86_spill] sm:$0xff]  ;;  %v9989_v33 = vld [vmem:[#allocation75_spill] sm:$0xff] }
 0x25f   :  { %9982 = vst [vmem:[#allocation141_spill] sm:$0xff] %v7439_v5  ;;  %v7441_v47 = vpop.eup %3512  ;;  %3540 = vtanh.f32 %v9985_v9  ;;  %v2118_v46 = vmul.f32 0.5, %v9986_v30  ;;  %v7451_v11 = vadd.f32 1e-10, %v2237_v8  ;;  %v7453_v19 = vadd.f32 1e-10, %v2238_v29 }
 0x260   :  { %9984 = vst [vmem:[#allocation143_spill] sm:$0xff] %v7445_v2  ;;  %v7447_v55 = vpop.eup %3514  ;;  %3542 = vtanh.f32 %v9989_v33  ;;  %v2244_v0 = vadd.f32 0.5, %v2116_v45  ;;  %v7458_v5 = vadd.f32 1e-10, %v2239_v43  ;;  %v7460_v10 = vadd.f32 1e-10, %v2240_v28 }
 0x261   :  { %9987 = vst [vmem:[#allocation132_spill] sm:$0xff] %v7451_v11  ;;  %9988 = vst [vmem:[#allocation144_spill] sm:$0xff] %v7453_v19  ;;  %v7455_v23 = vpop.eup %3516  ;;  %3544 = vtanh.f32 %v7018_v41  ;;  %v2119_v32 = vmul.f32 0.5, %v7020_v6  ;;  %v7466_v9 = vadd.f32 1e-10, %v2241_v24  ;;  %v9994_v30 = vld [vmem:[#allocation92_spill] sm:$0xff] }
 0x262   :  { %9990 = vst [vmem:[#allocation57_spill] sm:$0xff] %v7458_v5  ;;  %9991 = vst [vmem:[#allocation133_spill] sm:$0xff] %v7460_v10  ;;  %v7462_v31 = vpop.eup %3518  ;;  %v7468_v8 = vadd.f32 1e-10, %v2242_v17  ;;  %3546 = vtanh.f32 %v9994_v30  ;;  %v2120_v45 = vmul.f32 0.5, %v7038_v13  ;;  %v2245_v43 = vadd.f32 0.5, %v2117_v18 }
 0x263   :  { %9992 = vst [vmem:[#allocation145_spill] sm:$0xff] %v7466_v9  ;;  %v7470_v29 = vpop.eup %3520  ;;  %v7474_v33 = vadd.f32 1e-10, %v2243_v27  ;;  %v9996_v10 = vld [vmem:[#allocation76_spill] sm:$0xff]  ;;  %v2121_v41 = vmul.f32 0.5, %v7056_v54  ;;  %v2122_v6 = vmul.f32 0.5, %v7074_v3 }
 0x264   :  { %9993 = vst [vmem:[#allocation25_spill] sm:$0xff] %v7468_v8  ;;  %v7476_v28 = vpop.eup %3522  ;;  %3548 = vtanh.f32 %v9996_v10  ;;  %v2246_v24 = vadd.f32 0.5, %v2118_v46  ;;  %v9997_v8 = vld [vmem:[#allocation93_spill] sm:$0xff]  ;;  %v2123_v30 = vmul.f32 0.5, %v7092_v35  ;;  %v2124_v13 = vmul.f32 0.5, %v7110_v1  ;;  %v10000_v9 = vld [vmem:[#allocation96_spill] sm:$0xff] }
 0x265   :  { %9995 = vst [vmem:[#allocation148_spill] sm:$0xff] %v7474_v33  ;;  %v7481_v17 = vpop.eup %3524  ;;  %3550 = vtanh.f32 %v9997_v8  ;;  %v7486_v18 = vadd.f32 1e-10, %v2244_v0  ;;  %v9999_v33 = vld [vmem:[#allocation81_spill] sm:$0xff]  ;;  %v2125_v10 = vmul.f32 0.5, %v7128_v14  ;;  %v2126_v54 = vmul.f32 0.5, %v7146_v44 }
 0x266   :  { %v7488_v27 = vpop.eup %3526  ;;  %3552 = vtanh.f32 %v9999_v33  ;;  %v2247_v3 = vadd.f32 0.5, %v2119_v32  ;;  %v2127_v8 = vmul.f32 0.5, %v7164_v61  ;;  %v2248_v35 = vadd.f32 0.5, %v2120_v45  ;;  %v10002_v0 = vld [vmem:[#allocation82_spill] sm:$0xff]  ;;  %v10003_v44 = vld [vmem:[#allocation97_spill] sm:$0xff] }
 0x267   :  { %9998 = vst [vmem:[#allocation137_spill] sm:$0xff] %v7486_v18  ;;  %v7493_v46 = vpop.eup %3528  ;;  %3554 = vtanh.f32 %v10000_v9  ;;  %v7497_v5 = vadd.f32 1e-10, %v2245_v43  ;;  %v2249_v18 = vadd.f32 0.5, %v2121_v41  ;;  %v2250_v33 = vadd.f32 0.5, %v2122_v6  ;;  %v10004_v45 = vld [vmem:[#allocation14_spill] sm:$0xff] }
 0x268   :  { %v7499_v1 = vpop.eup %3530  ;;  %3556 = vtanh.f32 %v10002_v0  ;;  %v7502_v19 = vadd.f32 1e-10, %v2246_v24  ;;  %v2128_v32 = vmul.f32 0.5, %v7182_v56  ;;  %v2251_v9 = vadd.f32 0.5, %v2123_v30  ;;  %v10006_v6 = vld [vmem:[#allocation83_spill] sm:$0xff]  ;;  %v10007_v30 = vld [vmem:[#allocation98_spill] sm:$0xff] }
 0x269   :  { %10001 = vst [vmem:[#allocation149_spill] sm:$0xff] %v7497_v5  ;;  %v7504_v14 = vpop.eup %3532  ;;  %3558 = vtanh.f32 %v10003_v44  ;;  %v2252_v11 = vadd.f32 0.5, %v2124_v13  ;;  %v2253_v43 = vadd.f32 0.5, %v2125_v10  ;;  %v2254_v5 = vadd.f32 0.5, %v2126_v54 }
 0x26a   :  { %v7508_v61 = vpop.eup %3534  ;;  %3560 = vtanh.f32 %v10004_v45  ;;  %v7511_v2 = vadd.f32 1e-10, %v2247_v3  ;;  %v2129_v24 = vmul.f32 0.5, %v7200_v59  ;;  %v2255_v0 = vadd.f32 0.5, %v2127_v8  ;;  %v10009_v3 = vld [vmem:[#allocation88_spill] sm:$0xff] }
 0x26b   :  { %v7513_v41 = vpop.eup %3536  ;;  %3562 = vtanh.f32 %v10006_v6  ;;  %v7517_v44 = vadd.f32 1e-10, %v2248_v35  ;;  %v2130_v13 = vmul.f32 0.5, %v7218_v51  ;;  %v7523_v45 = vadd.f32 1e-10, %v2249_v18  ;;  %v10011_v35 = vld [vmem:[#allocation103_spill] sm:$0xff] }
 0x26c   :  { %10005 = vst [vmem:[#allocation62_spill] sm:$0xff] %v7511_v2  ;;  %v7519_v56 = vpop.eup %3538  ;;  %3564 = vtanh.f32 %v10007_v30  ;;  %v7525_v10 = vadd.f32 1e-10, %v2250_v33  ;;  %v2256_v6 = vadd.f32 0.5, %v2128_v32  ;;  %v7530_v2 = vadd.f32 1e-10, %v2251_v9 }
 0x26d   :  { %v7527_v54 = vpop.eup %3540  ;;  %3566 = vtanh.f32 %v10009_v3  ;;  %v7532_v59 = vadd.f32 1e-10, %v2252_v11  ;;  %v2131_v30 = vmul.f32 0.5, %v7236_v21  ;;  %v7538_v51 = vadd.f32 1e-10, %v2253_v43 }
 0x26e   :  { %10008 = vst [vmem:[#allocation138_spill] sm:$0xff] %v7525_v10  ;;  %v7534_v8 = vpop.eup %3542  ;;  %3568 = vtanh.f32 %v10011_v35  ;;  %v7540_v18 = vadd.f32 1e-10, %v2254_v5  ;;  %v10014_v10 = vld [vmem:[#allocation89_spill] sm:$0xff]  ;;  %v2132_v32 = vmul.f32 0.5, %v7254_v58  ;;  %v2257_v9 = vadd.f32 0.5, %v2129_v24 }
 0x26f   :  { %10010 = vst [vmem:[#allocation150_spill] sm:$0xff] %v7532_v59  ;;  %10012 = vst [vmem:[#allocation154_spill] sm:$0xff] %v7538_v51  ;;  %v7542_v33 = vpop.eup %3544  ;;  %3570 = vtanh.f32 %v10014_v10  ;;  %v7546_v3 = vadd.f32 1e-10, %v2255_v0  ;;  %v2133_v35 = vmul.f32 0.5, %v7272_v42  ;;  %v2134_v21 = vmul.f32 0.5, %v7290_v50 }
 0x270   :  { %10013 = vst [vmem:[#allocation26_spill] sm:$0xff] %v7540_v18  ;;  %v7548_v11 = vpop.eup %3546  ;;  %3572 = vtanh.f32 %v7102_v57  ;;  %v2258_v43 = vadd.f32 0.5, %v2130_v13  ;;  %v2135_v10 = vmul.f32 0.5, %v7304_v16  ;;  %v2136_v58 = vmul.f32 0.5, %v7314_v60 }
 0x271   :  { %10015 = vst [vmem:[#allocation155_spill] sm:$0xff] %v7546_v3  ;;  %v7553_v5 = vpop.eup %3548  ;;  %3574 = vtanh.f32 %v7107_v62  ;;  %v7558_v24 = vadd.f32 1e-10, %v2256_v6  ;;  %v2137_v57 = vmul.f32 0.5, %v7324_v48  ;;  %v2138_v42 = vmul.f32 0.5, %v7338_v40  ;;  %v10018_v6 = vld [vmem:[#allocation104_spill] sm:$0xff] }
 0x272   :  { %v7560_v0 = vpop.eup %3550  ;;  %3576 = vtanh.f32 %v7115_v20  ;;  %v2259_v50 = vadd.f32 0.5, %v2131_v30  ;;  %v2139_v62 = vmul.f32 0.5, %v7351_v7  ;;  %v2260_v16 = vadd.f32 0.5, %v2132_v32  ;;  %v10020_v40 = vld [vmem:[#allocation18_spill] sm:$0xff] }
 0x273   :  { %10016 = vst [vmem:[#allocation67_spill] sm:$0xff] %v7558_v24  ;;  %v7565_v13 = vpop.eup %3552  ;;  %3578 = vtanh.f32 %v7120_v39  ;;  %v7569_v3 = vadd.f32 1e-10, %v2257_v9  ;;  %v2261_v24 = vadd.f32 0.5, %v2133_v35  ;;  %v2262_v20 = vadd.f32 0.5, %v2134_v21  ;;  %v10021_v32 = vld [vmem:[#allocation90_spill] sm:$0xff] }
 0x274   :  { %v7571_v60 = vpop.eup %3554  ;;  %3580 = vtanh.f32 %v10018_v6  ;;  %v7574_v18 = vadd.f32 1e-10, %v2258_v43  ;;  %v2140_v30 = vmul.f32 0.5, %v7355_v22  ;;  %v2263_v39 = vadd.f32 0.5, %v2135_v10  ;;  %v10023_v21 = vld [vmem:[#allocation105_spill] sm:$0xff]  ;;  %v10025_v10 = vld [vmem:[#allocation110_spill] sm:$0xff] }
 0x275   :  { %10017 = vst [vmem:[#allocation142_spill] sm:$0xff] %v7569_v3  ;;  %v7576_v48 = vpop.eup %3556  ;;  %3582 = vtanh.f32 %v10020_v40  ;;  %v2264_v51 = vadd.f32 0.5, %v2136_v58  ;;  %v2265_v9 = vadd.f32 0.5, %v2137_v57  ;;  %v2266_v3 = vadd.f32 0.5, %v2138_v42 }
 0x276   :  { %10019 = vst [vmem:[#allocation156_spill] sm:$0xff] %v7574_v18  ;;  %v7580_v7 = vpop.eup %3558  ;;  %3584 = vtanh.f32 %v10021_v32  ;;  %v7583_v59 = vadd.f32 1e-10, %v2259_v50  ;;  %v2141_v43 = vmul.f32 0.5, %v7363_v15  ;;  %v2267_v6 = vadd.f32 0.5, %v2139_v62  ;;  %v10028_v50 = vld [vmem:[#allocation111_spill] sm:$0xff] }
 0x277   :  { %v7585_v35 = vpop.eup %3560  ;;  %3586 = vtanh.f32 %v10023_v21  ;;  %v7589_v40 = vadd.f32 1e-10, %v2260_v16  ;;  %v2142_v58 = vmul.f32 0.5, %v7372_v12  ;;  %v7595_v32 = vadd.f32 1e-10, %v2261_v24  ;;  %v10031_v16 = vld [vmem:[#allocation23_spill] sm:$0xff] }
 0x278   :  { %10022 = vst [vmem:[#allocation158_spill] sm:$0xff] %v7583_v59  ;;  %v7591_v22 = vpop.eup %3562  ;;  %3588 = vtanh.f32 %v10025_v10  ;;  %v7597_v57 = vadd.f32 1e-10, %v2262_v20  ;;  %v2268_v21 = vadd.f32 0.5, %v2140_v30  ;;  %v7602_v59 = vadd.f32 1e-10, %v2263_v39 }
 0x279   :  { %10024 = vst [vmem:[#allocation146_spill] sm:$0xff] %v7589_v40  ;;  %10026 = vst [vmem:[#allocation159_spill] sm:$0xff] %v7595_v32  ;;  %v7599_v42 = vpop.eup %3564  ;;  %3590 = vtanh.f32 %v10028_v50  ;;  %v7604_v15 = vadd.f32 1e-10, %v2264_v51  ;;  %v2143_v10 = vmul.f32 0.5, %v7383_v38  ;;  %v2144_v30 = vmul.f32 0.5, %v7390_v34 }
 0x27a   :  { %10027 = vst [vmem:[#allocation74_spill] sm:$0xff] %v7597_v57  ;;  %10029 = vst [vmem:[#allocation147_spill] sm:$0xff] %v7602_v59  ;;  %v7606_v62 = vpop.eup %3566  ;;  %3592 = vtanh.f32 %v10031_v16  ;;  %v7610_v12 = vadd.f32 1e-10, %v2265_v9  ;;  %v7612_v24 = vadd.f32 1e-10, %v2266_v3 }
 0x27b   :  { %10030 = vst [vmem:[#allocation160_spill] sm:$0xff] %v7604_v15  ;;  %v7614_v20 = vpop.eup %3568  ;;  %v10034_v57 = vld [vmem:[#allocation95_spill] sm:$0xff]  ;;  %v2269_v39 = vadd.f32 0.5, %v2141_v43  ;;  %v7618_v50 = vadd.f32 1e-10, %v2267_v6  ;;  %v10036_v15 = vld [vmem:[#allocation112_spill] sm:$0xff] }
 0x27c   :  { %10032 = vst [vmem:[#allocation151_spill] sm:$0xff] %v7610_v12  ;;  %10033 = vst [vmem:[#allocation162_spill] sm:$0xff] %v7612_v24  ;;  %3594 = vtanh.f32 %v10034_v57  ;;  %v7620_v51 = vpop.eup %3570  ;;  %v2145_v16 = vmul.f32 0.5, %v7398_v52  ;;  %v2146_v38 = vmul.f32 0.5, %v7404_v4  ;;  %v2270_v9 = vadd.f32 0.5, %v2142_v58  ;;  %v10037_v24 = vld [vmem:[#allocation100_spill] sm:$0xff] }
 0x27d   :  { %10035 = vst [vmem:[#allocation163_spill] sm:$0xff] %v7618_v50  ;;  %3596 = vtanh.f32 %v10036_v15  ;;  %v7625_v3 = vpop.eup %3572  ;;  %v2147_v57 = vmul.f32 0.5, %v7409_v63  ;;  %v2148_v34 = vmul.f32 0.5, %v7416_v49  ;;  %v7630_v43 = vadd.f32 1e-10, %v2268_v21  ;;  %v10039_v50 = vld [vmem:[#allocation114_spill] sm:$0xff] }
 0x27e   :  { %3598 = vtanh.f32 %v10037_v24  ;;  %v7632_v6 = vpop.eup %3574  ;;  %v2149_v15 = vmul.f32 0.5, %v7421_v53  ;;  %v2150_v52 = vmul.f32 0.5, %v7427_v37  ;;  %v2271_v4 = vadd.f32 0.5, %v2143_v10  ;;  %v10040_v12 = vld [vmem:[#allocation101_spill] sm:$0xff]  ;;  %v10042_v21 = vld [vmem:[#allocation115_spill] sm:$0xff] }
 0x27f   :  { %10038 = vst [vmem:[#allocation80_spill] sm:$0xff] %v7630_v43  ;;  %3600 = vtanh.f32 %v10039_v50  ;;  %v7637_v58 = vpop.eup %3576  ;;  %v2151_v24 = vmul.f32 0.5, %v7432_v25  ;;  %v2272_v63 = vadd.f32 0.5, %v2144_v30  ;;  %v7641_v59 = vadd.f32 1e-10, %v2269_v39  ;;  %v10043_v37 = vld [vmem:[#allocation27_spill] sm:$0xff] }
 0x280   :  { %3602 = vtanh.f32 %v10040_v12  ;;  %v7643_v49 = vpop.eup %3578  ;;  %v2273_v43 = vadd.f32 0.5, %v2145_v16  ;;  %v2274_v50 = vadd.f32 0.5, %v2146_v38  ;;  %v7646_v32 = vadd.f32 1e-10, %v2270_v9  ;;  %v10044_v30 = vld [vmem:[#allocation102_spill] sm:$0xff]  ;;  %v10046_v38 = vld [vmem:[#allocation116_spill] sm:$0xff] }
 0x281   :  { %10041 = vst [vmem:[#allocation153_spill] sm:$0xff] %v7641_v59  ;;  %3604 = vtanh.f32 %v10042_v21  ;;  %v7648_v53 = vpop.eup %3580  ;;  %v2152_v10 = vmul.f32 0.5, %v7436_v36  ;;  %v2275_v12 = vadd.f32 0.5, %v2147_v57  ;;  %v2276_v40 = vadd.f32 0.5, %v2148_v34  ;;  %v10048_v57 = vld [vmem:[#allocation107_spill] sm:$0xff] }
 0x282   :  { %3606 = vtanh.f32 %v10043_v37  ;;  %v7652_v25 = vpop.eup %3582  ;;  %v2277_v39 = vadd.f32 0.5, %v2149_v15  ;;  %v2278_v59 = vadd.f32 0.5, %v2150_v52  ;;  %v7655_v18 = vadd.f32 1e-10, %v2271_v4 }
 0x283   :  { %3608 = vtanh.f32 %v10044_v30  ;;  %v7657_v16 = vpop.eup %3584  ;;  %v2153_v9 = vmul.f32 0.5, %v7441_v47  ;;  %v2279_v21 = vadd.f32 0.5, %v2151_v24  ;;  %v7661_v37 = vadd.f32 1e-10, %v2272_v63  ;;  %v10053_v63 = vld [vmem:[#allocation119_spill] sm:$0xff] }
 0x284   :  { %10045 = vst [vmem:[#allocation152_spill] sm:$0xff] %v7655_v18  ;;  %3610 = vtanh.f32 %v10046_v38  ;;  %v7663_v36 = vpop.eup %3586  ;;  %v2154_v34 = vmul.f32 0.5, %v7447_v55  ;;  %v7667_v30 = vadd.f32 1e-10, %v2273_v43  ;;  %v7669_v15 = vadd.f32 1e-10, %v2274_v50 }
 0x285   :  { %10047 = vst [vmem:[#allocation164_spill] sm:$0xff] %v7661_v37  ;;  %3612 = vtanh.f32 %v10048_v57  ;;  %v7671_v52 = vpop.eup %3588  ;;  %v2280_v4 = vadd.f32 0.5, %v2152_v10  ;;  %v7674_v38 = vadd.f32 1e-10, %v2275_v12  ;;  %v7676_v47 = vadd.f32 1e-10, %v2276_v40 }
 0x286   :  { %10049 = vst [vmem:[#allocation166_spill] sm:$0xff] %v7667_v30  ;;  %10050 = vst [vmem:[#allocation167_spill] sm:$0xff] %v7669_v15  ;;  %3614 = vtanh.f32 %v7228_v26  ;;  %v7678_v24 = vpop.eup %3590  ;;  %v2155_v57 = vmul.f32 0.5, %v7455_v23  ;;  %v7682_v55 = vadd.f32 1e-10, %v2277_v39  ;;  %v10056_v15 = vld [vmem:[#allocation108_spill] sm:$0xff] }
 0x287   :  { %10051 = vst [vmem:[#allocation31_spill] sm:$0xff] %v7674_v38  ;;  %10052 = vst [vmem:[#allocation179_spill] sm:$0xff] %v7676_v47  ;;  %3616 = vtanh.f32 %v10053_v63  ;;  %v7684_v43 = vadd.f32 1e-10, %v2278_v59  ;;  %v7686_v50 = vpop.eup %3592  ;;  %v2156_v26 = vmul.f32 0.5, %v7462_v31  ;;  %v2281_v10 = vadd.f32 0.5, %v2153_v9 }
 0x288   :  { %10054 = vst [vmem:[#allocation87_spill] sm:$0xff] %v7682_v55  ;;  %3618 = vtanh.f32 %v10056_v15  ;;  %v7690_v12 = vadd.f32 1e-10, %v2279_v21  ;;  %v10058_v47 = vld [vmem:[#allocation120_spill] sm:$0xff]  ;;  %v2157_v63 = vmul.f32 0.5, %v7470_v29  ;;  %v2158_v23 = vmul.f32 0.5, %v7476_v28 }
 0x289   :  { %10055 = vst [vmem:[#allocation180_spill] sm:$0xff] %v7684_v43  ;;  %v7692_v40 = vpop.eup %3594  ;;  %3620 = vtanh.f32 %v10058_v47  ;;  %v2282_v39 = vadd.f32 0.5, %v2154_v34  ;;  %v10059_v43 = vld [vmem:[#allocation32_spill] sm:$0xff]  ;;  %v2159_v15 = vmul.f32 0.5, %v7481_v17  ;;  %v2160_v31 = vmul.f32 0.5, %v7488_v27  ;;  %v10062_v55 = vld [vmem:[#allocation121_spill] sm:$0xff] }
 0x28a   :  { %10057 = vst [vmem:[#allocation178_spill] sm:$0xff] %v7690_v12  ;;  %v7697_v59 = vpop.eup %3596  ;;  %3622 = vtanh.f32 %v10059_v43  ;;  %v7702_v9 = vadd.f32 1e-10, %v2280_v4  ;;  %v10061_v12 = vld [vmem:[#allocation109_spill] sm:$0xff]  ;;  %v2161_v47 = vmul.f32 0.5, %v7493_v46  ;;  %v2162_v29 = vmul.f32 0.5, %v7499_v1 }
 0x28b   :  { %v7704_v21 = vpop.eup %3598  ;;  %3624 = vtanh.f32 %v10061_v12  ;;  %v2283_v28 = vadd.f32 0.5, %v2155_v57  ;;  %v2163_v43 = vmul.f32 0.5, %v7504_v14  ;;  %v2284_v17 = vadd.f32 0.5, %v2156_v26  ;;  %v10064_v4 = vld [vmem:[#allocation124_spill] sm:$0xff]  ;;  %v10065_v1 = vld [vmem:[#allocation17_spill] sm:$0xff] }
 0x28c   :  { %10060 = vst [vmem:[#allocation181_spill] sm:$0xff] %v7702_v9  ;;  %v7709_v34 = vpop.eup %3600  ;;  %3626 = vtanh.f32 %v10062_v55  ;;  %v7713_v38 = vadd.f32 1e-10, %v2281_v10  ;;  %v2285_v9 = vadd.f32 0.5, %v2157_v63  ;;  %v2286_v12 = vadd.f32 0.5, %v2158_v23  ;;  %v10066_v26 = vld [vmem:[#allocation125_spill] sm:$0xff] }
 0x28d   :  { %v7715_v27 = vpop.eup %3602  ;;  %3628 = vtanh.f32 %v10064_v4  ;;  %v7718_v30 = vadd.f32 1e-10, %v2282_v39  ;;  %v2164_v57 = vmul.f32 0.5, %v7508_v61  ;;  %v2287_v55 = vadd.f32 0.5, %v2159_v15  ;;  %v10068_v23 = vld [vmem:[#allocation37_spill] sm:$0xff] }
 0x28e   :  { %10063 = vst [vmem:[#allocation157_spill] sm:$0xff] %v7713_v38  ;;  %v7720_v46 = vpop.eup %3604  ;;  %3630 = vtanh.f32 %v10065_v1  ;;  %v2288_v37 = vadd.f32 0.5, %v2160_v31  ;;  %v2289_v10 = vadd.f32 0.5, %v2161_v47  ;;  %v2290_v38 = vadd.f32 0.5, %v2162_v29  ;;  %v10069_v15 = vld [vmem:[#allocation113_spill] sm:$0xff] }
 0x28f   :  { %v7724_v14 = vpop.eup %3606  ;;  %3632 = vtanh.f32 %v10066_v26  ;;  %v7727_v18 = vadd.f32 1e-10, %v2283_v28  ;;  %v2165_v39 = vmul.f32 0.5, %v7513_v41  ;;  %v2291_v4 = vadd.f32 0.5, %v2163_v43  ;;  %v10071_v28 = vld [vmem:[#allocation126_spill] sm:$0xff] }
 0x290   :  { %v7729_v63 = vpop.eup %3608  ;;  %3634 = vtanh.f32 %v10068_v23  ;;  %v7733_v1 = vadd.f32 1e-10, %v2284_v17  ;;  %v2166_v31 = vmul.f32 0.5, %v7519_v56  ;;  %v7739_v26 = vadd.f32 1e-10, %v2285_v9  ;;  %v10074_v17 = vld [vmem:[#allocation128_spill] sm:$0xff] }
 0x291   :  { %10067 = vst [vmem:[#allocation186_spill] sm:$0xff] %v7727_v18  ;;  %v7735_v61 = vpop.eup %3610  ;;  %3636 = vtanh.f32 %v10069_v15  ;;  %v7741_v47 = vadd.f32 1e-10, %v2286_v12  ;;  %v2292_v23 = vadd.f32 0.5, %v2164_v57  ;;  %v7746_v18 = vadd.f32 1e-10, %v2287_v55 }
 0x292   :  { %v7743_v29 = vpop.eup %3612  ;;  %3638 = vtanh.f32 %v10071_v28  ;;  %v7748_v41 = vadd.f32 1e-10, %v2288_v37  ;;  %v2167_v15 = vmul.f32 0.5, %v7527_v54  ;;  %v7754_v56 = vadd.f32 1e-10, %v2289_v10 }
 0x293   :  { %10070 = vst [vmem:[#allocation182_spill] sm:$0xff] %v7741_v47  ;;  %10072 = vst [vmem:[#allocation187_spill] sm:$0xff] %v7746_v18  ;;  %v7750_v43 = vpop.eup %3614  ;;  %3640 = vtanh.f32 %v10074_v17  ;;  %v7756_v9 = vadd.f32 1e-10, %v2290_v38  ;;  %v10077_v47 = vld [vmem:[#allocation117_spill] sm:$0xff]  ;;  %v2168_v57 = vmul.f32 0.5, %v7534_v8 }
 0x294   :  { %10073 = vst [vmem:[#allocation183_spill] sm:$0xff] %v7748_v41  ;;  %10075 = vst [vmem:[#allocation188_spill] sm:$0xff] %v7754_v56  ;;  %v7758_v12 = vpop.eup %3616  ;;  %3642 = vtanh.f32 %v10077_v47  ;;  %v2293_v55 = vadd.f32 0.5, %v2165_v39  ;;  %v7762_v28 = vadd.f32 1e-10, %v2291_v4  ;;  %v10079_v41 = vld [vmem:[#allocation129_spill] sm:$0xff] }
 0x295   :  { %10076 = vst [vmem:[#allocation184_spill] sm:$0xff] %v7756_v9  ;;  %v7764_v37 = vpop.eup %3618  ;;  %3644 = vtanh.f32 %v10079_v41  ;;  %v2169_v17 = vmul.f32 0.5, %v7542_v33  ;;  %v2170_v54 = vmul.f32 0.5, %v7548_v11  ;;  %v2294_v10 = vadd.f32 0.5, %v2166_v31  ;;  %v10080_v9 = vld [vmem:[#allocation42_spill] sm:$0xff] }
 0x296   :  { %10078 = vst [vmem:[#allocation189_spill] sm:$0xff] %v7762_v28  ;;  %v7769_v38 = vpop.eup %3620  ;;  %3646 = vtanh.f32 %v10080_v9  ;;  %v2171_v47 = vmul.f32 0.5, %v7553_v5  ;;  %v2172_v8 = vmul.f32 0.5, %v7560_v0  ;;  %v7774_v39 = vadd.f32 1e-10, %v2292_v23  ;;  %v10083_v28 = vld [vmem:[#allocation118_spill] sm:$0xff] }
 0x297   :  { %v7776_v4 = vpop.eup %3622  ;;  %3648 = vtanh.f32 %v10083_v28  ;;  %v2173_v41 = vmul.f32 0.5, %v7565_v13  ;;  %v2174_v33 = vmul.f32 0.5, %v7571_v60  ;;  %v2295_v11 = vadd.f32 0.5, %v2167_v15  ;;  %v10085_v56 = vld [vmem:[#allocation130_spill] sm:$0xff]  ;;  %v10088_v23 = vld [vmem:[#allocation21_spill] sm:$0xff] }
 0x298   :  { %10081 = vst [vmem:[#allocation168_spill] sm:$0xff] %v7774_v39  ;;  %10082 = vst [vmem:[#allocation190_spill] sm:$0xff] %v7776_v4  ;;  %v7781_v31 = vpop.eup %3624  ;;  %3650 = vtanh.f32 %v10085_v56  ;;  %v2175_v9 = vmul.f32 0.5, %v7576_v48  ;;  %v2296_v5 = vadd.f32 0.5, %v2168_v57  ;;  %v7785_v18 = vadd.f32 1e-10, %v2293_v55 }
 0x299   :  { %10084 = vst [vmem:[#allocation185_spill] sm:$0xff] %v7781_v31  ;;  %v7787_v0 = vpop.eup %3626  ;;  %3652 = vtanh.f32 %v10088_v23  ;;  %v2297_v39 = vadd.f32 0.5, %v2169_v17  ;;  %v2298_v28 = vadd.f32 0.5, %v2170_v54  ;;  %v7790_v4 = vadd.f32 1e-10, %v2294_v10  ;;  %v10089_v60 = vld [vmem:[#allocation134_spill] sm:$0xff] }
 0x29a   :  { %10086 = vst [vmem:[#allocation191_spill] sm:$0xff] %v7785_v18  ;;  %10087 = vst [vmem:[#allocation169_spill] sm:$0xff] %v7787_v0  ;;  %v7792_v13 = vpop.eup %3628  ;;  %3654 = vtanh.f32 %v10089_v60  ;;  %v2176_v15 = vmul.f32 0.5, %v7580_v7  ;;  %v2299_v56 = vadd.f32 0.5, %v2171_v47  ;;  %v2300_v31 = vadd.f32 0.5, %v2172_v8  ;;  %v10090_v57 = vld [vmem:[#allocation122_spill] sm:$0xff] }
 0x29b   :  { %v7796_v48 = vpop.eup %3630  ;;  %3656 = vtanh.f32 %v10090_v57  ;;  %v2301_v55 = vadd.f32 0.5, %v2173_v41  ;;  %v2302_v0 = vadd.f32 0.5, %v2174_v33  ;;  %v7799_v18 = vadd.f32 1e-10, %v2295_v11  ;;  %v10092_v60 = vld [vmem:[#allocation135_spill] sm:$0xff] }
 0x29c   :  { %v7801_v17 = vpop.eup %3632  ;;  %v2177_v54 = vmul.f32 0.5, %v7585_v35  ;;  %v2303_v10 = vadd.f32 0.5, %v2175_v9  ;;  %v7804_v23 = vadd.f32 1e-10, %v2296_v5  ;;  %3658 = vlog2.f32 %v10092_v60  ;;  %v10094_v41 = vld [vmem:[#allocation47_spill] sm:$0xff] }
 0x29d   :  { %10091 = vst [vmem:[#allocation195_spill] sm:$0xff] %v7801_v17  ;;  %v7807_v7 = vpop.eup %3634  ;;  %v2178_v47 = vmul.f32 0.5, %v7591_v22  ;;  %v7810_v8 = vadd.f32 1e-10, %v2297_v39  ;;  %v7812_v57 = vadd.f32 1e-10, %v2298_v28  ;;  %3660 = vlog2.f32 %v10094_v41 }
 0x29e   :  { %10093 = vst [vmem:[#allocation192_spill] sm:$0xff] %v7807_v7  ;;  %v7815_v33 = vpop.eup %3636  ;;  %v2304_v11 = vadd.f32 0.5, %v2176_v15  ;;  %v7817_v17 = vadd.f32 1e-10, %v2299_v56  ;;  %v7819_v35 = vadd.f32 1e-10, %v2300_v31 }
 0x29f   :  { %10095 = vst [vmem:[#allocation170_spill] sm:$0xff] %v7815_v33  ;;  %v10096_v9 = vld [vmem:[#allocation123_spill] sm:$0xff]  ;;  %v7822_v5 = vpop.eup %3638  ;;  %v2179_v60 = vmul.f32 0.5, %v7599_v42  ;;  %v7825_v22 = vadd.f32 1e-10, %v2301_v55  ;;  %v10098_v28 = vld [vmem:[#allocation136_spill] sm:$0xff] }
 0x2a0   :  { %3662 = vlog2.f32 %v10096_v9  ;;  %10097 = vst [vmem:[#allocation193_spill] sm:$0xff] %v7822_v5  ;;  %v7827_v39 = vadd.f32 1e-10, %v2302_v0  ;;  %v7830_v41 = vpop.eup %3640  ;;  %v2180_v15 = vmul.f32 0.5, %v7606_v62  ;;  %v2305_v56 = vadd.f32 0.5, %v2177_v54  ;;  %v10100_v31 = vld [vmem:[#allocation139_spill] sm:$0xff] }
 0x2a1   :  { %3664 = vlog2.f32 %v10098_v28  ;;  %10099 = vst [vmem:[#allocation196_spill] sm:$0xff] %v7830_v41  ;;  %v7833_v33 = vadd.f32 1e-10, %v2303_v10  ;;  %v7836_v9 = vpop.eup %3642  ;;  %v2181_v5 = vmul.f32 0.5, %v7614_v20  ;;  %v2182_v42 = vmul.f32 0.5, %v7620_v51  ;;  %v10102_v0 = vld [vmem:[#allocation22_spill] sm:$0xff] }
 0x2a2   :  { %3666 = vlog2.f32 %v10100_v31  ;;  %10101 = vst [vmem:[#allocation194_spill] sm:$0xff] %v7836_v9  ;;  %v2306_v55 = vadd.f32 0.5, %v2178_v47  ;;  %v7841_v7 = vpop.eup %3644  ;;  %v2183_v28 = vmul.f32 0.5, %v7625_v3  ;;  %v2184_v62 = vmul.f32 0.5, %v7632_v6  ;;  %v10105_v10 = vld [vmem:[#allocation140_spill] sm:$0xff]  ;;  %v10110_v6 = vld [vmem:[#allocation127_spill] sm:$0xff] }
 0x2a3   :  { %3668 = vlog2.f32 %v10102_v0  ;;  %10103 = vst [vmem:[#allocation197_spill] sm:$0xff] %v7841_v7  ;;  %v7845_v54 = vadd.f32 1e-10, %v2304_v11  ;;  %v7848_v31 = vpop.eup %3646  ;;  %v2185_v9 = vmul.f32 0.5, %v7637_v58  ;;  %v2186_v20 = vmul.f32 0.5, %v7643_v49  ;;  %v10107_v47 = vld [vmem:[#allocation52_spill] sm:$0xff] }
 0x2a4   :  { %3670 = vlog2.f32 %v10105_v10  ;;  %10106 = vst [vmem:[#allocation198_spill] sm:$0xff] %v7848_v31  ;;  %v2307_v51 = vadd.f32 0.5, %v2179_v60  ;;  %v7853_v0 = vpop.eup %3648  ;;  %v2187_v7 = vmul.f32 0.5, %v7648_v53  ;;  %v2308_v3 = vadd.f32 0.5, %v2180_v15  ;;  %v10112_v58 = vld [vmem:[#allocation141_spill] sm:$0xff]  ;;  %v10114_v53 = vld [vmem:[#allocation143_spill] sm:$0xff] }
 0x2a5   :  { %10104 = vst [vmem:[#allocation94_spill] sm:$0xff] %v7845_v54  ;;  %3672 = vlog2.f32 %v10107_v47  ;;  %10108 = vst [vmem:[#allocation161_spill] sm:$0xff] %v7853_v0  ;;  %v7856_v41 = vadd.f32 1e-10, %v2305_v56  ;;  %v7859_v11 = vpop.eup %3650  ;;  %v2309_v10 = vadd.f32 0.5, %v2181_v5  ;;  %v2310_v31 = vadd.f32 0.5, %v2182_v42 }
 0x2a6   :  { %3674 = vlog2.f32 %v10110_v6  ;;  %10111 = vst [vmem:[#allocation199_spill] sm:$0xff] %v7859_v11  ;;  %v7861_v54 = vadd.f32 1e-10, %v2306_v55  ;;  %v7864_v49 = vpop.eup %3652  ;;  %v2188_v60 = vmul.f32 0.5, %v7652_v25  ;;  %v2311_v47 = vadd.f32 0.5, %v2183_v28  ;;  %v10116_v5 = vld [vmem:[#allocation132_spill] sm:$0xff] }
 0x2a7   :  { %10109 = vst [vmem:[#allocation171_spill] sm:$0xff] %v7856_v41  ;;  %3676 = vlog2.f32 %v10112_v58  ;;  %10113 = vst [vmem:[#allocation201_spill] sm:$0xff] %v7864_v49  ;;  %v2312_v0 = vadd.f32 0.5, %v2184_v62  ;;  %v7868_v15 = vpop.eup %3654  ;;  %v2313_v56 = vadd.f32 0.5, %v2185_v9  ;;  %v2314_v6 = vadd.f32 0.5, %v2186_v20  ;;  %v10118_v25 = vld [vmem:[#allocation144_spill] sm:$0xff] }
 0x2a8   :  { %3678 = vlog2.f32 %v10114_v53  ;;  %10115 = vst [vmem:[#allocation200_spill] sm:$0xff] %v7868_v15  ;;  %v7870_v41 = vadd.f32 1e-10, %v2307_v51  ;;  %v7873_v42 = vpop.eup %3656  ;;  %v2189_v55 = vmul.f32 0.5, %v7657_v16  ;;  %v2315_v58 = vadd.f32 0.5, %v2187_v7  ;;  %v10120_v20 = vld [vmem:[#allocation57_spill] sm:$0xff] }
 0x2a9   :  { %3680 = vlog2.f32 %v10116_v5  ;;  %10117 = vst [vmem:[#allocation202_spill] sm:$0xff] %v7873_v42  ;;  %v7876_v49 = vadd.f32 1e-10, %v2308_v3  ;;  %v3659_v28 = vpop.eup %3658  ;;  %v2190_v62 = vmul.f32 0.5, %v7663_v36  ;;  %v7880_v53 = vadd.f32 1e-10, %v2309_v10 }
 0x2aa   :  { %3682 = vlog2.f32 %v10118_v25  ;;  %v7882_v9 = vadd.f32 1e-10, %v2310_v31  ;;  %v3661_v51 = vpop.eup %3660  ;;  %v2316_v5 = vadd.f32 0.5, %v2188_v60  ;;  %v7885_v15 = vadd.f32 1e-10, %v2311_v47  ;;  %v10123_v16 = vld [vmem:[#allocation133_spill] sm:$0xff] }
 0x2ab   :  { %3684 = vlog2.f32 %v10120_v20  ;;  %v7887_v42 = vadd.f32 1e-10, %v2312_v0  ;;  %v2191_v3 = vmul.f32 0.5, %v7671_v52  ;;  %v7891_v25 = vadd.f32 1e-10, %v2313_v56  ;;  %v10126_v10 = vld [vmem:[#allocation145_spill] sm:$0xff] }
 0x2ac   :  { %10119 = vst [vmem:[#allocation173_spill] sm:$0xff] %v7882_v9  ;;  %10121 = vst [vmem:[#allocation203_spill] sm:$0xff] %v7885_v15  ;;  %3686 = vlog2.f32 %v10123_v16  ;;  %v7893_v36 = vadd.f32 1e-10, %v2314_v6  ;;  %v2317_v11 = vadd.f32 0.5, %v2189_v55  ;;  %v10128_v47 = vld [vmem:[#allocation25_spill] sm:$0xff] }
 0x2ad   :  { %10122 = vst [vmem:[#allocation99_spill] sm:$0xff] %v7887_v42  ;;  %v3663_v7 = vpop.eup %3662  ;;  %10124 = vst [vmem:[#allocation204_spill] sm:$0xff] %v7891_v25  ;;  %3688 = vlog2.f32 %v10126_v10  ;;  %v7896_v20 = vadd.f32 1e-10, %v2315_v58  ;;  %v2483_v60 = vmul.f32 0.6931472, %v3659_v28 }
 0x2ae   :  { %10125 = vst [vmem:[#allocation165_spill] sm:$0xff] %v7893_v36  ;;  %v3665_v31 = vpop.eup %3664  ;;  %3690 = vlog2.f32 %v10128_v47  ;;  %v2192_v42 = vmul.f32 0.5, %v7678_v24  ;;  %v2318_v16 = vadd.f32 0.5, %v2190_v62  ;;  %v2485_v15 = vmul.f32 0.6931472, %v3661_v51  ;;  %v10129_v9 = vld [vmem:[#allocation148_spill] sm:$0xff] }
 0x2af   :  { %10127 = vst [vmem:[#allocation205_spill] sm:$0xff] %v7896_v20  ;;  %v3667_v0 = vpop.eup %3666  ;;  %3692 = vlog2.f32 %v10129_v9  ;;  %v7901_v56 = vadd.f32 1e-10, %v2316_v5  ;;  %v2487_v6 = vmul.f32 0.6931472, %v3663_v7  ;;  %v10131_v10 = vld [vmem:[#allocation137_spill] sm:$0xff] }
 0x2b0   :  { %v3669_v52 = vpop.eup %3668  ;;  %v2491_v36 = vmul.f32 0.6931472, %v3667_v0  ;;  %3694 = vlog2.f32 %v10131_v10  ;;  %v2193_v58 = vmul.f32 0.5, %v7686_v50  ;;  %v2489_v28 = vmul.f32 0.6931472, %v3665_v31  ;;  %v10132_v47 = vld [vmem:[#allocation149_spill] sm:$0xff] }
 0x2b1   :  { %10130 = vst [vmem:[#allocation174_spill] sm:$0xff] %v7901_v56  ;;  %v3671_v55 = vpop.eup %3670  ;;  %v2493_v20 = vmul.f32 0.6931472, %v3669_v52  ;;  %3696 = vlog2.f32 %v10132_v47  ;;  %v2319_v24 = vadd.f32 0.5, %v2191_v3  ;;  %v7907_v5 = vadd.f32 1e-10, %v2317_v11 }
 0x2b2   :  { %v3673_v25 = vpop.eup %3672  ;;  %v2495_v62 = vmul.f32 0.6931472, %v3671_v55  ;;  %3698 = vlog2.f32 %v7502_v19  ;;  %v2738_v9 = vadd.f32 %v2491_v36, %v2483_v60  ;;  %v10133_v0 = vld [vmem:[#allocation62_spill] sm:$0xff]  ;;  %v2194_v50 = vmul.f32 0.5, %v7692_v40 }
 0x2b3   :  { %v3675_v51 = vpop.eup %3674  ;;  %v2497_v7 = vmul.f32 0.6931472, %v3673_v25  ;;  %3700 = vlog2.f32 %v10133_v0  ;;  %v2769_v10 = vadd.f32 %v2493_v20, %v2485_v15  ;;  %v2320_v3 = vadd.f32 0.5, %v2192_v42  ;;  %v10134_v60 = vld [vmem:[#allocation138_spill] sm:$0xff] }
 0x2b4   :  { %v3677_v56 = vpop.eup %3676  ;;  %v2499_v31 = vmul.f32 0.6931472, %v3675_v51  ;;  %3702 = vlog2.f32 %v7517_v44  ;;  %v2800_v52 = vadd.f32 %v2495_v62, %v2487_v6  ;;  %v7913_v11 = vadd.f32 1e-10, %v2318_v16  ;;  %v10135_v62 = vld [vmem:[#allocation150_spill] sm:$0xff] }
 0x2b5   :  { %v3679_v47 = vpop.eup %3678  ;;  %v2501_v55 = vmul.f32 0.6931472, %v3677_v56  ;;  %3704 = vlog2.f32 %v7523_v45  ;;  %v2831_v19 = vadd.f32 %v2497_v7, %v2489_v28  ;;  %v2195_v40 = vmul.f32 0.5, %v7697_v59  ;;  %v10136_v0 = vld [vmem:[#allocation154_spill] sm:$0xff] }
 0x2b6   :  { %v3681_v36 = vpop.eup %3680  ;;  %v2503_v25 = vmul.f32 0.6931472, %v3679_v47  ;;  %3706 = vlog2.f32 %v10134_v60  ;;  %v2739_v15 = vadd.f32 %v2738_v9, %v2499_v31  ;;  %v2321_v42 = vadd.f32 0.5, %v2193_v58  ;;  %v10138_v60 = vld [vmem:[#allocation155_spill] sm:$0xff] }
 0x2b7   :  { %v3683_v20 = vpop.eup %3682  ;;  %v2505_v51 = vmul.f32 0.6931472, %v3681_v36  ;;  %3708 = vlog2.f32 %v7530_v2  ;;  %v2770_v44 = vadd.f32 %v2769_v10, %v2501_v55  ;;  %v7919_v16 = vadd.f32 1e-10, %v2319_v24  ;;  %v10137_v36 = vld [vmem:[#allocation26_spill] sm:$0xff] }
 0x2b8   :  { %v3685_v6 = vpop.eup %3684  ;;  %v2507_v56 = vmul.f32 0.6931472, %v3683_v20  ;;  %3710 = vlog2.f32 %v10135_v62  ;;  %v2801_v45 = vadd.f32 %v2800_v52, %v2503_v25  ;;  %v2196_v59 = vmul.f32 0.5, %v7704_v21 }
 0x2b9   :  { %v3687_v28 = vpop.eup %3686  ;;  %v2509_v7 = vmul.f32 0.6931472, %v3685_v6  ;;  %3712 = vlog2.f32 %v10136_v0  ;;  %v2832_v9 = vadd.f32 %v2831_v19, %v2505_v51  ;;  %v2322_v58 = vadd.f32 0.5, %v2194_v50  ;;  %v10139_v6 = vld [vmem:[#allocation67_spill] sm:$0xff] }
 0x2ba   :  { %v3689_v31 = vpop.eup %3688  ;;  %v2511_v47 = vmul.f32 0.6931472, %v3687_v28  ;;  %3714 = vlog2.f32 %v10137_v36  ;;  %v2740_v2 = vadd.f32 %v2739_v15, %v2507_v56  ;;  %v7925_v24 = vadd.f32 1e-10, %v2320_v3  ;;  %v10140_v28 = vld [vmem:[#allocation142_spill] sm:$0xff] }
 0x2bb   :  { %v3691_v10 = vpop.eup %3690  ;;  %v2513_v55 = vmul.f32 0.6931472, %v3689_v31  ;;  %3716 = vlog2.f32 %v10138_v60  ;;  %v2771_v52 = vadd.f32 %v2770_v44, %v2509_v7  ;;  %v2197_v21 = vmul.f32 0.5, %v7709_v34  ;;  %v10141_v31 = vld [vmem:[#allocation156_spill] sm:$0xff] }
 0x2bc   :  { %v3693_v25 = vpop.eup %3692  ;;  %v2515_v20 = vmul.f32 0.6931472, %v3691_v10  ;;  %3718 = vlog2.f32 %v10139_v6  ;;  %v2802_v19 = vadd.f32 %v2801_v45, %v2511_v47  ;;  %v2323_v50 = vadd.f32 0.5, %v2195_v40  ;;  %v10142_v10 = vld [vmem:[#allocation158_spill] sm:$0xff] }
 0x2bd   :  { %v3695_v51 = vpop.eup %3694  ;;  %v2517_v62 = vmul.f32 0.6931472, %v3693_v25  ;;  %3720 = vlog2.f32 %v10140_v28  ;;  %v2833_v15 = vadd.f32 %v2832_v9, %v2513_v55  ;;  %v7931_v3 = vadd.f32 1e-10, %v2321_v42  ;;  %v10143_v25 = vld [vmem:[#allocation146_spill] sm:$0xff] }
 0x2be   :  { %v3697_v56 = vpop.eup %3696  ;;  %v2519_v0 = vmul.f32 0.6931472, %v3695_v51  ;;  %3722 = vlog2.f32 %v10141_v31  ;;  %v2741_v44 = vadd.f32 %v2740_v2, %v2515_v20  ;;  %v2198_v34 = vmul.f32 0.5, %v7715_v27  ;;  %v10144_v51 = vld [vmem:[#allocation159_spill] sm:$0xff] }
 0x2bf   :  { %v3699_v7 = vpop.eup %3698  ;;  %v2521_v36 = vmul.f32 0.6931472, %v3697_v56  ;;  %3724 = vlog2.f32 %v10142_v10  ;;  %v2772_v45 = vadd.f32 %v2771_v52, %v2517_v62  ;;  %v2324_v40 = vadd.f32 0.5, %v2196_v59  ;;  %v10145_v56 = vld [vmem:[#allocation74_spill] sm:$0xff] }
 0x2c0   :  { %v3701_v47 = vpop.eup %3700  ;;  %v2523_v60 = vmul.f32 0.6931472, %v3699_v7  ;;  %3726 = vlog2.f32 %v10143_v25  ;;  %v2803_v9 = vadd.f32 %v2802_v19, %v2519_v0  ;;  %v7937_v42 = vadd.f32 1e-10, %v2322_v58  ;;  %v10146_v7 = vld [vmem:[#allocation147_spill] sm:$0xff] }
 0x2c1   :  { %v3703_v55 = vpop.eup %3702  ;;  %v2525_v6 = vmul.f32 0.6931472, %v3701_v47  ;;  %3728 = vlog2.f32 %v10144_v51  ;;  %v2834_v2 = vadd.f32 %v2833_v15, %v2521_v36  ;;  %v2199_v27 = vmul.f32 0.5, %v7720_v46  ;;  %v10147_v47 = vld [vmem:[#allocation160_spill] sm:$0xff] }
 0x2c2   :  { %v3705_v20 = vpop.eup %3704  ;;  %v2527_v28 = vmul.f32 0.6931472, %v3703_v55  ;;  %3730 = vlog2.f32 %v10145_v56  ;;  %v2742_v52 = vadd.f32 %v2741_v44, %v2523_v60  ;;  %v2325_v59 = vadd.f32 0.5, %v2197_v21  ;;  %v10148_v55 = vld [vmem:[#allocation151_spill] sm:$0xff] }
 0x2c3   :  { %v3707_v62 = vpop.eup %3706  ;;  %v2529_v31 = vmul.f32 0.6931472, %v3705_v20  ;;  %3732 = vlog2.f32 %v10146_v7  ;;  %v2773_v19 = vadd.f32 %v2772_v45, %v2525_v6  ;;  %v7943_v58 = vadd.f32 1e-10, %v2323_v50  ;;  %v10149_v20 = vld [vmem:[#allocation162_spill] sm:$0xff] }
 0x2c4   :  { %v3709_v0 = vpop.eup %3708  ;;  %v2531_v10 = vmul.f32 0.6931472, %v3707_v62  ;;  %3734 = vlog2.f32 %v10147_v47  ;;  %v2804_v15 = vadd.f32 %v2803_v9, %v2527_v28  ;;  %v2200_v46 = vmul.f32 0.5, %v7724_v14  ;;  %v10150_v62 = vld [vmem:[#allocation163_spill] sm:$0xff] }
 0x2c5   :  { %v3711_v36 = vpop.eup %3710  ;;  %v2533_v25 = vmul.f32 0.6931472, %v3709_v0  ;;  %3736 = vlog2.f32 %v10148_v55  ;;  %v2835_v44 = vadd.f32 %v2834_v2, %v2529_v31  ;;  %v2326_v21 = vadd.f32 0.5, %v2198_v34  ;;  %v10151_v0 = vld [vmem:[#allocation80_spill] sm:$0xff] }
 0x2c6   :  { %v3713_v60 = vpop.eup %3712  ;;  %v2535_v51 = vmul.f32 0.6931472, %v3711_v36  ;;  %3738 = vlog2.f32 %v10149_v20  ;;  %v2743_v45 = vadd.f32 %v2742_v52, %v2531_v10  ;;  %v7949_v50 = vadd.f32 1e-10, %v2324_v40  ;;  %v10152_v36 = vld [vmem:[#allocation153_spill] sm:$0xff]  ;;  %v10153_v20 = vld [vmem:[#allocation152_spill] sm:$0xff] }
 0x2c7   :  { %v3715_v6 = vpop.eup %3714  ;;  %v2537_v56 = vmul.f32 0.6931472, %v3713_v60  ;;  %3740 = vlog2.f32 %v10150_v62  ;;  %v2774_v9 = vadd.f32 %v2773_v19, %v2533_v25  ;;  %v2201_v14 = vmul.f32 0.5, %v7729_v63  ;;  %v10154_v62 = vld [vmem:[#allocation164_spill] sm:$0xff] }
 0x2c8   :  { %v3717_v28 = vpop.eup %3716  ;;  %v2539_v7 = vmul.f32 0.6931472, %v3715_v6  ;;  %3742 = vlog2.f32 %v10151_v0  ;;  %v2805_v2 = vadd.f32 %v2804_v15, %v2535_v51  ;;  %v2327_v34 = vadd.f32 0.5, %v2199_v27  ;;  %v10155_v0 = vld [vmem:[#allocation166_spill] sm:$0xff] }
 0x2c9   :  { %v3719_v31 = vpop.eup %3718  ;;  %v2541_v47 = vmul.f32 0.6931472, %v3717_v28  ;;  %3744 = vlog2.f32 %v10152_v36  ;;  %v2836_v52 = vadd.f32 %v2835_v44, %v2537_v56  ;;  %v7955_v40 = vadd.f32 1e-10, %v2325_v59 }
 0x2ca   :  { %v3721_v10 = vpop.eup %3720  ;;  %v2543_v55 = vmul.f32 0.6931472, %v3719_v31  ;;  %3746 = vlog2.f32 %v7646_v32  ;;  %v2744_v19 = vadd.f32 %v2743_v45, %v2539_v7  ;;  %v2202_v63 = vmul.f32 0.5, %v7735_v61  ;;  %v10156_v31 = vld [vmem:[#allocation167_spill] sm:$0xff] }
 0x2cb   :  { %v3723_v25 = vpop.eup %3722  ;;  %v2545_v60 = vmul.f32 0.6931472, %v3721_v10  ;;  %3748 = vlog2.f32 %v10153_v20  ;;  %v2775_v15 = vadd.f32 %v2774_v9, %v2541_v47  ;;  %v2328_v27 = vadd.f32 0.5, %v2200_v46  ;;  %v10157_v10 = vld [vmem:[#allocation31_spill] sm:$0xff] }
 0x2cc   :  { %v3725_v51 = vpop.eup %3724  ;;  %v2547_v6 = vmul.f32 0.6931472, %v3723_v25  ;;  %3750 = vlog2.f32 %v10154_v62  ;;  %v2806_v44 = vadd.f32 %v2805_v2, %v2543_v55  ;;  %v7961_v59 = vadd.f32 1e-10, %v2326_v21  ;;  %v10158_v20 = vld [vmem:[#allocation179_spill] sm:$0xff] }
 0x2cd   :  { %v3727_v56 = vpop.eup %3726  ;;  %v2549_v28 = vmul.f32 0.6931472, %v3725_v51  ;;  %3752 = vlog2.f32 %v10155_v0  ;;  %v2837_v32 = vadd.f32 %v2836_v52, %v2545_v60  ;;  %v2203_v61 = vmul.f32 0.5, %v7743_v29  ;;  %v10159_v62 = vld [vmem:[#allocation87_spill] sm:$0xff]  ;;  %v10160_v0 = vld [vmem:[#allocation180_spill] sm:$0xff] }
 0x2ce   :  { %v3729_v45 = vpop.eup %3728  ;;  %v2551_v7 = vmul.f32 0.6931472, %v3727_v56  ;;  %3754 = vlog2.f32 %v10156_v31  ;;  %v2745_v9 = vadd.f32 %v2744_v19, %v2547_v6  ;;  %v2329_v46 = vadd.f32 0.5, %v2201_v14  ;;  %v10161_v31 = vld [vmem:[#allocation178_spill] sm:$0xff] }
 0x2cf   :  { %v3731_v47 = vpop.eup %3730  ;;  %v2553_v36 = vmul.f32 0.6931472, %v3729_v45  ;;  %3756 = vlog2.f32 %v10157_v10  ;;  %v2776_v2 = vadd.f32 %v2775_v15, %v2549_v28  ;;  %v7967_v21 = vadd.f32 1e-10, %v2327_v34  ;;  %v10162_v10 = vld [vmem:[#allocation181_spill] sm:$0xff] }
 0x2d0   :  { %v3733_v55 = vpop.eup %3732  ;;  %v2555_v25 = vmul.f32 0.6931472, %v3731_v47  ;;  %3758 = vlog2.f32 %v10158_v20  ;;  %v2807_v52 = vadd.f32 %v2806_v44, %v2551_v7  ;;  %v2204_v29 = vmul.f32 0.5, %v7750_v43  ;;  %v10163_v20 = vld [vmem:[#allocation157_spill] sm:$0xff] }
 0x2d1   :  { %v3735_v60 = vpop.eup %3734  ;;  %v2557_v51 = vmul.f32 0.6931472, %v3733_v55  ;;  %3760 = vlog2.f32 %v10159_v62  ;;  %v2838_v19 = vadd.f32 %v2837_v32, %v2553_v36  ;;  %v2330_v14 = vadd.f32 0.5, %v2202_v63 }
 0x2d2   :  { %v3737_v6 = vpop.eup %3736  ;;  %v2559_v56 = vmul.f32 0.6931472, %v3735_v60  ;;  %3762 = vlog2.f32 %v10160_v0  ;;  %v2746_v15 = vadd.f32 %v2745_v9, %v2555_v25  ;;  %v7973_v34 = vadd.f32 1e-10, %v2328_v27 }
 0x2d3   :  { %v3739_v28 = vpop.eup %3738  ;;  %v2561_v45 = vmul.f32 0.6931472, %v3737_v6  ;;  %3764 = vlog2.f32 %v10161_v31  ;;  %v2777_v44 = vadd.f32 %v2776_v2, %v2557_v51  ;;  %v2205_v43 = vmul.f32 0.5, %v7758_v12  ;;  %v10164_v6 = vld [vmem:[#allocation186_spill] sm:$0xff] }
 0x2d4   :  { %v3741_v7 = vpop.eup %3740  ;;  %v2563_v47 = vmul.f32 0.6931472, %v3739_v28  ;;  %3766 = vlog2.f32 %v10162_v10  ;;  %v2808_v32 = vadd.f32 %v2807_v52, %v2559_v56  ;;  %v2331_v63 = vadd.f32 0.5, %v2203_v61 }
 0x2d5   :  { %v3743_v36 = vpop.eup %3742  ;;  %v2565_v55 = vmul.f32 0.6931472, %v3741_v7  ;;  %3768 = vlog2.f32 %v10163_v20  ;;  %v2839_v9 = vadd.f32 %v2838_v19, %v2561_v45  ;;  %v7979_v27 = vadd.f32 1e-10, %v2329_v46  ;;  %v10165_v7 = vld [vmem:[#allocation182_spill] sm:$0xff]  ;;  %v10167_v20 = vld [vmem:[#allocation183_spill] sm:$0xff] }
 0x2d6   :  { %v3745_v25 = vpop.eup %3744  ;;  %v2567_v60 = vmul.f32 0.6931472, %v3743_v36  ;;  %3770 = vlog2.f32 %v7718_v30  ;;  %v2747_v2 = vadd.f32 %v2746_v15, %v2563_v47  ;;  %v2206_v12 = vmul.f32 0.5, %v7764_v37  ;;  %v10166_v36 = vld [vmem:[#allocation187_spill] sm:$0xff] }
 0x2d7   :  { %v3747_v51 = vpop.eup %3746  ;;  %v2569_v62 = vmul.f32 0.6931472, %v3745_v25  ;;  %3772 = vlog2.f32 %v10164_v6  ;;  %v2778_v52 = vadd.f32 %v2777_v44, %v2565_v55  ;;  %v2332_v61 = vadd.f32 0.5, %v2204_v29 }
 0x2d8   :  { %v3749_v56 = vpop.eup %3748  ;;  %v2571_v0 = vmul.f32 0.6931472, %v3747_v51  ;;  %3774 = vlog2.f32 %v7733_v1  ;;  %v2809_v19 = vadd.f32 %v2808_v32, %v2567_v60  ;;  %v7985_v46 = vadd.f32 1e-10, %v2330_v14  ;;  %v10168_v60 = vld [vmem:[#allocation188_spill] sm:$0xff] }
 0x2d9   :  { %v3751_v28 = vpop.eup %3750  ;;  %v2573_v45 = vmul.f32 0.6931472, %v3749_v56  ;;  %3776 = vlog2.f32 %v7739_v26  ;;  %v2840_v30 = vadd.f32 %v2839_v9, %v2569_v62  ;;  %v2207_v37 = vmul.f32 0.5, %v7769_v38  ;;  %v10169_v62 = vld [vmem:[#allocation190_spill] sm:$0xff]  ;;  %v10170_v56 = vld [vmem:[#allocation184_spill] sm:$0xff] }
 0x2da   :  { %v3753_v15 = vpop.eup %3752  ;;  %v2575_v31 = vmul.f32 0.6931472, %v3751_v28  ;;  %3778 = vlog2.f32 %v10165_v7  ;;  %v2748_v44 = vadd.f32 %v2747_v2, %v2571_v0  ;;  %v2333_v29 = vadd.f32 0.5, %v2205_v43  ;;  %v10172_v7 = vld [vmem:[#allocation168_spill] sm:$0xff] }
 0x2db   :  { %v3755_v47 = vpop.eup %3754  ;;  %v2577_v10 = vmul.f32 0.6931472, %v3753_v15  ;;  %3780 = vlog2.f32 %v10166_v36  ;;  %v2779_v1 = vadd.f32 %v2778_v52, %v2573_v45  ;;  %v7991_v14 = vadd.f32 1e-10, %v2331_v63  ;;  %v10171_v45 = vld [vmem:[#allocation189_spill] sm:$0xff] }
 0x2dc   :  { %v3757_v32 = vpop.eup %3756  ;;  %v2579_v55 = vmul.f32 0.6931472, %v3755_v47  ;;  %3782 = vlog2.f32 %v10167_v20  ;;  %v2810_v26 = vadd.f32 %v2809_v19, %v2575_v31  ;;  %v2208_v38 = vmul.f32 0.5, %v10169_v62  ;;  %v10174_v20 = vld [vmem:[#allocation191_spill] sm:$0xff]  ;;  %v10175_v62 = vld [vmem:[#allocation169_spill] sm:$0xff] }
 0x2dd   :  { %v3759_v9 = vpop.eup %3758  ;;  %v2581_v25 = vmul.f32 0.6931472, %v3757_v32  ;;  %3784 = vlog2.f32 %v10168_v60  ;;  %v2841_v2 = vadd.f32 %v2840_v30, %v2577_v10  ;;  %v2334_v43 = vadd.f32 0.5, %v2206_v12  ;;  %v10173_v10 = vld [vmem:[#allocation185_spill] sm:$0xff] }
 0x2de   :  { %v3761_v51 = vpop.eup %3760  ;;  %v2583_v6 = vmul.f32 0.6931472, %v3759_v9  ;;  %3786 = vlog2.f32 %v10170_v56  ;;  %v2749_v52 = vadd.f32 %v2748_v44, %v2579_v55  ;;  %v7997_v63 = vadd.f32 1e-10, %v2332_v61 }
 0x2df   :  { %v3763_v0 = vpop.eup %3762  ;;  %v2585_v28 = vmul.f32 0.6931472, %v3761_v51  ;;  %3788 = vlog2.f32 %v10171_v45  ;;  %v2780_v19 = vadd.f32 %v2779_v1, %v2581_v25  ;;  %v2209_v36 = vmul.f32 0.5, %v10173_v10 }
 0x2e0   :  { %v3765_v15 = vpop.eup %3764  ;;  %v2587_v31 = vmul.f32 0.6931472, %v3763_v0  ;;  %3790 = vlog2.f32 %v10172_v7  ;;  %v2811_v30 = vadd.f32 %v2810_v26, %v2583_v6  ;;  %v2335_v12 = vadd.f32 0.5, %v2207_v37 }
 0x2e1   :  { %v3767_v47 = vpop.eup %3766  ;;  %v2589_v32 = vmul.f32 0.6931472, %v3765_v15  ;;  %3792 = vlog2.f32 %v10174_v20  ;;  %v2842_v44 = vadd.f32 %v2841_v2, %v2585_v28  ;;  %v8003_v61 = vadd.f32 1e-10, %v2333_v29 }
 0x2e2   :  { %v3769_v55 = vpop.eup %3768  ;;  %v2591_v9 = vmul.f32 0.6931472, %v3767_v47  ;;  %3794 = vlog2.f32 %v7790_v4  ;;  %v2750_v1 = vadd.f32 %v2749_v52, %v2587_v31  ;;  %v2210_v6 = vmul.f32 0.5, %v10175_v62  ;;  %v10178_v62 = vld [vmem:[#allocation171_spill] sm:$0xff] }
 0x2e3   :  { %v3771_v25 = vpop.eup %3770  ;;  %v2593_v60 = vmul.f32 0.6931472, %v3769_v55  ;;  %3796 = vlog2.f32 %v7799_v18  ;;  %v2781_v26 = vadd.f32 %v2780_v19, %v2589_v32  ;;  %v2336_v37 = vadd.f32 0.5, %v2208_v38 }
 0x2e4   :  { %v3773_v51 = vpop.eup %3772  ;;  %v2595_v56 = vmul.f32 0.6931472, %v3771_v25  ;;  %3798 = vlog2.f32 %v7804_v23  ;;  %v2812_v2 = vadd.f32 %v2811_v30, %v2591_v9  ;;  %v8009_v29 = vadd.f32 1e-10, %v2334_v43  ;;  %v10176_v25 = vld [vmem:[#allocation94_spill] sm:$0xff] }
 0x2e5   :  { %v3775_v0 = vpop.eup %3774  ;;  %v2597_v28 = vmul.f32 0.6931472, %v3773_v51  ;;  %3800 = vlog2.f32 %v7810_v8  ;;  %v2843_v4 = vadd.f32 %v2842_v44, %v2593_v60  ;;  %v2211_v15 = vmul.f32 0.5, %v7792_v13 }
 0x2e6   :  { %v3777_v52 = vpop.eup %3776  ;;  %v2599_v45 = vmul.f32 0.6931472, %v3775_v0  ;;  %3802 = vlog2.f32 %v7812_v57  ;;  %v2751_v18 = vadd.f32 %v2750_v1, %v2595_v56  ;;  %v2337_v38 = vadd.f32 0.5, %v2209_v36 }
 0x2e7   :  { %v3779_v19 = vpop.eup %3778  ;;  %v2601_v31 = vmul.f32 0.6931472, %v3777_v52  ;;  %3804 = vlog2.f32 %v7817_v17  ;;  %v2782_v23 = vadd.f32 %v2781_v26, %v2597_v28  ;;  %v8015_v43 = vadd.f32 1e-10, %v2335_v12  ;;  %v10177_v26 = vld [vmem:[#allocation195_spill] sm:$0xff] }
 0x2e8   :  { %v3781_v7 = vpop.eup %3780  ;;  %v2603_v30 = vmul.f32 0.6931472, %v3779_v19  ;;  %3806 = vlog2.f32 %v7819_v35  ;;  %v2813_v8 = vadd.f32 %v2812_v2, %v2599_v45  ;;  %v2212_v13 = vmul.f32 0.5, %v7796_v48  ;;  %v10179_v45 = vld [vmem:[#allocation192_spill] sm:$0xff] }
 0x2e9   :  { %v3783_v47 = vpop.eup %3782  ;;  %v2605_v10 = vmul.f32 0.6931472, %v3781_v7  ;;  %3808 = vlog2.f32 %v7825_v22  ;;  %v2844_v57 = vadd.f32 %v2843_v4, %v2601_v31  ;;  %v2338_v36 = vadd.f32 0.5, %v2210_v6 }
 0x2ea   :  { %v3785_v32 = vpop.eup %3784  ;;  %v2607_v20 = vmul.f32 0.6931472, %v3783_v47  ;;  %3810 = vlog2.f32 %v7827_v39  ;;  %v2752_v17 = vadd.f32 %v2751_v18, %v2603_v30  ;;  %v8021_v12 = vadd.f32 1e-10, %v2336_v37  ;;  %v10180_v47 = vld [vmem:[#allocation173_spill] sm:$0xff] }
 0x2eb   :  { %v3787_v44 = vpop.eup %3786  ;;  %v2609_v55 = vmul.f32 0.6931472, %v3785_v32  ;;  %3812 = vlog2.f32 %v7833_v33  ;;  %v2783_v35 = vadd.f32 %v2782_v23, %v2605_v10  ;;  %v2213_v48 = vmul.f32 0.5, %v10177_v26  ;;  %v10185_v26 = vld [vmem:[#allocation193_spill] sm:$0xff] }
 0x2ec   :  { %v3789_v9 = vpop.eup %3788  ;;  %v2611_v1 = vmul.f32 0.6931472, %v3787_v44  ;;  %3814 = vlog2.f32 %v10176_v25  ;;  %v2814_v22 = vadd.f32 %v2813_v8, %v2607_v20  ;;  %v2339_v6 = vadd.f32 0.5, %v2211_v15  ;;  %v10184_v25 = vld [vmem:[#allocation204_spill] sm:$0xff] }
 0x2ed   :  { %v3791_v60 = vpop.eup %3790  ;;  %v2613_v51 = vmul.f32 0.6931472, %v3789_v9  ;;  %3816 = vlog2.f32 %v10178_v62  ;;  %v2845_v39 = vadd.f32 %v2844_v57, %v2609_v55  ;;  %v8027_v37 = vadd.f32 1e-10, %v2337_v38  ;;  %v10181_v57 = vld [vmem:[#allocation170_spill] sm:$0xff] }
 0x2ee   :  { %v3793_v56 = vpop.eup %3792  ;;  %v2615_v2 = vmul.f32 0.6931472, %v3791_v60  ;;  %3818 = vlog2.f32 %v7861_v54  ;;  %v2753_v33 = vadd.f32 %v2752_v17, %v2611_v1  ;;  %v2214_v18 = vmul.f32 0.5, %v10179_v45  ;;  %v10182_v17 = vld [vmem:[#allocation203_spill] sm:$0xff]  ;;  %v10188_v45 = vld [vmem:[#allocation174_spill] sm:$0xff] }
 0x2ef   :  { %v3795_v0 = vpop.eup %3794  ;;  %v2617_v28 = vmul.f32 0.6931472, %v3793_v56  ;;  %3820 = vlog2.f32 %v7870_v41  ;;  %v2784_v4 = vadd.f32 %v2783_v35, %v2613_v51  ;;  %v2340_v15 = vadd.f32 0.5, %v2212_v13  ;;  %v10183_v35 = vld [vmem:[#allocation99_spill] sm:$0xff] }
 0x2f0   :  { %v3797_v52 = vpop.eup %3796  ;;  %v2619_v19 = vmul.f32 0.6931472, %v3795_v0  ;;  %3822 = vlog2.f32 %v7876_v49  ;;  %v2815_v31 = vadd.f32 %v2814_v22, %v2615_v2  ;;  %v8033_v38 = vadd.f32 1e-10, %v2338_v36  ;;  %v10187_v0 = vld [vmem:[#allocation205_spill] sm:$0xff] }
 0x2f1   :  { %v3799_v23 = vpop.eup %3798  ;;  %v2621_v7 = vmul.f32 0.6931472, %v3797_v52  ;;  %3824 = vlog2.f32 %v7880_v53  ;;  %v2846_v54 = vadd.f32 %v2845_v39, %v2617_v28  ;;  %v2215_v32 = vmul.f32 0.5, %v10181_v57  ;;  %v10186_v39 = vld [vmem:[#allocation165_spill] sm:$0xff] }
 0x2f2   :  { %v3801_v30 = vpop.eup %3800  ;;  %v2623_v8 = vmul.f32 0.6931472, %v3799_v23  ;;  %3826 = vlog2.f32 %v10180_v47  ;;  %v2754_v41 = vadd.f32 %v2753_v33, %v2619_v19  ;;  %v2341_v13 = vadd.f32 0.5, %v2213_v48  ;;  %v10189_v23 = vld [vmem:[#allocation196_spill] sm:$0xff] }
 0x2f3   :  { %v3803_v10 = vpop.eup %3802  ;;  %v2625_v20 = vmul.f32 0.6931472, %v3801_v30  ;;  %3828 = vlog2.f32 %v10182_v17  ;;  %v2785_v49 = vadd.f32 %v2784_v4, %v2621_v7  ;;  %v8039_v36 = vadd.f32 1e-10, %v2339_v6 }
 0x2f4   :  { %v3805_v44 = vpop.eup %3804  ;;  %v2627_v55 = vmul.f32 0.6931472, %v3803_v10  ;;  %3830 = vlog2.f32 %v10183_v35  ;;  %v2816_v53 = vadd.f32 %v2815_v31, %v2623_v8  ;;  %v2216_v51 = vmul.f32 0.5, %v10185_v26 }
 0x2f5   :  { %v3807_v9 = vpop.eup %3806  ;;  %v2629_v1 = vmul.f32 0.6931472, %v3805_v44  ;;  %3832 = vlog2.f32 %v10184_v25  ;;  %v2847_v22 = vadd.f32 %v2846_v54, %v2625_v20  ;;  %v2342_v48 = vadd.f32 0.5, %v2214_v18 }
 0x2f6   :  { %v3809_v60 = vpop.eup %3808  ;;  %v2631_v62 = vmul.f32 0.6931472, %v3807_v9  ;;  %3834 = vlog2.f32 %v10186_v39  ;;  %v2755_v56 = vadd.f32 %v2754_v41, %v2627_v55  ;;  %v8045_v6 = vadd.f32 1e-10, %v2340_v15 }
 0x2f7   :  { %v3811_v2 = vpop.eup %3810  ;;  %v2633_v33 = vmul.f32 0.6931472, %v3809_v60  ;;  %3836 = vlog2.f32 %v10187_v0  ;;  %v2786_v28 = vadd.f32 %v2785_v49, %v2629_v1  ;;  %v2217_v7 = vmul.f32 0.5, %v10189_v23  ;;  %v10190_v49 = vld [vmem:[#allocation194_spill] sm:$0xff] }
 0x2f8   :  { %v3813_v4 = vpop.eup %3812  ;;  %v2635_v52 = vmul.f32 0.6931472, %v3811_v2  ;;  %3838 = vlog2.f32 %v10188_v45  ;;  %v2817_v19 = vadd.f32 %v2816_v53, %v2631_v62  ;;  %v2343_v18 = vadd.f32 0.5, %v2215_v32  ;;  %v10192_v0 = vld [vmem:[#allocation198_spill] sm:$0xff] }
 0x2f9   :  { %v3815_v31 = vpop.eup %3814  ;;  %v2637_v54 = vmul.f32 0.6931472, %v3813_v4  ;;  %3840 = vlog2.f32 %v7907_v5  ;;  %v2848_v30 = vadd.f32 %v2847_v22, %v2633_v33  ;;  %v8051_v15 = vadd.f32 1e-10, %v2341_v13  ;;  %v10191_v22 = vld [vmem:[#allocation197_spill] sm:$0xff] }
 0x2fa   :  { %v3817_v8 = vpop.eup %3816  ;;  %v2639_v47 = vmul.f32 0.6931472, %v3815_v31  ;;  %3842 = vlog2.f32 %v7913_v11  ;;  %v2756_v41 = vadd.f32 %v2755_v56, %v2635_v52  ;;  %v2218_v44 = vmul.f32 0.5, %v10190_v49 }
 0x2fb   :  { %v3819_v10 = vpop.eup %3818  ;;  %v2641_v57 = vmul.f32 0.6931472, %v3817_v8  ;;  %3844 = vlog2.f32 %v7919_v16  ;;  %v2787_v20 = vadd.f32 %v2786_v28, %v2637_v54  ;;  %v2344_v32 = vadd.f32 0.5, %v2216_v51 }
 0x2fc   :  { %v3821_v17 = vpop.eup %3820  ;;  %v2643_v55 = vmul.f32 0.6931472, %v3819_v10  ;;  %3846 = vlog2.f32 %v7925_v24  ;;  %v2818_v5 = vadd.f32 %v2817_v19, %v2639_v47  ;;  %v8057_v13 = vadd.f32 1e-10, %v2342_v48 }
 0x2fd   :  { %v3823_v35 = vpop.eup %3822  ;;  %v2645_v53 = vmul.f32 0.6931472, %v3821_v17  ;;  %3848 = vlog2.f32 %v7931_v3  ;;  %v2849_v11 = vadd.f32 %v2848_v30, %v2641_v57  ;;  %v2219_v60 = vmul.f32 0.5, %v10191_v22  ;;  %v10193_v30 = vld [vmem:[#allocation161_spill] sm:$0xff] }
 0x2fe   :  { %v3825_v9 = vpop.eup %3824  ;;  %v2647_v1 = vmul.f32 0.6931472, %v3823_v35  ;;  %3850 = vlog2.f32 %v7937_v42  ;;  %v2757_v16 = vadd.f32 %v2756_v41, %v2643_v55  ;;  %v2345_v51 = vadd.f32 0.5, %v2217_v7 }
 0x2ff   :  { %v3827_v25 = vpop.eup %3826  ;;  %v2649_v26 = vmul.f32 0.6931472, %v3825_v9  ;;  %3852 = vlog2.f32 %v7943_v58  ;;  %v2788_v24 = vadd.f32 %v2787_v20, %v2645_v53  ;;  %v8063_v2 = vadd.f32 1e-10, %v2343_v18 }
 0x300   :  { %v3829_v62 = vpop.eup %3828  ;;  %v2651_v39 = vmul.f32 0.6931472, %v3827_v25  ;;  %3854 = vlog2.f32 %v7949_v50  ;;  %v2819_v3 = vadd.f32 %v2818_v5, %v2647_v1  ;;  %v2220_v28 = vmul.f32 0.5, %v10192_v0  ;;  %v10195_v25 = vld [vmem:[#allocation201_spill] sm:$0xff] }
 0x301   :  { %v3831_v56 = vpop.eup %3830  ;;  %v2653_v48 = vmul.f32 0.6931472, %v3829_v62  ;;  %3856 = vlog2.f32 %v7955_v40  ;;  %v2850_v42 = vadd.f32 %v2849_v11, %v2649_v26  ;;  %v2346_v45 = vadd.f32 0.5, %v2218_v44  ;;  %v10194_v44 = vld [vmem:[#allocation199_spill] sm:$0xff] }
 0x302   :  { %v3833_v33 = vpop.eup %3832  ;;  %v2655_v4 = vmul.f32 0.6931472, %v3831_v56  ;;  %3858 = vlog2.f32 %v7961_v59  ;;  %v2758_v58 = vadd.f32 %v2757_v16, %v2651_v39  ;;  %v8069_v23 = vadd.f32 1e-10, %v2344_v32 }
 0x303   :  { %v3835_v52 = vpop.eup %3834  ;;  %v2657_v19 = vmul.f32 0.6931472, %v3833_v33  ;;  %3860 = vlog2.f32 %v7967_v21  ;;  %v2789_v50 = vadd.f32 %v2788_v24, %v2653_v48  ;;  %v2221_v8 = vmul.f32 0.5, %v10193_v30  ;;  %v10196_v48 = vld [vmem:[#allocation200_spill] sm:$0xff] }
 0x304   :  { %v3837_v31 = vpop.eup %3836  ;;  %v2659_v7 = vmul.f32 0.6931472, %v3835_v52  ;;  %3862 = vlog2.f32 %v7973_v34  ;;  %v2820_v40 = vadd.f32 %v2819_v3, %v2655_v4  ;;  %v2347_v41 = vadd.f32 0.5, %v2219_v60 }
 0x305   :  { %v3839_v54 = vpop.eup %3838  ;;  %v2661_v18 = vmul.f32 0.6931472, %v3837_v31  ;;  %3864 = vlog2.f32 %v7979_v27  ;;  %v2851_v59 = vadd.f32 %v2850_v42, %v2657_v19  ;;  %v8075_v20 = vadd.f32 1e-10, %v2345_v51 }
 0x306   :  { %v3841_v47 = vpop.eup %3840  ;;  %v2663_v10 = vmul.f32 0.6931472, %v3839_v54  ;;  %3866 = vlog2.f32 %v7985_v46  ;;  %v2759_v21 = vadd.f32 %v2758_v58, %v2659_v7  ;;  %v2222_v55 = vmul.f32 0.5, %v10194_v44 }
 0x307   :  { %v3843_v57 = vpop.eup %3842  ;;  %v2665_v17 = vmul.f32 0.6931472, %v3841_v47  ;;  %3868 = vlog2.f32 %v7991_v14  ;;  %v2790_v34 = vadd.f32 %v2789_v50, %v2661_v18  ;;  %v2348_v32 = vadd.f32 0.5, %v2220_v28  ;;  %v10197_v50 = vld [vmem:[#allocation202_spill] sm:$0xff] }
 0x308   :  { %v3845_v49 = vpop.eup %3844  ;;  %v2667_v5 = vmul.f32 0.6931472, %v3843_v57  ;;  %3870 = vlog2.f32 %v7997_v63  ;;  %v2821_v27 = vadd.f32 %v2820_v40, %v2663_v10  ;;  %v2474_v9 = vadd.f32 1e-10, %v2346_v45 }
 0x309   :  { %v3847_v35 = vpop.eup %3846  ;;  %v2669_v53 = vmul.f32 0.6931472, %v3845_v49  ;;  %3872 = vlog2.f32 %v8003_v61  ;;  %v2852_v46 = vadd.f32 %v2851_v59, %v2665_v17  ;;  %v2223_v22 = vmul.f32 0.5, %v10195_v25  ;;  %v10198_v25 = vld [vmem:[#allocation176_spill] sm:$0xff] }
 0x30a   :  { %v3849_v11 = vpop.eup %3848  ;;  %v2671_v1 = vmul.f32 0.6931472, %v3847_v35  ;;  %3874 = vlog2.f32 %v8009_v29  ;;  %v2760_v14 = vadd.f32 %v2759_v21, %v2667_v5  ;;  %v2349_v24 = vadd.f32 0.5, %v2221_v8 }
 0x30b   :  { %v3851_v16 = vpop.eup %3850  ;;  %v2673_v60 = vmul.f32 0.6931472, %v3849_v11  ;;  %3876 = vlog2.f32 %v8015_v43  ;;  %v2791_v63 = vadd.f32 %v2790_v34, %v2669_v53  ;;  %v2475_v39 = vadd.f32 1e-10, %v2347_v41 }
 0x30c   :  { %v3853_v26 = vpop.eup %3852  ;;  %v2675_v62 = vmul.f32 0.6931472, %v3851_v16  ;;  %3878 = vlog2.f32 %v8021_v12  ;;  %v2822_v61 = vadd.f32 %v2821_v27, %v2671_v1  ;;  %v2224_v42 = vmul.f32 0.5, %v10196_v48 }
 0x30d   :  { %v3855_v51 = vpop.eup %3854  ;;  %v2677_v3 = vmul.f32 0.6931472, %v3853_v26  ;;  %3880 = vlog2.f32 %v8027_v37  ;;  %v2853_v29 = vadd.f32 %v2852_v46, %v2673_v60  ;;  %v2350_v28 = vadd.f32 0.5, %v2222_v55  ;;  %v10199_v26 = vld [vmem:[#allocation15_spill] sm:$0xff] }
 0x30e   :  { %v3857_v56 = vpop.eup %3856  ;;  %v2679_v33 = vmul.f32 0.6931472, %v3855_v51  ;;  %3882 = vlog2.f32 %v8033_v38  ;;  %v2761_v43 = vadd.f32 %v2760_v14, %v2675_v62  ;;  %v2476_v52 = vadd.f32 1e-10, %v2348_v32 }
 0x30f   :  { %v3859_v0 = vpop.eup %3858  ;;  %v2681_v4 = vmul.f32 0.6931472, %v3857_v56  ;;  %3884 = vlog2.f32 %v8039_v36  ;;  %v2792_v12 = vadd.f32 %v2791_v63, %v2677_v3  ;;  %v2225_v31 = vmul.f32 0.5, %v10197_v50  ;;  %v10201_v3 = vld [vmem:[#allocation39_spill] sm:$0xff] }
 0x310   :  { %v3861_v58 = vpop.eup %3860  ;;  %v2683_v45 = vmul.f32 0.6931472, %v3859_v0  ;;  %3886 = vlog2.f32 %v8045_v6  ;;  %v2823_v37 = vadd.f32 %v2822_v61, %v2679_v33  ;;  %v2351_v54 = vadd.f32 0.5, %v2223_v22  ;;  %v10202_v33 = vld [vmem:[#allocation34_spill] sm:$0xff] }
 0x311   :  { %v3863_v19 = vpop.eup %3862  ;;  %v2685_v7 = vmul.f32 0.6931472, %v3861_v58  ;;  %3888 = vlog2.f32 %v8051_v15  ;;  %v2854_v38 = vadd.f32 %v2853_v29, %v2681_v4  ;;  %v2477_v18 = vadd.f32 1e-10, %v2349_v24  ;;  %v10204_v58 = vld [vmem:[#allocation209_spill] sm:$0xff] }
 0x312   :  { %v3865_v40 = vpop.eup %3864  ;;  %v2687_v30 = vmul.f32 0.6931472, %v3863_v19  ;;  %3890 = vlog2.f32 %v8057_v13  ;;  %v2762_v36 = vadd.f32 %v2761_v43, %v2683_v45  ;;  %v2352_v41 = vadd.f32 0.5, %v2224_v42  ;;  %v10205_v45 = vld [vmem:[#allocation214_spill] sm:$0xff] }
 0x313   :  { %v3867_v8 = vpop.eup %3866  ;;  %v2689_v59 = vmul.f32 0.6931472, %v3865_v40  ;;  %3892 = vlog2.f32 %v8063_v2  ;;  %v2793_v6 = vadd.f32 %v2792_v12, %v2685_v7  ;;  %v2353_v57 = vadd.f32 0.5, %v2225_v31  ;;  %v10203_v12 = vld [vmem:[#allocation215_spill] sm:$0xff]  ;;  %v10206_v7 = vld [vmem:[#allocation45_spill] sm:$0xff] }
 0x314   :  { %v3869_v47 = vpop.eup %3868  ;;  %v2691_v10 = vmul.f32 0.6931472, %v3867_v8  ;;  %3894 = vlog2.f32 %v8069_v23  ;;  %v2824_v21 = vadd.f32 %v2823_v37, %v2687_v30  ;;  %v2478_v49 = vadd.f32 1e-10, %v2350_v28  ;;  %v10207_v40 = vld [vmem:[#allocation49_spill] sm:$0xff] }
 0x315   :  { %v3871_v15 = vpop.eup %3870  ;;  %v2693_v17 = vmul.f32 0.6931472, %v3869_v47  ;;  %3896 = vlog2.f32 %v8075_v20  ;;  %v2855_v34 = vadd.f32 %v2854_v38, %v2689_v59  ;;  %v2479_v2 = vadd.f32 1e-10, %v2351_v54  ;;  %v10208_v47 = vld [vmem:[#allocation24_spill] sm:$0xff] }
 0x316   :  { %v3873_v13 = vpop.eup %3872  ;;  %v2695_v44 = vmul.f32 0.6931472, %v3871_v15  ;;  %3898 = vlog2.f32 %v2474_v9  ;;  %v2763_v55 = vadd.f32 %v2762_v36, %v2691_v10  ;;  %v2480_v53 = vadd.f32 1e-10, %v2352_v41  ;;  %v10209_v10 = vld [vmem:[#allocation50_spill] sm:$0xff] }
 0x317   :  { %v3875_v5 = vpop.eup %3874  ;;  %v2697_v27 = vmul.f32 0.6931472, %v3873_v13  ;;  %3900 = vlog2.f32 %v2475_v39  ;;  %v2794_v35 = vadd.f32 %v2793_v6, %v2693_v17  ;;  %v2481_v1 = vadd.f32 1e-10, %v2353_v57  ;;  %v10200_v39 = vld [vmem:[#allocation56_spill] sm:$0xff] }
 0x318   :  { %v3877_v32 = vpop.eup %3876  ;;  %v2699_v23 = vmul.f32 0.6931472, %v3875_v5  ;;  %3902 = vlog2.f32 %v2476_v52  ;;  %v2825_v46 = vadd.f32 %v2824_v21, %v2695_v44  ;;  %v1312_v22 = vmul.f32 0.6931472, %v10198_v25 }
 0x319   :  { %v3879_v11 = vpop.eup %3878  ;;  %v2701_v14 = vmul.f32 0.6931472, %v3877_v32  ;;  %3904 = vlog2.f32 %v2477_v18  ;;  %v2856_v20 = vadd.f32 %v2855_v34, %v2697_v27  ;;  %v1308_v24 = vmul.f32 0.6931472, %v10199_v26  ;;  %v10210_v34 = vld [vmem:[#allocation54_spill] sm:$0xff] }
 0x31a   :  { %v3881_v16 = vpop.eup %3880  ;;  %v2703_v9 = vmul.f32 0.6931472, %v3879_v11  ;;  %3906 = vlog2.f32 %v2478_v49  ;;  %v2764_v60 = vadd.f32 %v2763_v55, %v2699_v23  ;;  %v1415_v29 = vadd.f32 %v10201_v3, %v10200_v39 }
 0x31b   :  { %v3883_v63 = vpop.eup %3882  ;;  %v2705_v62 = vmul.f32 0.6931472, %v3881_v16  ;;  %3908 = vlog2.f32 %v2479_v2  ;;  %v2795_v61 = vadd.f32 %v2794_v35, %v2701_v14  ;;  %v1314_v43 = vmul.f32 0.6931472, %v10202_v33  ;;  %v10211_v16 = vld [vmem:[#allocation43_spill] sm:$0xff] }
 0x31c   :  { %v3885_v51 = vpop.eup %3884  ;;  %v2707_v56 = vmul.f32 0.6931472, %v3883_v63  ;;  %3910 = vlog2.f32 %v2480_v53  ;;  %v2826_v48 = vadd.f32 %v2825_v46, %v2703_v9  ;;  %v1354_v52 = vadd.f32 %v10204_v58, %v10203_v12 }
 0x31d   :  { %v3887_v42 = vpop.eup %3886  ;;  %v2709_v0 = vmul.f32 0.6931472, %v3885_v51  ;;  %3912 = vlog2.f32 %v2481_v1  ;;  %v2857_v28 = vadd.f32 %v2856_v20, %v2705_v62  ;;  %v1385_v37 = vadd.f32 %v10205_v45, %v1312_v22 }
 0x31e   :  { %v3889_v4 = vpop.eup %3888  ;;  %v2711_v19 = vmul.f32 0.6931472, %v3887_v42  ;;  %v2765_v50 = vadd.f32 %v2764_v60, %v2707_v56  ;;  %v1318_v38 = vmul.f32 0.6931472, %v10206_v7  ;;  %v1320_v54 = vmul.f32 0.6931472, %v10207_v40 }
 0x31f   :  { %v3891_v31 = vpop.eup %3890  ;;  %v2713_v30 = vmul.f32 0.6931472, %v3889_v4  ;;  %v2796_v36 = vadd.f32 %v2795_v61, %v2709_v0  ;;  %v1316_v41 = vmul.f32 0.6931472, %v10208_v47  ;;  %v1446_v21 = vadd.f32 %v10209_v10, %v1308_v24 }
 0x320   :  { %v3893_v8 = vpop.eup %3892  ;;  %v2715_v18 = vmul.f32 0.6931472, %v3891_v31  ;;  %v2827_v59 = vadd.f32 %v2826_v48, %v2711_v19  ;;  %v1322_v13 = vmul.f32 0.6931472, %v10210_v34  ;;  %v1416_v49 = vadd.f32 %v1415_v29, %v1314_v43 }
 0x321   :  { %v3895_v6 = vpop.eup %3894  ;;  %v2717_v15 = vmul.f32 0.6931472, %v3893_v8  ;;  %v2858_v57 = vadd.f32 %v2857_v28, %v2713_v30  ;;  %v1355_v2 = vadd.f32 %v1354_v52, %v1318_v38  ;;  %v1386_v27 = vadd.f32 %v1385_v37, %v1320_v54 }
 0x322   :  { %v3897_v17 = vpop.eup %3896  ;;  %v2719_v44 = vmul.f32 0.6931472, %v3895_v6  ;;  %v2766_v55 = vadd.f32 %v2765_v50, %v2715_v18  ;;  %v1324_v25 = vmul.f32 0.6931472, %v10211_v16  ;;  %v1447_v22 = vadd.f32 %v1446_v21, %v1316_v41 }
 0x323   :  { %v3899_v5 = vpop.eup %3898  ;;  %v2721_v35 = vmul.f32 0.6931472, %v3897_v17  ;;  %v2797_v32 = vadd.f32 %v2796_v36, %v2717_v15  ;;  %v1417_v26 = vadd.f32 %v1416_v49, %v1322_v13  ;;  %v1449_v24 = vadd.f32 %v1386_v27, %v1355_v2 }
 0x324   :  { %v3901_v53 = vpop.eup %3900  ;;  %v2723_v23 = vmul.f32 0.6931472, %v3899_v5  ;;  %v2828_v46 = vadd.f32 %v2827_v59, %v2719_v44  ;;  %v1448_v0 = vadd.f32 %v1447_v22, %v1324_v25 }
 0x325   :  { %v3903_v11 = vpop.eup %3902  ;;  %v2725_v1 = vmul.f32 0.6931472, %v3901_v53  ;;  %v2859_v14 = vadd.f32 %v2858_v57, %v2721_v35  ;;  %v1450_v28 = vadd.f32 %v1449_v24, %v1417_v26 }
 0x326   :  { %v3905_v20 = vpop.eup %3904  ;;  %v2727_v9 = vmul.f32 0.6931472, %v3903_v11  ;;  %v2767_v60 = vadd.f32 %v2766_v55, %v2723_v23 }
 0x327   :  { %v3907_v63 = vpop.eup %3906  ;;  %v2729_v62 = vmul.f32 0.6931472, %v3905_v20  ;;  %v2798_v61 = vadd.f32 %v2797_v32, %v2725_v1  ;;  %v1451_v37 = vadd.f32 %v1450_v28, %v1448_v0 }
 0x328   :  { %v3909_v51 = vpop.eup %3908  ;;  %v2731_v39 = vmul.f32 0.6931472, %v3907_v63  ;;  %v2829_v3 = vadd.f32 %v2828_v46, %v2727_v9 }
 0x329   :  { %v3911_v29 = vpop.eup %3910  ;;  %v2733_v56 = vmul.f32 0.6931472, %v3909_v51  ;;  %v2860_v48 = vadd.f32 %v2859_v14, %v2729_v62 }
 0x32a   :  { %v3913_v42 = vpop.eup %3912  ;;  %v2735_v33 = vmul.f32 0.6931472, %v3911_v29  ;;  %v2768_v43 = vadd.f32 %v2767_v60, %v2731_v39 }
 0x32b   :  { %v2737_v4 = vmul.f32 0.6931472, %v3913_v42  ;;  %v2799_v12 = vadd.f32 %v2798_v61, %v2733_v56 }
 0x32c   :  { %v2830_v58 = vadd.f32 %v2829_v3, %v2735_v33 }
 0x32d   :  { %v2861_v52 = vadd.f32 %v2860_v48, %v2737_v4  ;;  %v2862_v45 = vadd.f32 %v2799_v12, %v2768_v43 }
 0x32f   :  { %v2863_v19 = vadd.f32 %v2862_v45, %v2830_v58 }
 0x331   :  { %v2864_v50 = vadd.f32 %v2863_v19, %v2861_v52 }
 0x333   :  { %v2865_v31 = vadd.f32 %v2864_v50, %v1451_v37 }
 0x335   :  { %2866 = vst [vmem:[#allocation7] sm:$0xff] %v2865_v31 }
 0x336   :  { %3965 = shalt.err (!%p3962_p0)
}
 0x337   :  { %2876 = dma.vmem_to_hbm [thread:$0]  %s2874_s1, 128, %s8115_s2, [#allocation4]  }
 0x338   :  { %3978 = dma.done.wait [#allocation4], 128  }
 0x339   :  { %3979 = vsyncadd [#allocation4], 4294967168 }
 0x33a   :  { %2880 = vsyncpa [#allocation3], 1 }
 0x33b   :  { %2881 = vsyncpa [#allocation6], 1 }
 0x33c   :  { %2882 = vsyncpa [#allocation4], 1 }

</bundles_post_ra>
